<compile_context>
chip_gen: v7x
topology: tpu7x:2x2x1
jax: 0.10.0
libtpu: 0.0.40
codegen_flags: <defaults>
</compile_context>

<pallas_src>
import functools
import math

import numpy as np
import jax
import jax.numpy as jnp
from jax import lax
from jax.experimental import pallas as pl
from jax.experimental.pallas import tpu as pltpu

# ------------------------- cfg from the reference module -------------------------
CFG_CHANNEL = 4
CFG_HEIGHT = 16
CFG_WIDTH = 16
CFG_DROP_PROB = 0.5  # nn.Dropout -> identity in inference mode

_WEIGHT_ORDER = ("wl1", "bl1", "wl2", "bl2", "bxy",
                 "m1", "b1r", "m2", "b2r",
                 "wf1", "bf1", "wf2", "bf2")


# ------------------------------ fused Pallas kernel -------------------------------
def _network_kernel(imgf_ref, imgr_ref,
                    wl1_ref, bl1_ref, wl2_ref, bl2_ref, bxy_ref,
                    m1_ref, b1r_ref, m2_ref, b2r_ref,
                    wf1_ref, bf1_ref, wf2_ref, bf2_ref,
                    timg_ref, pred_ref, *, C, H, W):
    """Whole forward pass for a block of BT batch elements."""
    O = H * W
    xf = imgf_ref[...]                                        # (BT, C*O) f32

    # ---- localization head: theta = tanh(tanh(x_flat @ W1 + b1) @ W2 + b2)
    h = jnp.tanh(jnp.dot(xf, wl1_ref[...],
                         preferred_element_type=jnp.float32) + bl1_ref[...])   # (BT, 20)
    # nn.Dropout(cfg.drop_prob) is identity in inference mode.
    theta = jnp.tanh(jnp.dot(h, wl2_ref[...],
                             preferred_element_type=jnp.float32) + bl2_ref[...])  # (BT, 6)

    # ---- F.affine_grid (align_corners=False) as one matmul with a constant basis
    gxy = jnp.dot(theta, bxy_ref[...], preferred_element_type=jnp.float32)   # (BT, 2*O)
    gx = gxy[:, :O]
    gy = gxy[:, O:]
    ix = ((gx + 1.0) * float(W) - 1.0) * 0.5                  # (BT, O)
    iy = ((gy + 1.0) * float(H) - 1.0) * 0.5

    # ---- F.grid_sample (bilinear, align_corners=False, padding_mode='zeros')
    # Separable bilinear weights: hat(d) = max(0, 1-|d|) over the in-range tap
    # coordinates gives exactly the bilinear corner weights, and taps outside
    # [0, W-1] / [0, H-1] never appear -> zeros padding for free.
    xi = lax.broadcasted_iota(jnp.int32, (W, O), 0).astype(jnp.float32)      # (W, O)
    yi = lax.broadcasted_iota(jnp.int32, (H, O), 0).astype(jnp.float32)      # (H, O)
    wx = jnp.maximum(1.0 - jnp.abs(ix[:, None, :] - xi[None, :, :]), 0.0)    # (BT, W, O)
    wy = jnp.maximum(1.0 - jnp.abs(iy[:, None, :] - yi[None, :, :]), 0.0)    # (BT, H, O)

    # Contract over the x (W) axis on the MXU, then over the y (H) axis on the VPU.
    xr = imgr_ref[...]                                        # (BT, C*H, W)
    a = jnp.einsum("brw,bwo->bro", xr, wx,
                   preferred_element_type=jnp.float32)        # (BT, C*H, O)
    parts = []
    for c in range(C):                                        # static, C == 4
        parts.append(jnp.sum(a[:, c * H:(c + 1) * H, :] * wy, axis=1))       # (BT, O)
    timg = jnp.concatenate(parts, axis=1)                     # (BT, C*O), channel-major
    timg_ref[...] = timg.astype(timg_ref.dtype)

    # ---- conv1 (3x3/s2/p1, C->16) + conv2 (16->16): taps folded into K -> one
    # dense matmul each; outputs are channel-major flats, matching PyTorch .view.
    z1 = jnp.maximum(jnp.dot(timg, m1_ref[...],
                             preferred_element_type=jnp.float32) + b1r_ref[...], 0.0)  # (BT, 1024)
    z2 = jnp.maximum(jnp.dot(z1, m2_ref[...],
                             preferred_element_type=jnp.float32) + b2r_ref[...], 0.0)  # (BT, 256)

    # ---- fc1 / fc2
    f = jnp.maximum(jnp.dot(z2, wf1_ref[...],
                            preferred_element_type=jnp.float32) + bf1_ref[...], 0.0)   # (BT, 1024)
    # nn.Dropout(cfg.drop_prob) is identity in inference mode.
    pred = jnp.dot(f, wf2_ref[...], preferred_element_type=jnp.float32) + bf2_ref[...]
    pred_ref[...] = pred.astype(pred_ref.dtype)               # (BT, 10)


def _pick_block(B):
    """Batch block size: fill the MXU M dim, >=2 grid steps when B is large."""
    if B <= 8:
        return B
    bt = ((B + 1) // 2 + 7) // 8 * 8        # at least 2 grid steps (v7x megacore)
    return min(64, bt)                      # cap so intermediates stay well in VMEM


def network_forward(kp, img):
    """Equivalent of Network(mode='stn').forward(img) in inference mode."""
    B, C, H, W = img.shape
    O = H * W
    BT = _pick_block(B)
    NB = pl.cdiv(B, BT)
    B_pad = NB * BT

    img = img.astype(jnp.float32)
    if B_pad != B:
        img = jnp.concatenate(
            [img, jnp.zeros((B_pad - B, C, H, W), jnp.float32)], axis=0)
    img_flat = img.reshape(B_pad, C * O)          # PyTorch .view(B, -1) order
    img_rows = img.reshape(B_pad, C * H, W)       # rows for the W-contraction

    weights = [kp[name] for name in _WEIGHT_ORDER]

    def whole(a):
        return pl.BlockSpec(a.shape, lambda b, n=a.ndim: (0,) * n)

    in_specs = ([pl.BlockSpec((BT, C * O), lambda b: (b, 0)),
                 pl.BlockSpec((BT, C * H, W), lambda b: (b, 0, 0))]
                + [whole(a) for a in weights])

    timg_flat, pred = pl.pallas_call(
        functools.partial(_network_kernel, C=C, H=H, W=W),
        out_shape=(jax.ShapeDtypeStruct((B_pad, C * O), jnp.float32),
                   jax.ShapeDtypeStruct((B_pad, 10), jnp.float32)),
        grid=(NB,),
        in_specs=in_specs,
        out_specs=(pl.BlockSpec((BT, C * O), lambda b: (b, 0)),
                   pl.BlockSpec((BT, 10), lambda b: (b, 0))),
        compiler_params=pltpu.CompilerParams(
            dimension_semantics=("parallel",),
            vmem_limit_bytes=48 * 1024 * 1024),
    )(img_flat, img_rows, *weights)

    return timg_flat[:B].reshape(B, C, H, W), pred[:B]


# --------------------- one-time constant / weight re-layout -----------------------
def _affine_basis(H, W):
    """(6, H*W) bases so [gx | gy] = theta(B,6) @ [Bx | By] (align_corners=False)."""
    xs = (2.0 * np.arange(W, dtype=np.float32) + 1.0) / W - 1.0
    ys = (2.0 * np.arange(H, dtype=np.float32) + 1.0) / H - 1.0
    xg = np.tile(xs, H)            # x coord of flat output pixel o = i*W + j
    yg = np.repeat(ys, W)          # y coord
    bx = np.zeros((6, H * W), np.float32)
    by = np.zeros((6, H * W), np.float32)
    bx[0], bx[1], bx[2] = xg, yg, 1.0
    by[3], by[4], by[5] = xg, yg, 1.0
    return bx, by


def _conv_tap_mats(Hin, Win):
    """(9, Hin*Win, Ho*Wo) selection matrices for a 3x3/stride-2/pad-1 conv."""
    Ho, Wo = Hin // 2, Win // 2
    T = np.zeros((9, Hin * Win, Ho * Wo), np.float32)
    for kh in range(3):
        for kw in range(3):
            t = kh * 3 + kw
            for ho in range(Ho):
                hi = 2 * ho + kh - 1
                if not (0 <= hi < Hin):
                    continue
                for wo in range(Wo):
                    wi = 2 * wo + kw - 1
                    if 0 <= wi < Win:
                        T[t, hi * Win + wi, ho * Wo + wo] = 1.0
    return T


def prepare_params(p):
    """PyTorch-layout params -> kernel layout.  Called once, outside jit."""
    C, H, W = CFG_CHANNEL, CFG_HEIGHT, CFG_WIDTH
    O = H * W
    H1, W1 = H // 2, W // 2
    P1 = H1 * W1                    # conv1 output pixels (64)
    P2 = (H1 // 2) * (W1 // 2)      # conv2 output pixels (16)

    bx, by = _affine_basis(H, W)
    bxy = np.concatenate([bx, by], axis=1)                                  # (6, 2*O)

    # conv1 folded: M1[(c,m),(oc,p)] = sum_t w1[oc,c,t] * T1[t,m,p]
    w1 = np.asarray(p["conv1_w"], np.float32).reshape(16, C, 9)
    T1 = _conv_tap_mats(H, W)                                               # (9, O, P1)
    M1 = np.einsum("oct,tmp->cmop", w1, T1).reshape(C * O, 16 * P1)         # (1024, 1024)

    # conv2 folded: M2[(c1,p1),(oc2,p2)] = sum_t w2[oc2,c1,t] * T2[t,p1,p2]
    w2 = np.asarray(p["conv2_w"], np.float32).reshape(16, 16, 9)
    T2 = _conv_tap_mats(H1, W1)                                             # (9, P1, P2)
    M2 = np.einsum("oct,tmp->cmop", w2, T2).reshape(16 * P1, 16 * P2)       # (1024, 256)

    return {
        "wl1": jnp.asarray(np.asarray(p["loc_fc1_w"], np.float32).T),        # (1024, 20)
        "bl1": jnp.asarray(p["loc_fc1_b"]).reshape(1, 20).astype(jnp.float32),
        "wl2": jnp.asarray(p["loc_fc2_w"]).T.astype(jnp.float32),            # (20, 6)
        "bl2": jnp.asarray(p["loc_fc2_b"]).reshape(1, 6).astype(jnp.float32),
        "bxy": jnp.asarray(bxy),                                             # (6, 512)
        "m1": jnp.asarray(M1),                                               # (1024, 1024)
        "b1r": jnp.asarray(np.repeat(np.asarray(p["conv1_b"], np.float32), P1).reshape(1, 16 * P1)),
        "m2": jnp.asarray(M2),                                               # (1024, 256)
        "b2r": jnp.asarray(np.repeat(np.asarray(p["conv2_b"], np.float32), P2).reshape(1, 16 * P2)),
        "wf1": jnp.asarray(p["fc1_w"]).T.astype(jnp.float32),                # (256, 1024)
        "bf1": jnp.asarray(p["fc1_b"]).reshape(1, 1024).astype(jnp.float32),
        "wf2": jnp.asarray(p["fc2_w"]).T.astype(jnp.float32),                # (1024, 10)
        "bf2": jnp.asarray(p["fc2_b"]).reshape(1, 10).astype(jnp.float32),
    }


# ----------------------------- parameters (deterministic) ------------------------
def init_params(key):
    ks = jax.random.split(key, 8)

    def lin_init(k, fan_out, fan_in):
        bound = 1.0 / math.sqrt(fan_in)
        kw, kb = jax.random.split(k)
        w = jax.random.uniform(kw, (fan_out, fan_in), jnp.float32, -bound, bound)
        b = jax.random.uniform(kb, (fan_out,), jnp.float32, -bound, bound)
        return w, b

    def conv_init(k, oc, ic, ksz):
        fan_in = ic * ksz * ksz
        bound = 1.0 / math.sqrt(fan_in)
        kw, kb = jax.random.split(k)
        w = jax.random.uniform(kw, (oc, ic, ksz, ksz), jnp.float32, -bound, bound)
        b = jax.random.uniform(kb, (oc,), jnp.float32, -bound, bound)
        return w, b

    p = {}
    in_feat = CFG_CHANNEL * CFG_HEIGHT * CFG_WIDTH
    p["loc_fc1_w"], p["loc_fc1_b"] = lin_init(ks[0], 20, in_feat)
    p["loc_fc2_w"] = jnp.zeros((6, 20), jnp.float32)                  # nn.init.constant_(w, 0)
    p["loc_fc2_b"] = jnp.array([1, 0, 0, 0, 1, 0], jnp.float32)       # identity affine bias
    p["conv1_w"], p["conv1_b"] = conv_init(ks[1], 16, CFG_CHANNEL, 3)
    p["conv2_w"], p["conv2_b"] = conv_init(ks[2], 16, 16, 3)
    feat = (CFG_HEIGHT // 4) * (CFG_WIDTH // 4) * 16
    p["fc1_w"], p["fc1_b"] = lin_init(ks[3], 1024, feat)
    p["fc2_w"], p["fc2_b"] = lin_init(ks[4], 10, 1024)
    return p


# ------------------------------ pure-JAX reference --------------------------------
def _ref_forward(params, img):
    B, C, H, W = img.shape

    def lin(x, w, b):
        return x @ w.T + b

    h = jnp.tanh(lin(img.reshape(B, -1), params["loc_fc1_w"], params["loc_fc1_b"]))
    theta = jnp.tanh(lin(h, params["loc_fc2_w"], params["loc_fc2_b"])).reshape(B, 2, 3)

    xs = (2.0 * jnp.arange(W) + 1.0) / W - 1.0
    ys = (2.0 * jnp.arange(H) + 1.0) / H - 1.0
    xg, yg = jnp.meshgrid(xs, ys)                       # (H, W)
    base = jnp.stack([xg, yg, jnp.ones_like(xg)], -1).reshape(1, H * W, 3)
    grid = jnp.einsum("bij,bpj->bpi", theta, jnp.broadcast_to(base, (B, H * W, 3)))
    gx, gy = grid[..., 0], grid[..., 1]
    ix = ((gx + 1.0) * W - 1.0) / 2.0
    iy = ((gy + 1.0) * H - 1.0) / 2.0
    ix0 = jnp.floor(ix)
    iy0 = jnp.floor(iy)
    fx, fy = ix - ix0, iy - iy0

    def gather(imgb, yy, xx):
        valid = (xx >= 0) & (xx < W) & (yy >= 0) & (yy < H)
        v = imgb[:, jnp.clip(yy, 0, H - 1), jnp.clip(xx, 0, W - 1)]
        return v * valid[None, :]

    def sample_one(imgb, x0f, y0f, fxb, fyb):
        x0 = x0f.astype(jnp.int32)
        y0 = y0f.astype(jnp.int32)
        out = (gather(imgb, y0, x0) * ((1 - fyb) * (1 - fxb))[None]
               + gather(imgb, y0, x0 + 1) * ((1 - fyb) * fxb)[None]
               + gather(imgb, y0 + 1, x0) * (fyb * (1 - fxb))[None]
               + gather(imgb, y0 + 1, x0 + 1) * (fyb * fxb)[None])
        return out.reshape(imgb.shape[0], H, W)

    timg = jax.vmap(sample_one)(img, ix0, iy0, fx, fy)

    def conv(x, w, b):
        y = lax.conv_general_dilated(x, w, (2, 2), ((1, 1), (1, 1)),
                                     dimension_numbers=("NCHW", "OIHW", "NCHW"))
        return jax.nn.relu(y + b[None, :, None, None])

    y = conv(timg, params["conv1_w"], params["conv1_b"])
    y = conv(y, params["conv2_w"], params["conv2_b"])
    f = jax.nn.relu(lin(y.reshape(B, -1), params["fc1_w"], params["fc1_b"]))
    pred = lin(f, params["fc2_w"], params["fc2_b"])
    return timg, pred


# -------------------------------------- main ---------------------------------------
if __name__ == "__main__":
    key = jax.random.PRNGKey(0)
    pkey, wkey, xkey = jax.random.split(key, 3)
    params = init_params(pkey)
    # The module's documented init zeroes loc_fc2_w (theta == tanh(bias) for every
    # input).  Perturb it slightly here purely so the test also exercises the
    # input-dependent localization path; forward semantics are unchanged.
    params["loc_fc2_w"] = 0.05 * jax.random.normal(wkey, (6, 20), jnp.float32)

    img = jax.random.normal(xkey, (2, CFG_CHANNEL, CFG_HEIGHT, CFG_WIDTH), jnp.float32)

    kparams = prepare_params(params)          # one-time weight re-layout (outside jit)
    fwd = jax.jit(network_forward)
    timg, pred = fwd(kparams, img)
    jax.block_until_ready((timg, pred))

    assert timg.shape == (2, CFG_CHANNEL, CFG_HEIGHT, CFG_WIDTH)
    assert pred.shape == (2, 10)

    rt, rp = _ref_forward(params, img)
    assert jnp.allclose(timg, rt, atol=2e-3, rtol=2e-3), "transform_img mismatch"
    assert jnp.allclose(pred, rp, atol=1e-2, rtol=1e-2), "predict mismatch"

    print("KERNEL_OK")
</pallas_src>

<mosaic_0001>
module attributes {stable_mosaic.version = 11 : i64} {
  func.func @_network_kernel(%arg0: i32, %arg1: memref<2x1024xf32, #tpu.memory_space<vmem>>, %arg2: memref<2x64x16xf32, #tpu.memory_space<vmem>>, %arg3: memref<1024x20xf32, #tpu.memory_space<vmem>>, %arg4: memref<1x20xf32, #tpu.memory_space<vmem>>, %arg5: memref<20x6xf32, #tpu.memory_space<vmem>>, %arg6: memref<1x6xf32, #tpu.memory_space<vmem>>, %arg7: memref<6x512xf32, #tpu.memory_space<vmem>>, %arg8: memref<1024x1024xf32, #tpu.memory_space<vmem>>, %arg9: memref<1x1024xf32, #tpu.memory_space<vmem>>, %arg10: memref<1024x256xf32, #tpu.memory_space<vmem>>, %arg11: memref<1x256xf32, #tpu.memory_space<vmem>>, %arg12: memref<256x1024xf32, #tpu.memory_space<vmem>>, %arg13: memref<1x1024xf32, #tpu.memory_space<vmem>>, %arg14: memref<1024x10xf32, #tpu.memory_space<vmem>>, %arg15: memref<1x10xf32, #tpu.memory_space<vmem>>, %arg16: memref<2x1024xf32, #tpu.memory_space<vmem>>, %arg17: memref<2x10xf32, #tpu.memory_space<vmem>>) attributes {dimension_semantics = [#tpu.dimension_semantics<parallel>], iteration_bounds = array<i64: 1>, scalar_prefetch = 0 : i64, scratch_operands = 0 : i64, tpu.core_type = #tpu.core_type<tc>, window_params = [{transform_indices = @transform_0, window_bounds = array<i64: 2, 1024>}, {transform_indices = @transform_1, window_bounds = array<i64: 2, 64, 16>}, {pipeline_mode = #tpu.pipeline_mode<synchronous>, transform_indices = @transform_2, window_bounds = array<i64: 1024, 20>}, {pipeline_mode = #tpu.pipeline_mode<synchronous>, transform_indices = @transform_3, window_bounds = array<i64: 1, 20>}, {pipeline_mode = #tpu.pipeline_mode<synchronous>, transform_indices = @transform_4, window_bounds = array<i64: 20, 6>}, {pipeline_mode = #tpu.pipeline_mode<synchronous>, transform_indices = @transform_5, window_bounds = array<i64: 1, 6>}, {pipeline_mode = #tpu.pipeline_mode<synchronous>, transform_indices = @transform_6, window_bounds = array<i64: 6, 512>}, {pipeline_mode = #tpu.pipeline_mode<synchronous>, transform_indices = @transform_7, window_bounds = array<i64: 1024, 1024>}, {pipeline_mode = #tpu.pipeline_mode<synchronous>, transform_indices = @transform_8, window_bounds = array<i64: 1, 1024>}, {pipeline_mode = #tpu.pipeline_mode<synchronous>, transform_indices = @transform_9, window_bounds = array<i64: 1024, 256>}, {pipeline_mode = #tpu.pipeline_mode<synchronous>, transform_indices = @transform_10, window_bounds = array<i64: 1, 256>}, {pipeline_mode = #tpu.pipeline_mode<synchronous>, transform_indices = @transform_11, window_bounds = array<i64: 256, 1024>}, {pipeline_mode = #tpu.pipeline_mode<synchronous>, transform_indices = @transform_12, window_bounds = array<i64: 1, 1024>}, {pipeline_mode = #tpu.pipeline_mode<synchronous>, transform_indices = @transform_13, window_bounds = array<i64: 1024, 10>}, {pipeline_mode = #tpu.pipeline_mode<synchronous>, transform_indices = @transform_14, window_bounds = array<i64: 1, 10>}, {transform_indices = @transform_15, window_bounds = array<i64: 2, 1024>}, {transform_indices = @transform_16, window_bounds = array<i64: 2, 10>}]} {
    %c0 = arith.constant 0 : index
    %c0_0 = arith.constant 0 : index
    %0 = vector.load %arg1[%c0, %c0_0] : memref<2x1024xf32, #tpu.memory_space<vmem>>, vector<2x1024xf32>
    %c0_1 = arith.constant 0 : index
    %c0_2 = arith.constant 0 : index
    %1 = vector.load %arg3[%c0_1, %c0_2] : memref<1024x20xf32, #tpu.memory_space<vmem>>, vector<1024x20xf32>
    %cst = arith.constant dense<0.000000e+00> : vector<2x20xf32>
    %2 = tpu.matmul %0, %1, %cst {dimension_numbers = #tpu.dot_dimension_numbers<[1], [0], [0], [1], [0, 0, 1, 1], [], []>} : vector<2x1024xf32>, vector<1024x20xf32>, vector<2x20xf32> -> vector<2x20xf32>
    %c0_3 = arith.constant 0 : index
    %c0_4 = arith.constant 0 : index
    %3 = vector.load %arg4[%c0_3, %c0_4] : memref<1x20xf32, #tpu.memory_space<vmem>>, vector<1x20xf32>
    %4 = vector.broadcast %3 : vector<1x20xf32> to vector<2x20xf32>
    %5 = arith.addf %2, %4 : vector<2x20xf32>
    %6 = math.tanh %5 : vector<2x20xf32>
    %c0_5 = arith.constant 0 : index
    %c0_6 = arith.constant 0 : index
    %7 = vector.load %arg5[%c0_5, %c0_6] : memref<20x6xf32, #tpu.memory_space<vmem>>, vector<20x6xf32>
    %cst_7 = arith.constant dense<0.000000e+00> : vector<2x6xf32>
    %8 = tpu.matmul %6, %7, %cst_7 {dimension_numbers = #tpu.dot_dimension_numbers<[1], [0], [0], [1], [0, 0, 1, 1], [], []>} : vector<2x20xf32>, vector<20x6xf32>, vector<2x6xf32> -> vector<2x6xf32>
    %c0_8 = arith.constant 0 : index
    %c0_9 = arith.constant 0 : index
    %9 = vector.load %arg6[%c0_8, %c0_9] : memref<1x6xf32, #tpu.memory_space<vmem>>, vector<1x6xf32>
    %10 = vector.broadcast %9 : vector<1x6xf32> to vector<2x6xf32>
    %11 = arith.addf %8, %10 : vector<2x6xf32>
    %12 = math.tanh %11 : vector<2x6xf32>
    %c0_10 = arith.constant 0 : index
    %c0_11 = arith.constant 0 : index
    %13 = vector.load %arg7[%c0_10, %c0_11] : memref<6x512xf32, #tpu.memory_space<vmem>>, vector<6x512xf32>
    %cst_12 = arith.constant dense<0.000000e+00> : vector<2x512xf32>
    %14 = tpu.matmul %12, %13, %cst_12 {dimension_numbers = #tpu.dot_dimension_numbers<[1], [0], [0], [1], [0, 0, 1, 1], [], []>} : vector<2x6xf32>, vector<6x512xf32>, vector<2x512xf32> -> vector<2x512xf32>
    %15 = vector.extract_strided_slice %14 {offsets = [0, 0], sizes = [2, 256], strides = [1, 1]} : vector<2x512xf32> to vector<2x256xf32>
    %16 = vector.extract_strided_slice %14 {offsets = [0, 256], sizes = [2, 256], strides = [1, 1]} : vector<2x512xf32> to vector<2x256xf32>
    %cst_13 = arith.constant 1.000000e+00 : f32
    %17 = vector.broadcast %cst_13 : f32 to vector<2x256xf32>
    %18 = arith.addf %15, %17 : vector<2x256xf32>
    %cst_14 = arith.constant 1.600000e+01 : f32
    %19 = vector.broadcast %cst_14 : f32 to vector<2x256xf32>
    %20 = arith.mulf %18, %19 : vector<2x256xf32>
    %cst_15 = arith.constant 1.000000e+00 : f32
    %21 = vector.broadcast %cst_15 : f32 to vector<2x256xf32>
    %22 = arith.subf %20, %21 : vector<2x256xf32>
    %cst_16 = arith.constant 5.000000e-01 : f32
    %23 = vector.broadcast %cst_16 : f32 to vector<2x256xf32>
    %24 = arith.mulf %22, %23 : vector<2x256xf32>
    %cst_17 = arith.constant 1.000000e+00 : f32
    %25 = vector.broadcast %cst_17 : f32 to vector<2x256xf32>
    %26 = arith.addf %16, %25 : vector<2x256xf32>
    %cst_18 = arith.constant 1.600000e+01 : f32
    %27 = vector.broadcast %cst_18 : f32 to vector<2x256xf32>
    %28 = arith.mulf %26, %27 : vector<2x256xf32>
    %cst_19 = arith.constant 1.000000e+00 : f32
    %29 = vector.broadcast %cst_19 : f32 to vector<2x256xf32>
    %30 = arith.subf %28, %29 : vector<2x256xf32>
    %cst_20 = arith.constant 5.000000e-01 : f32
    %31 = vector.broadcast %cst_20 : f32 to vector<2x256xf32>
    %32 = arith.mulf %30, %31 : vector<2x256xf32>
    %33 = tpu.iota {dimensions = array<i32: 0>} : vector<16x256xi32>
    %34 = arith.sitofp %33 : vector<16x256xi32> to vector<16x256xf32>
    %35 = tpu.iota {dimensions = array<i32: 0>} : vector<16x256xi32>
    %36 = arith.sitofp %35 : vector<16x256xi32> to vector<16x256xf32>
    %37 = vector.shape_cast %24 : vector<2x256xf32> to vector<2x1x256xf32>
    %38 = vector.shape_cast %34 : vector<16x256xf32> to vector<1x16x256xf32>
    %39 = vector.broadcast %37 : vector<2x1x256xf32> to vector<2x16x256xf32>
    %40 = vector.broadcast %38 : vector<1x16x256xf32> to vector<2x16x256xf32>
    %41 = arith.subf %39, %40 : vector<2x16x256xf32>
    %42 = math.absf %41 : vector<2x16x256xf32>
    %cst_21 = arith.constant 1.000000e+00 : f32
    %43 = vector.broadcast %cst_21 : f32 to vector<2x16x256xf32>
    %44 = arith.subf %43, %42 : vector<2x16x256xf32>
    %cst_22 = arith.constant 0.000000e+00 : f32
    %45 = vector.broadcast %cst_22 : f32 to vector<2x16x256xf32>
    %46 = arith.maximumf %44, %45 : vector<2x16x256xf32>
    %47 = vector.shape_cast %32 : vector<2x256xf32> to vector<2x1x256xf32>
    %48 = vector.shape_cast %36 : vector<16x256xf32> to vector<1x16x256xf32>
    %49 = vector.broadcast %47 : vector<2x1x256xf32> to vector<2x16x256xf32>
    %50 = vector.broadcast %48 : vector<1x16x256xf32> to vector<2x16x256xf32>
    %51 = arith.subf %49, %50 : vector<2x16x256xf32>
    %52 = math.absf %51 : vector<2x16x256xf32>
    %cst_23 = arith.constant 1.000000e+00 : f32
    %53 = vector.broadcast %cst_23 : f32 to vector<2x16x256xf32>
    %54 = arith.subf %53, %52 : vector<2x16x256xf32>
    %cst_24 = arith.constant 0.000000e+00 : f32
    %55 = vector.broadcast %cst_24 : f32 to vector<2x16x256xf32>
    %56 = arith.maximumf %54, %55 : vector<2x16x256xf32>
    %c0_25 = arith.constant 0 : index
    %c0_26 = arith.constant 0 : index
    %c0_27 = arith.constant 0 : index
    %57 = vector.load %arg2[%c0_25, %c0_26, %c0_27] : memref<2x64x16xf32, #tpu.memory_space<vmem>>, vector<2x64x16xf32>
    "tpu.trace_start"() <{level = 10 : i32, message = "brw,bwo->bro"}> : () -> ()
    %cst_28 = arith.constant dense<0.000000e+00> : vector<2x64x256xf32>
    %58 = tpu.matmul %57, %46, %cst_28 {dimension_numbers = #tpu.dot_dimension_numbers<[2], [1], [1], [2], [0, 0, 0, 1, 1, 2], [0], [0]>} : vector<2x64x16xf32>, vector<2x16x256xf32>, vector<2x64x256xf32> -> vector<2x64x256xf32>
    "tpu.trace_stop"() : () -> ()
    %59 = vector.extract_strided_slice %58 {offsets = [0, 0, 0], sizes = [2, 16, 256], strides = [1, 1, 1]} : vector<2x64x256xf32> to vector<2x16x256xf32>
    %60 = arith.mulf %59, %56 : vector<2x16x256xf32>
    %cst_29 = arith.constant dense<0.000000e+00> : vector<2x256xf32>
    %61 = vector.multi_reduction <add>, %60, %cst_29 [1] : vector<2x16x256xf32> to vector<2x256xf32>
    %62 = vector.extract_strided_slice %58 {offsets = [0, 16, 0], sizes = [2, 16, 256], strides = [1, 1, 1]} : vector<2x64x256xf32> to vector<2x16x256xf32>
    %63 = arith.mulf %62, %56 : vector<2x16x256xf32>
    %cst_30 = arith.constant dense<0.000000e+00> : vector<2x256xf32>
    %64 = vector.multi_reduction <add>, %63, %cst_30 [1] : vector<2x16x256xf32> to vector<2x256xf32>
    %65 = vector.extract_strided_slice %58 {offsets = [0, 32, 0], sizes = [2, 16, 256], strides = [1, 1, 1]} : vector<2x64x256xf32> to vector<2x16x256xf32>
    %66 = arith.mulf %65, %56 : vector<2x16x256xf32>
    %cst_31 = arith.constant dense<0.000000e+00> : vector<2x256xf32>
    %67 = vector.multi_reduction <add>, %66, %cst_31 [1] : vector<2x16x256xf32> to vector<2x256xf32>
    %68 = vector.extract_strided_slice %58 {offsets = [0, 48, 0], sizes = [2, 16, 256], strides = [1, 1, 1]} : vector<2x64x256xf32> to vector<2x16x256xf32>
    %69 = arith.mulf %68, %56 : vector<2x16x256xf32>
    %cst_32 = arith.constant dense<0.000000e+00> : vector<2x256xf32>
    %70 = vector.multi_reduction <add>, %69, %cst_32 [1] : vector<2x16x256xf32> to vector<2x256xf32>
    %71 = tpu.concatenate %61, %64, %67, %70 in 1 : vector<2x256xf32>, vector<2x256xf32>, vector<2x256xf32>, vector<2x256xf32> -> vector<2x1024xf32>
    %c0_33 = arith.constant 0 : index
    %c0_34 = arith.constant 0 : index
    %72 = vector.load %arg16[%c0_33, %c0_34] : memref<2x1024xf32, #tpu.memory_space<vmem>>, vector<2x1024xf32>
    tpu.vector_store %arg16[%c0_33, %c0_34], %71 {strides = array<i32>} : memref<2x1024xf32, #tpu.memory_space<vmem>>, vector<2x1024xf32>,
    %c0_35 = arith.constant 0 : index
    %c0_36 = arith.constant 0 : index
    %73 = vector.load %arg8[%c0_35, %c0_36] : memref<1024x1024xf32, #tpu.memory_space<vmem>>, vector<1024x1024xf32>
    %cst_37 = arith.constant dense<0.000000e+00> : vector<2x1024xf32>
    %74 = tpu.matmul %71, %73, %cst_37 {dimension_numbers = #tpu.dot_dimension_numbers<[1], [0], [0], [1], [0, 0, 1, 1], [], []>} : vector<2x1024xf32>, vector<1024x1024xf32>, vector<2x1024xf32> -> vector<2x1024xf32>
    %c0_38 = arith.constant 0 : index
    %c0_39 = arith.constant 0 : index
    %75 = vector.load %arg9[%c0_38, %c0_39] : memref<1x1024xf32, #tpu.memory_space<vmem>>, vector<1x1024xf32>
    %76 = vector.broadcast %75 : vector<1x1024xf32> to vector<2x1024xf32>
    %77 = arith.addf %74, %76 : vector<2x1024xf32>
    %cst_40 = arith.constant 0.000000e+00 : f32
    %78 = vector.broadcast %cst_40 : f32 to vector<2x1024xf32>
    %79 = arith.maximumf %77, %78 : vector<2x1024xf32>
    %c0_41 = arith.constant 0 : index
    %c0_42 = arith.constant 0 : index
    %80 = vector.load %arg10[%c0_41, %c0_42] : memref<1024x256xf32, #tpu.memory_space<vmem>>, vector<1024x256xf32>
    %cst_43 = arith.constant dense<0.000000e+00> : vector<2x256xf32>
    %81 = tpu.matmul %79, %80, %cst_43 {dimension_numbers = #tpu.dot_dimension_numbers<[1], [0], [0], [1], [0, 0, 1, 1], [], []>} : vector<2x1024xf32>, vector<1024x256xf32>, vector<2x256xf32> -> vector<2x256xf32>
    %c0_44 = arith.constant 0 : index
    %c0_45 = arith.constant 0 : index
    %82 = vector.load %arg11[%c0_44, %c0_45] : memref<1x256xf32, #tpu.memory_space<vmem>>, vector<1x256xf32>
    %83 = vector.broadcast %82 : vector<1x256xf32> to vector<2x256xf32>
    %84 = arith.addf %81, %83 : vector<2x256xf32>
    %cst_46 = arith.constant 0.000000e+00 : f32
    %85 = vector.broadcast %cst_46 : f32 to vector<2x256xf32>
    %86 = arith.maximumf %84, %85 : vector<2x256xf32>
    %c0_47 = arith.constant 0 : index
    %c0_48 = arith.constant 0 : index
    %87 = vector.load %arg12[%c0_47, %c0_48] : memref<256x1024xf32, #tpu.memory_space<vmem>>, vector<256x1024xf32>
    %cst_49 = arith.constant dense<0.000000e+00> : vector<2x1024xf32>
    %88 = tpu.matmul %86, %87, %cst_49 {dimension_numbers = #tpu.dot_dimension_numbers<[1], [0], [0], [1], [0, 0, 1, 1], [], []>} : vector<2x256xf32>, vector<256x1024xf32>, vector<2x1024xf32> -> vector<2x1024xf32>
    %c0_50 = arith.constant 0 : index
    %c0_51 = arith.constant 0 : index
    %89 = vector.load %arg13[%c0_50, %c0_51] : memref<1x1024xf32, #tpu.memory_space<vmem>>, vector<1x1024xf32>
    %90 = vector.broadcast %89 : vector<1x1024xf32> to vector<2x1024xf32>
    %91 = arith.addf %88, %90 : vector<2x1024xf32>
    %cst_52 = arith.constant 0.000000e+00 : f32
    %92 = vector.broadcast %cst_52 : f32 to vector<2x1024xf32>
    %93 = arith.maximumf %91, %92 : vector<2x1024xf32>
    %c0_53 = arith.constant 0 : index
    %c0_54 = arith.constant 0 : index
    %94 = vector.load %arg14[%c0_53, %c0_54] : memref<1024x10xf32, #tpu.memory_space<vmem>>, vector<1024x10xf32>
    %cst_55 = arith.constant dense<0.000000e+00> : vector<2x10xf32>
    %95 = tpu.matmul %93, %94, %cst_55 {dimension_numbers = #tpu.dot_dimension_numbers<[1], [0], [0], [1], [0, 0, 1, 1], [], []>} : vector<2x1024xf32>, vector<1024x10xf32>, vector<2x10xf32> -> vector<2x10xf32>
    %c0_56 = arith.constant 0 : index
    %c0_57 = arith.constant 0 : index
    %96 = vector.load %arg15[%c0_56, %c0_57] : memref<1x10xf32, #tpu.memory_space<vmem>>, vector<1x10xf32>
    %97 = vector.broadcast %96 : vector<1x10xf32> to vector<2x10xf32>
    %98 = arith.addf %95, %97 : vector<2x10xf32>
    %c0_58 = arith.constant 0 : index
    %c0_59 = arith.constant 0 : index
    %99 = vector.load %arg17[%c0_58, %c0_59] : memref<2x10xf32, #tpu.memory_space<vmem>>, vector<2x10xf32>
    tpu.vector_store %arg17[%c0_58, %c0_59], %98 {strides = array<i32>} : memref<2x10xf32, #tpu.memory_space<vmem>>, vector<2x10xf32>,
    return
  }
  func.func @transform_0(%arg0: i32) -> (i32, i32) {
    %c0_i32 = arith.constant 0 : i32
    %c0_i32_0 = arith.constant 0 : i32
    return %arg0, %c0_i32 : i32, i32
  }
  func.func @transform_1(%arg0: i32) -> (i32, i32, i32) {
    %c0_i32 = arith.constant 0 : i32
    %c0_i32_0 = arith.constant 0 : i32
    %c0_i32_1 = arith.constant 0 : i32
    return %arg0, %c0_i32, %c0_i32_0 : i32, i32, i32
  }
  func.func @transform_2(%arg0: i32) -> (i32, i32) {
    %c0_i32 = arith.constant 0 : i32
    %c0_i32_0 = arith.constant 0 : i32
    %c0_i32_1 = arith.constant 0 : i32
    return %c0_i32, %c0_i32_0 : i32, i32
  }
  func.func @transform_3(%arg0: i32) -> (i32, i32) {
    %c0_i32 = arith.constant 0 : i32
    %c0_i32_0 = arith.constant 0 : i32
    %c0_i32_1 = arith.constant 0 : i32
    return %c0_i32, %c0_i32_0 : i32, i32
  }
  func.func @transform_4(%arg0: i32) -> (i32, i32) {
    %c0_i32 = arith.constant 0 : i32
    %c0_i32_0 = arith.constant 0 : i32
    %c0_i32_1 = arith.constant 0 : i32
    return %c0_i32, %c0_i32_0 : i32, i32
  }
  func.func @transform_5(%arg0: i32) -> (i32, i32) {
    %c0_i32 = arith.constant 0 : i32
    %c0_i32_0 = arith.constant 0 : i32
    %c0_i32_1 = arith.constant 0 : i32
    return %c0_i32, %c0_i32_0 : i32, i32
  }
  func.func @transform_6(%arg0: i32) -> (i32, i32) {
    %c0_i32 = arith.constant 0 : i32
    %c0_i32_0 = arith.constant 0 : i32
    %c0_i32_1 = arith.constant 0 : i32
    return %c0_i32, %c0_i32_0 : i32, i32
  }
  func.func @transform_7(%arg0: i32) -> (i32, i32) {
    %c0_i32 = arith.constant 0 : i32
    %c0_i32_0 = arith.constant 0 : i32
    %c0_i32_1 = arith.constant 0 : i32
    return %c0_i32, %c0_i32_0 : i32, i32
  }
  func.func @transform_8(%arg0: i32) -> (i32, i32) {
    %c0_i32 = arith.constant 0 : i32
    %c0_i32_0 = arith.constant 0 : i32
    %c0_i32_1 = arith.constant 0 : i32
    return %c0_i32, %c0_i32_0 : i32, i32
  }
  func.func @transform_9(%arg0: i32) -> (i32, i32) {
    %c0_i32 = arith.constant 0 : i32
    %c0_i32_0 = arith.constant 0 : i32
    %c0_i32_1 = arith.constant 0 : i32
    return %c0_i32, %c0_i32_0 : i32, i32
  }
  func.func @transform_10(%arg0: i32) -> (i32, i32) {
    %c0_i32 = arith.constant 0 : i32
    %c0_i32_0 = arith.constant 0 : i32
    %c0_i32_1 = arith.constant 0 : i32
    return %c0_i32, %c0_i32_0 : i32, i32
  }
  func.func @transform_11(%arg0: i32) -> (i32, i32) {
    %c0_i32 = arith.constant 0 : i32
    %c0_i32_0 = arith.constant 0 : i32
    %c0_i32_1 = arith.constant 0 : i32
    return %c0_i32, %c0_i32_0 : i32, i32
  }
  func.func @transform_12(%arg0: i32) -> (i32, i32) {
    %c0_i32 = arith.constant 0 : i32
    %c0_i32_0 = arith.constant 0 : i32
    %c0_i32_1 = arith.constant 0 : i32
    return %c0_i32, %c0_i32_0 : i32, i32
  }
  func.func @transform_13(%arg0: i32) -> (i32, i32) {
    %c0_i32 = arith.constant 0 : i32
    %c0_i32_0 = arith.constant 0 : i32
    %c0_i32_1 = arith.constant 0 : i32
    return %c0_i32, %c0_i32_0 : i32, i32
  }
  func.func @transform_14(%arg0: i32) -> (i32, i32) {
    %c0_i32 = arith.constant 0 : i32
    %c0_i32_0 = arith.constant 0 : i32
    %c0_i32_1 = arith.constant 0 : i32
    return %c0_i32, %c0_i32_0 : i32, i32
  }
  func.func @transform_15(%arg0: i32) -> (i32, i32) {
    %c0_i32 = arith.constant 0 : i32
    %c0_i32_0 = arith.constant 0 : i32
    return %arg0, %c0_i32 : i32, i32
  }
  func.func @transform_16(%arg0: i32) -> (i32, i32) {
    %c0_i32 = arith.constant 0 : i32
    %c0_i32_0 = arith.constant 0 : i32
    return %arg0, %c0_i32 : i32, i32
  }
}

</mosaic_0001>

<bundles_post_ra>
// kernel: network_forward.1
= control target key start
LH: loop header
LB: loop body
LE: loop exit
PB: predicated region body
PF: predicated region fallthrough
CT: control target
= control target key end

     0   :  { %s9386_s0 = inlined_call_operand.vmem [shape: f32[2,1024], index: 0, kind: input, shape index: {}]   ;;  %s9387_s1 = inlined_call_operand.hbm [shape: f32[2,64,16], index: 1, kind: input, shape index: {}]   ;;  %s9388_s2 = inlined_call_operand.vmem [shape: f32[1024,20], index: 2, kind: input, shape index: {}]   ;;  %s9389_s3 = inlined_call_operand.hbm [shape: f32[1,20], index: 3, kind: input, shape index: {}]   ;;  %s9390_s4 = inlined_call_operand.vmem [shape: f32[20,6], index: 4, kind: input, shape index: {}]   ;;  %s9391_s5 = inlined_call_operand.hbm [shape: f32[1,6], index: 5, kind: input, shape index: {}]   ;;  %s9392_s6 = inlined_call_operand.hbm [shape: f32[6,512], index: 6, kind: input, shape index: {}]   ;;  %s9393_s7 = inlined_call_operand.hbm [shape: f32[1024,1024], index: 7, kind: input, shape index: {}]   ;;  %s9394_s8 = inlined_call_operand.hbm [shape: f32[1,1024], index: 8, kind: input, shape index: {}]   ;;  %s9395_s9 = inlined_call_operand.hbm [shape: f32[1024,256], index: 9, kind: input, shape index: {}]   ;;  %s9396_s10 = inlined_call_operand.hbm [shape: f32[1,256], index: 10, kind: input, shape index: {}]   ;;  %s9397_s11 = inlined_call_operand.hbm [shape: f32[256,1024], index: 11, kind: input, shape index: {}]   ;;  %s9398_s12 = inlined_call_operand.hbm [shape: f32[1,1024], index: 12, kind: input, shape index: {}]   ;;  %s9399_s13 = inlined_call_operand.vmem [shape: f32[1024,10], index: 13, kind: input, shape index: {}]   ;;  %s9400_s14 = inlined_call_operand.hbm [shape: f32[1,10], index: 14, kind: input, shape index: {}]   ;;  %s9401_s15 = inlined_call_operand.vmem [shape: f32[2,1024], index: 15, kind: output, shape index: {0}]   ;;  %s9402_s16 = inlined_call_operand.hbm [shape: f32[2,10], index: 16, kind: output, shape index: {1}]  }
   0x1   :  { %9429 = sst [smem:[#allocation49_spill]] %s9386_s0 }
   0x2   :  { %22 = vsyncpa [#allocation3], 0 }
   0x3   :  { %23 = vsyncpa [#allocation6], 0 }
   0x4   :  { %24 = vsyncpa [#allocation9], 0 }
   0x5   :  { %25 = vsyncpa [#allocation12], 0 }
   0x6   :  { %26 = vsyncpa [#allocation15], 0 }
   0x7   :  { %27 = vsyncpa [#allocation18], 0 }
   0x8   :  { %28 = vsyncpa [#allocation4], 0  ;;  %s7853_s21 = smov [#allocation5]   ;;  %s7854_s23 = smov [#allocation8]  }
   0x9   :  { %s51_s22 = sshll.u32 %s7853_s21, 4  ;;  %s73_s24 = sshll.u32 %s7854_s23, 4  ;;  %s52_s22 = int_to_ptr.vmem [resolvable:$true] %s51_s22  ;;  %s74_s24 = int_to_ptr.vmem [resolvable:$true] %s73_s24 }
   0xa   :  { %s7575_s27 = scalar_lea.hbm %s9389_s3, 16 }
   0xb   :  { %p7576_p0 = scmp.ne.s32.totalorder %s9389_s3, %s7575_s27  ;;  %p7579_p1 = scmp.lt.u32.totalorder %s7575_s27, %s9389_s3 }
   0xd   :  { %p7581_p2 = pnand %p7579_p1, %p7576_p0 }
   0xf   :  { %7584 = shalt.err (!%p7581_p2)
}
  0x10   :  { %s7585_s17 = scalar_lea.vmem %s52_s22, 16  ;;  %s7589_s18 = scalar_lea.vmem %s52_s22, 32 }
  0x11   :  { %p7586_p3 = scmp.ne.s32.totalorder %s52_s22, %s7585_s17  ;;  %p7590_p4 = scmp.lt.s32.totalorder %s52_s22, %s52_s22 }
  0x12   :  { %p7591_p5 = scmp.lt.s32.totalorder %s7589_s18, %s7585_s17 }
  0x14   :  { %p7592_p6 = por %p7591_p5, %p7590_p4 }
  0x16   :  { %p7593_p7 = pnand %p7592_p6, %p7586_p3 }
  0x18   :  { %7596 = shalt.err (!%p7593_p7)
}
  0x19   :  { %54 = dma.hbm_to_vmem [thread:$0]  %s9389_s3, 16, %s52_s22, [#allocation6]  }
  0x1a   :  { %s7597_s25 = scalar_lea.hbm %s9392_s6, 512 }
  0x1b   :  { %p7598_p8 = scmp.ne.s32.totalorder %s9392_s6, %s7597_s25  ;;  %p7601_p9 = scmp.lt.u32.totalorder %s7597_s25, %s9392_s6 }
  0x1d   :  { %p7603_p10 = pnand %p7601_p9, %p7598_p8 }
  0x1f   :  { %7606 = shalt.err (!%p7603_p10)
}
  0x20   :  { %s7607_s30 = scalar_lea.vmem %s74_s24, 512  ;;  %p7612_p12 = scmp.lt.s32.totalorder %s74_s24, %s74_s24 }
  0x21   :  { %p7608_p11 = scmp.ne.s32.totalorder %s74_s24, %s7607_s30  ;;  %p7613_p13 = scmp.lt.s32.totalorder %s7607_s30, %s7607_s30 }
  0x23   :  { %p7614_p0 = por %p7613_p13, %p7612_p12 }
  0x25   :  { %p7615_p1 = pnand %p7614_p0, %p7608_p11 }
  0x27   :  { %7618 = shalt.err (!%p7615_p1)
}
  0x28   :  { %76 = dma.hbm_to_vmem [thread:$0]  %s9392_s6, 512, %s74_s24, [#allocation9]  }
  0x29   :  { %s7855_s0 = smov [#allocation11]   ;;  %s7856_s18 = smov [#allocation14]  }
  0x2a   :  { %s95_s17 = sshll.u32 %s7855_s0, 4  ;;  %s117_s19 = sshll.u32 %s7856_s18, 4  ;;  %s96_s17 = int_to_ptr.vmem [resolvable:$true] %s95_s17  ;;  %s118_s19 = int_to_ptr.vmem [resolvable:$true] %s117_s19 }
  0x2b   :  { %s7619_s23 = scalar_lea.hbm %s9394_s8, 128 }
  0x2c   :  { %p7620_p2 = scmp.ne.s32.totalorder %s9394_s8, %s7619_s23  ;;  %p7623_p3 = scmp.lt.u32.totalorder %s7619_s23, %s9394_s8 }
  0x2e   :  { %p7625_p4 = pnand %p7623_p3, %p7620_p2 }
  0x30   :  { %7628 = shalt.err (!%p7625_p4)
}
  0x31   :  { %s7629_s6 = scalar_lea.vmem %s96_s17, 128  ;;  %p7634_p6 = scmp.lt.s32.totalorder %s96_s17, %s96_s17 }
  0x32   :  { %p7630_p5 = scmp.ne.s32.totalorder %s96_s17, %s7629_s6  ;;  %p7635_p7 = scmp.lt.s32.totalorder %s7629_s6, %s7629_s6 }
  0x34   :  { %p7636_p8 = por %p7635_p7, %p7634_p6 }
  0x36   :  { %p7637_p9 = pnand %p7636_p8, %p7630_p5 }
  0x38   :  { %7640 = shalt.err (!%p7637_p9)
}
  0x39   :  { %98 = dma.hbm_to_vmem [thread:$0]  %s9394_s8, 128, %s96_s17, [#allocation12]  }
  0x3a   :  { %s7641_s22 = scalar_lea.hbm %s9396_s10, 32 }
  0x3b   :  { %p7642_p10 = scmp.ne.s32.totalorder %s9396_s10, %s7641_s22  ;;  %p7645_p11 = scmp.lt.u32.totalorder %s7641_s22, %s9396_s10 }
  0x3d   :  { %p7647_p12 = pnand %p7645_p11, %p7642_p10 }
  0x3f   :  { %7650 = shalt.err (!%p7647_p12)
}
  0x40   :  { %s7651_s23 = scalar_lea.vmem %s118_s19, 32  ;;  %p7656_p0 = scmp.lt.s32.totalorder %s118_s19, %s118_s19 }
  0x41   :  { %p7652_p13 = scmp.ne.s32.totalorder %s118_s19, %s7651_s23  ;;  %p7657_p1 = scmp.lt.s32.totalorder %s7651_s23, %s7651_s23 }
  0x43   :  { %p7658_p2 = por %p7657_p1, %p7656_p0 }
  0x45   :  { %p7659_p3 = pnand %p7658_p2, %p7652_p13 }
  0x47   :  { %7662 = shalt.err (!%p7659_p3)
}
  0x48   :  { %120 = dma.hbm_to_vmem [thread:$0]  %s9396_s10, 32, %s118_s19, [#allocation15]  }
  0x49   :  { %s7857_s25 = smov [#allocation17]   ;;  %s7858_s27 = smov [#allocation2]  }
  0x4a   :  { %s139_s26 = sshll.u32 %s7857_s25, 4  ;;  %s36_s28 = sshll.u32 %s7858_s27, 4  ;;  %s140_s26 = int_to_ptr.vmem [resolvable:$true] %s139_s26  ;;  %s8009_s28 = int_to_ptr.vmem [resolvable:$true] %s36_s28 }
  0x4b   :  { %s7663_s29 = scalar_lea.hbm %s9398_s12, 128 }
  0x4c   :  { %p7664_p4 = scmp.ne.s32.totalorder %s9398_s12, %s7663_s29  ;;  %p7667_p5 = scmp.lt.u32.totalorder %s7663_s29, %s9398_s12 }
  0x4e   :  { %p7669_p6 = pnand %p7667_p5, %p7664_p4 }
  0x50   :  { %7672 = shalt.err (!%p7669_p6)
}
  0x51   :  { %s7673_s10 = scalar_lea.vmem %s140_s26, 128  ;;  %p7678_p8 = scmp.lt.s32.totalorder %s140_s26, %s140_s26 }
  0x52   :  { %p7674_p7 = scmp.ne.s32.totalorder %s140_s26, %s7673_s10  ;;  %p7679_p9 = scmp.lt.s32.totalorder %s7673_s10, %s7673_s10 }
  0x54   :  { %p7680_p10 = por %p7679_p9, %p7678_p8 }
  0x56   :  { %p7681_p11 = pnand %p7680_p10, %p7674_p7 }
  0x58   :  { %7684 = shalt.err (!%p7681_p11)
}
  0x59   :  { %142 = dma.hbm_to_vmem [thread:$0]  %s9398_s12, 128, %s140_s26, [#allocation18]  }
  0x5a   :  { %s7685_s23 = scalar_lea.hbm %s9387_s1, 2048 }
  0x5b   :  { %p7686_p12 = scmp.ne.s32.totalorder %s9387_s1, %s7685_s23  ;;  %p7689_p13 = scmp.lt.u32.totalorder %s7685_s23, %s9387_s1 }
  0x5d   :  { %p7691_p0 = pnand %p7689_p13, %p7686_p12 }
  0x5f   :  { %7694 = shalt.err (!%p7691_p0)
}
  0x60   :  { %s7695_s6 = scalar_lea.vmem %s8009_s28, 2048  ;;  %p7700_p2 = scmp.lt.s32.totalorder %s8009_s28, %s8009_s28 }
  0x61   :  { %p7696_p1 = scmp.ne.s32.totalorder %s8009_s28, %s7695_s6  ;;  %p7701_p3 = scmp.lt.s32.totalorder %s7695_s6, %s7695_s6 }
  0x63   :  { %p7702_p4 = por %p7701_p3, %p7700_p2 }
  0x65   :  { %p7703_p5 = pnand %p7702_p4, %p7696_p1 }
  0x67   :  { %7706 = shalt.err (!%p7703_p5)
}
  0x68   :  { %s7859_s12 = smov 128   ;;  %s7860_s26 = smov 8  }
  0x69   :  { %42 = dma.hbm_to_vmem [thread:$0]  %s9387_s1, 2048, %s8009_s28, [#allocation3], %s7859_s12, %s7859_s12, %s7860_s26  }
  0x6a   :  { %s7861_s30 = smov [#allocation7]   ;;  %s7862_s22 = smov [#allocation10]  }
  0x6b   :  { %s63_s3 = sshll.u32 %s7861_s30, 4  ;;  %s82_s0 = sshll.u32 %s7862_s22, 4  ;;  %s64_s3 = int_to_ptr.vmem [resolvable:$true] %s63_s3  ;;  %s8040_s0 = int_to_ptr.vmem [resolvable:$true] %s82_s0 }
  0x6c   :  { %s7707_s18 = scalar_lea.hbm %s9391_s5, 16 }
  0x6d   :  { %p7708_p6 = scmp.ne.s32.totalorder %s9391_s5, %s7707_s18  ;;  %p7711_p7 = scmp.lt.u32.totalorder %s7707_s18, %s9391_s5 }
  0x6f   :  { %p7713_p8 = pnand %p7711_p7, %p7708_p6 }
  0x71   :  { %7716 = shalt.err (!%p7713_p8)
}
  0x72   :  { %s7717_s1 = scalar_lea.vmem %s64_s3, 16  ;;  %s7721_s28 = scalar_lea.vmem %s64_s3, 32 }
  0x73   :  { %p7718_p9 = scmp.ne.s32.totalorder %s64_s3, %s7717_s1  ;;  %p7722_p10 = scmp.lt.s32.totalorder %s64_s3, %s64_s3 }
  0x74   :  { %p7723_p11 = scmp.lt.s32.totalorder %s7721_s28, %s7717_s1 }
  0x76   :  { %p7724_p12 = por %p7723_p11, %p7722_p10 }
  0x78   :  { %p7725_p13 = pnand %p7724_p12, %p7718_p9 }
  0x7a   :  { %7728 = shalt.err (!%p7725_p13)
}
  0x7b   :  { %66 = dma.hbm_to_vmem [thread:$0]  %s9391_s5, 16, %s64_s3, [#allocation6]  }
  0x7c   :  { %s7729_s12 = scalar_lea.hbm %s9393_s7, 131072 }
  0x7d   :  { %p7730_p0 = scmp.ne.s32.totalorder %s9393_s7, %s7729_s12  ;;  %p7733_p1 = scmp.lt.u32.totalorder %s7729_s12, %s9393_s7 }
  0x7f   :  { %p7735_p2 = pnand %p7733_p1, %p7730_p0 }
  0x81   :  { %7738 = shalt.err (!%p7735_p2)
}
  0x82   :  { %s7739_s22 = scalar_lea.vmem %s8040_s0, 131072  ;;  %p7744_p4 = scmp.lt.s32.totalorder %s8040_s0, %s8040_s0 }
  0x83   :  { %p7740_p3 = scmp.ne.s32.totalorder %s8040_s0, %s7739_s22  ;;  %p7745_p5 = scmp.lt.s32.totalorder %s7739_s22, %s7739_s22 }
  0x85   :  { %p7746_p6 = por %p7745_p5, %p7744_p4 }
  0x87   :  { %p7747_p7 = pnand %p7746_p6, %p7740_p3 }
  0x89   :  { %7750 = shalt.err (!%p7747_p7)
}
  0x8a   :  { %s7863_s5 = smov 1024   ;;  %s7864_s3 = smov 64  }
  0x8b   :  { %88 = dma.hbm_to_vmem [thread:$0]  %s9393_s7, 131072, %s8040_s0, [#allocation9], %s7863_s5, %s7863_s5, %s7864_s3  }
  0x8c   :  { %s7865_s18 = smov [#allocation13]   ;;  %s7751_s8 = scalar_lea.hbm %s9395_s9, 32768 }
  0x8d   :  { %s104_s20 = sshll.u32 %s7865_s18, 4  ;;  %p7752_p8 = scmp.ne.s32.totalorder %s9395_s9, %s7751_s8  ;;  %s105_s20 = int_to_ptr.vmem [resolvable:$true] %s104_s20 }
  0x8e   :  { %p7755_p9 = scmp.lt.u32.totalorder %s7751_s8, %s9395_s9 }
  0x90   :  { %p7757_p10 = pnand %p7755_p9, %p7752_p8 }
  0x92   :  { %7760 = shalt.err (!%p7757_p10)
}
  0x93   :  { %s7761_s27 = scalar_lea.vmem %s105_s20, 32768  ;;  %p7766_p12 = scmp.lt.s32.totalorder %s105_s20, %s105_s20 }
  0x94   :  { %p7762_p11 = scmp.ne.s32.totalorder %s105_s20, %s7761_s27  ;;  %p7767_p13 = scmp.lt.s32.totalorder %s7761_s27, %s7761_s27 }
  0x96   :  { %p7768_p0 = por %p7767_p13, %p7766_p12 }
  0x98   :  { %p7769_p1 = pnand %p7768_p0, %p7762_p11 }
  0x9a   :  { %7772 = shalt.err (!%p7769_p1)
}
  0x9b   :  { %s7866_s7 = smov 256   ;;  %s7867_s0 = smov 16  }
  0x9c   :  { %110 = dma.hbm_to_vmem [thread:$0]  %s9395_s9, 32768, %s105_s20, [#allocation12], %s7866_s7, %s7866_s7, %s7867_s0  }
  0x9d   :  { %s7868_s26 = smov [#allocation16]   ;;  %s7869_s29 = smov [#allocation19]  }
  0x9e   :  { %s126_s24 = sshll.u32 %s7868_s26, 4  ;;  %s151_s30 = sshll.u32 %s7869_s29, 4  ;;  %s127_s24 = int_to_ptr.vmem [resolvable:$true] %s126_s24  ;;  %s152_s30 = int_to_ptr.vmem [resolvable:$true] %s151_s30 }
  0x9f   :  { %s7773_s19 = scalar_lea.hbm %s9397_s11, 32768 }
  0xa0   :  { %p7774_p2 = scmp.ne.s32.totalorder %s9397_s11, %s7773_s19  ;;  %p7777_p3 = scmp.lt.u32.totalorder %s7773_s19, %s9397_s11 }
  0xa2   :  { %p7779_p4 = pnand %p7777_p3, %p7774_p2 }
  0xa4   :  { %7782 = shalt.err (!%p7779_p4)
}
  0xa5   :  { %s7783_s9 = scalar_lea.vmem %s127_s24, 32768  ;;  %p7788_p6 = scmp.lt.s32.totalorder %s127_s24, %s127_s24 }
  0xa6   :  { %p7784_p5 = scmp.ne.s32.totalorder %s127_s24, %s7783_s9  ;;  %p7789_p7 = scmp.lt.s32.totalorder %s7783_s9, %s7783_s9 }
  0xa8   :  { %p7790_p8 = por %p7789_p7, %p7788_p6 }
  0xaa   :  { %p7791_p9 = pnand %p7790_p8, %p7784_p5 }
  0xac   :  { %7794 = shalt.err (!%p7791_p9)
}
  0xad   :  { %132 = dma.hbm_to_vmem [thread:$0]  %s9397_s11, 32768, %s127_s24, [#allocation15], %s7863_s5, %s7863_s5, %s7864_s3  }
  0xae   :  { %s7795_s25 = scalar_lea.hbm %s9400_s14, 16 }
  0xaf   :  { %p7796_p10 = scmp.ne.s32.totalorder %s9400_s14, %s7795_s25  ;;  %p7799_p11 = scmp.lt.u32.totalorder %s7795_s25, %s9400_s14 }
  0xb1   :  { %p7801_p12 = pnand %p7799_p11, %p7796_p10 }
  0xb3   :  { %7804 = shalt.err (!%p7801_p12)
}
  0xb4   :  { %s7805_s12 = scalar_lea.vmem %s152_s30, 16  ;;  %s7809_s26 = scalar_lea.vmem %s152_s30, 32 }
  0xb5   :  { %p7806_p13 = scmp.ne.s32.totalorder %s152_s30, %s7805_s12  ;;  %p7810_p0 = scmp.lt.s32.totalorder %s152_s30, %s152_s30 }
  0xb6   :  { %p7811_p1 = scmp.lt.s32.totalorder %s7809_s26, %s7805_s12 }
  0xb8   :  { %p7812_p2 = por %p7811_p1, %p7810_p0 }
  0xba   :  { %p7813_p3 = pnand %p7812_p2, %p7806_p13 }
  0xbc   :  { %7816 = shalt.err (!%p7813_p3)
}
  0xbd   :  { %154 = dma.hbm_to_vmem [thread:$0]  %s9400_s14, 16, %s152_s30, [#allocation18]  }
  0xbe   :  { %7839 = dma.done.wait [#allocation3], 2048  }
  0xbf   :  { %7840 = vsyncadd [#allocation3], 4294965248 }
  0xc0   :  { %7841 = dma.done.wait [#allocation6], 32  }
  0xc1   :  { %7842 = vsyncadd [#allocation6], 4294967264 }
  0xc2   :  { %7843 = dma.done.wait [#allocation9], 131584  }
  0xc3   :  { %7844 = vsyncadd [#allocation9], 4294835712 }
  0xc4   :  { %7845 = dma.done.wait [#allocation12], 32896  }
  0xc5   :  { %7846 = vsyncadd [#allocation12], 4294934400 }
  0xc6   :  { %7847 = dma.done.wait [#allocation15], 32800  }
  0xc7   :  { %7848 = vsyncadd [#allocation15], 4294934496 }
  0xc8   :  { %7849 = dma.done.wait [#allocation18], 144  }
  0xc9   :  { %7850 = vsyncadd [#allocation18], 4294967152  ;;  %v206_v0 = vld [vmem:[%s9388_s2 + $0x80] sm:$0xff]  ;;  %v207_v1 = vld [vmem:[%s9388_s2 + $0x88] sm:$0xff]  ;;  %v7870_v47 = vmov 1983009808   ;;  %v331_v49 = vlaneseq }
  0xca   :  { %v190_v2 = vld [vmem:[%s9388_s2] sm:$0xff]  ;;  %v5702_v3 = vpack.c.bf16 %v207_v1, %v206_v0  ;;  %v191_v4 = vld [vmem:[%s9388_s2 + $0x8] sm:$0xff]  ;;  %v208_v11 = vld [vmem:[%s9388_s2 + $0x90] sm:$0xff]  ;;  %v329_v48 = vunpack.c.l.s4 %v7870_v47  ;;  %s9432_s18 = sld [smem:[#allocation49_spill]]  ;;  %vm7873_vm0 = vmmov 0   ;;  %vm664_vm1 = vcmask 1043456  }
  0xcb   :  { %v238_v5 = vld [vmem:[%s9388_s2 + $0x180] sm:$0xff]  ;;  %v239_v6 = vld [vmem:[%s9388_s2 + $0x188] sm:$0xff]  ;;  %v5704_v7 = vpack.c.bf16 %v191_v4, %v190_v2  ;;  %v209_v13 = vld [vmem:[%s9388_s2 + $0x98] sm:$0xff]  ;;  %v8239_v0 = vshrl.u32 %v331_v49, 7  ;;  %vm660_vm2 = vcmask 162816   ;;  %vm747_vm3 = vcmask 1045504  }
  0xcc   :  { %v5734_v8 = vpack.c.bf16 %v239_v6, %v238_v5  ;;  %v222_v9 = vld [vmem:[%s9388_s2 + $0x100] sm:$0xff]  ;;  %v223_v10 = vld [vmem:[%s9388_s2 + $0x108] sm:$0xff]  ;;  %5703 = vmatprep.subr.bf16.mxu0 %v5702_v3  ;;  %v192_v14 = vld [vmem:[%s9388_s2 + $0x10] sm:$0xff]  ;;  %v5706_v16 = vpack.c.bf16 %v209_v13, %v208_v11  ;;  %v330_v63 = vunpack.c.0.s8 %v329_v48  ;;  %vm743_vm4 = vcmask 48128  }
  0xcd   :  { %v5736_v12 = vpack.c.bf16 %v223_v10, %v222_v9  ;;  %v193_v15 = vld [vmem:[%s9388_s2 + $0x18] sm:$0xff]  ;;  %5705 = vmatpush3.bf16.msra.mxu0 %v5704_v7  ;;  %v240_v18 = vld [vmem:[%s9388_s2 + $0x190] sm:$0xff]  ;;  %v210_v23 = vld [vmem:[%s9388_s2 + $0xa0] sm:$0xff]  ;;  %9430 = vst [vmem:[#allocation28_spill] sm:$0xff] %v8239_v0  ;;  %vm1093_vm5 = vcmask 130048   ;;  %vm1516_vm6 = vcmask 1041409  }
  0xce   :  { %5735 = vmatprep.subr.bf16.mxu1 %v5734_v8  ;;  %v5708_v17 = vpack.c.bf16 %v193_v15, %v192_v14  ;;  %v241_v19 = vld [vmem:[%s9388_s2 + $0x198] sm:$0xff]  ;;  %v224_v20 = vld [vmem:[%s9388_s2 + $0x110] sm:$0xff]  ;;  %v211_v24 = vld [vmem:[%s9388_s2 + $0xa8] sm:$0xff]  ;;  %5707 = vmatprep.subr.bf16.mxu0 %v5706_v16  ;;  %v8266_v13 = vsub.s32 %v330_v63, %v8239_v0  ;;  %vm5352_vm7 = vcmask 74752  }
  0xcf   :  { %5737 = vmatpush3.bf16.msra.mxu1 %v5736_v12  ;;  %v5738_v21 = vpack.c.bf16 %v241_v19, %v240_v18  ;;  %v225_v22 = vld [vmem:[%s9388_s2 + $0x118] sm:$0xff]  ;;  %v5710_v26 = vpack.c.bf16 %v211_v24, %v210_v23  ;;  %v194_v27 = vld [vmem:[%s9388_s2 + $0x20] sm:$0xff]  ;;  %v195_v28 = vld [vmem:[%s9388_s2 + $0x28] sm:$0xff] }
  0xd0   :  { %v5740_v25 = vpack.c.bf16 %v225_v22, %v224_v20  ;;  %v242_v29 = vld [vmem:[%s9388_s2 + $0x1a0] sm:$0xff]  ;;  %v243_v30 = vld [vmem:[%s9388_s2 + $0x1a8] sm:$0xff]  ;;  %v5712_v33 = vpack.c.bf16 %v195_v28, %v194_v27  ;;  %v212_v35 = vld [vmem:[%s9388_s2 + $0xb0] sm:$0xff]  ;;  %9431 = vst [vmem:[#allocation29_spill] sm:$0xff] %v8266_v13 }
  0xd1   :  { %5739 = vmatprep.subr.bf16.mxu1 %v5738_v21  ;;  %v226_v31 = vld [vmem:[%s9388_s2 + $0x120] sm:$0xff]  ;;  %v227_v32 = vld [vmem:[%s9388_s2 + $0x128] sm:$0xff]  ;;  %5709 = vmatpush3.bf16.msra.mxu0 %v5708_v17  ;;  %v5742_v34 = vpack.c.bf16 %v243_v30, %v242_v29  ;;  %v213_v36 = vld [vmem:[%s9388_s2 + $0xb8] sm:$0xff] }
  0xd2   :  { %v196_v37 = vld [vmem:[%s9388_s2 + $0x30] sm:$0xff]  ;;  %5711 = vmatprep.subr.bf16.mxu0 %v5710_v26  ;;  %v5744_v38 = vpack.c.bf16 %v227_v32, %v226_v31  ;;  %v5714_v39 = vpack.c.bf16 %v213_v36, %v212_v35  ;;  %v197_v40 = vld [vmem:[%s9388_s2 + $0x38] sm:$0xff]  ;;  %v214_v46 = vld [vmem:[%s9388_s2 + $0xc0] sm:$0xff] }
  0xd3   :  { %5741 = vmatpush3.bf16.msra.mxu1 %v5740_v25  ;;  %v244_v41 = vld [vmem:[%s9388_s2 + $0x1b0] sm:$0xff]  ;;  %v245_v42 = vld [vmem:[%s9388_s2 + $0x1b8] sm:$0xff]  ;;  %v215_v50 = vld [vmem:[%s9388_s2 + $0xc8] sm:$0xff]  ;;  %v5716_v51 = vpack.c.bf16 %v197_v40, %v196_v37 }
  0xd4   :  { %5743 = vmatprep.subr.bf16.mxu1 %v5742_v34  ;;  %v5746_v43 = vpack.c.bf16 %v245_v42, %v244_v41  ;;  %v228_v44 = vld [vmem:[%s9388_s2 + $0x130] sm:$0xff]  ;;  %v229_v45 = vld [vmem:[%s9388_s2 + $0x138] sm:$0xff]  ;;  %v246_v52 = vld [vmem:[%s9388_s2 + $0x1c0] sm:$0xff]  ;;  %v5718_v55 = vpack.c.bf16 %v215_v50, %v214_v46 }
  0xd5   :  { %5713 = vmatpush3.bf16.msra.mxu0 %v5712_v33  ;;  %v247_v53 = vld [vmem:[%s9388_s2 + $0x1c8] sm:$0xff]  ;;  %v5748_v54 = vpack.c.bf16 %v229_v45, %v228_v44  ;;  %v198_v56 = vld [vmem:[%s9388_s2 + $0x40] sm:$0xff]  ;;  %v216_v61 = vld [vmem:[%s9388_s2 + $0xd0] sm:$0xff] }
  0xd6   :  { %5715 = vmatprep.subr.bf16.mxu0 %v5714_v39  ;;  %v199_v57 = vld [vmem:[%s9388_s2 + $0x48] sm:$0xff]  ;;  %v230_v58 = vld [vmem:[%s9388_s2 + $0x140] sm:$0xff]  ;;  %v5750_v59 = vpack.c.bf16 %v247_v53, %v246_v52  ;;  %v217_v62 = vld [vmem:[%s9388_s2 + $0xd8] sm:$0xff] }
  0xd7   :  { %5745 = vmatpush3.bf16.msra.mxu1 %v5744_v38  ;;  %v231_v60 = vld [vmem:[%s9388_s2 + $0x148] sm:$0xff]  ;;  %v248_v1 = vld [vmem:[%s9388_s2 + $0x1d0] sm:$0xff]  ;;  %v249_v2 = vld [vmem:[%s9388_s2 + $0x1d8] sm:$0xff]  ;;  %v5720_v3 = vpack.c.bf16 %v199_v57, %v198_v56  ;;  %v5722_v5 = vpack.c.bf16 %v217_v62, %v216_v61 }
  0xd8   :  { %5747 = vmatprep.subr.bf16.mxu1 %v5746_v43  ;;  %v5752_v4 = vpack.c.bf16 %v231_v60, %v230_v58  ;;  %v200_v6 = vld [vmem:[%s9388_s2 + $0x50] sm:$0xff]  ;;  %v201_v7 = vld [vmem:[%s9388_s2 + $0x58] sm:$0xff]  ;;  %v5754_v9 = vpack.c.bf16 %v249_v2, %v248_v1  ;;  %v218_v11 = vld [vmem:[%s9388_s2 + $0xe0] sm:$0xff] }
  0xd9   :  { %5717 = vmatpush3.bf16.msra.mxu0 %v5716_v51  ;;  %v232_v8 = vld [vmem:[%s9388_s2 + $0x150] sm:$0xff]  ;;  %v233_v10 = vld [vmem:[%s9388_s2 + $0x158] sm:$0xff]  ;;  %v219_v12 = vld [vmem:[%s9388_s2 + $0xe8] sm:$0xff]  ;;  %v5724_v16 = vpack.c.bf16 %v201_v7, %v200_v6 }
  0xda   :  { %5719 = vmatprep.subr.bf16.mxu0 %v5718_v55  ;;  %v250_v14 = vld [vmem:[%s9388_s2 + $0x1e0] sm:$0xff]  ;;  %v251_v15 = vld [vmem:[%s9388_s2 + $0x1e8] sm:$0xff]  ;;  %v5756_v18 = vpack.c.bf16 %v233_v10, %v232_v8  ;;  %v5726_v19 = vpack.c.bf16 %v219_v12, %v218_v11  ;;  %v220_v25 = vld [vmem:[%s9388_s2 + $0xf0] sm:$0xff] }
  0xdb   :  { %5749 = vmatpush3.bf16.msra.mxu1 %v5748_v54  ;;  %v202_v17 = vld [vmem:[%s9388_s2 + $0x60] sm:$0xff]  ;;  %v203_v20 = vld [vmem:[%s9388_s2 + $0x68] sm:$0xff]  ;;  %v5758_v23 = vpack.c.bf16 %v251_v15, %v250_v14  ;;  %v221_v26 = vld [vmem:[%s9388_s2 + $0xf8] sm:$0xff] }
  0xdc   :  { %5751 = vmatprep.subr.bf16.mxu1 %v5750_v59  ;;  %v234_v21 = vld [vmem:[%s9388_s2 + $0x160] sm:$0xff]  ;;  %v235_v24 = vld [vmem:[%s9388_s2 + $0x168] sm:$0xff]  ;;  %v252_v29 = vld [vmem:[%s9388_s2 + $0x1f0] sm:$0xff]  ;;  %v5728_v31 = vpack.c.bf16 %v203_v20, %v202_v17  ;;  %v5730_v35 = vpack.c.bf16 %v221_v26, %v220_v25 }
  0xdd   :  { %5721 = vmatpush3.bf16.msra.mxu0 %v5720_v3  ;;  %v188_v22 = vld [vmem:[%s9432_s18] sm:$0xff]  ;;  %v253_v30 = vld [vmem:[%s9388_s2 + $0x1f8] sm:$0xff]  ;;  %v5760_v34 = vpack.c.bf16 %v235_v24, %v234_v21  ;;  %v204_v36 = vld [vmem:[%s9388_s2 + $0x70] sm:$0xff] }
  0xde   :  { %5723 = vmatprep.subr.bf16.mxu0 %v5722_v5  ;;  %v334_v27 = vrot.slane %v188_v22, %v8266_v13  ;;  %v327_v28 = vcombine.high %v188_v22, %v188_v22  ;;  %v205_v37 = vld [vmem:[%s9388_s2 + $0x78] sm:$0xff]  ;;  %v236_v38 = vld [vmem:[%s9388_s2 + $0x170] sm:$0xff]  ;;  %v5762_v39 = vpack.c.bf16 %v253_v30, %v252_v29  ;;  %v270_v41 = vld [vmem:[%s9388_s2 + $0x280] sm:$0xff] }
  0xdf   :  { %5753 = vmatpush3.bf16.msra.mxu1 %v5752_v4  ;;  %v237_v40 = vld [vmem:[%s9388_s2 + $0x178] sm:$0xff]  ;;  %v271_v42 = vld [vmem:[%s9388_s2 + $0x288] sm:$0xff]  ;;  %v302_v44 = vld [vmem:[%s9388_s2 + $0x380] sm:$0xff]  ;;  %v5732_v46 = vpack.c.bf16 %v205_v37, %v204_v36 }
  0xe0   :  { %5755 = vmatprep.subr.bf16.mxu1 %v5754_v9  ;;  %v342_v32 = vcombine.high %v334_v27, %v334_v27  ;;  %v341_v33 = vrot.slane %v327_v28, %v8266_v13  ;;  %v303_v45 = vld [vmem:[%s9388_s2 + $0x388] sm:$0xff]  ;;  %v5764_v47 = vpack.c.bf16 %v237_v40, %v236_v38  ;;  %v5766_v48 = vpack.c.bf16 %v271_v42, %v270_v41  ;;  %v254_v49 = vld [vmem:[%s9388_s2 + $0x200] sm:$0xff]  ;;  %v272_v54 = vld [vmem:[%s9388_s2 + $0x290] sm:$0xff] }
  0xe1   :  { %5725 = vmatpush3.bf16.msra.mxu0 %v5724_v16  ;;  %v255_v50 = vld [vmem:[%s9388_s2 + $0x208] sm:$0xff]  ;;  %v286_v51 = vld [vmem:[%s9388_s2 + $0x300] sm:$0xff]  ;;  %v5798_v52 = vpack.c.bf16 %v303_v45, %v302_v44  ;;  %v273_v55 = vld [vmem:[%s9388_s2 + $0x298] sm:$0xff] }
  0xe2   :  { %5727 = vmatprep.subr.bf16.mxu0 %v5726_v19  ;;  %433 = vmatprep.mubr.f32.mxu0 %v342_v32  ;;  %v343_v43 = vcombine.high %v341_v33, %v341_v33  ;;  %v287_v53 = vld [vmem:[%s9388_s2 + $0x308] sm:$0xff]  ;;  %v304_v56 = vld [vmem:[%s9388_s2 + $0x390] sm:$0xff]  ;;  %v305_v57 = vld [vmem:[%s9388_s2 + $0x398] sm:$0xff]  ;;  %v5768_v58 = vpack.c.bf16 %v255_v50, %v254_v49  ;;  %v5770_v60 = vpack.c.bf16 %v273_v55, %v272_v54 }
  0xe3   :  { %5757 = vmatpush3.bf16.msra.mxu1 %v5756_v18  ;;  %v5800_v59 = vpack.c.bf16 %v287_v53, %v286_v51  ;;  %v256_v61 = vld [vmem:[%s9388_s2 + $0x210] sm:$0xff]  ;;  %v257_v62 = vld [vmem:[%s9388_s2 + $0x218] sm:$0xff]  ;;  %v5802_v1 = vpack.c.bf16 %v305_v57, %v304_v56  ;;  %v274_v3 = vld [vmem:[%s9388_s2 + $0x2a0] sm:$0xff] }
  0xe4   :  { %5759 = vmatprep.subr.bf16.mxu1 %v5758_v23  ;;  %503 = vmatprep.mubr.f32.mxu1 %v343_v43  ;;  %v288_v63 = vld [vmem:[%s9388_s2 + $0x310] sm:$0xff]  ;;  %v289_v2 = vld [vmem:[%s9388_s2 + $0x318] sm:$0xff]  ;;  %v275_v4 = vld [vmem:[%s9388_s2 + $0x2a8] sm:$0xff]  ;;  %v5772_v7 = vpack.c.bf16 %v257_v62, %v256_v61 }
  0xe5   :  { %5729 = vmatpush3.bf16.msra.mxu0 %v5728_v31  ;;  %v306_v5 = vld [vmem:[%s9388_s2 + $0x3a0] sm:$0xff]  ;;  %v307_v6 = vld [vmem:[%s9388_s2 + $0x3a8] sm:$0xff]  ;;  %v5804_v8 = vpack.c.bf16 %v289_v2, %v288_v63  ;;  %v5774_v9 = vpack.c.bf16 %v275_v4, %v274_v3  ;;  %v276_v16 = vld [vmem:[%s9388_s2 + $0x2b0] sm:$0xff] }
  0xe6   :  { %5731 = vmatprep.subr.bf16.mxu0 %v5730_v35  ;;  %v258_v10 = vld [vmem:[%s9388_s2 + $0x220] sm:$0xff]  ;;  %v259_v11 = vld [vmem:[%s9388_s2 + $0x228] sm:$0xff]  ;;  %v5806_v14 = vpack.c.bf16 %v307_v6, %v306_v5  ;;  %v277_v17 = vld [vmem:[%s9388_s2 + $0x2b8] sm:$0xff] }
  0xe7   :  { %5761 = vmatpush3.bf16.msra.mxu1 %v5760_v34  ;;  %v290_v12 = vld [vmem:[%s9388_s2 + $0x320] sm:$0xff]  ;;  %v291_v15 = vld [vmem:[%s9388_s2 + $0x328] sm:$0xff]  ;;  %v308_v18 = vld [vmem:[%s9388_s2 + $0x3b0] sm:$0xff]  ;;  %v5776_v20 = vpack.c.bf16 %v259_v11, %v258_v10  ;;  %v5778_v22 = vpack.c.bf16 %v277_v17, %v276_v16 }
  0xe8   :  { %5763 = vmatprep.subr.bf16.mxu1 %v5762_v39  ;;  %v309_v19 = vld [vmem:[%s9388_s2 + $0x3b8] sm:$0xff]  ;;  %v5808_v21 = vpack.c.bf16 %v291_v15, %v290_v12  ;;  %v260_v23 = vld [vmem:[%s9388_s2 + $0x230] sm:$0xff]  ;;  %v278_v28 = vld [vmem:[%s9388_s2 + $0x2c0] sm:$0xff] }
  0xe9   :  { %5733 = vmatpush3.bf16.msra.mxu0 %v5732_v46  ;;  %v261_v24 = vld [vmem:[%s9388_s2 + $0x238] sm:$0xff]  ;;  %v292_v25 = vld [vmem:[%s9388_s2 + $0x330] sm:$0xff]  ;;  %v5810_v26 = vpack.c.bf16 %v309_v19, %v308_v18  ;;  %v279_v29 = vld [vmem:[%s9388_s2 + $0x2c8] sm:$0xff] }
  0xea   :  { %5767 = vmatprep.subr.bf16.mxu0 %v5766_v48  ;;  %v310_v30 = vld [vmem:[%s9388_s2 + $0x3c0] sm:$0xff]  ;;  %v311_v31 = vld [vmem:[%s9388_s2 + $0x3c8] sm:$0xff]  ;;  %v5782_v37 = vpack.c.bf16 %v279_v29, %v278_v28  ;;  %v280_v43 = vld [vmem:[%s9388_s2 + $0x2d0] sm:$0xff] }
  0xeb   :  { %5765 = vmatpush3.bf16.msra.mxu1 %v5764_v47  ;;  %v189_v32 = vld [vmem:[%s9432_s18 + $0x8] sm:$0xff]  ;;  %v262_v38 = vld [vmem:[%s9388_s2 + $0x240] sm:$0xff]  ;;  %v5814_v41 = vpack.c.bf16 %v311_v31, %v310_v30  ;;  %v281_v44 = vld [vmem:[%s9388_s2 + $0x2d8] sm:$0xff] }
  0xec   :  { %5799 = vmatprep.subr.bf16.mxu1 %v5798_v52  ;;  %434 = vmatmul.mubr.f32.vlgmr.msra.gmra.mrb[0].mxu0 %v334_v27  ;;  %v293_v27 = vld [vmem:[%s9388_s2 + $0x338] sm:$0xff]  ;;  %v8427_v34 = vrot.slane %v189_v32, %v8266_v13  ;;  %v344_v35 = vcombine.high %v189_v32, %v189_v32  ;;  %v263_v39 = vld [vmem:[%s9388_s2 + $0x248] sm:$0xff]  ;;  %v294_v40 = vld [vmem:[%s9388_s2 + $0x340] sm:$0xff]  ;;  %v5786_v52 = vpack.c.bf16 %v281_v44, %v280_v43 }
  0xed   :  { %5769 = vmatpush3.bf16.msra.mxu0 %v5768_v58  ;;  %v5812_v36 = vpack.c.bf16 %v293_v27, %v292_v25  ;;  %v295_v42 = vld [vmem:[%s9388_s2 + $0x348] sm:$0xff]  ;;  %v312_v47 = vld [vmem:[%s9388_s2 + $0x3d0] sm:$0xff]  ;;  %v313_v48 = vld [vmem:[%s9388_s2 + $0x3d8] sm:$0xff]  ;;  %v5784_v49 = vpack.c.bf16 %v263_v39, %v262_v38 }
  0xee   :  { %504 = vmatmul.mubr.f32.vlgmr.msra.gmra.mrb[0].mxu1 %v341_v33  ;;  %5771 = vmatprep.subr.bf16.mxu0 %v5770_v60  ;;  %v5780_v33 = vpack.c.bf16 %v261_v24, %v260_v23  ;;  %v359_v45 = vcombine.high %v8427_v34, %v8427_v34  ;;  %v358_v46 = vrot.slane %v344_v35, %v8266_v13  ;;  %v264_v53 = vld [vmem:[%s9388_s2 + $0x250] sm:$0xff]  ;;  %v265_v54 = vld [vmem:[%s9388_s2 + $0x258] sm:$0xff]  ;;  %v282_v58 = vld [vmem:[%s9388_s2 + $0x2e0] sm:$0xff]  ;;  %v7871_v24 = vmov 0.0|0.0  }
  0xef   :  { %5801 = vmatpush3.bf16.msra.mxu1 %v5800_v59  ;;  %v5816_v51 = vpack.c.bf16 %v295_v42, %v294_v40  ;;  %v296_v55 = vld [vmem:[%s9388_s2 + $0x350] sm:$0xff]  ;;  %v5818_v56 = vpack.c.bf16 %v313_v48, %v312_v47  ;;  %v297_v57 = vld [vmem:[%s9388_s2 + $0x358] sm:$0xff]  ;;  %v283_v59 = vld [vmem:[%s9388_s2 + $0x2e8] sm:$0xff]  ;;  %v5788_v62 = vpack.c.bf16 %v265_v54, %v264_v53 }
  0xf0   :  { %5803 = vmatprep.subr.bf16.mxu1 %v5802_v1  ;;  %573 = vmatprep.mubr.f32.mxu0 %v359_v45  ;;  %v360_v50 = vcombine.high %v358_v46, %v358_v46  ;;  %v314_v60 = vld [vmem:[%s9388_s2 + $0x3e0] sm:$0xff]  ;;  %v315_v61 = vld [vmem:[%s9388_s2 + $0x3e8] sm:$0xff]  ;;  %v5820_v63 = vpack.c.bf16 %v297_v57, %v296_v55  ;;  %v5790_v1 = vpack.c.bf16 %v283_v59, %v282_v58  ;;  %v317_v10 = vld [vmem:[%s9388_s2 + $0x3f8] sm:$0xff] }
  0xf1   :  { %5773 = vmatpush3.bf16.msra.mxu0 %v5772_v7  ;;  %v266_v2 = vld [vmem:[%s9388_s2 + $0x260] sm:$0xff]  ;;  %v267_v3 = vld [vmem:[%s9388_s2 + $0x268] sm:$0xff]  ;;  %v5822_v5 = vpack.c.bf16 %v315_v61, %v314_v60  ;;  %v284_v7 = vld [vmem:[%s9388_s2 + $0x2f0] sm:$0xff] }
  0xf2   :  { %5775 = vmatprep.subr.bf16.mxu0 %v5774_v9  ;;  %643 = vmatprep.mubr.f32.mxu1 %v360_v50  ;;  %v298_v4 = vld [vmem:[%s9388_s2 + $0x360] sm:$0xff]  ;;  %v299_v6 = vld [vmem:[%s9388_s2 + $0x368] sm:$0xff]  ;;  %v316_v9 = vld [vmem:[%s9388_s2 + $0x3f0] sm:$0xff]  ;;  %v5792_v11 = vpack.c.bf16 %v267_v3, %v266_v2 }
  0xf3   :  { %5805 = vmatpush3.bf16.msra.mxu1 %v5804_v8  ;;  %v285_v8 = vld [vmem:[%s9388_s2 + $0x2f8] sm:$0xff]  ;;  %v5824_v12 = vpack.c.bf16 %v299_v6, %v298_v4  ;;  %v268_v15 = vld [vmem:[%s9388_s2 + $0x270] sm:$0xff]  ;;  %v5826_v17 = vpack.c.bf16 %v317_v10, %v316_v9  ;;  %v651_v23 = vld [vmem:[%s9390_s4 + $0x8] sm:$0xff] }
  0xf4   :  { %5807 = vmatprep.subr.bf16.mxu1 %v5806_v14  ;;  %v5794_v14 = vpack.c.bf16 %v285_v8, %v284_v7  ;;  %v269_v16 = vld [vmem:[%s9388_s2 + $0x278] sm:$0xff]  ;;  %v300_v18 = vld [vmem:[%s9388_s2 + $0x370] sm:$0xff]  ;;  %v5378_v29 = vld [vmem:[#allocation5] ss:$0 sm:$0xff] }
  0xf5   :  { %5777 = vmatpush3.bf16.msra.mxu0 %v5776_v20  ;;  %v301_v19 = vld [vmem:[%s9388_s2 + $0x378] sm:$0xff]  ;;  %v5796_v20 = vpack.c.bf16 %v269_v16, %v268_v15  ;;  %v652_v27 = vld [vmem:[%s9390_s4 + $0x10] sm:$0xf]  ;;  %v739_v47 = vld [vmem:[#allocation8] sm:$0x3f] }
  0xf6   :  { %5779 = vmatprep.subr.bf16.mxu0 %v5778_v22  ;;  %v650_v22 = vld [vmem:[%s9390_s4] sm:$0xff]  ;;  %v741_v53 = vld [vmem:[#allocation8 + $0x10] sm:$0x3f] }
  0xf7   :  { %5809 = vmatpush3.bf16.msra.mxu1 %v5808_v21  ;;  %v5828_v21 = vpack.c.bf16 %v301_v19, %v300_v18  ;;  %v5831_v25 = vpack.c.bf16 %v651_v23, %v650_v22  ;;  %v742_v48 = vld [vmem:[#allocation8 + $0x18] sm:$0x3f]  ;;  %v8535_v19 = vsub.s32 0, %v8239_v0 }
  0xf8   :  { %5811 = vmatprep.subr.bf16.mxu1 %v5810_v26  ;;  %v7872_v26 = vmov 0.0  }
  0xf9   :  { %5781 = vmatpush3.bf16.msra.mxu0 %v5780_v33  ;;  %9433 = vst [vmem:[#allocation30_spill] sm:$0xff] %v8535_v19 }
  0xfa   :  { %5783 = vmatprep.subr.bf16.mxu0 %v5782_v37 }
  0xfb   :  { %5813 = vmatpush3.bf16.msra.mxu1 %v5812_v36 }
  0xfc   :  { %5815 = vmatprep.subr.bf16.mxu1 %v5814_v41 }
  0xfd   :  { %5785 = vmatpush3.bf16.msra.mxu0 %v5784_v49  ;;  %v5379_v49 = vld [vmem:[#allocation7] ss:$0 sm:$0xff] }
  0xfe   :  { %5787 = vmatprep.subr.bf16.mxu0 %v5786_v52 }
  0xff   :  { %5817 = vmatpush3.bf16.msra.mxu1 %v5816_v51 }
 0x100   :  { %5819 = vmatprep.subr.bf16.mxu1 %v5818_v56  ;;  %v7874_v56 = vmov 1966171168  }
 0x101   :  { %5789 = vmatpush3.bf16.msra.mxu0 %v5788_v62  ;;  %v927_v57 = vunpack.c.l.s4 %v7874_v56 }
 0x102   :  { %5791 = vmatprep.subr.bf16.mxu0 %v5790_v1 }
 0x103   :  { %5821 = vmatpush3.bf16.msra.mxu1 %v5820_v63  ;;  %v928_v63 = vunpack.c.0.s8 %v927_v57  ;;  %v1592_v57 = vld [vmem:[#allocation10 + $0x48] sm:$0xff] }
 0x104   :  { %5823 = vmatprep.subr.bf16.mxu1 %v5822_v5 }
 0x105   :  { %5793 = vmatpush3.bf16.msra.mxu0 %v5792_v11  ;;  %v931_v10 = vsub.s32 %v928_v63, %v8239_v0 }
 0x106   :  { %5795 = vmatprep.subr.bf16.mxu0 %v5794_v14 }
 0x107   :  { %5825 = vmatpush3.bf16.msra.mxu1 %v5824_v12 }
 0x108   :  { %5827 = vmatprep.subr.bf16.mxu1 %v5826_v17  ;;  %v920_v17 = vadd.s32 8, %v8239_v0 }
 0x109   :  { %5797 = vmatpush3.bf16.msra.mxu0 %v5796_v20 }
 0x10a   :  { %5830 = vmatprep.subr.bf16.mxu0 %v7871_v24 }
 0x10b   :  { %5829 = vmatpush3.bf16.msra.mxu1 %v5828_v21  ;;  %v8538_v21 = vsub.s32 1, %v8239_v0 }
 0x10c   :  { %574 = vmatmul.mubr.f32.vlgmr.msra.gmra.mrb[2].mxu0 %v8427_v34 }
 0x10d   :  { %5699 = vmatprep.mubr.msk.f32.mxu0 %vm7873_vm0, %v7872_v26  ;;  %5832 = vmatpush3.bf16.msra.mxu0 %v5831_v25  ;;  %9434 = vst [vmem:[#allocation31_spill] sm:$0xff] %v8538_v21  ;;  %v8541_v25 = vcvt.s32.f32 %v8239_v0  ;;  %v8753_v0 = vld [vmem:[#allocation10 + $0xa08] sm:$0xff] }
 0x10e   :  { %644 = vmatmul.mubr.f32.vlgmr.msra.gmra.mrb[2].mxu1 %v358_v46  ;;  %5697 = vmatprep.subr.mxu0 %v7872_v26  ;;  %v740_v46 = vld [vmem:[#allocation8 + $0x8] sm:$0x3f]  ;;  %9450 = vst [vmem:[#allocation47_spill] sm:$0xff] %v8753_v0 }
 0x10f   :  { %824 = vmatprep.mubr.f32.mxu1 %v7872_v26  ;;  %5382 = vmatprep.subr.msk.mxu1 %vm747_vm3, %v740_v46 }
 0x110   :  { %5383 = vmatpush1.msk.msra.mxu1 %vm747_vm3, %v739_v47 }
 0x111   :  { %5698 = vmatpush3.msk.msra.mxu0 %vm664_vm1, %v652_v27  ;;  %5385 = vmatprep.subr.msk.mxu1 %vm747_vm3, %v742_v48  ;;  %v8543_v27 = vcvt.s32.f32 %v920_v17  ;;  %v1583_v17 = vld [vmem:[#allocation10] sm:$0xff] }
 0x1bf   :  { %v5441_v28 = vpop.f32.mrb[0].mxu0 }
 0x1c0   :  { %v5442_v30 = vpop.f32.mrb[1].mxu0 }
 0x1c1   :  { %v5476_v31 = vpop.f32.mrb[0].mxu1  ;;  %v5443_v32 = vadd.f32 %v5442_v30, %v5441_v28 }
 0x1c2   :  { %v5477_v33 = vpop.f32.mrb[1].mxu1 }
 0x1c3   :  { %v5478_v34 = vadd.f32 %v5477_v33, %v5476_v31  ;;  %v436_v35 = vadd.f32 %v5443_v32, %v5378_v29 }
 0x1c5   :  { %v506_v36 = vadd.f32 %v5478_v34, %v436_v35 }
 0x1df   :  { %v5511_v37 = vpop.f32.mrb[2].mxu0 }
 0x1e0   :  { %v5512_v38 = vpop.f32.mrb[3].mxu0 }
 0x1e1   :  { %v5546_v39 = vpop.f32.mrb[2].mxu1  ;;  %v5513_v40 = vadd.f32 %v5512_v38, %v5511_v37 }
 0x1e2   :  { %v5547_v41 = vpop.f32.mrb[3].mxu1 }
 0x1e3   :  { %v5548_v42 = vadd.f32 %v5547_v41, %v5546_v39  ;;  %v576_v43 = vadd.f32 %v5513_v40, %v506_v36 }
 0x1e5   :  { %v646_v44 = vadd.f32 %v5548_v42, %v576_v43 }
 0x1e7   :  { %7570 = vtanh.f32 %v646_v44 }
 0x1f1   :  { %v7571_v45 = vpop.eup %7570 }
 0x1f2   :  { %5700 = vmatmul.mubr.msk.f32.vlgmr.msra.gmra.mrb[4].mxu0 %vm660_vm2, %v7571_v45 }
 0x1f3   :  { %1182 = vmatprep.mubr.f32.mxu0 %v7872_v26 }
 0x2c5   :  { %v734_v50 = vpop.f32.mrb[4].mxu0 }
 0x2c6   :  { %v735_v51 = vadd.f32 %v5379_v49, %v734_v50  ;;  %v5701_v52 = vpop.f32.mrb[5].mxu0 }
 0x2c7   :  { %v1584_v52 = vld [vmem:[#allocation10 + $0x8] sm:$0xff] }
 0x2c8   :  { %7572 = vtanh.f32 %v735_v51 }
 0x2d2   :  { %v7573_v54 = vpop.eup %7572 }
 0x2d3   :  { %5384 = vmatmul.mubr.msk.f32.vlgmr.msra.gmra.mrb[4].mxu1 %vm743_vm4, %v7573_v54 }
 0x2d4   :  { %5386 = vmatpush1.msk.msra.mxu1 %vm747_vm3, %v741_v53  ;;  %895 = vmatprep.mubr.f32.mxu1 %v7872_v26 }
 0x2d7   :  { %5387 = vmatmul.mubr.msk.f32.vlgmr.msra.gmra.mrb[6].mxu1 %vm743_vm4, %v7573_v54 }
 0x2d8   :  { %1319 = vmatprep.mubr.f32.mxu1 %v7872_v26 }
 0x3a6   :  { %v826_v55 = vpop.f32.mrb[4].mxu1 }
 0x3a7   :  { %v902_v58 = vadd.f32 1.0, %v826_v55  ;;  %v828_v59 = vpop.f32.mrb[5].mxu1 }
 0x3a8   :  { %v903_v60 = vadd.f32 1.0, %v828_v59 }
 0x3a9   :  { %v904_v61 = vmul.f32 16.0, %v902_v58 }
 0x3aa   :  { %v905_v62 = vmul.f32 16.0, %v903_v60  ;;  %v897_v1 = vpop.f32.mrb[6].mxu1 }
 0x3ab   :  { %v5388_v2 = vadd.f32 -1.0, %v904_v61  ;;  %v910_v3 = vadd.f32 1.0, %v897_v1  ;;  %v899_v4 = vpop.f32.mrb[7].mxu1 }
 0x3ac   :  { %v5389_v5 = vadd.f32 -1.0, %v905_v62  ;;  %v911_v6 = vadd.f32 1.0, %v899_v4 }
 0x3ad   :  { %v908_v7 = vmul.f32 0.5, %v5388_v2  ;;  %v912_v8 = vmul.f32 16.0, %v910_v3 }
 0x3ae   :  { %v909_v9 = vmul.f32 0.5, %v5389_v5  ;;  %v913_v11 = vmul.f32 16.0, %v911_v6  ;;  %v5841_v6 = vpack.c.bf16 %v1592_v57, %v1584_v52  ;;  %v1078_v52 = vld [vmem:[#allocation2 + $0x8] sm:$0xff] }
 0x3af   :  { %v5390_v12 = vadd.f32 -1.0, %v912_v8 }
 0x3b0   :  { %v925_v14 = vcombine.low %v908_v7, %v909_v9  ;;  %v5391_v15 = vadd.f32 -1.0, %v913_v11 }
 0x3b1   :  { %v916_v16 = vmul.f32 0.5, %v5390_v12 }
 0x3b2   :  { %v932_v18 = vrot.slane %v925_v14, %v931_v10  ;;  %v917_v20 = vmul.f32 0.5, %v5391_v15 }
 0x3b4   :  { %v933_v22 = vcombine.high %v932_v18, %v932_v18  ;;  %v940_v23 = vrot.slane %v932_v18, %v931_v10  ;;  %v1002_v24 = vcombine.low %v916_v16, %v917_v20  ;;  %v1594_v16 = vld [vmem:[#allocation10 + $0x58] sm:$0xff]  ;;  %v1591_v18 = vld [vmem:[#allocation10 + $0x40] sm:$0xff]  ;;  %v1600_v20 = vld [vmem:[#allocation10 + $0x88] sm:$0xff] }
 0x3b6   :  { %v947_v28 = vrot.slane %v933_v22, %v931_v10  ;;  %v951_v29 = vrot.slane %v940_v23, %v8535_v19  ;;  %v1009_v30 = vrot.slane %v1002_v24, %v931_v10  ;;  %v955_v31 = vrot.slane %v940_v23, %v8538_v21  ;;  %v1608_v22 = vld [vmem:[#allocation10 + $0xc8] sm:$0xff] }
 0x3b8   :  { %v959_v32 = vrot.slane %v947_v28, %v8535_v19  ;;  %v1010_v33 = vcombine.high %v1009_v30, %v1009_v30  ;;  %v1017_v34 = vrot.slane %v1009_v30, %v931_v10  ;;  %v969_v35 = vsub.f32 %v955_v31, %v8541_v25 }
 0x3b9   :  { %v971_v36 = vsub.f32 %v955_v31, %v8543_v27  ;;  %v968_v37 = vsub.f32 %v951_v29, %v8541_v25  ;;  %v970_v38 = vsub.f32 %v951_v29, %v8543_v27  ;;  %v963_v39 = vrot.slane %v947_v28, %v8538_v21  ;;  %v1077_v31 = vld [vmem:[#allocation2] sm:$0xff] }
 0x3ba   :  { %v1024_v40 = vrot.slane %v1010_v33, %v931_v10  ;;  %v8554_v41 = vrot.slane %v1017_v34, %v8535_v19  ;;  %v8557_v42 = vrot.slane %v1017_v34, %v8538_v21  ;;  %v977_v43 = vand.u32 2147483647, %v969_v35  ;;  %v1586_v10 = vld [vmem:[#allocation10 + $0x18] sm:$0xff]  ;;  %v1585_v35 = vld [vmem:[#allocation10 + $0x10] sm:$0xff] }
 0x3bb   :  { %v979_v44 = vand.u32 2147483647, %v971_v36  ;;  %v976_v45 = vand.u32 2147483647, %v968_v37  ;;  %v978_v46 = vand.u32 2147483647, %v970_v38  ;;  %v973_v47 = vsub.f32 %v963_v39, %v8541_v25 }
 0x3bc   :  { %v985_v48 = vsub.f32 1.0, %v977_v43  ;;  %v975_v49 = vsub.f32 %v963_v39, %v8543_v27  ;;  %v972_v50 = vsub.f32 %v959_v32, %v8541_v25  ;;  %v974_v51 = vsub.f32 %v959_v32, %v8543_v27  ;;  %v1593_v36 = vld [vmem:[#allocation10 + $0x50] sm:$0xff]  ;;  %v1602_v43 = vld [vmem:[#allocation10 + $0x98] sm:$0xff] }
 0x3bd   :  { %v987_v53 = vsub.f32 1.0, %v979_v44  ;;  %v984_v54 = vsub.f32 1.0, %v976_v45  ;;  %v986_v55 = vsub.f32 1.0, %v978_v46  ;;  %v981_v56 = vand.u32 2147483647, %v973_v47  ;;  %v1599_v44 = vld [vmem:[#allocation10 + $0x80] sm:$0xff] }
 0x3be   :  { %v993_v58 = vmax.f32 %v985_v48, 0.0  ;;  %v983_v59 = vand.u32 2147483647, %v975_v49  ;;  %v980_v60 = vand.u32 2147483647, %v972_v50  ;;  %v1045_v61 = vsub.f32 %v8554_v41, %v8541_v25  ;;  %v1607_v45 = vld [vmem:[#allocation10 + $0xc0] sm:$0xff] }
 0x3bf   :  { %v995_v62 = vmax.f32 %v987_v53, 0.0  ;;  %v992_v63 = vmax.f32 %v984_v54, 0.0  ;;  %v994_v1 = vmax.f32 %v986_v55, 0.0  ;;  %v989_v2 = vsub.f32 1.0, %v981_v56  ;;  %v1610_v48 = vld [vmem:[#allocation10 + $0xd8] sm:$0xff]  ;;  %v1616_v49 = vld [vmem:[#allocation10 + $0x108] sm:$0xff] }
 0x3c0   :  { %v991_v3 = vsub.f32 1.0, %v983_v59  ;;  %v982_v4 = vand.u32 2147483647, %v974_v51  ;;  %v988_v5 = vsub.f32 1.0, %v980_v60  ;;  %v1046_v11 = vsub.f32 %v8557_v42, %v8541_v25  ;;  %v1624_v50 = vld [vmem:[#allocation10 + $0x148] sm:$0xff]  ;;  %v1085_v51 = vld [vmem:[#allocation2 + $0x40] sm:$0xff] }
 0x3c1   :  { %v5833_v7 = vpack.c.bf16 %v995_v62, %v993_v58  ;;  %v5835_v8 = vpack.c.bf16 %v994_v1, %v992_v63  ;;  %v997_v9 = vmax.f32 %v989_v2, 0.0  ;;  %v8568_v23 = vrot.slane %v1024_v40, %v8535_v19  ;;  %v1601_v55 = vld [vmem:[#allocation10 + $0x90] sm:$0xff]  ;;  %v1618_v59 = vld [vmem:[#allocation10 + $0x118] sm:$0xff]  ;;  %v1615_v60 = vld [vmem:[#allocation10 + $0x100] sm:$0xff] }
 0x3c2   :  { %v999_v12 = vmax.f32 %v991_v3, 0.0  ;;  %v990_v14 = vsub.f32 1.0, %v982_v4  ;;  %v996_v15 = vmax.f32 %v988_v5, 0.0  ;;  %v8571_v24 = vrot.slane %v1024_v40, %v8538_v21  ;;  %v1609_v56 = vld [vmem:[#allocation10 + $0xd0] sm:$0xff]  ;;  %v1623_v62 = vld [vmem:[#allocation10 + $0x140] sm:$0xff]  ;;  %v1626_v63 = vld [vmem:[#allocation10 + $0x158] sm:$0xff] }
 0x3c3   :  { %5834 = vmatprep.subr.bf16.mxu0 %v5833_v7  ;;  %v1047_v28 = vsub.f32 %v8554_v41, %v8543_v27  ;;  %v1048_v32 = vsub.f32 %v8557_v42, %v8543_v27  ;;  %v6097_v33 = vpack.c.bf16 %v1594_v16, %v1586_v10  ;;  %v5843_v34 = vpack.c.bf16 %v1591_v18, %v1583_v17  ;;  %v1632_v1 = vld [vmem:[#allocation10 + $0x188] sm:$0xff]  ;;  %v1617_v7 = vld [vmem:[#allocation10 + $0x110] sm:$0xff]  ;;  %v1642_v16 = vld [vmem:[#allocation10 + $0x1d8] sm:$0xff] }
 0x3c4   :  { %5836 = vmatpush1.bf16.msra.mxu0 %v5835_v8  ;;  %v5837_v29 = vpack.c.bf16 %v999_v12, %v997_v9  ;;  %v998_v30 = vmax.f32 %v990_v14, 0.0  ;;  %v1049_v37 = vsub.f32 %v8568_v23, %v8541_v25  ;;  %v1050_v38 = vsub.f32 %v8571_v24, %v8541_v25  ;;  %v1640_v2 = vld [vmem:[#allocation10 + $0x1c8] sm:$0xff]  ;;  %v1625_v8 = vld [vmem:[#allocation10 + $0x150] sm:$0xff]  ;;  %v1634_v12 = vld [vmem:[#allocation10 + $0x198] sm:$0xff] }
 0x3c5   :  { %5842 = vmatprep.subr.bf16.mxu0 %v5841_v6  ;;  %v5845_v40 = vpack.c.bf16 %v1608_v22, %v1600_v20  ;;  %v1051_v46 = vsub.f32 %v8568_v23, %v8543_v27  ;;  %v1052_v47 = vsub.f32 %v8571_v24, %v8543_v27  ;;  %v6099_v53 = vpack.c.bf16 %v1593_v36, %v1585_v35  ;;  %v1086_v3 = vld [vmem:[#allocation2 + $0x48] sm:$0xff]  ;;  %v1079_v4 = vld [vmem:[#allocation2 + $0x10] sm:$0xff]  ;;  %v1080_v22 = vld [vmem:[#allocation2 + $0x18] sm:$0xff] }
 0x3c6   :  { %5838 = vmatprep.subr.bf16.mxu1 %v5837_v29  ;;  %v5839_v39 = vpack.c.bf16 %v998_v30, %v996_v15  ;;  %v5847_v54 = vpack.c.bf16 %v1607_v45, %v1599_v44  ;;  %v6101_v57 = vpack.c.bf16 %v1610_v48, %v1602_v43  ;;  %v5849_v58 = vpack.c.bf16 %v1624_v50, %v1616_v49  ;;  %v1631_v14 = vld [vmem:[#allocation10 + $0x180] sm:$0xff]  ;;  %v1648_v17 = vld [vmem:[#allocation10 + $0x208] sm:$0xff]  ;;  %v1650_v36 = vld [vmem:[#allocation10 + $0x218] sm:$0xff] }
 0x3c7   :  { %5392 = vmatmul.mubr.msk.f32.vlgmr.msra.gmra.mrb[6].mxu0 %vm1093_vm5, %v1077_v31  ;;  %v6103_v5 = vpack.c.bf16 %v1609_v56, %v1601_v55  ;;  %v5851_v6 = vpack.c.bf16 %v1623_v62, %v1615_v60  ;;  %v6105_v9 = vpack.c.bf16 %v1626_v63, %v1618_v59  ;;  %v5853_v10 = vpack.c.bf16 %v1640_v2, %v1632_v1  ;;  %v1639_v15 = vld [vmem:[#allocation10 + $0x1c0] sm:$0xff]  ;;  %v1656_v18 = vld [vmem:[#allocation10 + $0x248] sm:$0xff]  ;;  %v1633_v31 = vld [vmem:[#allocation10 + $0x190] sm:$0xff] }
 0x3c8   :  { %5840 = vmatpush1.bf16.msra.mxu1 %v5839_v39  ;;  %1188 = vmatprep.mubr.f32.mxu0 %v7872_v26  ;;  %v1087_v20 = vld [vmem:[#allocation2 + $0x50] sm:$0xff]  ;;  %v6107_v29 = vpack.c.bf16 %v1625_v8, %v1617_v7  ;;  %v5855_v30 = vpack.c.bf16 %v1639_v15, %v1631_v14  ;;  %v5857_v35 = vpack.c.bf16 %v1656_v18, %v1648_v17  ;;  %v1647_v39 = vld [vmem:[#allocation10 + $0x200] sm:$0xff]  ;;  %v1658_v43 = vld [vmem:[#allocation10 + $0x258] sm:$0xff]  ;;  %v1060_v25 = vand.u32 2147483647, %v1052_v47 }
 0x3c9   :  { %6098 = vmatprep.subr.bf16.mxu1 %v6097_v33  ;;  %5844 = vmatpush1.bf16.msra.mxu0 %v5843_v34  ;;  %v1641_v33 = vld [vmem:[#allocation10 + $0x1d0] sm:$0xff]  ;;  %v6109_v34 = vpack.c.bf16 %v1642_v16, %v1634_v12  ;;  %v1664_v44 = vld [vmem:[#allocation10 + $0x288] sm:$0xff]  ;;  %v1081_v49 = vld [vmem:[#allocation2 + $0x20] sm:$0xff] }
 0x3ca   :  { %5846 = vmatprep.subr.bf16.mxu0 %v5845_v40  ;;  %v1655_v40 = vld [vmem:[#allocation10 + $0x240] sm:$0xff]  ;;  %v1672_v45 = vld [vmem:[#allocation10 + $0x2c8] sm:$0xff]  ;;  %v1088_v48 = vld [vmem:[#allocation2 + $0x58] sm:$0xff]  ;;  %v6111_v50 = vpack.c.bf16 %v1641_v33, %v1633_v31 }
 0x3cb   :  { %5400 = vmatmul.mubr.msk.f32.vlgmr.msra.gmra.mrb[8].mxu1 %vm1093_vm5, %v1085_v51  ;;  %5393 = vmatmul.mubr.msk.f32.gmra.mrb[8].mxu0 %vm1093_vm5, %v1078_v52  ;;  %v5859_v51 = vpack.c.bf16 %v1655_v40, %v1647_v39  ;;  %v1649_v52 = vld [vmem:[#allocation10 + $0x210] sm:$0xff]  ;;  %v5861_v55 = vpack.c.bf16 %v1672_v45, %v1664_v44  ;;  %v1666_v56 = vld [vmem:[#allocation10 + $0x298] sm:$0xff]  ;;  %v1680_v60 = vld [vmem:[#allocation10 + $0x308] sm:$0xff] }
 0x3cc   :  { %1325 = vmatprep.mubr.f32.mxu1 %v7872_v26  ;;  %1194 = vmatprep.mubr.f32.mxu0 %v7872_v26  ;;  %v1674_v59 = vld [vmem:[#allocation10 + $0x2d8] sm:$0xff]  ;;  %v1688_v62 = vld [vmem:[#allocation10 + $0x348] sm:$0xff] }
 0x3cd   :  { %6100 = vmatpush1.bf16.msra.mxu1 %v6099_v53  ;;  %5848 = vmatpush1.bf16.msra.mxu0 %v5847_v54  ;;  %v1657_v53 = vld [vmem:[#allocation10 + $0x250] sm:$0xff]  ;;  %v6113_v54 = vpack.c.bf16 %v1658_v43, %v1650_v36  ;;  %v1089_v63 = vld [vmem:[#allocation2 + $0x60] sm:$0xff]  ;;  %v1082_v1 = vld [vmem:[#allocation2 + $0x28] sm:$0xff]  ;;  %v5865_v7 = vpack.c.bf16 %v1688_v62, %v1680_v60 }
 0x3ce   :  { %6102 = vmatprep.subr.bf16.mxu1 %v6101_v57  ;;  %5850 = vmatprep.subr.bf16.mxu0 %v5849_v58  ;;  %v1663_v57 = vld [vmem:[#allocation10 + $0x280] sm:$0xff]  ;;  %v6115_v2 = vpack.c.bf16 %v1657_v53, %v1649_v52  ;;  %v1682_v8 = vld [vmem:[#allocation10 + $0x318] sm:$0xff]  ;;  %v1696_v14 = vld [vmem:[#allocation10 + $0x388] sm:$0xff] }
 0x3cf   :  { %5401 = vmatmul.mubr.msk.f32.gmra.mrb[10].mxu1 %vm1093_vm5, %v1086_v3  ;;  %5394 = vmatmul.mubr.msk.f32.gmra.mrb[10].mxu0 %vm1093_vm5, %v1079_v4  ;;  %v1671_v58 = vld [vmem:[#allocation10 + $0x2c0] sm:$0xff]  ;;  %v1665_v4 = vld [vmem:[#allocation10 + $0x290] sm:$0xff]  ;;  %v1690_v12 = vld [vmem:[#allocation10 + $0x358] sm:$0xff] }
 0x3d0   :  { %1331 = vmatprep.mubr.f32.mxu1 %v7872_v26  ;;  %1200 = vmatprep.mubr.f32.mxu0 %v7872_v26  ;;  %v5863_v3 = vpack.c.bf16 %v1671_v58, %v1663_v57  ;;  %v1704_v15 = vld [vmem:[#allocation10 + $0x3c8] sm:$0xff]  ;;  %v1698_v33 = vld [vmem:[#allocation10 + $0x398] sm:$0xff] }
 0x3d1   :  { %6104 = vmatpush1.bf16.msra.mxu1 %v6103_v5  ;;  %5852 = vmatpush1.bf16.msra.mxu0 %v5851_v6  ;;  %v1673_v5 = vld [vmem:[#allocation10 + $0x2d0] sm:$0xff]  ;;  %v6117_v6 = vpack.c.bf16 %v1674_v59, %v1666_v56  ;;  %v1090_v16 = vld [vmem:[#allocation2 + $0x68] sm:$0xff]  ;;  %v5869_v31 = vpack.c.bf16 %v1704_v15, %v1696_v14  ;;  %v1706_v36 = vld [vmem:[#allocation10 + $0x3d8] sm:$0xff] }
 0x3d2   :  { %6106 = vmatprep.subr.bf16.mxu1 %v6105_v9  ;;  %5854 = vmatprep.subr.bf16.mxu0 %v5853_v10  ;;  %v1679_v9 = vld [vmem:[#allocation10 + $0x300] sm:$0xff]  ;;  %v1083_v17 = vld [vmem:[#allocation2 + $0x30] sm:$0xff]  ;;  %v6119_v18 = vpack.c.bf16 %v1673_v5, %v1665_v4  ;;  %v1084_v44 = vld [vmem:[#allocation2 + $0x38] sm:$0xff] }
 0x3d3   :  { %5402 = vmatmul.mubr.msk.f32.gmra.mrb[12].mxu1 %vm1093_vm5, %v1087_v20  ;;  %5395 = vmatmul.mubr.msk.f32.gmra.mrb[12].mxu0 %vm1093_vm5, %v1080_v22  ;;  %v1687_v10 = vld [vmem:[#allocation10 + $0x340] sm:$0xff]  ;;  %v1681_v22 = vld [vmem:[#allocation10 + $0x310] sm:$0xff]  ;;  %v1712_v39 = vld [vmem:[#allocation10 + $0x408] sm:$0xff] }
 0x3d4   :  { %1337 = vmatprep.mubr.f32.mxu1 %v7872_v26  ;;  %1206 = vmatprep.mubr.f32.mxu0 %v7872_v26  ;;  %v5867_v20 = vpack.c.bf16 %v1687_v10, %v1679_v9  ;;  %v1720_v40 = vld [vmem:[#allocation10 + $0x448] sm:$0xff]  ;;  %v1714_v53 = vld [vmem:[#allocation10 + $0x418] sm:$0xff]  ;;  %v1727_v4 = vld [vmem:[#allocation10 + $0x480] sm:$0xff] }
 0x3d5   :  { %6108 = vmatpush1.bf16.msra.mxu1 %v6107_v29  ;;  %5856 = vmatpush1.bf16.msra.mxu0 %v5855_v30  ;;  %v1689_v29 = vld [vmem:[#allocation10 + $0x350] sm:$0xff]  ;;  %v6121_v30 = vpack.c.bf16 %v1690_v12, %v1682_v8  ;;  %v5873_v52 = vpack.c.bf16 %v1720_v40, %v1712_v39  ;;  %v1722_v56 = vld [vmem:[#allocation10 + $0x458] sm:$0xff]  ;;  %v1728_v57 = vld [vmem:[#allocation10 + $0x488] sm:$0xff] }
 0x3d6   :  { %6110 = vmatprep.subr.bf16.mxu1 %v6109_v34  ;;  %5858 = vmatprep.subr.bf16.mxu0 %v5857_v35  ;;  %v1695_v34 = vld [vmem:[#allocation10 + $0x380] sm:$0xff]  ;;  %v1091_v43 = vld [vmem:[#allocation2 + $0x70] sm:$0xff]  ;;  %v6123_v45 = vpack.c.bf16 %v1689_v29, %v1681_v22  ;;  %v1092_v59 = vld [vmem:[#allocation2 + $0x78] sm:$0xff] }
 0x3d7   :  { %5403 = vmatmul.mubr.msk.f32.gmra.mrb[14].mxu1 %vm1093_vm5, %v1088_v48  ;;  %5396 = vmatmul.mubr.msk.f32.gmra.mrb[14].mxu0 %vm1093_vm5, %v1081_v49  ;;  %v1703_v35 = vld [vmem:[#allocation10 + $0x3c0] sm:$0xff]  ;;  %v1697_v49 = vld [vmem:[#allocation10 + $0x390] sm:$0xff]  ;;  %v1736_v58 = vld [vmem:[#allocation10 + $0x4c8] sm:$0xff] }
 0x3d8   :  { %1343 = vmatprep.mubr.f32.mxu1 %v7872_v26  ;;  %1212 = vmatprep.mubr.f32.mxu0 %v7872_v26  ;;  %v5871_v48 = vpack.c.bf16 %v1703_v35, %v1695_v34  ;;  %v1735_v5 = vld [vmem:[#allocation10 + $0x4c0] sm:$0xff]  ;;  %v1729_v10 = vld [vmem:[#allocation10 + $0x490] sm:$0xff]  ;;  %v1744_v15 = vld [vmem:[#allocation10 + $0x508] sm:$0xff] }
 0x3d9   :  { %6112 = vmatpush1.bf16.msra.mxu1 %v6111_v50  ;;  %5860 = vmatpush1.bf16.msra.mxu0 %v5859_v51  ;;  %v1705_v50 = vld [vmem:[#allocation10 + $0x3d0] sm:$0xff]  ;;  %v6125_v51 = vpack.c.bf16 %v1706_v36, %v1698_v33  ;;  %v5879_v8 = vpack.c.bf16 %v1735_v5, %v1727_v4  ;;  %v1743_v29 = vld [vmem:[#allocation10 + $0x500] sm:$0xff]  ;;  %v1760_v36 = vld [vmem:[#allocation10 + $0x588] sm:$0xff] }
 0x3da   :  { %6114 = vmatprep.subr.bf16.mxu1 %v6113_v54  ;;  %5862 = vmatprep.subr.bf16.mxu0 %v5861_v55  ;;  %v1711_v54 = vld [vmem:[#allocation10 + $0x400] sm:$0xff]  ;;  %v6127_v60 = vpack.c.bf16 %v1705_v50, %v1697_v49  ;;  %v1737_v12 = vld [vmem:[#allocation10 + $0x4d0] sm:$0xff]  ;;  %v1768_v39 = vld [vmem:[#allocation10 + $0x5c8] sm:$0xff] }
 0x3db   :  { %5404 = vmatmul.mubr.msk.f32.gmra.mrb[16].mxu1 %vm1093_vm5, %v1089_v63  ;;  %5397 = vmatmul.mubr.msk.f32.gmra.mrb[16].mxu0 %vm1093_vm5, %v1082_v1  ;;  %v1719_v55 = vld [vmem:[#allocation10 + $0x440] sm:$0xff]  ;;  %v1713_v63 = vld [vmem:[#allocation10 + $0x410] sm:$0xff]  ;;  %v6129_v1 = vpack.c.bf16 %v1722_v56, %v1714_v53  ;;  %v6135_v14 = vpack.c.bf16 %v1737_v12, %v1729_v10  ;;  %v1762_v40 = vld [vmem:[#allocation10 + $0x598] sm:$0xff] }
 0x3dc   :  { %1349 = vmatprep.mubr.f32.mxu1 %v7872_v26  ;;  %1218 = vmatprep.mubr.f32.mxu0 %v7872_v26  ;;  %v5875_v62 = vpack.c.bf16 %v1719_v55, %v1711_v54  ;;  %v1753_v34 = vld [vmem:[#allocation10 + $0x550] sm:$0xff]  ;;  %v1776_v54 = vld [vmem:[#allocation10 + $0x608] sm:$0xff]  ;;  %v1778_v56 = vld [vmem:[#allocation10 + $0x618] sm:$0xff] }
 0x3dd   :  { %6116 = vmatpush1.bf16.msra.mxu1 %v6115_v2  ;;  %5864 = vmatpush1.bf16.msra.mxu0 %v5863_v3  ;;  %v1721_v2 = vld [vmem:[#allocation10 + $0x450] sm:$0xff]  ;;  %v5877_v3 = vpack.c.bf16 %v1736_v58, %v1728_v57  ;;  %v1784_v55 = vld [vmem:[#allocation10 + $0x648] sm:$0xff]  ;;  %v1786_v58 = vld [vmem:[#allocation10 + $0x658] sm:$0xff] }
 0x3de   :  { %6118 = vmatprep.subr.bf16.mxu1 %v6117_v6  ;;  %5866 = vmatprep.subr.bf16.mxu0 %v5865_v7  ;;  %v1730_v6 = vld [vmem:[#allocation10 + $0x498] sm:$0xff]  ;;  %v5889_v57 = vpack.c.bf16 %v1784_v55, %v1776_v54  ;;  %v1792_v4 = vld [vmem:[#allocation10 + $0x688] sm:$0xff]  ;;  %v1833_v54 = vld [vmem:[#allocation10 + $0x7d0] sm:$0xff] }
 0x3df   :  { %5405 = vmatmul.mubr.msk.f32.gmra.mrb[18].mxu1 %vm1093_vm5, %v1090_v16  ;;  %5398 = vmatmul.mubr.msk.f32.gmra.mrb[18].mxu0 %vm1093_vm5, %v1083_v17  ;;  %v1738_v7 = vld [vmem:[#allocation10 + $0x4d8] sm:$0xff]  ;;  %v1752_v16 = vld [vmem:[#allocation10 + $0x548] sm:$0xff] }
 0x3e0   :  { %1355 = vmatprep.mubr.f32.mxu1 %v7872_v26  ;;  %1224 = vmatprep.mubr.f32.mxu0 %v7872_v26  ;;  %v6133_v9 = vpack.c.bf16 %v1738_v7, %v1730_v6  ;;  %v1746_v17 = vld [vmem:[#allocation10 + $0x518] sm:$0xff]  ;;  %v1800_v5 = vld [vmem:[#allocation10 + $0x6c8] sm:$0xff] }
 0x3e1   :  { %6120 = vmatpush1.bf16.msra.mxu1 %v6119_v18  ;;  %5868 = vmatpush1.bf16.msra.mxu0 %v5867_v20  ;;  %v5881_v18 = vpack.c.bf16 %v1752_v16, %v1744_v15  ;;  %v1754_v20 = vld [vmem:[#allocation10 + $0x558] sm:$0xff]  ;;  %v5893_v7 = vpack.c.bf16 %v1800_v5, %v1792_v4  ;;  %v1801_v15 = vld [vmem:[#allocation10 + $0x6d0] sm:$0xff]  ;;  %v1055_v4 = vand.u32 2147483647, %v1047_v28 }
 0x3e2   :  { %6122 = vmatprep.subr.bf16.mxu1 %v6121_v30  ;;  %5870 = vmatprep.subr.bf16.mxu0 %v5869_v31  ;;  %v6137_v22 = vpack.c.bf16 %v1754_v20, %v1746_v17  ;;  %v1751_v30 = vld [vmem:[#allocation10 + $0x540] sm:$0xff]  ;;  %v1745_v31 = vld [vmem:[#allocation10 + $0x510] sm:$0xff]  ;;  %v1794_v6 = vld [vmem:[#allocation10 + $0x698] sm:$0xff] }
 0x3e3   :  { %5406 = vmatmul.mubr.msk.f32.gmra.mrb[20].mxu1 %vm1093_vm5, %v1091_v43  ;;  %5399 = vmatmul.mubr.msk.f32.gmra.mrb[20].mxu0 %vm1093_vm5, %v1084_v44  ;;  %v5883_v33 = vpack.c.bf16 %v1751_v30, %v1743_v29  ;;  %v6139_v35 = vpack.c.bf16 %v1753_v34, %v1745_v31  ;;  %v5885_v43 = vpack.c.bf16 %v1768_v39, %v1760_v36  ;;  %v1770_v44 = vld [vmem:[#allocation10 + $0x5d8] sm:$0xff]  ;;  %v1808_v17 = vld [vmem:[#allocation10 + $0x708] sm:$0xff]  ;;  %v1807_v30 = vld [vmem:[#allocation10 + $0x700] sm:$0xff] }
 0x3e4   :  { %1361 = vmatprep.mubr.f32.mxu1 %v7872_v26  ;;  %v6131_v26 = vpack.c.bf16 %v1721_v2, %v1713_v63  ;;  %v6141_v49 = vpack.c.bf16 %v1770_v44, %v1762_v40  ;;  %v1785_v2 = vld [vmem:[#allocation10 + $0x650] sm:$0xff]  ;;  %v1810_v20 = vld [vmem:[#allocation10 + $0x718] sm:$0xff]  ;;  %v1815_v31 = vld [vmem:[#allocation10 + $0x740] sm:$0xff] }
 0x3e5   :  { %6124 = vmatpush1.bf16.msra.mxu1 %v6123_v45  ;;  %5872 = vmatpush1.bf16.msra.mxu0 %v5871_v48  ;;  %v1759_v45 = vld [vmem:[#allocation10 + $0x580] sm:$0xff]  ;;  %v1818_v29 = vld [vmem:[#allocation10 + $0x758] sm:$0xff]  ;;  %v5899_v34 = vpack.c.bf16 %v1815_v31, %v1807_v30  ;;  %v1817_v36 = vld [vmem:[#allocation10 + $0x750] sm:$0xff] }
 0x3e6   :  { %6126 = vmatprep.subr.bf16.mxu1 %v6125_v51  ;;  %5874 = vmatprep.subr.bf16.mxu0 %v5873_v52  ;;  %v1767_v48 = vld [vmem:[#allocation10 + $0x5c0] sm:$0xff]  ;;  %v1761_v51 = vld [vmem:[#allocation10 + $0x590] sm:$0xff]  ;;  %v1824_v40 = vld [vmem:[#allocation10 + $0x788] sm:$0xff] }
 0x3e7   :  { %5407 = vmatmul.mubr.msk.f32.gmra.mrb[22].mxu1 %vm1093_vm5, %v1092_v59  ;;  %v5887_v50 = vpack.c.bf16 %v1767_v48, %v1759_v45  ;;  %v1769_v52 = vld [vmem:[#allocation10 + $0x5d0] sm:$0xff]  ;;  %v1775_v59 = vld [vmem:[#allocation10 + $0x600] sm:$0xff]  ;;  %v1826_v44 = vld [vmem:[#allocation10 + $0x798] sm:$0xff] }
 0x3e8   :  { %v6143_v53 = vpack.c.bf16 %v1769_v52, %v1761_v51  ;;  %v1834_v48 = vld [vmem:[#allocation10 + $0x7d8] sm:$0xff]  ;;  %v8659_v30 = vld [vmem:[#allocation10 + $0x840] sm:$0xff]  ;;  %v8661_v31 = vld [vmem:[#allocation10 + $0x810] sm:$0xff] }
 0x3e9   :  { %6128 = vmatpush1.bf16.msra.mxu1 %v6127_v60  ;;  %5876 = vmatpush1.bf16.msra.mxu0 %v5875_v62  ;;  %v1783_v60 = vld [vmem:[#allocation10 + $0x640] sm:$0xff]  ;;  %v6145_v62 = vpack.c.bf16 %v1786_v58, %v1778_v56  ;;  %v6157_v51 = vpack.c.bf16 %v1834_v48, %v1826_v44  ;;  %v1840_v56 = vld [vmem:[#allocation10 + $0x808] sm:$0xff]  ;;  %v1842_v58 = vld [vmem:[#allocation10 + $0x818] sm:$0xff] }
 0x3ea   :  { %6130 = vmatprep.subr.bf16.mxu1 %v6129_v1  ;;  %5878 = vmatprep.subr.bf16.mxu0 %v5877_v3  ;;  %v5891_v63 = vpack.c.bf16 %v1783_v60, %v1775_v59  ;;  %v1777_v1 = vld [vmem:[#allocation10 + $0x610] sm:$0xff]  ;;  %v1850_v60 = vld [vmem:[#allocation10 + $0x858] sm:$0xff] }
 0x3eb   :  { %v6147_v3 = vpack.c.bf16 %v1785_v2, %v1777_v1  ;;  %v1054_v1 = vand.u32 2147483647, %v1046_v11 }
 0x3ed   :  { %6132 = vmatpush1.bf16.msra.mxu1 %v6131_v26  ;;  %5880 = vmatpush1.bf16.msra.mxu0 %v5879_v8  ;;  %v1802_v26 = vld [vmem:[#allocation10 + $0x6d8] sm:$0xff]  ;;  %v1791_v8 = vld [vmem:[#allocation10 + $0x680] sm:$0xff]  ;;  %v1062_v5 = vsub.f32 1.0, %v1054_v1 }
 0x3ee   :  { %6134 = vmatprep.subr.bf16.mxu1 %v6133_v9  ;;  %5882 = vmatprep.subr.bf16.mxu0 %v5881_v18  ;;  %v1799_v9 = vld [vmem:[#allocation10 + $0x6c0] sm:$0xff]  ;;  %v6149_v10 = vpack.c.bf16 %v1802_v26, %v1794_v6  ;;  %v1816_v18 = vld [vmem:[#allocation10 + $0x748] sm:$0xff]  ;;  %v1058_v6 = vand.u32 2147483647, %v1050_v38  ;;  %v1063_v26 = vsub.f32 1.0, %v1055_v4 }
 0x3ef   :  { %v5895_v12 = vpack.c.bf16 %v1799_v9, %v1791_v8  ;;  %v8638_v41 = vmax.f32 %v1062_v5, 0.0  ;;  %v8749_v5 = vld [vmem:[#allocation10 + $0x9d0] sm:$0xff] }
 0x3f0   :  { %v1066_v28 = vsub.f32 1.0, %v1058_v6  ;;  %9449 = vst [vmem:[#allocation46_spill] sm:$0xff] %v8749_v5  ;;  %v8755_v6 = vld [vmem:[#allocation10 + $0xa48] sm:$0xff] }
 0x3f1   :  { %6136 = vmatpush1.bf16.msra.mxu1 %v6135_v14  ;;  %5884 = vmatpush1.bf16.msra.mxu0 %v5883_v33  ;;  %v1793_v14 = vld [vmem:[#allocation10 + $0x690] sm:$0xff]  ;;  %v6153_v33 = vpack.c.bf16 %v1818_v29, %v1810_v20  ;;  %v8655_v20 = vld [vmem:[#allocation10 + $0x800] sm:$0xff]  ;;  %9451 = vst [vmem:[#allocation48_spill] sm:$0xff] %v8755_v6 }
 0x3f2   :  { %6138 = vmatprep.subr.bf16.mxu1 %v6137_v22  ;;  %5886 = vmatprep.subr.bf16.mxu0 %v5885_v43  ;;  %v6151_v16 = vpack.c.bf16 %v1801_v15, %v1793_v14  ;;  %v5897_v22 = vpack.c.bf16 %v1816_v18, %v1808_v17  ;;  %v1832_v43 = vld [vmem:[#allocation10 + $0x7c8] sm:$0xff]  ;;  %v8649_v14 = vmax.f32 %v1066_v28, 0.0  ;;  %v1068_v17 = vsub.f32 1.0, %v1060_v25 }
 0x3f3   :  { %v5901_v45 = vpack.c.bf16 %v1832_v43, %v1824_v40  ;;  %v8671_v40 = vld [vmem:[#allocation10 + $0x898] sm:$0xff] }
 0x3f5   :  { %6140 = vmatpush1.bf16.msra.mxu1 %v6139_v35  ;;  %5888 = vmatpush1.bf16.msra.mxu0 %v5887_v50  ;;  %v1809_v35 = vld [vmem:[#allocation10 + $0x710] sm:$0xff]  ;;  %v1831_v50 = vld [vmem:[#allocation10 + $0x7c0] sm:$0xff] }
 0x3f6   :  { %6142 = vmatprep.subr.bf16.mxu1 %v6141_v49  ;;  %5890 = vmatprep.subr.bf16.mxu0 %v5889_v57  ;;  %v6155_v39 = vpack.c.bf16 %v1817_v36, %v1809_v35  ;;  %v1823_v49 = vld [vmem:[#allocation10 + $0x780] sm:$0xff]  ;;  %v1848_v57 = vld [vmem:[#allocation10 + $0x848] sm:$0xff] }
 0x3f7   :  { %v5903_v52 = vpack.c.bf16 %v1831_v50, %v1823_v49  ;;  %v5905_v59 = vpack.c.bf16 %v1848_v57, %v1840_v56  ;;  %v8667_v36 = vld [vmem:[#allocation10 + $0x888] sm:$0xff]  ;;  %v8675_v49 = vld [vmem:[#allocation10 + $0x8d8] sm:$0xff]  ;;  %v8677_v50 = vld [vmem:[#allocation10 + $0x880] sm:$0xff] }
 0x3f9   :  { %6144 = vmatpush1.bf16.msra.mxu1 %v6143_v53  ;;  %5892 = vmatpush1.bf16.msra.mxu0 %v5891_v63  ;;  %v1825_v53 = vld [vmem:[#allocation10 + $0x790] sm:$0xff]  ;;  %v1053_v63 = vand.u32 2147483647, %v1045_v61  ;;  %v1056_v61 = vand.u32 2147483647, %v1048_v32 }
 0x3fa   :  { %6146 = vmatprep.subr.bf16.mxu1 %v6145_v62  ;;  %5894 = vmatprep.subr.bf16.mxu0 %v5893_v7  ;;  %v6159_v55 = vpack.c.bf16 %v1833_v54, %v1825_v53  ;;  %v6161_v62 = vpack.c.bf16 %v1850_v60, %v1842_v58  ;;  %v8685_v58 = vld [vmem:[#allocation10 + $0x890] sm:$0xff] }
 0x3fb   :  { %v1061_v2 = vsub.f32 1.0, %v1053_v63  ;;  %v1064_v9 = vsub.f32 1.0, %v1056_v61  ;;  %v8739_v61 = vld [vmem:[#allocation10 + $0x9c0] sm:$0xff] }
 0x3fc   :  { %9447 = vst [vmem:[#allocation44_spill] sm:$0xff] %v8739_v61 }
 0x3fd   :  { %6148 = vmatpush1.bf16.msra.mxu1 %v6147_v3  ;;  %5896 = vmatpush1.bf16.msra.mxu0 %v5895_v12  ;;  %v1057_v3 = vand.u32 2147483647, %v1049_v37  ;;  %v8633_v7 = vmax.f32 %v1061_v2, 0.0  ;;  %v1059_v37 = vand.u32 2147483647, %v1051_v46  ;;  %v8647_v12 = vmax.f32 %v1063_v26, 0.0 }
 0x3fe   :  { %6150 = vmatprep.subr.bf16.mxu1 %v6149_v10  ;;  %5898 = vmatprep.subr.bf16.mxu0 %v5897_v22  ;;  %v8693_v2 = vld [vmem:[#allocation10 + $0x908] sm:$0xff]  ;;  %v8705_v26 = vld [vmem:[#allocation10 + $0x958] sm:$0xff] }
 0x3ff   :  { %v1065_v11 = vsub.f32 1.0, %v1057_v3  ;;  %v1067_v23 = vsub.f32 1.0, %v1059_v37  ;;  %9435 = vst [vmem:[#allocation32_spill] sm:$0xff] %v8693_v2  ;;  %v8695_v3 = vld [vmem:[#allocation10 + $0x948] sm:$0xff]  ;;  %9437 = vst [vmem:[#allocation34_spill] sm:$0xff] %v8705_v26 }
 0x401   :  { %6152 = vmatpush1.bf16.msra.mxu1 %v6151_v16  ;;  %5900 = vmatpush1.bf16.msra.mxu0 %v5899_v34  ;;  %v8645_v10 = vmax.f32 %v1065_v11, 0.0  ;;  %v8651_v16 = vmax.f32 %v1064_v9, 0.0  ;;  %v8665_v35 = vmax.f32 %v1067_v23, 0.0  ;;  %v8703_v11 = vld [vmem:[#allocation10 + $0x918] sm:$0xff] }
 0x402   :  { %6154 = vmatprep.subr.bf16.mxu1 %v6153_v33  ;;  %5902 = vmatprep.subr.bf16.mxu0 %v5901_v45  ;;  %v8663_v33 = vld [vmem:[#allocation10 + $0x850] sm:$0xff]  ;;  %v8673_v45 = vmax.f32 %v1068_v17, 0.0  ;;  %9436 = vst [vmem:[#allocation33_spill] sm:$0xff] %v8703_v11 }
 0x405   :  { %6156 = vmatpush1.bf16.msra.mxu1 %v6155_v39  ;;  %5904 = vmatpush1.bf16.msra.mxu0 %v5903_v52  ;;  %v8669_v39 = vld [vmem:[#allocation10 + $0x8c8] sm:$0xff] }
 0x406   :  { %6158 = vmatprep.subr.bf16.mxu1 %v6157_v51  ;;  %5906 = vmatprep.subr.bf16.mxu0 %v5905_v59  ;;  %v8679_v51 = vld [vmem:[#allocation10 + $0x8c0] sm:$0xff]  ;;  %v8687_v59 = vld [vmem:[#allocation10 + $0x8d0] sm:$0xff] }
 0x409   :  { %6160 = vmatpush1.bf16.msra.mxu1 %v6159_v55 }
 0x40a   :  { %6162 = vmatprep.subr.bf16.mxu1 %v6161_v62 }
 0x49a   :  { %v1184_v8 = vpop.f32.mrb[6].mxu0 }
 0x49b   :  { %v1368_v42 = vmul.f32 %v1184_v8, %v8633_v7  ;;  %v1186_v32 = vpop.f32.mrb[7].mxu0 }
 0x49c   :  { %v1369_v38 = vmul.f32 %v1186_v32, %v8638_v41  ;;  %v8709_v32 = vld [vmem:[#allocation10 + $0x900] sm:$0xff] }
 0x49d   :  { %9438 = vst [vmem:[#allocation35_spill] sm:$0xff] %v8709_v32 }
 0x49e   :  { %v1321_v46 = vpop.f32.mrb[8].mxu1  ;;  %v1190_v15 = vpop.f32.mrb[8].mxu0 }
 0x49f   :  { %v1372_v27 = vmul.f32 %v1321_v46, %v8645_v10  ;;  %v1323_v24 = vpop.f32.mrb[9].mxu1  ;;  %v1370_v47 = vmul.f32 %v1190_v15, %v8647_v12  ;;  %v1192_v18 = vpop.f32.mrb[9].mxu0 }
 0x4a0   :  { %v1373_v22 = vmul.f32 %v1323_v24, %v8649_v14  ;;  %v1371_v29 = vmul.f32 %v1192_v18, %v8651_v16  ;;  %v8719_v18 = vld [vmem:[#allocation10 + $0x950] sm:$0xff] }
 0x4a1   :  { %v1376_v34 = vadd.f32 %v1370_v47, %v1368_v42  ;;  %v8717_v47 = vld [vmem:[#allocation10 + $0x910] sm:$0xff]  ;;  %9441 = vst [vmem:[#allocation38_spill] sm:$0xff] %v8719_v18  ;;  %v8737_v42 = vld [vmem:[#allocation10 + $0x980] sm:$0xff] }
 0x4a2   :  { %v1383_v43 = vadd.f32 %v1371_v29, %v1369_v38  ;;  %v1327_v44 = vpop.f32.mrb[10].mxu1  ;;  %v1196_v48 = vpop.f32.mrb[10].mxu0  ;;  %v8711_v38 = vld [vmem:[#allocation10 + $0x940] sm:$0xff]  ;;  %9440 = vst [vmem:[#allocation37_spill] sm:$0xff] %v8717_v47  ;;  %9446 = vst [vmem:[#allocation43_spill] sm:$0xff] %v8737_v42 }
 0x4a3   :  { %v1377_v52 = vrot.slane %v1376_v34, 4  ;;  %v1374_v53 = vmul.f32 %v1327_v44, %v8665_v35  ;;  %v1329_v54 = vpop.f32.mrb[11].mxu1  ;;  %v1404_v55 = vmul.f32 %v1196_v48, %v8633_v7  ;;  %v1198_v56 = vpop.f32.mrb[11].mxu0  ;;  %9439 = vst [vmem:[#allocation36_spill] sm:$0xff] %v8711_v38  ;;  %v8725_v44 = vld [vmem:[#allocation10 + $0x988] sm:$0xff] }
 0x4a4   :  { %v1384_v60 = vrot.slane %v1383_v43, 4  ;;  %v1375_v62 = vmul.f32 %v1329_v54, %v8673_v45  ;;  %v1405_v63 = vmul.f32 %v1198_v56, %v8638_v41  ;;  %9442 = vst [vmem:[#allocation39_spill] sm:$0xff] %v8725_v44  ;;  %v8727_v48 = vld [vmem:[#allocation10 + $0x9c8] sm:$0xff] }
 0x4a5   :  { %v1390_v4 = vadd.f32 %v1374_v53, %v1372_v27  ;;  %v1378_v37 = vadd.f32 %v1377_v52, %v1376_v34  ;;  %9443 = vst [vmem:[#allocation40_spill] sm:$0xff] %v8727_v48 }
 0x4a6   :  { %v1385_v8 = vadd.f32 %v1384_v60, %v1383_v43  ;;  %v1397_v28 = vadd.f32 %v1375_v62, %v1373_v22  ;;  %v1333_v9 = vpop.f32.mrb[12].mxu1  ;;  %v1202_v25 = vpop.f32.mrb[12].mxu0  ;;  %v8731_v60 = vld [vmem:[#allocation10 + $0x998] sm:$0xff]  ;;  %v8747_v43 = vld [vmem:[#allocation10 + $0x990] sm:$0xff] }
 0x4a7   :  { %v1391_v23 = vrot.slane %v1390_v4, 4  ;;  %v1408_v46 = vmul.f32 %v1333_v9, %v8645_v10  ;;  %v1335_v15 = vpop.f32.mrb[13].mxu1  ;;  %v1406_v17 = vmul.f32 %v1202_v25, %v8647_v12  ;;  %v1204_v27 = vpop.f32.mrb[13].mxu0  ;;  %9444 = vst [vmem:[#allocation41_spill] sm:$0xff] %v8731_v60  ;;  %v8733_v62 = vld [vmem:[#allocation10 + $0x9d8] sm:$0xff]  ;;  %v1379_v9 = vrot.slane %v1378_v37, 2 }
 0x4a8   :  { %v1398_v22 = vrot.slane %v1397_v28, 4  ;;  %v1409_v29 = vmul.f32 %v1335_v15, %v8649_v14  ;;  %v1407_v34 = vmul.f32 %v1204_v27, %v8651_v16  ;;  %v1386_v52 = vrot.slane %v1385_v8, 2  ;;  %9445 = vst [vmem:[#allocation42_spill] sm:$0xff] %v8733_v62  ;;  %9448 = vst [vmem:[#allocation45_spill] sm:$0xff] %v8747_v43 }
 0x4a9   :  { %v1392_v53 = vadd.f32 %v1391_v23, %v1390_v4  ;;  %v1412_v54 = vadd.f32 %v1406_v17, %v1404_v55  ;;  %v1380_v21 = vadd.f32 %v1379_v9, %v1378_v37 }
 0x4aa   :  { %v1399_v25 = vadd.f32 %v1398_v22, %v1397_v28  ;;  %v1419_v15 = vadd.f32 %v1407_v34, %v1405_v63  ;;  %v1339_v27 = vpop.f32.mrb[14].mxu1  ;;  %v1208_v24 = vpop.f32.mrb[14].mxu0  ;;  %v1387_v1 = vadd.f32 %v1386_v52, %v1385_v8 }
 0x4ab   :  { %v1393_v55 = vrot.slane %v1392_v53, 2  ;;  %v1413_v4 = vrot.slane %v1412_v54, 4  ;;  %v1410_v23 = vmul.f32 %v1339_v27, %v8665_v35  ;;  %v1341_v17 = vpop.f32.mrb[15].mxu1  ;;  %v1210_v56 = vpop.f32.mrb[15].mxu0  ;;  %v1440_v8 = vmul.f32 %v1208_v24, %v8633_v7 }
 0x4ac   :  { %v1400_v28 = vrot.slane %v1399_v25, 2  ;;  %v1420_v63 = vrot.slane %v1419_v15, 4  ;;  %v1411_v22 = vmul.f32 %v1341_v17, %v8673_v45  ;;  %v1441_v27 = vmul.f32 %v1210_v56, %v8638_v41 }
 0x4ad   :  { %v1414_v57 = vadd.f32 %v1413_v4, %v1412_v54  ;;  %v1426_v19 = vadd.f32 %v1410_v23, %v1408_v46  ;;  %v1394_v44 = vadd.f32 %v1393_v55, %v1392_v53 }
 0x4ae   :  { %v1401_v17 = vadd.f32 %v1400_v28, %v1399_v25  ;;  %v1433_v48 = vadd.f32 %v1411_v22, %v1409_v29  ;;  %v1345_v47 = vpop.f32.mrb[16].mxu1  ;;  %v1214_v34 = vpop.f32.mrb[16].mxu0  ;;  %v1421_v60 = vadd.f32 %v1420_v63, %v1419_v15  ;;  %v1388_v29 = vrot.slane %v1387_v1, 1 }
 0x4af   :  { %v1427_v62 = vrot.slane %v1426_v19, 4  ;;  %v1347_v52 = vpop.f32.mrb[17].mxu1  ;;  %v1216_v46 = vpop.f32.mrb[17].mxu0  ;;  %v1415_v4 = vrot.slane %v1414_v57, 2  ;;  %v1444_v25 = vmul.f32 %v1345_v47, %v8645_v10  ;;  %v1381_v15 = vrot.slane %v1380_v21, 1 }
 0x4b0   :  { %v1434_v23 = vrot.slane %v1433_v48, 4  ;;  %v1402_v53 = vrot.slane %v1401_v17, 1  ;;  %v1395_v55 = vrot.slane %v1394_v44, 1  ;;  %v1445_v28 = vmul.f32 %v1347_v52, %v8649_v14 }
 0x4b1   :  { %v1428_v9 = vadd.f32 %v1427_v62, %v1426_v19  ;;  %v1422_v54 = vrot.slane %v1421_v60, 2  ;;  %v1442_v5 = vmul.f32 %v1214_v34, %v8647_v12  ;;  %v1443_v56 = vmul.f32 %v1216_v46, %v8651_v16 }
 0x4b2   :  { %v1435_v24 = vadd.f32 %v1434_v23, %v1433_v48  ;;  %v1351_v63 = vpop.f32.mrb[18].mxu1  ;;  %v1220_v22 = vpop.f32.mrb[18].mxu0  ;;  %v1416_v0 = vadd.f32 %v1415_v4, %v1414_v57  ;;  %v1389_v62 = vadd.f32 %v1388_v29, %v1387_v1  ;;  %v1403_v48 = vadd.f32 %v1402_v53, %v1401_v17 }
 0x4b3   :  { %v1429_v43 = vrot.slane %v1428_v9, 2  ;;  %v1353_v42 = vpop.f32.mrb[19].mxu1  ;;  %v1222_v37 = vpop.f32.mrb[19].mxu0  ;;  %v1446_v19 = vmul.f32 %v1351_v63, %v8665_v35  ;;  %v1448_v23 = vadd.f32 %v1442_v5, %v1440_v8  ;;  %v1455_v52 = vadd.f32 %v1443_v56, %v1441_v27  ;;  %v8770_v63 = vld [vmem:[#allocation10 + $0xa18] sm:$0xff] }
 0x4b4   :  { %v1436_v6 = vrot.slane %v1435_v24, 2  ;;  %v1447_v47 = vmul.f32 %v1353_v42, %v8673_v45  ;;  %v1396_v11 = vadd.f32 %v1395_v55, %v1394_v44  ;;  %v1423_v46 = vadd.f32 %v1422_v54, %v1421_v60  ;;  %v8772_v42 = vld [vmem:[#allocation10 + $0xa58] sm:$0xff] }
 0x4b5   :  { %v1430_v61 = vadd.f32 %v1429_v43, %v1428_v9  ;;  %v1462_v32 = vadd.f32 %v1446_v19, %v1444_v25  ;;  %v1456_v26 = vrot.slane %v1455_v52, 4  ;;  %v1476_v57 = vmul.f32 %v1220_v22, %v8633_v7 }
 0x4b6   :  { %v1437_v18 = vadd.f32 %v1436_v6, %v1435_v24  ;;  %v1469_v38 = vadd.f32 %v1447_v47, %v1445_v28  ;;  %v1357_v13 = vpop.f32.mrb[20].mxu1  ;;  %v1226_v34 = vpop.f32.mrb[20].mxu0  ;;  %v1417_v1 = vrot.slane %v1416_v0, 1  ;;  %v1477_v6 = vmul.f32 %v1222_v37, %v8638_v41 }
 0x4b7   :  { %v1359_v4 = vpop.f32.mrb[21].mxu1  ;;  %v1228_v2 = vpop.f32.mrb[21].mxu0  ;;  %v1463_v5 = vrot.slane %v1462_v32, 4  ;;  %v1382_v43 = vadd.f32 %v1381_v15, %v1380_v21  ;;  %v1449_v17 = vrot.slane %v1448_v23, 4  ;;  %v1457_v8 = vadd.f32 %v1456_v26, %v1455_v52 }
 0x4b8   :  { %v1470_v27 = vrot.slane %v1469_v38, 4  ;;  %v8776_v44 = vsel %vm1516_vm6, %v1403_v48, %v1389_v62  ;;  %v1431_v60 = vrot.slane %v1430_v61, 1  ;;  %v1438_v54 = vrot.slane %v1437_v18, 1 }
 0x4b9   :  { %2713 = vmatprep.mubr.f32.mxu0 %v8776_v44  ;;  %2997 = vmatprep.mubr.f32.mxu1 %v8776_v44  ;;  %v6177_v53 = vpack.c.bf16 %v8772_v42, %v8770_v63  ;;  %v1458_v9 = vrot.slane %v1457_v8, 2  ;;  %v1464_v25 = vadd.f32 %v1463_v5, %v1462_v32  ;;  %v1480_v21 = vmul.f32 %v1357_v13, %v8645_v10  ;;  %v1935_v63 = vld [vmem:[#allocation10 + $0xb00] sm:$0xff] }
 0x4ba   :  { %v1471_v7 = vadd.f32 %v1470_v27, %v1469_v38  ;;  %v1363_v29 = vpop.f32.mrb[22].mxu1  ;;  %v8784_v41 = vsel %vm1516_vm6, %v1396_v11, %v1382_v43  ;;  %v1418_v37 = vadd.f32 %v1417_v1, %v1416_v0  ;;  %v1424_v15 = vrot.slane %v1423_v46, 1  ;;  %v1943_v42 = vld [vmem:[#allocation10 + $0xb40] sm:$0xff] }
 0x4bb   :  { %v1365_v26 = vpop.f32.mrb[23].mxu1  ;;  %2714 = vmatmul.mubr.f32.vlgmr.msra.gmra.mrb[22].mxu0 %v8784_v41  ;;  %2998 = vmatmul.mubr.f32.vlgmr.msra.gmra.mrb[24].mxu1 %v8784_v41  ;;  %v1481_v38 = vmul.f32 %v1359_v4, %v8649_v14  ;;  %v1450_v24 = vadd.f32 %v1449_v17, %v1448_v23  ;;  %v1459_v28 = vadd.f32 %v1458_v9, %v1457_v8  ;;  %v1465_v47 = vrot.slane %v1464_v25, 2  ;;  %v9464_v8 = vld [vmem:[#allocation36_spill] sm:$0xff] }
 0x4bc   :  { %v1472_v55 = vrot.slane %v1471_v7, 2  ;;  %v9452_v32 = vpack.c.bf16 %v8659_v30, %v8655_v20  ;;  %v9453_v13 = vpack.c.bf16 %v8663_v33, %v8661_v31  ;;  %v1478_v0 = vmul.f32 %v1226_v34, %v8647_v12  ;;  %v9460_v34 = vld [vmem:[#allocation34_spill] sm:$0xff] }
 0x4bd   :  { %v1432_v10 = vadd.f32 %v1431_v60, %v1430_v61  ;;  %v1439_v11 = vadd.f32 %v1438_v54, %v1437_v18  ;;  %v1479_v56 = vmul.f32 %v1228_v2, %v8651_v16  ;;  %v9454_v14 = vpack.c.bf16 %v8669_v39, %v8667_v36  ;;  %v9465_v60 = vld [vmem:[#allocation35_spill] sm:$0xff] }
 0x4be   :  { %5908 = vmatpush1.bf16.msra.mxu0 %v9452_v32  ;;  %6164 = vmatpush1.bf16.msra.mxu1 %v9453_v13  ;;  %v1473_v22 = vadd.f32 %v1472_v55, %v1471_v7  ;;  %v1460_v19 = vrot.slane %v1459_v28, 1  ;;  %v1484_v62 = vadd.f32 %v1478_v0, %v1476_v57  ;;  %v9455_v20 = vpack.c.bf16 %v8675_v49, %v8671_v40  ;;  %v9467_v7 = vld [vmem:[#allocation38_spill] sm:$0xff]  ;;  %v9474_v13 = vld [vmem:[#allocation41_spill] sm:$0xff] }
 0x4bf   :  { %5910 = vmatprep.subr.bf16.mxu0 %v9454_v14  ;;  %v1482_v30 = vmul.f32 %v1363_v29, %v8665_v35  ;;  %v1425_v31 = vadd.f32 %v1424_v15, %v1423_v46  ;;  %v1491_v33 = vadd.f32 %v1479_v56, %v1477_v6  ;;  %v1483_v61 = vmul.f32 %v1365_v26, %v8673_v45  ;;  %v9458_v45 = vld [vmem:[#allocation32_spill] sm:$0xff]  ;;  %v9461_v46 = vld [vmem:[#allocation33_spill] sm:$0xff]  ;;  %v9473_v32 = vld [vmem:[#allocation42_spill] sm:$0xff] }
 0x4c0   :  { %6166 = vmatprep.subr.bf16.mxu1 %v9455_v20  ;;  %v1474_v12 = vrot.slane %v1473_v22, 1  ;;  %v1451_v18 = vrot.slane %v1450_v24, 2  ;;  %v1461_v16 = vadd.f32 %v1460_v19, %v1459_v28  ;;  %v1545_v36 = vcombine.low %v8784_v41, %v8776_v44  ;;  %v9463_v6 = vld [vmem:[#allocation29_spill] sm:$0xff]  ;;  %v1905_v26 = vld [vmem:[#allocation10 + $0xa10] sm:$0xff] }
 0x4c1   :  { %v1498_v39 = vadd.f32 %v1482_v30, %v1480_v21  ;;  %v9456_v2 = vpack.c.bf16 %v8679_v51, %v8677_v50  ;;  %v9457_v40 = vpack.c.bf16 %v8687_v59, %v8685_v58  ;;  %v1485_v49 = vrot.slane %v1484_v62, 4  ;;  %v9468_v29 = vld [vmem:[#allocation37_spill] sm:$0xff]  ;;  %v9471_v28 = vld [vmem:[#allocation39_spill] sm:$0xff] }
 0x4c2   :  { %v1475_v35 = vadd.f32 %v1474_v12, %v1473_v22  ;;  %v1492_v48 = vrot.slane %v1491_v33, 4  ;;  %v1505_v23 = vadd.f32 %v1483_v61, %v1481_v38  ;;  %v9459_v52 = vpack.c.bf16 %v8695_v3, %v9458_v45  ;;  %v1911_v21 = vld [vmem:[#allocation10 + $0xa40] sm:$0xff]  ;;  %v9470_v38 = vld [vmem:[#allocation40_spill] sm:$0xff]  ;;  %v1928_v22 = vld [vmem:[#allocation10 + $0xac8] sm:$0xff] }
 0x4c3   :  { %5912 = vmatpush1.bf16.msra.mxu0 %v9456_v2  ;;  %6168 = vmatpush1.bf16.msra.mxu1 %v9457_v40  ;;  %v9462_v57 = vpack.c.bf16 %v9460_v34, %v9461_v46  ;;  %v1466_v4 = vadd.f32 %v1465_v47, %v1464_v25  ;;  %v1499_v1 = vrot.slane %v1498_v39, 4  ;;  %v8820_v50 = vsel %vm1516_vm6, %v1439_v11, %v1425_v31  ;;  %v1903_v25 = vld [vmem:[#allocation10 + $0xa00] sm:$0xff]  ;;  %v1920_v11 = vld [vmem:[#allocation10 + $0xa88] sm:$0xff]  ;;  %v1922_v19 = vld [vmem:[#allocation10 + $0xa98] sm:$0xff] }
 0x4c4   :  { %5914 = vmatprep.subr.bf16.mxu0 %v9459_v52  ;;  %v8823_v51 = vsel %vm1516_vm6, %v1432_v10, %v1418_v37  ;;  %v1493_v58 = vadd.f32 %v1492_v48, %v1491_v33  ;;  %v1506_v59 = vrot.slane %v1505_v23, 4  ;;  %2784 = vmatprep.mubr.f32.mxu0 %v8820_v50  ;;  %v8830_v5 = vsel %vm1516_vm6, %v1475_v35, %v1461_v16  ;;  %v1913_v10 = vld [vmem:[#allocation10 + $0xa50] sm:$0xff]  ;;  %v1930_v47 = vld [vmem:[#allocation10 + $0xad8] sm:$0xff]  ;;  %v1919_v31 = vld [vmem:[#allocation10 + $0xa80] sm:$0xff] }
 0x4c5   :  { %6170 = vmatprep.subr.bf16.mxu1 %v9462_v57  ;;  %3068 = vmatprep.mubr.f32.mxu1 %v8820_v50  ;;  %v1546_v3 = vcombine.low %v8823_v51, %v8820_v50  ;;  %v1452_v27 = vadd.f32 %v1451_v18, %v1450_v24  ;;  %v1553_v43 = vrot.slane %v1545_v36, %v9463_v6  ;;  %v1467_v14 = vrot.slane %v1466_v4, 1  ;;  %v1927_v12 = vld [vmem:[#allocation10 + $0xac0] sm:$0xff]  ;;  %v9476_v18 = vld [vmem:[#allocation44_spill] sm:$0xff]  ;;  %v9477_v16 = vld [vmem:[#allocation43_spill] sm:$0xff] }
 0x4c6   :  { %v1500_v17 = vadd.f32 %v1499_v1, %v1498_v39  ;;  %v9466_v54 = vpack.c.bf16 %v9464_v8, %v9465_v60  ;;  %v9469_v9 = vpack.c.bf16 %v9467_v7, %v9468_v29  ;;  %v1486_v37 = vadd.f32 %v1485_v49, %v1484_v62  ;;  %v9479_v39 = vld [vmem:[#allocation46_spill] sm:$0xff]  ;;  %v9480_v2 = vld [vmem:[#allocation45_spill] sm:$0xff]  ;;  %v1929_v45 = vld [vmem:[#allocation10 + $0xad0] sm:$0xff] }
 0x4c7   :  { %v1494_v15 = vrot.slane %v1493_v58, 2  ;;  %v1507_v55 = vadd.f32 %v1506_v59, %v1505_v23  ;;  %v9472_v24 = vpack.c.bf16 %v9470_v38, %v9471_v28  ;;  %v9475_v0 = vpack.c.bf16 %v9473_v32, %v9474_v13  ;;  %v1921_v23 = vld [vmem:[#allocation10 + $0xa90] sm:$0xff]  ;;  %v1936_v52 = vld [vmem:[#allocation10 + $0xb08] sm:$0xff]  ;;  %v1938_v8 = vld [vmem:[#allocation10 + $0xb18] sm:$0xff] }
 0x4c8   :  { %5916 = vmatpush1.bf16.msra.mxu0 %v9466_v54  ;;  %6172 = vmatpush1.bf16.msra.mxu1 %v9469_v9  ;;  %v1560_v56 = vrot.slane %v1546_v3, %v9463_v6  ;;  %v1501_v62 = vrot.slane %v1500_v17, 2  ;;  %v1453_v61 = vrot.slane %v1452_v27, 1  ;;  %v9478_v36 = vpack.c.bf16 %v9476_v18, %v9477_v16  ;;  %v9482_v1 = vld [vmem:[#allocation48_spill] sm:$0xff]  ;;  %v1952_v32 = vld [vmem:[#allocation10 + $0xb88] sm:$0xff] }
 0x4c9   :  { %5918 = vmatprep.subr.bf16.mxu0 %v9472_v24  ;;  %6174 = vmatprep.subr.bf16.mxu1 %v9475_v0  ;;  %v1495_v20 = vadd.f32 %v1494_v15, %v1493_v58  ;;  %v1508_v30 = vrot.slane %v1507_v55, 2  ;;  %v9481_v40 = vpack.c.bf16 %v9479_v39, %v9480_v2  ;;  %v5923_v35 = vpack.c.bf16 %v1911_v21, %v1903_v25  ;;  %v9483_v58 = vld [vmem:[#allocation47_spill] sm:$0xff]  ;;  %v1946_v60 = vld [vmem:[#allocation10 + $0xb58] sm:$0xff]  ;;  %v1975_v39 = vld [vmem:[#allocation10 + $0xc40] sm:$0xff] }
 0x4ca   :  { %v1561_v33 = vcombine.low %v1553_v43, %v1560_v56  ;;  %v6179_v49 = vpack.c.bf16 %v1913_v10, %v1905_v26  ;;  %v5925_v48 = vpack.c.bf16 %v1928_v22, %v1920_v11  ;;  %v1487_v34 = vrot.slane %v1486_v37, 2  ;;  %v1944_v43 = vld [vmem:[#allocation10 + $0xb48] sm:$0xff]  ;;  %v1937_v28 = vld [vmem:[#allocation10 + $0xb10] sm:$0xff]  ;;  %v1962_v13 = vld [vmem:[#allocation10 + $0xbd8] sm:$0xff] }
 0x4cb   :  { %v1496_v46 = vrot.slane %v1495_v20, 1  ;;  %v1509_v57 = vadd.f32 %v1508_v30, %v1507_v55  ;;  %v9484_v59 = vpack.c.bf16 %v9482_v1, %v9483_v58  ;;  %v6181_v3 = vpack.c.bf16 %v1930_v47, %v1922_v19  ;;  %v1945_v24 = vld [vmem:[#allocation10 + $0xb50] sm:$0xff]  ;;  %v1951_v22 = vld [vmem:[#allocation10 + $0xb80] sm:$0xff]  ;;  %v1968_v30 = vld [vmem:[#allocation10 + $0xc08] sm:$0xff] }
 0x4cc   :  { %5920 = vmatpush1.bf16.msra.mxu0 %v9478_v36  ;;  %6176 = vmatpush1.bf16.msra.mxu1 %v9481_v40  ;;  %1581 = vst [vmem:[%s9401_s15] sm:$0xff] %v1561_v33  ;;  %v1468_v54 = vadd.f32 %v1467_v14, %v1466_v4  ;;  %v1502_v7 = vadd.f32 %v1501_v62, %v1500_v17  ;;  %v1960_v4 = vld [vmem:[#allocation10 + $0xbc8] sm:$0xff]  ;;  %v1954_v17 = vld [vmem:[#allocation10 + $0xb98] sm:$0xff]  ;;  %v1959_v56 = vld [vmem:[#allocation10 + $0xbc0] sm:$0xff] }
 0x4cd   :  { %5922 = vmatprep.subr.bf16.mxu0 %v9484_v59  ;;  %6178 = vmatprep.subr.bf16.mxu1 %v6177_v53  ;;  %v1510_v29 = vrot.slane %v1509_v57, 1  ;;  %v5927_v9 = vpack.c.bf16 %v1927_v12, %v1919_v31  ;;  %v6183_v25 = vpack.c.bf16 %v1929_v45, %v1921_v23  ;;  %v1454_v21 = vadd.f32 %v1453_v61, %v1452_v27  ;;  %v1961_v62 = vld [vmem:[#allocation10 + $0xbd0] sm:$0xff]  ;;  %v1976_v31 = vld [vmem:[#allocation10 + $0xc48] sm:$0xff]  ;;  %v1970_v12 = vld [vmem:[#allocation10 + $0xc18] sm:$0xff] }
 0x4ce   :  { %v5929_v26 = vpack.c.bf16 %v1944_v43, %v1936_v52  ;;  %v6185_v15 = vpack.c.bf16 %v1946_v60, %v1938_v8  ;;  %v1488_v53 = vadd.f32 %v1487_v34, %v1486_v37  ;;  %v1497_v55 = vadd.f32 %v1496_v46, %v1495_v20  ;;  %v1953_v20 = vld [vmem:[#allocation10 + $0xb90] sm:$0xff]  ;;  %v1978_v33 = vld [vmem:[#allocation10 + $0xc58] sm:$0xff]  ;;  %v1967_v36 = vld [vmem:[#allocation10 + $0xc00] sm:$0xff] }
 0x4cf   :  { %v1511_v38 = vadd.f32 %v1510_v29, %v1509_v57  ;;  %v8862_v0 = vsel %vm1516_vm6, %v1468_v54, %v1454_v21  ;;  %v1503_v27 = vrot.slane %v1502_v7, 1  ;;  %v5931_v37 = vpack.c.bf16 %v1943_v42, %v1935_v63  ;;  %v1984_v23 = vld [vmem:[#allocation10 + $0xc88] sm:$0xff]  ;;  %v1986_v52 = vld [vmem:[#allocation10 + $0xc98] sm:$0xff]  ;;  %v1983_v59 = vld [vmem:[#allocation10 + $0xc80] sm:$0xff] }
 0x4d0   :  { %5924 = vmatpush1.bf16.msra.mxu0 %v5923_v35  ;;  %6180 = vmatpush1.bf16.msra.mxu1 %v6179_v49  ;;  %v6187_v11 = vpack.c.bf16 %v1945_v24, %v1937_v28  ;;  %v1489_v14 = vrot.slane %v1488_v53, 1  ;;  %v5933_v19 = vpack.c.bf16 %v1960_v4, %v1952_v32  ;;  %v6189_v47 = vpack.c.bf16 %v1962_v13, %v1954_v17  ;;  %v1969_v49 = vld [vmem:[#allocation10 + $0xc10] sm:$0xff]  ;;  %v1992_v45 = vld [vmem:[#allocation10 + $0xcc8] sm:$0xff]  ;;  %v1994_v34 = vld [vmem:[#allocation10 + $0xcd8] sm:$0xff] }
 0x4d1   :  { %5926 = vmatprep.subr.bf16.mxu0 %v5925_v48  ;;  %6182 = vmatprep.subr.bf16.mxu1 %v6181_v3  ;;  %v8865_v10 = vsel %vm1516_vm6, %v1511_v38, %v1497_v55  ;;  %v1504_v61 = vadd.f32 %v1503_v27, %v1502_v7  ;;  %v5935_v18 = vpack.c.bf16 %v1959_v56, %v1951_v22  ;;  %v1977_v48 = vld [vmem:[#allocation10 + $0xc50] sm:$0xff]  ;;  %v1991_v3 = vld [vmem:[#allocation10 + $0xcc0] sm:$0xff]  ;;  %v2000_v29 = vld [vmem:[#allocation10 + $0xd08] sm:$0xff] }
 0x4d2   :  { %v6191_v16 = vpack.c.bf16 %v1961_v62, %v1953_v20  ;;  %v1490_v2 = vadd.f32 %v1489_v14, %v1488_v53  ;;  %v5937_v40 = vpack.c.bf16 %v1976_v31, %v1968_v30  ;;  %v6193_v35 = vpack.c.bf16 %v1978_v33, %v1970_v12  ;;  %v1985_v54 = vld [vmem:[#allocation10 + $0xc90] sm:$0xff]  ;;  %v2010_v21 = vld [vmem:[#allocation10 + $0xd58] sm:$0xff]  ;;  %v1999_v53 = vld [vmem:[#allocation10 + $0xd00] sm:$0xff] }
 0x4d3   :  { %v1562_v46 = vcombine.low %v8862_v0, %v8830_v5  ;;  %v5939_v1 = vpack.c.bf16 %v1975_v39, %v1967_v36  ;;  %v6195_v58 = vpack.c.bf16 %v1977_v48, %v1969_v49  ;;  %v5941_v8 = vpack.c.bf16 %v1992_v45, %v1984_v23  ;;  %v1993_v7 = vld [vmem:[#allocation10 + $0xcd0] sm:$0xff]  ;;  %v2007_v55 = vld [vmem:[#allocation10 + $0xd40] sm:$0xff]  ;;  %v2016_v17 = vld [vmem:[#allocation10 + $0xd88] sm:$0xff] }
 0x4d4   :  { %5928 = vmatpush1.bf16.msra.mxu0 %v5927_v9  ;;  %6184 = vmatpush1.bf16.msra.mxu1 %v6183_v25  ;;  %v8870_v57 = vsel %vm1516_vm6, %v1504_v61, %v1490_v2  ;;  %v6197_v60 = vpack.c.bf16 %v1994_v34, %v1986_v52  ;;  %v2008_v9 = vld [vmem:[#allocation10 + $0xd48] sm:$0xff]  ;;  %v2002_v25 = vld [vmem:[#allocation10 + $0xd18] sm:$0xff]  ;;  %v5943_v63 = vpack.c.bf16 %v1991_v3, %v1983_v59  ;;  %v2001_v32 = vld [vmem:[#allocation10 + $0xd10] sm:$0xff] }
 0x4d5   :  { %5930 = vmatprep.subr.bf16.mxu0 %v5929_v26  ;;  %6186 = vmatprep.subr.bf16.mxu1 %v6185_v15  ;;  %v1563_v43 = vcombine.low %v8870_v57, %v8865_v10  ;;  %v1570_v26 = vrot.slane %v1562_v46, %v9463_v6  ;;  %v6199_v42 = vpack.c.bf16 %v1993_v7, %v1985_v54  ;;  %v2009_v4 = vld [vmem:[#allocation10 + $0xd50] sm:$0xff]  ;;  %v2024_v13 = vld [vmem:[#allocation10 + $0xdc8] sm:$0xff]  ;;  %v2018_v27 = vld [vmem:[#allocation10 + $0xd98] sm:$0xff] }
 0x4d6   :  { %v5945_v28 = vpack.c.bf16 %v2008_v9, %v2000_v29  ;;  %v6201_v24 = vpack.c.bf16 %v2010_v21, %v2002_v25  ;;  %v2015_v22 = vld [vmem:[#allocation10 + $0xd80] sm:$0xff]  ;;  %v5949_v14 = vpack.c.bf16 %v2024_v13, %v2016_v17  ;;  %v2025_v20 = vld [vmem:[#allocation10 + $0xdd0] sm:$0xff]  ;;  %v2032_v62 = vld [vmem:[#allocation10 + $0xe08] sm:$0xff] }
 0x4d7   :  { %v1577_v15 = vrot.slane %v1563_v43, %v9463_v6  ;;  %v5947_v6 = vpack.c.bf16 %v2007_v55, %v1999_v53  ;;  %v2023_v56 = vld [vmem:[#allocation10 + $0xdc0] sm:$0xff]  ;;  %v2040_v30 = vld [vmem:[#allocation10 + $0xe48] sm:$0xff]  ;;  %v2034_v31 = vld [vmem:[#allocation10 + $0xe18] sm:$0xff] }
 0x4d8   :  { %5932 = vmatpush1.bf16.msra.mxu0 %v5931_v37  ;;  %6188 = vmatpush1.bf16.msra.mxu1 %v6187_v11  ;;  %v2026_v37 = vld [vmem:[#allocation10 + $0xdd8] sm:$0xff]  ;;  %v6203_v11 = vpack.c.bf16 %v2009_v4, %v2001_v32  ;;  %v5951_v33 = vpack.c.bf16 %v2023_v56, %v2015_v22  ;;  %v5953_v36 = vpack.c.bf16 %v2040_v30, %v2032_v62  ;;  %v2033_v2 = vld [vmem:[#allocation10 + $0xe10] sm:$0xff]  ;;  %v2056_v49 = vld [vmem:[#allocation10 + $0xec8] sm:$0xff] }
 0x4d9   :  { %5934 = vmatprep.subr.bf16.mxu0 %v5933_v19  ;;  %6190 = vmatprep.subr.bf16.mxu1 %v6189_v47  ;;  %v1578_v38 = vcombine.low %v1570_v26, %v1577_v15  ;;  %v6205_v19 = vpack.c.bf16 %v2026_v37, %v2018_v27  ;;  %v2017_v47 = vld [vmem:[#allocation10 + $0xd90] sm:$0xff]  ;;  %v2042_v12 = vld [vmem:[#allocation10 + $0xe58] sm:$0xff]  ;;  %v2047_v34 = vld [vmem:[#allocation10 + $0xe80] sm:$0xff] }
 0x4da   :  { %v6207_v61 = vpack.c.bf16 %v2025_v20, %v2017_v47  ;;  %v6209_v39 = vpack.c.bf16 %v2042_v12, %v2034_v31  ;;  %v2050_v48 = vld [vmem:[#allocation10 + $0xe98] sm:$0xff]  ;;  %v2055_v46 = vld [vmem:[#allocation10 + $0xec0] sm:$0xff]  ;;  %v2049_v59 = vld [vmem:[#allocation10 + $0xe90] sm:$0xff] }
 0x4db   :  { %1582 = vst [vmem:[%s9401_s15 + $0x8] sm:$0xff] %v1578_v38  ;;  %v2058_v23 = vld [vmem:[#allocation10 + $0xed8] sm:$0xff]  ;;  %v2057_v3 = vld [vmem:[#allocation10 + $0xed0] sm:$0xff]  ;;  %v2064_v43 = vld [vmem:[#allocation10 + $0xf08] sm:$0xff]  ;;  %v5959_v7 = vpack.c.bf16 %v2055_v46, %v2047_v34 }
 0x4dc   :  { %5936 = vmatpush1.bf16.msra.mxu0 %v5935_v18  ;;  %6192 = vmatpush1.bf16.msra.mxu1 %v6191_v16  ;;  %v2031_v18 = vld [vmem:[#allocation10 + $0xe00] sm:$0xff]  ;;  %v2074_v54 = vld [vmem:[#allocation10 + $0xf58] sm:$0xff]  ;;  %v6215_v29 = vpack.c.bf16 %v2057_v3, %v2049_v59  ;;  %v2065_v15 = vld [vmem:[#allocation10 + $0xf10] sm:$0xff] }
 0x4dd   :  { %5938 = vmatprep.subr.bf16.mxu0 %v5937_v40  ;;  %6194 = vmatprep.subr.bf16.mxu1 %v6193_v35  ;;  %v2039_v16 = vld [vmem:[#allocation10 + $0xe40] sm:$0xff]  ;;  %v2041_v40 = vld [vmem:[#allocation10 + $0xe50] sm:$0xff]  ;;  %v2048_v35 = vld [vmem:[#allocation10 + $0xe88] sm:$0xff] }
 0x4de   :  { %v5955_v45 = vpack.c.bf16 %v2039_v16, %v2031_v18  ;;  %v6211_v52 = vpack.c.bf16 %v2041_v40, %v2033_v2  ;;  %v2063_v9 = vld [vmem:[#allocation10 + $0xf00] sm:$0xff]  ;;  %v2088_v53 = vld [vmem:[#allocation10 + $0xfc8] sm:$0xff]  ;;  %v2082_v55 = vld [vmem:[#allocation10 + $0xf98] sm:$0xff] }
 0x4df   :  { %v2071_v25 = vld [vmem:[#allocation10 + $0xf40] sm:$0xff]  ;;  %v2090_v38 = vld [vmem:[#allocation10 + $0xfd8] sm:$0xff]  ;;  %v2081_v27 = vld [vmem:[#allocation10 + $0xf90] sm:$0xff] }
 0x4e0   :  { %5940 = vmatpush1.bf16.msra.mxu0 %v5939_v1  ;;  %6196 = vmatpush1.bf16.msra.mxu1 %v6195_v58  ;;  %v5957_v1 = vpack.c.bf16 %v2056_v49, %v2048_v35  ;;  %v6213_v58 = vpack.c.bf16 %v2058_v23, %v2050_v48  ;;  %v2079_v32 = vld [vmem:[#allocation10 + $0xf80] sm:$0xff]  ;;  %v6221_v13 = vpack.c.bf16 %v2090_v38, %v2082_v55  ;;  %v2089_v37 = vld [vmem:[#allocation10 + $0xfd0] sm:$0xff]  ;;  %v2098_v22 = vld [vmem:[#allocation10 + $0x1018] sm:$0xff] }
 0x4e1   :  { %5942 = vmatprep.subr.bf16.mxu0 %v5941_v8  ;;  %6198 = vmatprep.subr.bf16.mxu1 %v6197_v60  ;;  %v2072_v8 = vld [vmem:[#allocation10 + $0xf48] sm:$0xff]  ;;  %v2066_v60 = vld [vmem:[#allocation10 + $0xf18] sm:$0xff]  ;;  %v2087_v4 = vld [vmem:[#allocation10 + $0xfc0] sm:$0xff] }
 0x4e2   :  { %v5961_v21 = vpack.c.bf16 %v2072_v8, %v2064_v43  ;;  %v6217_v26 = vpack.c.bf16 %v2074_v54, %v2066_v60  ;;  %v2106_v56 = vld [vmem:[#allocation10 + $0x1058] sm:$0xff]  ;;  %v2095_v62 = vld [vmem:[#allocation10 + $0x1000] sm:$0xff]  ;;  %v2097_v31 = vld [vmem:[#allocation10 + $0x1010] sm:$0xff] }
 0x4e3   :  { %v6225_v20 = vpack.c.bf16 %v2106_v56, %v2098_v22  ;;  %v2103_v30 = vld [vmem:[#allocation10 + $0x1040] sm:$0xff]  ;;  %v2105_v12 = vld [vmem:[#allocation10 + $0x1050] sm:$0xff]  ;;  %v2114_v18 = vld [vmem:[#allocation10 + $0x1098] sm:$0xff] }
 0x4e4   :  { %5944 = vmatpush1.bf16.msra.mxu0 %v5943_v63  ;;  %6200 = vmatpush1.bf16.msra.mxu1 %v6199_v42  ;;  %v2073_v63 = vld [vmem:[#allocation10 + $0xf50] sm:$0xff]  ;;  %v2080_v42 = vld [vmem:[#allocation10 + $0xf88] sm:$0xff]  ;;  %v2122_v16 = vld [vmem:[#allocation10 + $0x10d8] sm:$0xff] }
 0x4e5   :  { %5946 = vmatprep.subr.bf16.mxu0 %v5945_v28  ;;  %6202 = vmatprep.subr.bf16.mxu1 %v6201_v24  ;;  %v5963_v28 = vpack.c.bf16 %v2071_v25, %v2063_v9  ;;  %v6219_v24 = vpack.c.bf16 %v2073_v63, %v2065_v15  ;;  %v5965_v17 = vpack.c.bf16 %v2088_v53, %v2080_v42  ;;  %v2111_v2 = vld [vmem:[#allocation10 + $0x1080] sm:$0xff]  ;;  %v2113_v35 = vld [vmem:[#allocation10 + $0x1090] sm:$0xff]  ;;  %v2130_v34 = vld [vmem:[#allocation10 + $0x1118] sm:$0xff] }
 0x4e6   :  { %v2119_v40 = vld [vmem:[#allocation10 + $0x10c0] sm:$0xff]  ;;  %v6229_v48 = vpack.c.bf16 %v2122_v16, %v2114_v18  ;;  %v2121_v23 = vld [vmem:[#allocation10 + $0x10d0] sm:$0xff]  ;;  %v2138_v46 = vld [vmem:[#allocation10 + $0x1158] sm:$0xff] }
 0x4e7   :  { %v2127_v3 = vld [vmem:[#allocation10 + $0x1100] sm:$0xff]  ;;  %v2129_v8 = vld [vmem:[#allocation10 + $0x1110] sm:$0xff]  ;;  %v6233_v60 = vpack.c.bf16 %v2138_v46, %v2130_v34  ;;  %v2146_v9 = vld [vmem:[#allocation10 + $0x1198] sm:$0xff] }
 0x4e8   :  { %5948 = vmatpush1.bf16.msra.mxu0 %v5947_v6  ;;  %6204 = vmatpush1.bf16.msra.mxu1 %v6203_v11  ;;  %v2096_v6 = vld [vmem:[#allocation10 + $0x1008] sm:$0xff]  ;;  %v2135_v43 = vld [vmem:[#allocation10 + $0x1140] sm:$0xff]  ;;  %v2137_v54 = vld [vmem:[#allocation10 + $0x1150] sm:$0xff] }
 0x4e9   :  { %5950 = vmatprep.subr.bf16.mxu0 %v5949_v14  ;;  %6206 = vmatprep.subr.bf16.mxu1 %v6205_v19  ;;  %v2104_v11 = vld [vmem:[#allocation10 + $0x1048] sm:$0xff]  ;;  %v5967_v14 = vpack.c.bf16 %v2087_v4, %v2079_v32  ;;  %v6223_v19 = vpack.c.bf16 %v2089_v37, %v2081_v27  ;;  %v2154_v25 = vld [vmem:[#allocation10 + $0x11d8] sm:$0xff]  ;;  %v2143_v63 = vld [vmem:[#allocation10 + $0x1180] sm:$0xff] }
 0x4ea   :  { %v5969_v47 = vpack.c.bf16 %v2104_v11, %v2096_v6  ;;  %v2151_v42 = vld [vmem:[#allocation10 + $0x11c0] sm:$0xff]  ;;  %v2145_v53 = vld [vmem:[#allocation10 + $0x1190] sm:$0xff]  ;;  %v6237_v55 = vpack.c.bf16 %v2154_v25, %v2146_v9  ;;  %v2162_v32 = vld [vmem:[#allocation10 + $0x1218] sm:$0xff] }
 0x4eb   :  { %v2153_v38 = vld [vmem:[#allocation10 + $0x11d0] sm:$0xff]  ;;  %v2170_v4 = vld [vmem:[#allocation10 + $0x1258] sm:$0xff]  ;;  %v2159_v37 = vld [vmem:[#allocation10 + $0x1200] sm:$0xff] }
 0x4ec   :  { %5952 = vmatpush1.bf16.msra.mxu0 %v5951_v33  ;;  %6208 = vmatpush1.bf16.msra.mxu1 %v6207_v61  ;;  %v2112_v33 = vld [vmem:[#allocation10 + $0x1088] sm:$0xff]  ;;  %v2167_v6 = vld [vmem:[#allocation10 + $0x1240] sm:$0xff]  ;;  %v2161_v11 = vld [vmem:[#allocation10 + $0x1210] sm:$0xff]  ;;  %v6241_v22 = vpack.c.bf16 %v2170_v4, %v2162_v32 }
 0x4ed   :  { %5954 = vmatprep.subr.bf16.mxu0 %v5953_v36  ;;  %6210 = vmatprep.subr.bf16.mxu1 %v6209_v39  ;;  %v2120_v61 = vld [vmem:[#allocation10 + $0x10c8] sm:$0xff]  ;;  %v5971_v36 = vpack.c.bf16 %v2103_v30, %v2095_v62  ;;  %v6227_v39 = vpack.c.bf16 %v2105_v12, %v2097_v31  ;;  %v2169_v56 = vld [vmem:[#allocation10 + $0x1250] sm:$0xff]  ;;  %v5987_v62 = vpack.c.bf16 %v2167_v6, %v2159_v37  ;;  %v2175_v12 = vld [vmem:[#allocation10 + $0x1280] sm:$0xff] }
 0x4ee   :  { %v5973_v49 = vpack.c.bf16 %v2120_v61, %v2112_v33  ;;  %v6243_v30 = vpack.c.bf16 %v2169_v56, %v2161_v11  ;;  %v2183_v33 = vld [vmem:[#allocation10 + $0x12c0] sm:$0xff]  ;;  %v2177_v61 = vld [vmem:[#allocation10 + $0x1290] sm:$0xff]  ;;  %v2250_v37 = vld [vmem:[#allocation10 + $0x14d8] sm:$0xff] }
 0x4ef   :  { %v2185_v16 = vld [vmem:[#allocation10 + $0x12d0] sm:$0xff]  ;;  %v2239_v56 = vld [vmem:[#allocation10 + $0x1480] sm:$0xff] }
 0x4f0   :  { %5956 = vmatpush1.bf16.msra.mxu0 %v5955_v45  ;;  %6212 = vmatpush1.bf16.msra.mxu1 %v6211_v52  ;;  %v2128_v45 = vld [vmem:[#allocation10 + $0x1108] sm:$0xff]  ;;  %v2201_v46 = vld [vmem:[#allocation10 + $0x1350] sm:$0xff] }
 0x4f1   :  { %5958 = vmatprep.subr.bf16.mxu0 %v5957_v1  ;;  %6214 = vmatprep.subr.bf16.mxu1 %v6213_v58  ;;  %v2136_v52 = vld [vmem:[#allocation10 + $0x1148] sm:$0xff]  ;;  %v5975_v1 = vpack.c.bf16 %v2119_v40, %v2111_v2  ;;  %v6231_v58 = vpack.c.bf16 %v2121_v23, %v2113_v35  ;;  %v2194_v2 = vld [vmem:[#allocation10 + $0x1318] sm:$0xff]  ;;  %v5991_v35 = vpack.c.bf16 %v2183_v33, %v2175_v12  ;;  %v2191_v23 = vld [vmem:[#allocation10 + $0x1300] sm:$0xff] }
 0x4f2   :  { %v5977_v59 = vpack.c.bf16 %v2136_v52, %v2128_v45  ;;  %v2202_v40 = vld [vmem:[#allocation10 + $0x1358] sm:$0xff]  ;;  %v2199_v45 = vld [vmem:[#allocation10 + $0x1340] sm:$0xff]  ;;  %v2193_v52 = vld [vmem:[#allocation10 + $0x1310] sm:$0xff] }
 0x4f3   :  { %v6249_v34 = vpack.c.bf16 %v2202_v40, %v2194_v2  ;;  %v2217_v25 = vld [vmem:[#allocation10 + $0x13d0] sm:$0xff]  ;;  %v2266_v12 = vld [vmem:[#allocation10 + $0x1558] sm:$0xff] }
 0x4f4   :  { %5960 = vmatpush1.bf16.msra.mxu0 %v5959_v7  ;;  %6216 = vmatpush1.bf16.msra.mxu1 %v6215_v29  ;;  %v2144_v7 = vld [vmem:[#allocation10 + $0x1188] sm:$0xff]  ;;  %v2233_v4 = vld [vmem:[#allocation10 + $0x1450] sm:$0xff] }
 0x4f5   :  { %5962 = vmatprep.subr.bf16.mxu0 %v5961_v21  ;;  %6218 = vmatprep.subr.bf16.mxu1 %v6217_v26  ;;  %v2152_v29 = vld [vmem:[#allocation10 + $0x11c8] sm:$0xff]  ;;  %v5979_v21 = vpack.c.bf16 %v2135_v43, %v2127_v3  ;;  %v6235_v26 = vpack.c.bf16 %v2137_v54, %v2129_v8  ;;  %v2218_v3 = vld [vmem:[#allocation10 + $0x13d8] sm:$0xff]  ;;  %v5995_v43 = vpack.c.bf16 %v2199_v45, %v2191_v23  ;;  %v2207_v54 = vld [vmem:[#allocation10 + $0x1380] sm:$0xff] }
 0x4f6   :  { %v5981_v15 = vpack.c.bf16 %v2152_v29, %v2144_v7  ;;  %v6251_v8 = vpack.c.bf16 %v2201_v46, %v2193_v52  ;;  %v2215_v7 = vld [vmem:[#allocation10 + $0x13c0] sm:$0xff]  ;;  %v2209_v29 = vld [vmem:[#allocation10 + $0x1390] sm:$0xff]  ;;  %v2282_v23 = vld [vmem:[#allocation10 + $0x15d8] sm:$0xff] }
 0x4f7   :  { %v2265_v40 = vld [vmem:[#allocation10 + $0x1550] sm:$0xff]  ;;  %v2271_v46 = vld [vmem:[#allocation10 + $0x1580] sm:$0xff] }
 0x4f8   :  { %5964 = vmatpush1.bf16.msra.mxu0 %v5963_v28  ;;  %6220 = vmatpush1.bf16.msra.mxu1 %v6219_v24  ;;  %v2160_v28 = vld [vmem:[#allocation10 + $0x1208] sm:$0xff] }
 0x4f9   :  { %5966 = vmatprep.subr.bf16.mxu0 %v5965_v17  ;;  %6222 = vmatprep.subr.bf16.mxu1 %v6221_v13  ;;  %v2168_v24 = vld [vmem:[#allocation10 + $0x1248] sm:$0xff]  ;;  %v5983_v17 = vpack.c.bf16 %v2151_v42, %v2143_v63  ;;  %v6239_v13 = vpack.c.bf16 %v2153_v38, %v2145_v53  ;;  %v2234_v63 = vld [vmem:[#allocation10 + $0x1458] sm:$0xff]  ;;  %v5999_v42 = vpack.c.bf16 %v2215_v7, %v2207_v54  ;;  %v2223_v38 = vld [vmem:[#allocation10 + $0x1400] sm:$0xff] }
 0x4fa   :  { %v5985_v27 = vpack.c.bf16 %v2168_v24, %v2160_v28  ;;  %v6255_v53 = vpack.c.bf16 %v2217_v25, %v2209_v29  ;;  %v2231_v28 = vld [vmem:[#allocation10 + $0x1440] sm:$0xff]  ;;  %v2225_v24 = vld [vmem:[#allocation10 + $0x1410] sm:$0xff]  ;;  %v2298_v54 = vld [vmem:[#allocation10 + $0x1658] sm:$0xff] }
 0x4fb   :  { %v6003_v6 = vpack.c.bf16 %v2231_v28, %v2223_v38  ;;  %v6259_v11 = vpack.c.bf16 %v2233_v4, %v2225_v24  ;;  %v2287_v25 = vld [vmem:[#allocation10 + $0x1600] sm:$0xff]  ;;  %v2314_v38 = vld [vmem:[#allocation10 + $0x16d8] sm:$0xff] }
 0x4fc   :  { %5968 = vmatpush1.bf16.msra.mxu0 %v5967_v14  ;;  %6224 = vmatpush1.bf16.msra.mxu1 %v6223_v19  ;;  %v2176_v14 = vld [vmem:[#allocation10 + $0x1288] sm:$0xff]  ;;  %v2303_v4 = vld [vmem:[#allocation10 + $0x1680] sm:$0xff] }
 0x4fd   :  { %5970 = vmatprep.subr.bf16.mxu0 %v5969_v47  ;;  %6226 = vmatprep.subr.bf16.mxu1 %v6225_v20  ;;  %v2184_v19 = vld [vmem:[#allocation10 + $0x12c8] sm:$0xff]  ;;  %v2178_v47 = vld [vmem:[#allocation10 + $0x1298] sm:$0xff] }
 0x4fe   :  { %v2186_v20 = vld [vmem:[#allocation10 + $0x12d8] sm:$0xff]  ;;  %v5989_v31 = vpack.c.bf16 %v2184_v19, %v2176_v14  ;;  %v2247_v14 = vld [vmem:[#allocation10 + $0x14c0] sm:$0xff]  ;;  %v2241_v19 = vld [vmem:[#allocation10 + $0x1490] sm:$0xff] }
 0x4ff   :  { %2785 = vmatmul.mubr.f32.vlgmr.msra.gmra.mrb[22].mxu0 %v8823_v51  ;;  %3069 = vmatmul.mubr.f32.vlgmr.msra.gmra.mrb[24].mxu1 %v8823_v51  ;;  %v6245_v18 = vpack.c.bf16 %v2186_v20, %v2178_v47  ;;  %v2249_v20 = vld [vmem:[#allocation10 + $0x14d0] sm:$0xff]  ;;  %v6007_v33 = vpack.c.bf16 %v2247_v14, %v2239_v56  ;;  %v2330_v56 = vld [vmem:[#allocation10 + $0x1758] sm:$0xff] }
 0x500   :  { %5972 = vmatpush1.bf16.msra.mxu0 %v5971_v36  ;;  %2855 = vmatprep.mubr.f32.mxu0 %v8830_v5  ;;  %v2192_v36 = vld [vmem:[#allocation10 + $0x1308] sm:$0xff] }
 0x501   :  { %6228 = vmatpush1.bf16.msra.mxu1 %v6227_v39  ;;  %3139 = vmatprep.mubr.f32.mxu1 %v8830_v5  ;;  %v2200_v39 = vld [vmem:[#allocation10 + $0x1348] sm:$0xff] }
 0x502   :  { %5974 = vmatprep.subr.bf16.mxu0 %v5973_v49  ;;  %6230 = vmatprep.subr.bf16.mxu1 %v6229_v48  ;;  %v6247_v49 = vpack.c.bf16 %v2185_v16, %v2177_v61  ;;  %v5993_v48 = vpack.c.bf16 %v2200_v39, %v2192_v36  ;;  %v6263_v61 = vpack.c.bf16 %v2249_v20, %v2241_v19  ;;  %v2255_v16 = vld [vmem:[#allocation10 + $0x1500] sm:$0xff]  ;;  %v2257_v39 = vld [vmem:[#allocation10 + $0x1510] sm:$0xff] }
 0x503   :  { %v2263_v36 = vld [vmem:[#allocation10 + $0x1540] sm:$0xff]  ;;  %v6267_v52 = vpack.c.bf16 %v2265_v40, %v2257_v39 }
 0x504   :  { %5976 = vmatpush1.bf16.msra.mxu0 %v5975_v1  ;;  %v2208_v1 = vld [vmem:[#allocation10 + $0x1388] sm:$0xff]  ;;  %v6011_v45 = vpack.c.bf16 %v2263_v36, %v2255_v16  ;;  %v2319_v20 = vld [vmem:[#allocation10 + $0x1700] sm:$0xff]  ;;  %v2346_v16 = vld [vmem:[#allocation10 + $0x17d8] sm:$0xff] }
 0x505   :  { %6232 = vmatpush1.bf16.msra.mxu1 %v6231_v58  ;;  %5978 = vmatprep.subr.bf16.mxu0 %v5977_v59  ;;  %v2216_v58 = vld [vmem:[#allocation10 + $0x13c8] sm:$0xff]  ;;  %v2210_v59 = vld [vmem:[#allocation10 + $0x1398] sm:$0xff]  ;;  %v2335_v40 = vld [vmem:[#allocation10 + $0x1780] sm:$0xff] }
 0x506   :  { %6234 = vmatprep.subr.bf16.mxu1 %v6233_v60  ;;  %v5997_v60 = vpack.c.bf16 %v2216_v58, %v2208_v1  ;;  %v6253_v9 = vpack.c.bf16 %v2218_v3, %v2210_v59  ;;  %v2279_v1 = vld [vmem:[#allocation10 + $0x15c0] sm:$0xff]  ;;  %v2273_v58 = vld [vmem:[#allocation10 + $0x1590] sm:$0xff] }
 0x507   :  { %v2281_v3 = vld [vmem:[#allocation10 + $0x15d0] sm:$0xff]  ;;  %v6015_v7 = vpack.c.bf16 %v2279_v1, %v2271_v46  ;;  %v2362_v46 = vld [vmem:[#allocation10 + $0x1858] sm:$0xff] }
 0x508   :  { %5980 = vmatpush1.bf16.msra.mxu0 %v5979_v21  ;;  %v2224_v21 = vld [vmem:[#allocation10 + $0x1408] sm:$0xff]  ;;  %v6271_v29 = vpack.c.bf16 %v2281_v3, %v2273_v58  ;;  %v2351_v3 = vld [vmem:[#allocation10 + $0x1800] sm:$0xff] }
 0x509   :  { %6236 = vmatpush1.bf16.msra.mxu1 %v6235_v26  ;;  %5982 = vmatprep.subr.bf16.mxu0 %v5981_v15  ;;  %v2232_v26 = vld [vmem:[#allocation10 + $0x1448] sm:$0xff]  ;;  %v2226_v15 = vld [vmem:[#allocation10 + $0x1418] sm:$0xff] }
 0x50a   :  { %6238 = vmatprep.subr.bf16.mxu1 %v6237_v55  ;;  %v6001_v55 = vpack.c.bf16 %v2232_v26, %v2224_v21  ;;  %v6257_v32 = vpack.c.bf16 %v2234_v63, %v2226_v15  ;;  %v2295_v21 = vld [vmem:[#allocation10 + $0x1640] sm:$0xff]  ;;  %v2289_v26 = vld [vmem:[#allocation10 + $0x1610] sm:$0xff] }
 0x50b   :  { %v2297_v63 = vld [vmem:[#allocation10 + $0x1650] sm:$0xff]  ;;  %v6019_v28 = vpack.c.bf16 %v2295_v21, %v2287_v25  ;;  %v2370_v25 = vld [vmem:[#allocation10 + $0x1898] sm:$0xff] }
 0x50c   :  { %5984 = vmatpush1.bf16.msra.mxu0 %v5983_v17  ;;  %v2240_v17 = vld [vmem:[#allocation10 + $0x1488] sm:$0xff]  ;;  %v6275_v24 = vpack.c.bf16 %v2297_v63, %v2289_v26  ;;  %v2378_v21 = vld [vmem:[#allocation10 + $0x18d8] sm:$0xff]  ;;  %v2375_v63 = vld [vmem:[#allocation10 + $0x18c0] sm:$0xff] }
 0x50d   :  { %6240 = vmatpush1.bf16.msra.mxu1 %v6239_v13  ;;  %5986 = vmatprep.subr.bf16.mxu0 %v5985_v27  ;;  %v2248_v13 = vld [vmem:[#allocation10 + $0x14c8] sm:$0xff]  ;;  %v2242_v27 = vld [vmem:[#allocation10 + $0x1498] sm:$0xff] }
 0x50e   :  { %6242 = vmatprep.subr.bf16.mxu1 %v6241_v22  ;;  %v6005_v22 = vpack.c.bf16 %v2248_v13, %v2240_v17  ;;  %v6261_v47 = vpack.c.bf16 %v2250_v37, %v2242_v27  ;;  %v2311_v17 = vld [vmem:[#allocation10 + $0x16c0] sm:$0xff]  ;;  %v2305_v13 = vld [vmem:[#allocation10 + $0x1690] sm:$0xff] }
 0x50f   :  { %v2313_v37 = vld [vmem:[#allocation10 + $0x16d0] sm:$0xff]  ;;  %v6023_v14 = vpack.c.bf16 %v2311_v17, %v2303_v4  ;;  %v2394_v4 = vld [vmem:[#allocation10 + $0x1958] sm:$0xff] }
 0x510   :  { %5988 = vmatpush1.bf16.msra.mxu0 %v5987_v62  ;;  %v2256_v62 = vld [vmem:[#allocation10 + $0x1508] sm:$0xff]  ;;  %v6279_v19 = vpack.c.bf16 %v2313_v37, %v2305_v13  ;;  %v2383_v37 = vld [vmem:[#allocation10 + $0x1900] sm:$0xff] }
 0x511   :  { %6244 = vmatpush1.bf16.msra.mxu1 %v6243_v30  ;;  %5990 = vmatprep.subr.bf16.mxu0 %v5989_v31  ;;  %v2264_v30 = vld [vmem:[#allocation10 + $0x1548] sm:$0xff]  ;;  %v2258_v31 = vld [vmem:[#allocation10 + $0x1518] sm:$0xff] }
 0x512   :  { %6246 = vmatprep.subr.bf16.mxu1 %v6245_v18  ;;  %v6009_v18 = vpack.c.bf16 %v2264_v30, %v2256_v62  ;;  %v6265_v2 = vpack.c.bf16 %v2266_v12, %v2258_v31  ;;  %v2327_v62 = vld [vmem:[#allocation10 + $0x1740] sm:$0xff]  ;;  %v2321_v30 = vld [vmem:[#allocation10 + $0x1710] sm:$0xff] }
 0x513   :  { %v2329_v12 = vld [vmem:[#allocation10 + $0x1750] sm:$0xff]  ;;  %v6027_v36 = vpack.c.bf16 %v2327_v62, %v2319_v20  ;;  %v2410_v20 = vld [vmem:[#allocation10 + $0x19d8] sm:$0xff] }
 0x514   :  { %5992 = vmatpush1.bf16.msra.mxu0 %v5991_v35  ;;  %v2272_v35 = vld [vmem:[#allocation10 + $0x1588] sm:$0xff]  ;;  %v6283_v39 = vpack.c.bf16 %v2329_v12, %v2321_v30  ;;  %v2399_v12 = vld [vmem:[#allocation10 + $0x1980] sm:$0xff] }
 0x515   :  { %6248 = vmatpush1.bf16.msra.mxu1 %v6247_v49  ;;  %5994 = vmatprep.subr.bf16.mxu0 %v5993_v48  ;;  %v2280_v49 = vld [vmem:[#allocation10 + $0x15c8] sm:$0xff]  ;;  %v2274_v48 = vld [vmem:[#allocation10 + $0x1598] sm:$0xff] }
 0x516   :  { %6250 = vmatprep.subr.bf16.mxu1 %v6249_v34  ;;  %v6013_v34 = vpack.c.bf16 %v2280_v49, %v2272_v35  ;;  %v6269_v59 = vpack.c.bf16 %v2282_v23, %v2274_v48  ;;  %v2343_v35 = vld [vmem:[#allocation10 + $0x17c0] sm:$0xff]  ;;  %v2337_v49 = vld [vmem:[#allocation10 + $0x1790] sm:$0xff] }
 0x517   :  { %v2345_v23 = vld [vmem:[#allocation10 + $0x17d0] sm:$0xff]  ;;  %v6031_v1 = vpack.c.bf16 %v2343_v35, %v2335_v40  ;;  %v2426_v40 = vld [vmem:[#allocation10 + $0x1a58] sm:$0xff] }
 0x518   :  { %5996 = vmatpush1.bf16.msra.mxu0 %v5995_v43  ;;  %v2288_v43 = vld [vmem:[#allocation10 + $0x1608] sm:$0xff]  ;;  %v6287_v58 = vpack.c.bf16 %v2345_v23, %v2337_v49  ;;  %v2415_v23 = vld [vmem:[#allocation10 + $0x1a00] sm:$0xff] }
 0x519   :  { %6252 = vmatpush1.bf16.msra.mxu1 %v6251_v8  ;;  %5998 = vmatprep.subr.bf16.mxu0 %v5997_v60  ;;  %v2296_v8 = vld [vmem:[#allocation10 + $0x1648] sm:$0xff]  ;;  %v2290_v60 = vld [vmem:[#allocation10 + $0x1618] sm:$0xff] }
 0x51a   :  { %6254 = vmatprep.subr.bf16.mxu1 %v6253_v9  ;;  %v6017_v9 = vpack.c.bf16 %v2296_v8, %v2288_v43  ;;  %v6273_v15 = vpack.c.bf16 %v2298_v54, %v2290_v60  ;;  %v2359_v43 = vld [vmem:[#allocation10 + $0x1840] sm:$0xff]  ;;  %v2353_v60 = vld [vmem:[#allocation10 + $0x1810] sm:$0xff] }
 0x51b   :  { %v2361_v54 = vld [vmem:[#allocation10 + $0x1850] sm:$0xff] }
 0x51c   :  { %6000 = vmatpush1.bf16.msra.mxu0 %v5999_v42  ;;  %v2304_v42 = vld [vmem:[#allocation10 + $0x1688] sm:$0xff]  ;;  %v6291_v26 = vpack.c.bf16 %v2361_v54, %v2353_v60  ;;  %v2431_v54 = vld [vmem:[#allocation10 + $0x1a80] sm:$0xff] }
 0x51d   :  { %6256 = vmatpush1.bf16.msra.mxu1 %v6255_v53  ;;  %6002 = vmatprep.subr.bf16.mxu0 %v6001_v55  ;;  %v2312_v53 = vld [vmem:[#allocation10 + $0x16c8] sm:$0xff]  ;;  %v2306_v55 = vld [vmem:[#allocation10 + $0x1698] sm:$0xff] }
 0x51e   :  { %6258 = vmatprep.subr.bf16.mxu1 %v6257_v32  ;;  %v6021_v32 = vpack.c.bf16 %v2312_v53, %v2304_v42  ;;  %v6277_v27 = vpack.c.bf16 %v2314_v38, %v2306_v55  ;;  %v2369_v42 = vld [vmem:[#allocation10 + $0x1890] sm:$0xff]  ;;  %v2384_v38 = vld [vmem:[#allocation10 + $0x1908] sm:$0xff] }
 0x51f   :  { %v2377_v55 = vld [vmem:[#allocation10 + $0x18d0] sm:$0xff] }
 0x520   :  { %6004 = vmatpush1.bf16.msra.mxu0 %v6003_v6  ;;  %v2320_v6 = vld [vmem:[#allocation10 + $0x1708] sm:$0xff]  ;;  %v6295_v13 = vpack.c.bf16 %v2377_v55, %v2369_v42 }
 0x521   :  { %6260 = vmatpush1.bf16.msra.mxu1 %v6259_v11  ;;  %6006 = vmatprep.subr.bf16.mxu0 %v6005_v22  ;;  %v2328_v11 = vld [vmem:[#allocation10 + $0x1748] sm:$0xff]  ;;  %v2322_v22 = vld [vmem:[#allocation10 + $0x1718] sm:$0xff] }
 0x522   :  { %6262 = vmatprep.subr.bf16.mxu1 %v6261_v47  ;;  %v6025_v47 = vpack.c.bf16 %v2328_v11, %v2320_v6  ;;  %v6281_v31 = vpack.c.bf16 %v2330_v56, %v2322_v22  ;;  %v2391_v6 = vld [vmem:[#allocation10 + $0x1940] sm:$0xff]  ;;  %v2385_v11 = vld [vmem:[#allocation10 + $0x1910] sm:$0xff] }
 0x523   :  { %v2393_v56 = vld [vmem:[#allocation10 + $0x1950] sm:$0xff]  ;;  %v6043_v62 = vpack.c.bf16 %v2391_v6, %v2383_v37  ;;  %v2474_v37 = vld [vmem:[#allocation10 + $0x1bd8] sm:$0xff] }
 0x524   :  { %6008 = vmatpush1.bf16.msra.mxu0 %v6007_v33  ;;  %v2336_v33 = vld [vmem:[#allocation10 + $0x1788] sm:$0xff]  ;;  %v6299_v30 = vpack.c.bf16 %v2393_v56, %v2385_v11  ;;  %v2463_v56 = vld [vmem:[#allocation10 + $0x1b80] sm:$0xff] }
 0x525   :  { %6264 = vmatpush1.bf16.msra.mxu1 %v6263_v61  ;;  %6010 = vmatprep.subr.bf16.mxu0 %v6009_v18  ;;  %v2344_v61 = vld [vmem:[#allocation10 + $0x17c8] sm:$0xff]  ;;  %v2338_v18 = vld [vmem:[#allocation10 + $0x1798] sm:$0xff] }
 0x526   :  { %6266 = vmatprep.subr.bf16.mxu1 %v6265_v2  ;;  %v6029_v2 = vpack.c.bf16 %v2344_v61, %v2336_v33  ;;  %v6285_v48 = vpack.c.bf16 %v2346_v16, %v2338_v18  ;;  %v2407_v33 = vld [vmem:[#allocation10 + $0x19c0] sm:$0xff]  ;;  %v2401_v61 = vld [vmem:[#allocation10 + $0x1990] sm:$0xff] }
 0x527   :  { %v2409_v16 = vld [vmem:[#allocation10 + $0x19d0] sm:$0xff]  ;;  %v6047_v35 = vpack.c.bf16 %v2407_v33, %v2399_v12  ;;  %v2490_v12 = vld [vmem:[#allocation10 + $0x1c58] sm:$0xff] }
 0x528   :  { %6012 = vmatpush1.bf16.msra.mxu0 %v6011_v45  ;;  %v2352_v45 = vld [vmem:[#allocation10 + $0x1808] sm:$0xff]  ;;  %v6303_v49 = vpack.c.bf16 %v2409_v16, %v2401_v61  ;;  %v2479_v16 = vld [vmem:[#allocation10 + $0x1c00] sm:$0xff] }
 0x529   :  { %6268 = vmatpush1.bf16.msra.mxu1 %v6267_v52  ;;  %6014 = vmatprep.subr.bf16.mxu0 %v6013_v34  ;;  %v2360_v52 = vld [vmem:[#allocation10 + $0x1848] sm:$0xff]  ;;  %v2354_v34 = vld [vmem:[#allocation10 + $0x1818] sm:$0xff] }
 0x52a   :  { %6270 = vmatprep.subr.bf16.mxu1 %v6269_v59  ;;  %v6033_v59 = vpack.c.bf16 %v2360_v52, %v2352_v45  ;;  %v6289_v8 = vpack.c.bf16 %v2362_v46, %v2354_v34  ;;  %v2423_v45 = vld [vmem:[#allocation10 + $0x1a40] sm:$0xff]  ;;  %v2417_v52 = vld [vmem:[#allocation10 + $0x1a10] sm:$0xff] }
 0x52b   :  { %v2425_v46 = vld [vmem:[#allocation10 + $0x1a50] sm:$0xff] }
 0x52c   :  { %6016 = vmatpush1.bf16.msra.mxu0 %v6015_v7  ;;  %v2368_v7 = vld [vmem:[#allocation10 + $0x1888] sm:$0xff] }
 0x52d   :  { %6272 = vmatpush1.bf16.msra.mxu1 %v6271_v29  ;;  %6018 = vmatprep.subr.bf16.mxu0 %v6017_v9  ;;  %v2376_v29 = vld [vmem:[#allocation10 + $0x18c8] sm:$0xff]  ;;  %v6035_v9 = vpack.c.bf16 %v2359_v43, %v2351_v3  ;;  %v2442_v3 = vld [vmem:[#allocation10 + $0x1ad8] sm:$0xff]  ;;  %v6051_v43 = vpack.c.bf16 %v2423_v45, %v2415_v23 }
 0x52e   :  { %6274 = vmatprep.subr.bf16.mxu1 %v6273_v15  ;;  %v2367_v15 = vld [vmem:[#allocation10 + $0x1880] sm:$0xff]  ;;  %v6037_v53 = vpack.c.bf16 %v2376_v29, %v2368_v7  ;;  %v2433_v29 = vld [vmem:[#allocation10 + $0x1a90] sm:$0xff]  ;;  %v2506_v23 = vld [vmem:[#allocation10 + $0x1cd8] sm:$0xff] }
 0x52f   :  { %v6039_v17 = vpack.c.bf16 %v2375_v63, %v2367_v15  ;;  %v2439_v7 = vld [vmem:[#allocation10 + $0x1ac0] sm:$0xff]  ;;  %v2450_v15 = vld [vmem:[#allocation10 + $0x1b18] sm:$0xff] }
 0x530   :  { %6020 = vmatpush1.bf16.msra.mxu0 %v6019_v28  ;;  %v2392_v28 = vld [vmem:[#allocation10 + $0x1948] sm:$0xff]  ;;  %v2458_v63 = vld [vmem:[#allocation10 + $0x1b58] sm:$0xff]  ;;  %v6055_v42 = vpack.c.bf16 %v2439_v7, %v2431_v54 }
 0x531   :  { %6276 = vmatpush1.bf16.msra.mxu1 %v6275_v24  ;;  %6022 = vmatprep.subr.bf16.mxu0 %v6021_v32  ;;  %v6293_v24 = vpack.c.bf16 %v2378_v21, %v2370_v25  ;;  %v2386_v32 = vld [vmem:[#allocation10 + $0x1918] sm:$0xff]  ;;  %v2441_v25 = vld [vmem:[#allocation10 + $0x1ad0] sm:$0xff]  ;;  %v2448_v21 = vld [vmem:[#allocation10 + $0x1b08] sm:$0xff] }
 0x532   :  { %6278 = vmatprep.subr.bf16.mxu1 %v6277_v27  ;;  %v6041_v27 = vpack.c.bf16 %v2392_v28, %v2384_v38  ;;  %v6297_v22 = vpack.c.bf16 %v2394_v4, %v2386_v32  ;;  %v2447_v38 = vld [vmem:[#allocation10 + $0x1b00] sm:$0xff]  ;;  %v6313_v32 = vpack.c.bf16 %v2458_v63, %v2450_v15  ;;  %v2457_v4 = vld [vmem:[#allocation10 + $0x1b50] sm:$0xff]  ;;  %v2522_v54 = vld [vmem:[#allocation10 + $0x1d58] sm:$0xff] }
 0x533   :  { %v2455_v28 = vld [vmem:[#allocation10 + $0x1b40] sm:$0xff]  ;;  %v2521_v63 = vld [vmem:[#allocation10 + $0x1d50] sm:$0xff] }
 0x534   :  { %6024 = vmatpush1.bf16.msra.mxu0 %v6023_v14  ;;  %v2400_v14 = vld [vmem:[#allocation10 + $0x1988] sm:$0xff]  ;;  %v6059_v6 = vpack.c.bf16 %v2455_v28, %v2447_v38  ;;  %v2538_v38 = vld [vmem:[#allocation10 + $0x1dd8] sm:$0xff] }
 0x535   :  { %6280 = vmatpush1.bf16.msra.mxu1 %v6279_v19  ;;  %6026 = vmatprep.subr.bf16.mxu0 %v6025_v47  ;;  %v2408_v19 = vld [vmem:[#allocation10 + $0x19c8] sm:$0xff]  ;;  %v2402_v47 = vld [vmem:[#allocation10 + $0x1998] sm:$0xff] }
 0x536   :  { %6282 = vmatprep.subr.bf16.mxu1 %v6281_v31  ;;  %v6045_v31 = vpack.c.bf16 %v2408_v19, %v2400_v14  ;;  %v6301_v18 = vpack.c.bf16 %v2410_v20, %v2402_v47  ;;  %v2471_v14 = vld [vmem:[#allocation10 + $0x1bc0] sm:$0xff]  ;;  %v2465_v19 = vld [vmem:[#allocation10 + $0x1b90] sm:$0xff] }
 0x537   :  { %v2473_v20 = vld [vmem:[#allocation10 + $0x1bd0] sm:$0xff]  ;;  %v6063_v33 = vpack.c.bf16 %v2471_v14, %v2463_v56  ;;  %v2554_v56 = vld [vmem:[#allocation10 + $0x1e58] sm:$0xff] }
 0x538   :  { %6028 = vmatpush1.bf16.msra.mxu0 %v6027_v36  ;;  %v2416_v36 = vld [vmem:[#allocation10 + $0x1a08] sm:$0xff]  ;;  %v6319_v61 = vpack.c.bf16 %v2473_v20, %v2465_v19  ;;  %v2543_v20 = vld [vmem:[#allocation10 + $0x1e00] sm:$0xff] }
 0x539   :  { %6284 = vmatpush1.bf16.msra.mxu1 %v6283_v39  ;;  %6030 = vmatprep.subr.bf16.mxu0 %v6029_v2  ;;  %v2424_v39 = vld [vmem:[#allocation10 + $0x1a48] sm:$0xff]  ;;  %v2418_v2 = vld [vmem:[#allocation10 + $0x1a18] sm:$0xff] }
 0x53a   :  { %6286 = vmatprep.subr.bf16.mxu1 %v6285_v48  ;;  %v6049_v48 = vpack.c.bf16 %v2424_v39, %v2416_v36  ;;  %v6305_v34 = vpack.c.bf16 %v2426_v40, %v2418_v2  ;;  %v2487_v36 = vld [vmem:[#allocation10 + $0x1c40] sm:$0xff]  ;;  %v2481_v39 = vld [vmem:[#allocation10 + $0x1c10] sm:$0xff] }
 0x53b   :  { %v2489_v40 = vld [vmem:[#allocation10 + $0x1c50] sm:$0xff]  ;;  %v6067_v45 = vpack.c.bf16 %v2487_v36, %v2479_v16  ;;  %v2570_v16 = vld [vmem:[#allocation10 + $0x1ed8] sm:$0xff] }
 0x53c   :  { %6032 = vmatpush1.bf16.msra.mxu0 %v6031_v1  ;;  %v2432_v1 = vld [vmem:[#allocation10 + $0x1a88] sm:$0xff] }
 0x53d   :  { %6288 = vmatpush1.bf16.msra.mxu1 %v6287_v58  ;;  %6034 = vmatprep.subr.bf16.mxu0 %v6033_v59  ;;  %v2440_v58 = vld [vmem:[#allocation10 + $0x1ac8] sm:$0xff]  ;;  %v2434_v59 = vld [vmem:[#allocation10 + $0x1a98] sm:$0xff] }
 0x53e   :  { %6290 = vmatprep.subr.bf16.mxu1 %v6289_v8  ;;  %v6307_v8 = vpack.c.bf16 %v2425_v46, %v2417_v52  ;;  %v6053_v60 = vpack.c.bf16 %v2440_v58, %v2432_v1  ;;  %v6323_v52 = vpack.c.bf16 %v2489_v40, %v2481_v39  ;;  %v2495_v46 = vld [vmem:[#allocation10 + $0x1c80] sm:$0xff]  ;;  %v2497_v58 = vld [vmem:[#allocation10 + $0x1c90] sm:$0xff] }
 0x53f   :  { %2856 = vmatmul.mubr.f32.vlgmr.msra.gmra.mrb[22].mxu0 %v8862_v0  ;;  %v2503_v1 = vld [vmem:[#allocation10 + $0x1cc0] sm:$0xff] }
 0x540   :  { %3140 = vmatmul.mubr.f32.vlgmr.msra.gmra.mrb[24].mxu1 %v8862_v0  ;;  %6036 = vmatpush1.bf16.msra.mxu0 %v6035_v9  ;;  %v6309_v9 = vpack.c.bf16 %v2442_v3, %v2434_v59  ;;  %v2505_v3 = vld [vmem:[#allocation10 + $0x1cd0] sm:$0xff]  ;;  %v6071_v7 = vpack.c.bf16 %v2503_v1, %v2495_v46  ;;  %v2559_v40 = vld [vmem:[#allocation10 + $0x1e80] sm:$0xff]  ;;  %v2586_v46 = vld [vmem:[#allocation10 + $0x1f58] sm:$0xff] }
 0x541   :  { %2926 = vmatprep.mubr.f32.mxu0 %v8865_v10  ;;  %6292 = vmatpush1.bf16.msra.mxu1 %v6291_v26  ;;  %v2456_v26 = vld [vmem:[#allocation10 + $0x1b48] sm:$0xff] }
 0x542   :  { %3210 = vmatprep.mubr.f32.mxu1 %v8865_v10  ;;  %6038 = vmatprep.subr.bf16.mxu0 %v6037_v53  ;;  %v6311_v53 = vpack.c.bf16 %v2441_v25, %v2433_v29  ;;  %v6057_v55 = vpack.c.bf16 %v2456_v26, %v2448_v21  ;;  %v6327_v29 = vpack.c.bf16 %v2505_v3, %v2497_v58  ;;  %v2511_v25 = vld [vmem:[#allocation10 + $0x1d00] sm:$0xff]  ;;  %v2513_v26 = vld [vmem:[#allocation10 + $0x1d10] sm:$0xff] }
 0x543   :  { %6294 = vmatprep.subr.bf16.mxu1 %v6293_v24  ;;  %v2449_v24 = vld [vmem:[#allocation10 + $0x1b10] sm:$0xff]  ;;  %v2519_v21 = vld [vmem:[#allocation10 + $0x1d40] sm:$0xff] }
 0x544   :  { %6040 = vmatpush1.bf16.msra.mxu0 %v6039_v17  ;;  %v2464_v17 = vld [vmem:[#allocation10 + $0x1b88] sm:$0xff]  ;;  %v6315_v11 = vpack.c.bf16 %v2457_v4, %v2449_v24  ;;  %v6075_v28 = vpack.c.bf16 %v2519_v21, %v2511_v25  ;;  %v6331_v24 = vpack.c.bf16 %v2521_v63, %v2513_v26  ;;  %v2527_v4 = vld [vmem:[#allocation10 + $0x1d80] sm:$0xff]  ;;  %v2602_v25 = vld [vmem:[#allocation10 + $0x1fd8] sm:$0xff] }
 0x545   :  { %6296 = vmatpush1.bf16.msra.mxu1 %v6295_v13  ;;  %6042 = vmatprep.subr.bf16.mxu0 %v6041_v27  ;;  %v2472_v13 = vld [vmem:[#allocation10 + $0x1bc8] sm:$0xff]  ;;  %v2466_v27 = vld [vmem:[#allocation10 + $0x1b98] sm:$0xff]  ;;  %v2575_v3 = vld [vmem:[#allocation10 + $0x1f00] sm:$0xff] }
 0x546   :  { %6298 = vmatprep.subr.bf16.mxu1 %v6297_v22  ;;  %v6061_v22 = vpack.c.bf16 %v2472_v13, %v2464_v17  ;;  %v6317_v47 = vpack.c.bf16 %v2474_v37, %v2466_v27  ;;  %v2535_v17 = vld [vmem:[#allocation10 + $0x1dc0] sm:$0xff]  ;;  %v2529_v13 = vld [vmem:[#allocation10 + $0x1d90] sm:$0xff] }
 0x547   :  { %v2537_v37 = vld [vmem:[#allocation10 + $0x1dd0] sm:$0xff]  ;;  %v6079_v14 = vpack.c.bf16 %v2535_v17, %v2527_v4  ;;  %v2591_v63 = vld [vmem:[#allocation10 + $0x1f80] sm:$0xff]  ;;  %v1598_v4 = vld [vmem:[#allocation10 + $0x78] sm:$0xff] }
 0x548   :  { %6044 = vmatpush1.bf16.msra.mxu0 %v6043_v62  ;;  %v2480_v62 = vld [vmem:[#allocation10 + $0x1c08] sm:$0xff]  ;;  %v6335_v19 = vpack.c.bf16 %v2537_v37, %v2529_v13  ;;  %v1587_v37 = vld [vmem:[#allocation10 + $0x20] sm:$0xff] }
 0x549   :  { %6300 = vmatpush1.bf16.msra.mxu1 %v6299_v30  ;;  %6046 = vmatprep.subr.bf16.mxu0 %v6045_v31  ;;  %v2488_v30 = vld [vmem:[#allocation10 + $0x1c48] sm:$0xff]  ;;  %v2482_v31 = vld [vmem:[#allocation10 + $0x1c18] sm:$0xff] }
 0x54a   :  { %6302 = vmatprep.subr.bf16.mxu1 %v6301_v18  ;;  %v6065_v18 = vpack.c.bf16 %v2488_v30, %v2480_v62  ;;  %v6321_v2 = vpack.c.bf16 %v2490_v12, %v2482_v31  ;;  %v2551_v62 = vld [vmem:[#allocation10 + $0x1e40] sm:$0xff]  ;;  %v2545_v30 = vld [vmem:[#allocation10 + $0x1e10] sm:$0xff] }
 0x54b   :  { %v2553_v12 = vld [vmem:[#allocation10 + $0x1e50] sm:$0xff]  ;;  %v6083_v36 = vpack.c.bf16 %v2551_v62, %v2543_v20  ;;  %v1606_v20 = vld [vmem:[#allocation10 + $0xb8] sm:$0xff] }
 0x54c   :  { %6048 = vmatpush1.bf16.msra.mxu0 %v6047_v35  ;;  %v2496_v35 = vld [vmem:[#allocation10 + $0x1c88] sm:$0xff]  ;;  %v6339_v39 = vpack.c.bf16 %v2553_v12, %v2545_v30  ;;  %v1614_v62 = vld [vmem:[#allocation10 + $0xf8] sm:$0xff]  ;;  %v1611_v12 = vld [vmem:[#allocation10 + $0xe0] sm:$0xff] }
 0x54d   :  { %6304 = vmatpush1.bf16.msra.mxu1 %v6303_v49  ;;  %6050 = vmatprep.subr.bf16.mxu0 %v6049_v48  ;;  %v2504_v49 = vld [vmem:[#allocation10 + $0x1cc8] sm:$0xff]  ;;  %v2498_v48 = vld [vmem:[#allocation10 + $0x1c98] sm:$0xff] }
 0x54e   :  { %6306 = vmatprep.subr.bf16.mxu1 %v6305_v34  ;;  %v6069_v34 = vpack.c.bf16 %v2504_v49, %v2496_v35  ;;  %v6325_v59 = vpack.c.bf16 %v2506_v23, %v2498_v48  ;;  %v2567_v35 = vld [vmem:[#allocation10 + $0x1ec0] sm:$0xff]  ;;  %v2561_v49 = vld [vmem:[#allocation10 + $0x1e90] sm:$0xff] }
 0x54f   :  { %v2569_v23 = vld [vmem:[#allocation10 + $0x1ed0] sm:$0xff]  ;;  %v6087_v1 = vpack.c.bf16 %v2567_v35, %v2559_v40  ;;  %v1630_v40 = vld [vmem:[#allocation10 + $0x178] sm:$0xff] }
 0x550   :  { %6052 = vmatpush1.bf16.msra.mxu0 %v6051_v43  ;;  %v2512_v43 = vld [vmem:[#allocation10 + $0x1d08] sm:$0xff]  ;;  %v6343_v58 = vpack.c.bf16 %v2569_v23, %v2561_v49  ;;  %v1619_v23 = vld [vmem:[#allocation10 + $0x120] sm:$0xff] }
 0x551   :  { %6308 = vmatpush1.bf16.msra.mxu1 %v6307_v8  ;;  %6054 = vmatprep.subr.bf16.mxu0 %v6053_v60  ;;  %v2520_v8 = vld [vmem:[#allocation10 + $0x1d48] sm:$0xff]  ;;  %v2514_v60 = vld [vmem:[#allocation10 + $0x1d18] sm:$0xff] }
 0x552   :  { %6310 = vmatprep.subr.bf16.mxu1 %v6309_v9  ;;  %v6073_v9 = vpack.c.bf16 %v2520_v8, %v2512_v43  ;;  %v6329_v15 = vpack.c.bf16 %v2522_v54, %v2514_v60  ;;  %v2583_v43 = vld [vmem:[#allocation10 + $0x1f40] sm:$0xff]  ;;  %v2577_v8 = vld [vmem:[#allocation10 + $0x1f10] sm:$0xff] }
 0x553   :  { %v2585_v54 = vld [vmem:[#allocation10 + $0x1f50] sm:$0xff]  ;;  %v6091_v21 = vpack.c.bf16 %v2583_v43, %v2575_v3  ;;  %v1646_v3 = vld [vmem:[#allocation10 + $0x1f8] sm:$0xff] }
 0x554   :  { %6056 = vmatpush1.bf16.msra.mxu0 %v6055_v42  ;;  %v2528_v42 = vld [vmem:[#allocation10 + $0x1d88] sm:$0xff]  ;;  %v6347_v26 = vpack.c.bf16 %v2585_v54, %v2577_v8  ;;  %v1635_v54 = vld [vmem:[#allocation10 + $0x1a0] sm:$0xff] }
 0x555   :  { %6312 = vmatpush1.bf16.msra.mxu1 %v6311_v53  ;;  %6058 = vmatprep.subr.bf16.mxu0 %v6057_v55  ;;  %v2536_v53 = vld [vmem:[#allocation10 + $0x1dc8] sm:$0xff]  ;;  %v2530_v55 = vld [vmem:[#allocation10 + $0x1d98] sm:$0xff] }
 0x556   :  { %6314 = vmatprep.subr.bf16.mxu1 %v6313_v32  ;;  %v6077_v32 = vpack.c.bf16 %v2536_v53, %v2528_v42  ;;  %v6333_v27 = vpack.c.bf16 %v2538_v38, %v2530_v55  ;;  %v2599_v42 = vld [vmem:[#allocation10 + $0x1fc0] sm:$0xff]  ;;  %v2593_v53 = vld [vmem:[#allocation10 + $0x1f90] sm:$0xff] }
 0x557   :  { %v2601_v38 = vld [vmem:[#allocation10 + $0x1fd0] sm:$0xff]  ;;  %v6095_v17 = vpack.c.bf16 %v2599_v42, %v2591_v63 }
 0x558   :  { %6060 = vmatpush1.bf16.msra.mxu0 %v6059_v6  ;;  %v2544_v6 = vld [vmem:[#allocation10 + $0x1e08] sm:$0xff]  ;;  %v6351_v13 = vpack.c.bf16 %v2601_v38, %v2593_v53  ;;  %v1659_v38 = vld [vmem:[#allocation10 + $0x260] sm:$0xff] }
 0x559   :  { %6316 = vmatpush1.bf16.msra.mxu1 %v6315_v11  ;;  %6062 = vmatprep.subr.bf16.mxu0 %v6061_v22  ;;  %v2552_v11 = vld [vmem:[#allocation10 + $0x1e48] sm:$0xff]  ;;  %v2546_v22 = vld [vmem:[#allocation10 + $0x1e18] sm:$0xff] }
 0x55a   :  { %6318 = vmatprep.subr.bf16.mxu1 %v6317_v47  ;;  %v6081_v47 = vpack.c.bf16 %v2552_v11, %v2544_v6  ;;  %v6337_v31 = vpack.c.bf16 %v2554_v56, %v2546_v22  ;;  %v1595_v6 = vld [vmem:[#allocation10 + $0x60] sm:$0xff]  ;;  %v1589_v22 = vld [vmem:[#allocation10 + $0x30] sm:$0xff] }
 0x55b   :  { %v1597_v56 = vld [vmem:[#allocation10 + $0x70] sm:$0xff] }
 0x55c   :  { %6064 = vmatpush1.bf16.msra.mxu0 %v6063_v33  ;;  %v2560_v33 = vld [vmem:[#allocation10 + $0x1e88] sm:$0xff]  ;;  %v6611_v30 = vpack.c.bf16 %v1597_v56, %v1589_v22  ;;  %v1667_v22 = vld [vmem:[#allocation10 + $0x2a0] sm:$0xff] }
 0x55d   :  { %6320 = vmatpush1.bf16.msra.mxu1 %v6319_v61  ;;  %6066 = vmatprep.subr.bf16.mxu0 %v6065_v18  ;;  %v2568_v61 = vld [vmem:[#allocation10 + $0x1ec8] sm:$0xff]  ;;  %v2562_v18 = vld [vmem:[#allocation10 + $0x1e98] sm:$0xff]  ;;  %v1675_v56 = vld [vmem:[#allocation10 + $0x2e0] sm:$0xff] }
 0x55e   :  { %6322 = vmatprep.subr.bf16.mxu1 %v6321_v2  ;;  %v6085_v2 = vpack.c.bf16 %v2568_v61, %v2560_v33  ;;  %v6341_v48 = vpack.c.bf16 %v2570_v16, %v2562_v18  ;;  %v1605_v33 = vld [vmem:[#allocation10 + $0xb0] sm:$0xff]  ;;  %v1620_v16 = vld [vmem:[#allocation10 + $0x128] sm:$0xff] }
 0x55f   :  { %v1613_v18 = vld [vmem:[#allocation10 + $0xf0] sm:$0xff] }
 0x560   :  { %6068 = vmatpush1.bf16.msra.mxu0 %v6067_v45  ;;  %v2576_v45 = vld [vmem:[#allocation10 + $0x1f08] sm:$0xff]  ;;  %v6615_v49 = vpack.c.bf16 %v1613_v18, %v1605_v33  ;;  %v1683_v18 = vld [vmem:[#allocation10 + $0x320] sm:$0xff] }
 0x561   :  { %6324 = vmatpush1.bf16.msra.mxu1 %v6323_v52  ;;  %6070 = vmatprep.subr.bf16.mxu0 %v6069_v34  ;;  %v2584_v52 = vld [vmem:[#allocation10 + $0x1f48] sm:$0xff]  ;;  %v2578_v34 = vld [vmem:[#allocation10 + $0x1f18] sm:$0xff] }
 0x562   :  { %6326 = vmatprep.subr.bf16.mxu1 %v6325_v59  ;;  %v6089_v59 = vpack.c.bf16 %v2584_v52, %v2576_v45  ;;  %v6345_v60 = vpack.c.bf16 %v2586_v46, %v2578_v34  ;;  %v1627_v45 = vld [vmem:[#allocation10 + $0x160] sm:$0xff]  ;;  %v1621_v52 = vld [vmem:[#allocation10 + $0x130] sm:$0xff] }
 0x563   :  { %v1629_v46 = vld [vmem:[#allocation10 + $0x170] sm:$0xff]  ;;  %v6363_v43 = vpack.c.bf16 %v1627_v45, %v1619_v23 }
 0x564   :  { %6072 = vmatpush1.bf16.msra.mxu0 %v6071_v7  ;;  %v2592_v7 = vld [vmem:[#allocation10 + $0x1f88] sm:$0xff]  ;;  %v6619_v8 = vpack.c.bf16 %v1629_v46, %v1621_v52  ;;  %v1707_v46 = vld [vmem:[#allocation10 + $0x3e0] sm:$0xff] }
 0x565   :  { %6328 = vmatpush1.bf16.msra.mxu1 %v6327_v29  ;;  %6074 = vmatprep.subr.bf16.mxu0 %v6073_v9  ;;  %v2600_v29 = vld [vmem:[#allocation10 + $0x1fc8] sm:$0xff]  ;;  %v2594_v9 = vld [vmem:[#allocation10 + $0x1f98] sm:$0xff] }
 0x566   :  { %6330 = vmatprep.subr.bf16.mxu1 %v6329_v15  ;;  %v6093_v15 = vpack.c.bf16 %v2600_v29, %v2592_v7  ;;  %v6349_v55 = vpack.c.bf16 %v2602_v25, %v2594_v9  ;;  %v1643_v7 = vld [vmem:[#allocation10 + $0x1e0] sm:$0xff]  ;;  %v1637_v29 = vld [vmem:[#allocation10 + $0x1b0] sm:$0xff]  ;;  %v1652_v25 = vld [vmem:[#allocation10 + $0x228] sm:$0xff] }
 0x567   :  { %v6367_v63 = vpack.c.bf16 %v1643_v7, %v1635_v54 }
 0x568   :  { %6076 = vmatpush1.bf16.msra.mxu0 %v6075_v28  ;;  %v1588_v28 = vld [vmem:[#allocation10 + $0x28] sm:$0xff] }
 0x569   :  { %6332 = vmatpush1.bf16.msra.mxu1 %v6331_v24  ;;  %6078 = vmatprep.subr.bf16.mxu0 %v6077_v32  ;;  %v1596_v24 = vld [vmem:[#allocation10 + $0x68] sm:$0xff]  ;;  %v1590_v32 = vld [vmem:[#allocation10 + $0x38] sm:$0xff] }
 0x56a   :  { %6334 = vmatprep.subr.bf16.mxu1 %v6333_v27  ;;  %v6353_v27 = vpack.c.bf16 %v1596_v24, %v1588_v28  ;;  %v6609_v11 = vpack.c.bf16 %v1598_v4, %v1590_v32  ;;  %v1653_v28 = vld [vmem:[#allocation10 + $0x230] sm:$0xff]  ;;  %v1668_v4 = vld [vmem:[#allocation10 + $0x2a8] sm:$0xff] }
 0x56b   :  { %v1661_v32 = vld [vmem:[#allocation10 + $0x270] sm:$0xff] }
 0x56c   :  { %6080 = vmatpush1.bf16.msra.mxu0 %v6079_v14  ;;  %v1604_v14 = vld [vmem:[#allocation10 + $0xa8] sm:$0xff] }
 0x56d   :  { %6336 = vmatpush1.bf16.msra.mxu1 %v6335_v19  ;;  %6082 = vmatprep.subr.bf16.mxu0 %v6081_v47  ;;  %v1612_v19 = vld [vmem:[#allocation10 + $0xe8] sm:$0xff]  ;;  %v6355_v47 = vpack.c.bf16 %v1595_v6, %v1587_v37  ;;  %v6627_v6 = vpack.c.bf16 %v1661_v32, %v1653_v28  ;;  %v1739_v32 = vld [vmem:[#allocation10 + $0x4e0] sm:$0xff] }
 0x56e   :  { %6338 = vmatprep.subr.bf16.mxu1 %v6337_v31  ;;  %v1603_v31 = vld [vmem:[#allocation10 + $0xa0] sm:$0xff]  ;;  %v6357_v61 = vpack.c.bf16 %v1612_v19, %v1604_v14  ;;  %v1669_v14 = vld [vmem:[#allocation10 + $0x2b0] sm:$0xff] }
 0x56f   :  { %v6359_v35 = vpack.c.bf16 %v1611_v12, %v1603_v31  ;;  %v1694_v31 = vld [vmem:[#allocation10 + $0x378] sm:$0xff]  ;;  %v6375_v12 = vpack.c.bf16 %v1675_v56, %v1667_v22 }
 0x570   :  { %6084 = vmatpush1.bf16.msra.mxu0 %v6083_v36  ;;  %v1628_v36 = vld [vmem:[#allocation10 + $0x168] sm:$0xff] }
 0x571   :  { %6340 = vmatpush1.bf16.msra.mxu1 %v6339_v39  ;;  %6086 = vmatprep.subr.bf16.mxu0 %v6085_v2  ;;  %v6613_v39 = vpack.c.bf16 %v1614_v62, %v1606_v20  ;;  %v1622_v2 = vld [vmem:[#allocation10 + $0x138] sm:$0xff]  ;;  %v1684_v20 = vld [vmem:[#allocation10 + $0x328] sm:$0xff] }
 0x572   :  { %6342 = vmatprep.subr.bf16.mxu1 %v6341_v48  ;;  %v6361_v48 = vpack.c.bf16 %v1628_v36, %v1620_v16  ;;  %v6617_v34 = vpack.c.bf16 %v1630_v40, %v1622_v2  ;;  %v1692_v62 = vld [vmem:[#allocation10 + $0x368] sm:$0xff]  ;;  %v1691_v16 = vld [vmem:[#allocation10 + $0x360] sm:$0xff]  ;;  %v1685_v36 = vld [vmem:[#allocation10 + $0x330] sm:$0xff] }
 0x573   :  { %v1693_v2 = vld [vmem:[#allocation10 + $0x370] sm:$0xff]  ;;  %v1700_v40 = vld [vmem:[#allocation10 + $0x3a8] sm:$0xff]  ;;  %v6379_v23 = vpack.c.bf16 %v1691_v16, %v1683_v18 }
 0x574   :  { %6088 = vmatpush1.bf16.msra.mxu0 %v6087_v1  ;;  %v1636_v1 = vld [vmem:[#allocation10 + $0x1a8] sm:$0xff]  ;;  %v6635_v45 = vpack.c.bf16 %v1693_v2, %v1685_v36  ;;  %v1771_v2 = vld [vmem:[#allocation10 + $0x5e0] sm:$0xff] }
 0x575   :  { %6344 = vmatpush1.bf16.msra.mxu1 %v6343_v58  ;;  %6090 = vmatprep.subr.bf16.mxu0 %v6089_v59  ;;  %v1644_v58 = vld [vmem:[#allocation10 + $0x1e8] sm:$0xff]  ;;  %v1638_v59 = vld [vmem:[#allocation10 + $0x1b8] sm:$0xff] }
 0x576   :  { %6346 = vmatprep.subr.bf16.mxu1 %v6345_v60  ;;  %v6365_v60 = vpack.c.bf16 %v1644_v58, %v1636_v1  ;;  %v6621_v9 = vpack.c.bf16 %v1646_v3, %v1638_v59  ;;  %v1701_v1 = vld [vmem:[#allocation10 + $0x3b0] sm:$0xff]  ;;  %v1716_v3 = vld [vmem:[#allocation10 + $0x428] sm:$0xff] }
 0x577   :  { %v1709_v59 = vld [vmem:[#allocation10 + $0x3f0] sm:$0xff] }
 0x578   :  { %6092 = vmatpush1.bf16.msra.mxu0 %v6091_v21  ;;  %v1660_v21 = vld [vmem:[#allocation10 + $0x268] sm:$0xff]  ;;  %v6639_v7 = vpack.c.bf16 %v1709_v59, %v1701_v1  ;;  %v1787_v59 = vld [vmem:[#allocation10 + $0x660] sm:$0xff] }
 0x579   :  { %6348 = vmatpush1.bf16.msra.mxu1 %v6347_v26  ;;  %6094 = vmatprep.subr.bf16.mxu0 %v6093_v15  ;;  %v1654_v26 = vld [vmem:[#allocation10 + $0x238] sm:$0xff]  ;;  %v6369_v53 = vpack.c.bf16 %v1660_v21, %v1652_v25  ;;  %v1717_v25 = vld [vmem:[#allocation10 + $0x430] sm:$0xff] }
 0x57a   :  { %6350 = vmatprep.subr.bf16.mxu1 %v6349_v55  ;;  %v1662_v15 = vld [vmem:[#allocation10 + $0x278] sm:$0xff]  ;;  %v1651_v55 = vld [vmem:[#allocation10 + $0x220] sm:$0xff] }
 0x57b   :  { %v6625_v24 = vpack.c.bf16 %v1662_v15, %v1654_v26  ;;  %v6371_v37 = vpack.c.bf16 %v1659_v38, %v1651_v55  ;;  %v1725_v26 = vld [vmem:[#allocation10 + $0x470] sm:$0xff]  ;;  %v1732_v15 = vld [vmem:[#allocation10 + $0x4a8] sm:$0xff] }
 0x57c   :  { %6096 = vmatpush1.bf16.msra.mxu0 %v6095_v17  ;;  %v1676_v17 = vld [vmem:[#allocation10 + $0x2e8] sm:$0xff]  ;;  %v6643_v38 = vpack.c.bf16 %v1725_v26, %v1717_v25  ;;  %v1803_v26 = vld [vmem:[#allocation10 + $0x6e0] sm:$0xff] }
 0x57d   :  { %6352 = vmatpush1.bf16.msra.mxu1 %v6351_v13  ;;  %6354 = vmatprep.subr.bf16.mxu0 %v6353_v27  ;;  %v1670_v13 = vld [vmem:[#allocation10 + $0x2b8] sm:$0xff] }
 0x57e   :  { %6610 = vmatprep.subr.bf16.mxu1 %v6609_v11  ;;  %v1678_v27 = vld [vmem:[#allocation10 + $0x2f8] sm:$0xff]  ;;  %v6373_v11 = vpack.c.bf16 %v1676_v17, %v1668_v4  ;;  %v1733_v4 = vld [vmem:[#allocation10 + $0x4b0] sm:$0xff] }
 0x57f   :  { %2927 = vmatmul.mubr.f32.vlgmr.msra.gmra.mrb[22].mxu0 %v8870_v57  ;;  %v6629_v19 = vpack.c.bf16 %v1678_v27, %v1670_v13  ;;  %v1741_v13 = vld [vmem:[#allocation10 + $0x4f0] sm:$0xff]  ;;  %v1748_v27 = vld [vmem:[#allocation10 + $0x528] sm:$0xff] }
 0x580   :  { %3211 = vmatmul.mubr.f32.vlgmr.msra.gmra.mrb[24].mxu1 %v8870_v57  ;;  %6356 = vmatpush1.bf16.msra.mxu0 %v6355_v47  ;;  %v1677_v47 = vld [vmem:[#allocation10 + $0x2f0] sm:$0xff]  ;;  %v6647_v56 = vpack.c.bf16 %v1741_v13, %v1733_v4  ;;  %v1819_v13 = vld [vmem:[#allocation10 + $0x760] sm:$0xff] }
 0x581   :  { %3281 = vmatprep.mubr.f32.mxu0 %v8776_v44  ;;  %6612 = vmatpush1.bf16.msra.mxu1 %v6611_v30  ;;  %v1686_v30 = vld [vmem:[#allocation10 + $0x338] sm:$0xff]  ;;  %v6631_v33 = vpack.c.bf16 %v1677_v47, %v1669_v14  ;;  %v1755_v47 = vld [vmem:[#allocation10 + $0x560] sm:$0xff] }
 0x582   :  { %3565 = vmatprep.mubr.f32.mxu1 %v8776_v44  ;;  %6358 = vmatprep.subr.bf16.mxu0 %v6357_v61  ;;  %v1645_v44 = vld [vmem:[#allocation10 + $0x1f0] sm:$0xff]  ;;  %v6377_v61 = vpack.c.bf16 %v1692_v62, %v1684_v20 }
 0x583   :  { %6614 = vmatprep.subr.bf16.mxu1 %v6613_v39  ;;  %v6623_v42 = vpack.c.bf16 %v1645_v44, %v1637_v29  ;;  %v6633_v39 = vpack.c.bf16 %v1694_v31, %v1686_v30  ;;  %v1723_v44 = vld [vmem:[#allocation10 + $0x460] sm:$0xff]  ;;  %v1749_v20 = vld [vmem:[#allocation10 + $0x530] sm:$0xff]  ;;  %v1764_v31 = vld [vmem:[#allocation10 + $0x5a8] sm:$0xff] }
 0x584   :  { %6360 = vmatpush1.bf16.msra.mxu0 %v6359_v35  ;;  %v1708_v35 = vld [vmem:[#allocation10 + $0x3e8] sm:$0xff]  ;;  %v1757_v30 = vld [vmem:[#allocation10 + $0x570] sm:$0xff] }
 0x585   :  { %6616 = vmatpush1.bf16.msra.mxu1 %v6615_v49  ;;  %6362 = vmatprep.subr.bf16.mxu0 %v6361_v48  ;;  %v1702_v49 = vld [vmem:[#allocation10 + $0x3b8] sm:$0xff]  ;;  %v6381_v52 = vpack.c.bf16 %v1708_v35, %v1700_v40  ;;  %v6651_v16 = vpack.c.bf16 %v1757_v30, %v1749_v20  ;;  %v1765_v40 = vld [vmem:[#allocation10 + $0x5b0] sm:$0xff]  ;;  %v1835_v30 = vld [vmem:[#allocation10 + $0x7e0] sm:$0xff] }
 0x586   :  { %6618 = vmatprep.subr.bf16.mxu1 %v6617_v34  ;;  %v1710_v48 = vld [vmem:[#allocation10 + $0x3f8] sm:$0xff]  ;;  %v1699_v34 = vld [vmem:[#allocation10 + $0x3a0] sm:$0xff] }
 0x587   :  { %v6637_v58 = vpack.c.bf16 %v1710_v48, %v1702_v49  ;;  %v6383_v54 = vpack.c.bf16 %v1707_v46, %v1699_v34  ;;  %v1773_v49 = vld [vmem:[#allocation10 + $0x5f0] sm:$0xff]  ;;  %v1780_v48 = vld [vmem:[#allocation10 + $0x628] sm:$0xff] }
 0x588   :  { %6364 = vmatpush1.bf16.msra.mxu0 %v6363_v43  ;;  %v1724_v43 = vld [vmem:[#allocation10 + $0x468] sm:$0xff]  ;;  %v6655_v46 = vpack.c.bf16 %v1773_v49, %v1765_v40  ;;  %v1851_v49 = vld [vmem:[#allocation10 + $0x860] sm:$0xff] }
 0x589   :  { %6620 = vmatpush1.bf16.msra.mxu1 %v6619_v8  ;;  %6366 = vmatprep.subr.bf16.mxu0 %v6365_v60  ;;  %v1718_v8 = vld [vmem:[#allocation10 + $0x438] sm:$0xff]  ;;  %v6385_v29 = vpack.c.bf16 %v1724_v43, %v1716_v3  ;;  %v1781_v3 = vld [vmem:[#allocation10 + $0x630] sm:$0xff] }
 0x58a   :  { %6622 = vmatprep.subr.bf16.mxu1 %v6621_v9  ;;  %v1726_v60 = vld [vmem:[#allocation10 + $0x478] sm:$0xff]  ;;  %v1715_v9 = vld [vmem:[#allocation10 + $0x420] sm:$0xff] }
 0x58b   :  { %v6641_v21 = vpack.c.bf16 %v1726_v60, %v1718_v8  ;;  %v6387_v55 = vpack.c.bf16 %v1723_v44, %v1715_v9  ;;  %v1789_v8 = vld [vmem:[#allocation10 + $0x670] sm:$0xff]  ;;  %v1796_v60 = vld [vmem:[#allocation10 + $0x6a8] sm:$0xff] }
 0x58c   :  { %6368 = vmatpush1.bf16.msra.mxu0 %v6367_v63  ;;  %v1740_v63 = vld [vmem:[#allocation10 + $0x4e8] sm:$0xff]  ;;  %v6659_v44 = vpack.c.bf16 %v1789_v8, %v1781_v3  ;;  %v1859_v3 = vld [vmem:[#allocation10 + $0x8a0] sm:$0xff]  ;;  %v1861_v8 = vld [vmem:[#allocation10 + $0x8b0] sm:$0xff] }
 0x58d   :  { %6624 = vmatpush1.bf16.msra.mxu1 %v6623_v42  ;;  %6370 = vmatprep.subr.bf16.mxu0 %v6369_v53  ;;  %v1734_v42 = vld [vmem:[#allocation10 + $0x4b8] sm:$0xff]  ;;  %v6389_v28 = vpack.c.bf16 %v1740_v63, %v1732_v15  ;;  %v1797_v15 = vld [vmem:[#allocation10 + $0x6b0] sm:$0xff] }
 0x58e   :  { %6626 = vmatprep.subr.bf16.mxu1 %v6625_v24  ;;  %v1742_v53 = vld [vmem:[#allocation10 + $0x4f8] sm:$0xff]  ;;  %v1731_v24 = vld [vmem:[#allocation10 + $0x4a0] sm:$0xff] }
 0x58f   :  { %v6645_v17 = vpack.c.bf16 %v1742_v53, %v1734_v42  ;;  %v6391_v22 = vpack.c.bf16 %v1739_v32, %v1731_v24  ;;  %v1805_v42 = vld [vmem:[#allocation10 + $0x6f0] sm:$0xff]  ;;  %v1812_v53 = vld [vmem:[#allocation10 + $0x728] sm:$0xff] }
 0x590   :  { %6372 = vmatpush1.bf16.msra.mxu0 %v6371_v37  ;;  %v1756_v37 = vld [vmem:[#allocation10 + $0x568] sm:$0xff]  ;;  %v6663_v32 = vpack.c.bf16 %v1805_v42, %v1797_v15  ;;  %v1883_v42 = vld [vmem:[#allocation10 + $0x960] sm:$0xff] }
 0x591   :  { %6628 = vmatpush1.bf16.msra.mxu1 %v6627_v6  ;;  %6374 = vmatprep.subr.bf16.mxu0 %v6373_v11  ;;  %v1750_v6 = vld [vmem:[#allocation10 + $0x538] sm:$0xff]  ;;  %v6393_v14 = vpack.c.bf16 %v1756_v37, %v1748_v27  ;;  %v1813_v27 = vld [vmem:[#allocation10 + $0x730] sm:$0xff] }
 0x592   :  { %6630 = vmatprep.subr.bf16.mxu1 %v6629_v19  ;;  %v1758_v11 = vld [vmem:[#allocation10 + $0x578] sm:$0xff]  ;;  %v1747_v19 = vld [vmem:[#allocation10 + $0x520] sm:$0xff] }
 0x593   :  { %v6649_v62 = vpack.c.bf16 %v1758_v11, %v1750_v6  ;;  %v6395_v18 = vpack.c.bf16 %v1755_v47, %v1747_v19  ;;  %v1821_v6 = vld [vmem:[#allocation10 + $0x770] sm:$0xff]  ;;  %v1828_v11 = vld [vmem:[#allocation10 + $0x7a8] sm:$0xff] }
 0x594   :  { %6376 = vmatpush1.bf16.msra.mxu0 %v6375_v12  ;;  %v1772_v12 = vld [vmem:[#allocation10 + $0x5e8] sm:$0xff]  ;;  %v6667_v47 = vpack.c.bf16 %v1821_v6, %v1813_v27  ;;  %v1891_v27 = vld [vmem:[#allocation10 + $0x9a0] sm:$0xff]  ;;  %v1893_v6 = vld [vmem:[#allocation10 + $0x9b0] sm:$0xff] }
 0x595   :  { %6632 = vmatpush1.bf16.msra.mxu1 %v6631_v33  ;;  %6378 = vmatprep.subr.bf16.mxu0 %v6377_v61  ;;  %v1766_v33 = vld [vmem:[#allocation10 + $0x5b8] sm:$0xff]  ;;  %v6397_v36 = vpack.c.bf16 %v1772_v12, %v1764_v31  ;;  %v1829_v31 = vld [vmem:[#allocation10 + $0x7b0] sm:$0xff] }
 0x596   :  { %6634 = vmatprep.subr.bf16.mxu1 %v6633_v39  ;;  %v1774_v61 = vld [vmem:[#allocation10 + $0x5f8] sm:$0xff]  ;;  %v1763_v39 = vld [vmem:[#allocation10 + $0x5a0] sm:$0xff] }
 0x597   :  { %v6653_v35 = vpack.c.bf16 %v1774_v61, %v1766_v33  ;;  %v6399_v34 = vpack.c.bf16 %v1771_v2, %v1763_v39  ;;  %v1837_v33 = vld [vmem:[#allocation10 + $0x7f0] sm:$0xff]  ;;  %v1844_v61 = vld [vmem:[#allocation10 + $0x828] sm:$0xff] }
 0x598   :  { %6380 = vmatpush1.bf16.msra.mxu0 %v6379_v23  ;;  %v1788_v23 = vld [vmem:[#allocation10 + $0x668] sm:$0xff]  ;;  %v6671_v2 = vpack.c.bf16 %v1837_v33, %v1829_v31  ;;  %v1915_v31 = vld [vmem:[#allocation10 + $0xa60] sm:$0xff] }
 0x599   :  { %6636 = vmatpush1.bf16.msra.mxu1 %v6635_v45  ;;  %6382 = vmatprep.subr.bf16.mxu0 %v6381_v52  ;;  %v1782_v45 = vld [vmem:[#allocation10 + $0x638] sm:$0xff]  ;;  %v6401_v1 = vpack.c.bf16 %v1788_v23, %v1780_v48  ;;  %v1845_v23 = vld [vmem:[#allocation10 + $0x830] sm:$0xff] }
 0x59a   :  { %6638 = vmatprep.subr.bf16.mxu1 %v6637_v58  ;;  %v1790_v52 = vld [vmem:[#allocation10 + $0x678] sm:$0xff]  ;;  %v1779_v58 = vld [vmem:[#allocation10 + $0x620] sm:$0xff] }
 0x59b   :  { %v6657_v43 = vpack.c.bf16 %v1790_v52, %v1782_v45  ;;  %v6403_v9 = vpack.c.bf16 %v1787_v59, %v1779_v58  ;;  %v1853_v45 = vld [vmem:[#allocation10 + $0x870] sm:$0xff]  ;;  %v1860_v52 = vld [vmem:[#allocation10 + $0x8a8] sm:$0xff]  ;;  %v1870_v58 = vld [vmem:[#allocation10 + $0x8f8] sm:$0xff] }
 0x59c   :  { %6384 = vmatpush1.bf16.msra.mxu0 %v6383_v54  ;;  %v1804_v54 = vld [vmem:[#allocation10 + $0x6e8] sm:$0xff]  ;;  %v6675_v59 = vpack.c.bf16 %v1853_v45, %v1845_v23  ;;  %v1925_v23 = vld [vmem:[#allocation10 + $0xab0] sm:$0xff] }
 0x59d   :  { %6640 = vmatpush1.bf16.msra.mxu1 %v6639_v7  ;;  %6386 = vmatprep.subr.bf16.mxu0 %v6385_v29  ;;  %v1798_v7 = vld [vmem:[#allocation10 + $0x6b8] sm:$0xff]  ;;  %v6405_v25 = vpack.c.bf16 %v1804_v54, %v1796_v60  ;;  %v1869_v54 = vld [vmem:[#allocation10 + $0x8f0] sm:$0xff] }
 0x59e   :  { %6642 = vmatprep.subr.bf16.mxu1 %v6641_v21  ;;  %v1806_v29 = vld [vmem:[#allocation10 + $0x6f8] sm:$0xff]  ;;  %v1795_v21 = vld [vmem:[#allocation10 + $0x6a0] sm:$0xff] }
 0x59f   :  { %v6661_v63 = vpack.c.bf16 %v1806_v29, %v1798_v7  ;;  %v6407_v24 = vpack.c.bf16 %v1803_v26, %v1795_v21  ;;  %v1876_v7 = vld [vmem:[#allocation10 + $0x928] sm:$0xff]  ;;  %v6679_v26 = vpack.c.bf16 %v1869_v54, %v1861_v8  ;;  %v1939_v8 = vld [vmem:[#allocation10 + $0xb20] sm:$0xff]  ;;  %v1941_v54 = vld [vmem:[#allocation10 + $0xb30] sm:$0xff] }
 0x5a0   :  { %6388 = vmatpush1.bf16.msra.mxu0 %v6387_v55  ;;  %v1820_v55 = vld [vmem:[#allocation10 + $0x768] sm:$0xff] }
 0x5a1   :  { %6644 = vmatpush1.bf16.msra.mxu1 %v6643_v38  ;;  %6390 = vmatprep.subr.bf16.mxu0 %v6389_v28  ;;  %v1814_v38 = vld [vmem:[#allocation10 + $0x738] sm:$0xff]  ;;  %v6409_v4 = vpack.c.bf16 %v1820_v55, %v1812_v53  ;;  %v1884_v29 = vld [vmem:[#allocation10 + $0x968] sm:$0xff]  ;;  %v1877_v53 = vld [vmem:[#allocation10 + $0x930] sm:$0xff] }
 0x5a2   :  { %6646 = vmatprep.subr.bf16.mxu1 %v6645_v17  ;;  %v1822_v28 = vld [vmem:[#allocation10 + $0x778] sm:$0xff]  ;;  %v1811_v17 = vld [vmem:[#allocation10 + $0x720] sm:$0xff]  ;;  %v6425_v15 = vpack.c.bf16 %v1884_v29, %v1876_v7  ;;  %v1949_v29 = vld [vmem:[#allocation10 + $0xb70] sm:$0xff] }
 0x5a3   :  { %v6665_v37 = vpack.c.bf16 %v1822_v28, %v1814_v38  ;;  %v6411_v19 = vpack.c.bf16 %v1819_v13, %v1811_v17  ;;  %v1885_v38 = vld [vmem:[#allocation10 + $0x970] sm:$0xff]  ;;  %v1892_v28 = vld [vmem:[#allocation10 + $0x9a8] sm:$0xff] }
 0x5a4   :  { %6392 = vmatpush1.bf16.msra.mxu0 %v6391_v22  ;;  %v1836_v22 = vld [vmem:[#allocation10 + $0x7e8] sm:$0xff]  ;;  %v6683_v17 = vpack.c.bf16 %v1885_v38, %v1877_v53  ;;  %v1963_v53 = vld [vmem:[#allocation10 + $0xbe0] sm:$0xff] }
 0x5a5   :  { %6648 = vmatpush1.bf16.msra.mxu1 %v6647_v56  ;;  %6394 = vmatprep.subr.bf16.mxu0 %v6393_v14  ;;  %v1830_v56 = vld [vmem:[#allocation10 + $0x7b8] sm:$0xff]  ;;  %v6413_v20 = vpack.c.bf16 %v1836_v22, %v1828_v11  ;;  %v1908_v22 = vld [vmem:[#allocation10 + $0xa28] sm:$0xff] }
 0x5a6   :  { %6650 = vmatprep.subr.bf16.mxu1 %v6649_v62  ;;  %v1838_v14 = vld [vmem:[#allocation10 + $0x7f8] sm:$0xff]  ;;  %v1827_v62 = vld [vmem:[#allocation10 + $0x7a0] sm:$0xff] }
 0x5a7   :  { %v6669_v12 = vpack.c.bf16 %v1838_v14, %v1830_v56  ;;  %v6415_v39 = vpack.c.bf16 %v1835_v30, %v1827_v62  ;;  %v1916_v56 = vld [vmem:[#allocation10 + $0xa68] sm:$0xff]  ;;  %v1910_v14 = vld [vmem:[#allocation10 + $0xa38] sm:$0xff]  ;;  %v1907_v30 = vld [vmem:[#allocation10 + $0xa20] sm:$0xff] }
 0x5a8   :  { %6396 = vmatpush1.bf16.msra.mxu0 %v6395_v18  ;;  %v1852_v18 = vld [vmem:[#allocation10 + $0x868] sm:$0xff]  ;;  %v6433_v62 = vpack.c.bf16 %v1916_v56, %v1908_v22  ;;  %v1981_v22 = vld [vmem:[#allocation10 + $0xc70] sm:$0xff] }
 0x5a9   :  { %6652 = vmatpush1.bf16.msra.mxu1 %v6651_v16  ;;  %6398 = vmatprep.subr.bf16.mxu0 %v6397_v36  ;;  %v1846_v16 = vld [vmem:[#allocation10 + $0x838] sm:$0xff]  ;;  %v6417_v40 = vpack.c.bf16 %v1852_v18, %v1844_v61  ;;  %v1917_v61 = vld [vmem:[#allocation10 + $0xa70] sm:$0xff]  ;;  %v1924_v18 = vld [vmem:[#allocation10 + $0xaa8] sm:$0xff] }
 0x5aa   :  { %6654 = vmatprep.subr.bf16.mxu1 %v6653_v35  ;;  %v1854_v36 = vld [vmem:[#allocation10 + $0x878] sm:$0xff]  ;;  %v1843_v35 = vld [vmem:[#allocation10 + $0x820] sm:$0xff]  ;;  %v1988_v56 = vld [vmem:[#allocation10 + $0xca8] sm:$0xff] }
 0x5ab   :  { %v6673_v48 = vpack.c.bf16 %v1854_v36, %v1846_v16  ;;  %v1932_v16 = vld [vmem:[#allocation10 + $0xae8] sm:$0xff]  ;;  %v1926_v36 = vld [vmem:[#allocation10 + $0xab8] sm:$0xff] }
 0x5ac   :  { %6400 = vmatpush1.bf16.msra.mxu0 %v6399_v34  ;;  %v1868_v34 = vld [vmem:[#allocation10 + $0x8e8] sm:$0xff] }
 0x5ad   :  { %6656 = vmatpush1.bf16.msra.mxu1 %v6655_v46  ;;  %6402 = vmatprep.subr.bf16.mxu0 %v6401_v1  ;;  %v6419_v46 = vpack.c.bf16 %v1851_v49, %v1843_v35  ;;  %v1862_v1 = vld [vmem:[#allocation10 + $0x8b8] sm:$0xff]  ;;  %v6421_v60 = vpack.c.bf16 %v1868_v34, %v1860_v52  ;;  %v6437_v35 = vpack.c.bf16 %v1932_v16, %v1924_v18  ;;  %v1923_v49 = vld [vmem:[#allocation10 + $0xaa0] sm:$0xff]  ;;  %v1933_v52 = vld [vmem:[#allocation10 + $0xaf0] sm:$0xff] }
 0x5ae   :  { %6658 = vmatprep.subr.bf16.mxu1 %v6657_v43  ;;  %v1867_v43 = vld [vmem:[#allocation10 + $0x8e0] sm:$0xff]  ;;  %v1940_v34 = vld [vmem:[#allocation10 + $0xb28] sm:$0xff]  ;;  %v1997_v18 = vld [vmem:[#allocation10 + $0xcf0] sm:$0xff] }
 0x5af   :  { %v6423_v21 = vpack.c.bf16 %v1867_v43, %v1859_v3  ;;  %v6695_v3 = vpack.c.bf16 %v1933_v52, %v1925_v23  ;;  %v2004_v16 = vld [vmem:[#allocation10 + $0xd28] sm:$0xff]  ;;  %v2011_v23 = vld [vmem:[#allocation10 + $0xd60] sm:$0xff] }
 0x5b0   :  { %6404 = vmatpush1.bf16.msra.mxu0 %v6403_v9  ;;  %v6677_v9 = vpack.c.bf16 %v1870_v58, %v1862_v1  ;;  %v1942_v1 = vld [vmem:[#allocation10 + $0xb38] sm:$0xff] }
 0x5b1   :  { %6660 = vmatpush1.bf16.msra.mxu1 %v6659_v44  ;;  %6406 = vmatprep.subr.bf16.mxu0 %v6405_v25  ;;  %v1878_v44 = vld [vmem:[#allocation10 + $0x938] sm:$0xff] }
 0x5b2   :  { %6662 = vmatprep.subr.bf16.mxu1 %v6661_v63  ;;  %v1886_v25 = vld [vmem:[#allocation10 + $0x978] sm:$0xff]  ;;  %v1875_v63 = vld [vmem:[#allocation10 + $0x920] sm:$0xff] }
 0x5b3   :  { %v6681_v55 = vpack.c.bf16 %v1886_v25, %v1878_v44  ;;  %v1950_v58 = vld [vmem:[#allocation10 + $0xb78] sm:$0xff]  ;;  %v1964_v44 = vld [vmem:[#allocation10 + $0xbe8] sm:$0xff] }
 0x5b4   :  { %6408 = vmatpush1.bf16.msra.mxu0 %v6407_v24  ;;  %v1900_v24 = vld [vmem:[#allocation10 + $0x9e8] sm:$0xff]  ;;  %v6697_v7 = vpack.c.bf16 %v1950_v58, %v1942_v1  ;;  %v1958_v25 = vld [vmem:[#allocation10 + $0xbb8] sm:$0xff] }
 0x5b5   :  { %6664 = vmatpush1.bf16.msra.mxu1 %v6663_v32  ;;  %6410 = vmatprep.subr.bf16.mxu0 %v6409_v4  ;;  %v1894_v32 = vld [vmem:[#allocation10 + $0x9b8] sm:$0xff]  ;;  %v6427_v4 = vpack.c.bf16 %v1883_v42, %v1875_v63  ;;  %v6429_v13 = vpack.c.bf16 %v1900_v24, %v1892_v28  ;;  %v1955_v42 = vld [vmem:[#allocation10 + $0xba0] sm:$0xff]  ;;  %v1965_v28 = vld [vmem:[#allocation10 + $0xbf0] sm:$0xff] }
 0x5b6   :  { %6666 = vmatprep.subr.bf16.mxu1 %v6665_v37  ;;  %v1899_v37 = vld [vmem:[#allocation10 + $0x9e0] sm:$0xff]  ;;  %v1972_v24 = vld [vmem:[#allocation10 + $0xc28] sm:$0xff]  ;;  %v2022_v58 = vld [vmem:[#allocation10 + $0xdb8] sm:$0xff] }
 0x5b7   :  { %v2028_v1 = vld [vmem:[#allocation10 + $0xde8] sm:$0xff] }
 0x5b8   :  { %6412 = vmatpush1.bf16.msra.mxu0 %v6411_v19  ;;  %v1918_v19 = vld [vmem:[#allocation10 + $0xa78] sm:$0xff] }
 0x5b9   :  { %6668 = vmatpush1.bf16.msra.mxu1 %v6667_v47  ;;  %6414 = vmatprep.subr.bf16.mxu0 %v6413_v20  ;;  %v6431_v47 = vpack.c.bf16 %v1899_v37, %v1891_v27  ;;  %v6689_v33 = vpack.c.bf16 %v1918_v19, %v1910_v14  ;;  %v1971_v37 = vld [vmem:[#allocation10 + $0xc20] sm:$0xff]  ;;  %v1996_v14 = vld [vmem:[#allocation10 + $0xce8] sm:$0xff]  ;;  %v1990_v19 = vld [vmem:[#allocation10 + $0xcb8] sm:$0xff] }
 0x5ba   :  { %6670 = vmatprep.subr.bf16.mxu1 %v6669_v12  ;;  %v1909_v12 = vld [vmem:[#allocation10 + $0xa30] sm:$0xff] }
 0x5bc   :  { %6416 = vmatpush1.bf16.msra.mxu0 %v6415_v39  ;;  %v1934_v39 = vld [vmem:[#allocation10 + $0xaf8] sm:$0xff] }
 0x5bd   :  { %6672 = vmatpush1.bf16.msra.mxu1 %v6671_v2  ;;  %6418 = vmatprep.subr.bf16.mxu0 %v6417_v40  ;;  %v6435_v2 = vpack.c.bf16 %v1915_v31, %v1907_v30  ;;  %v6691_v40 = vpack.c.bf16 %v1917_v61, %v1909_v12  ;;  %v6693_v45 = vpack.c.bf16 %v1934_v39, %v1926_v36  ;;  %v1987_v31 = vld [vmem:[#allocation10 + $0xca0] sm:$0xff]  ;;  %v2012_v36 = vld [vmem:[#allocation10 + $0xd68] sm:$0xff]  ;;  %v2006_v39 = vld [vmem:[#allocation10 + $0xd38] sm:$0xff] }
 0x5be   :  { %6674 = vmatprep.subr.bf16.mxu1 %v6673_v48  ;;  %v1931_v48 = vld [vmem:[#allocation10 + $0xae0] sm:$0xff]  ;;  %v6453_v30 = vpack.c.bf16 %v1996_v14, %v1988_v56  ;;  %v2061_v56 = vld [vmem:[#allocation10 + $0xef0] sm:$0xff]  ;;  %v2068_v14 = vld [vmem:[#allocation10 + $0xf28] sm:$0xff] }
 0x5bf   :  { %3282 = vmatmul.mubr.f32.vlgmr.msra.gmra.mrb[24].mxu0 %v8784_v41  ;;  %v1995_v12 = vld [vmem:[#allocation10 + $0xce0] sm:$0xff] }
 0x5c0   :  { %3566 = vmatmul.mubr.f32.vlgmr.msra.gmra.mrb[26].mxu1 %v8784_v41  ;;  %6420 = vmatpush1.bf16.msra.mxu0 %v6419_v46  ;;  %v1902_v41 = vld [vmem:[#allocation10 + $0x9f8] sm:$0xff]  ;;  %v1948_v46 = vld [vmem:[#allocation10 + $0xb68] sm:$0xff] }
 0x5c1   :  { %3352 = vmatprep.mubr.f32.mxu0 %v8820_v50  ;;  %6676 = vmatpush1.bf16.msra.mxu1 %v6675_v59  ;;  %v6685_v11 = vpack.c.bf16 %v1902_v41, %v1894_v32  ;;  %v6439_v59 = vpack.c.bf16 %v1931_v48, %v1923_v49  ;;  %v6441_v43 = vpack.c.bf16 %v1948_v46, %v1940_v34  ;;  %v1980_v32 = vld [vmem:[#allocation10 + $0xc68] sm:$0xff]  ;;  %v1974_v41 = vld [vmem:[#allocation10 + $0xc38] sm:$0xff]  ;;  %v2003_v48 = vld [vmem:[#allocation10 + $0xd20] sm:$0xff] }
 0x5c2   :  { %3636 = vmatprep.mubr.f32.mxu1 %v8820_v50  ;;  %6422 = vmatprep.subr.bf16.mxu0 %v6421_v60  ;;  %v1901_v50 = vld [vmem:[#allocation10 + $0x9f0] sm:$0xff]  ;;  %v1947_v60 = vld [vmem:[#allocation10 + $0xb60] sm:$0xff]  ;;  %v6449_v27 = vpack.c.bf16 %v1980_v32, %v1972_v24  ;;  %v6457_v49 = vpack.c.bf16 %v2012_v36, %v2004_v16  ;;  %v2020_v46 = vld [vmem:[#allocation10 + $0xda8] sm:$0xff] }
 0x5c3   :  { %6678 = vmatprep.subr.bf16.mxu1 %v6677_v9  ;;  %v6687_v20 = vpack.c.bf16 %v1901_v50, %v1893_v6  ;;  %v1956_v9 = vld [vmem:[#allocation10 + $0xba8] sm:$0xff]  ;;  %v1979_v6 = vld [vmem:[#allocation10 + $0xc60] sm:$0xff]  ;;  %v2013_v34 = vld [vmem:[#allocation10 + $0xd70] sm:$0xff] }
 0x5c4   :  { %6424 = vmatpush1.bf16.msra.mxu0 %v6423_v21  ;;  %v1966_v21 = vld [vmem:[#allocation10 + $0xbf8] sm:$0xff]  ;;  %v6445_v63 = vpack.c.bf16 %v1964_v44, %v1956_v9  ;;  %v2029_v9 = vld [vmem:[#allocation10 + $0xdf0] sm:$0xff]  ;;  %v2036_v44 = vld [vmem:[#allocation10 + $0xe28] sm:$0xff] }
 0x5c5   :  { %6680 = vmatpush1.bf16.msra.mxu1 %v6679_v26  ;;  %6426 = vmatprep.subr.bf16.mxu0 %v6425_v15  ;;  %v6443_v26 = vpack.c.bf16 %v1947_v60, %v1939_v8  ;;  %v6699_v15 = vpack.c.bf16 %v1949_v29, %v1941_v54  ;;  %v6701_v38 = vpack.c.bf16 %v1966_v21, %v1958_v25  ;;  %v2019_v60 = vld [vmem:[#allocation10 + $0xda0] sm:$0xff]  ;;  %v2044_v25 = vld [vmem:[#allocation10 + $0xe68] sm:$0xff]  ;;  %v2038_v21 = vld [vmem:[#allocation10 + $0xe38] sm:$0xff] }
 0x5c6   :  { %6682 = vmatprep.subr.bf16.mxu1 %v6681_v55  ;;  %v1957_v55 = vld [vmem:[#allocation10 + $0xbb0] sm:$0xff]  ;;  %v6461_v8 = vpack.c.bf16 %v2028_v1, %v2020_v46  ;;  %v2027_v54 = vld [vmem:[#allocation10 + $0xde0] sm:$0xff]  ;;  %v2052_v32 = vld [vmem:[#allocation10 + $0xea8] sm:$0xff] }
 0x5c7   :  { %v2045_v24 = vld [vmem:[#allocation10 + $0xe70] sm:$0xff]  ;;  %v2084_v36 = vld [vmem:[#allocation10 + $0xfa8] sm:$0xff] }
 0x5c8   :  { %6428 = vmatpush1.bf16.msra.mxu0 %v6427_v4  ;;  %v1982_v4 = vld [vmem:[#allocation10 + $0xc78] sm:$0xff]  ;;  %v2077_v16 = vld [vmem:[#allocation10 + $0xf70] sm:$0xff]  ;;  %v2100_v1 = vld [vmem:[#allocation10 + $0x1028] sm:$0xff] }
 0x5c9   :  { %6684 = vmatpush1.bf16.msra.mxu1 %v6683_v17  ;;  %6430 = vmatprep.subr.bf16.mxu0 %v6429_v13  ;;  %v6447_v17 = vpack.c.bf16 %v1963_v53, %v1955_v42  ;;  %v6703_v13 = vpack.c.bf16 %v1965_v28, %v1957_v55  ;;  %v6705_v50 = vpack.c.bf16 %v1982_v4, %v1974_v41  ;;  %v2035_v53 = vld [vmem:[#allocation10 + $0xe20] sm:$0xff]  ;;  %v2060_v41 = vld [vmem:[#allocation10 + $0xee8] sm:$0xff]  ;;  %v2054_v4 = vld [vmem:[#allocation10 + $0xeb8] sm:$0xff] }
 0x5ca   :  { %6686 = vmatprep.subr.bf16.mxu1 %v6685_v11  ;;  %v1973_v11 = vld [vmem:[#allocation10 + $0xc30] sm:$0xff]  ;;  %v6465_v42 = vpack.c.bf16 %v2044_v25, %v2036_v44  ;;  %v2043_v55 = vld [vmem:[#allocation10 + $0xe60] sm:$0xff]  ;;  %v2116_v25 = vld [vmem:[#allocation10 + $0x10a8] sm:$0xff] }
 0x5cb   :  { %v2093_v46 = vld [vmem:[#allocation10 + $0xff0] sm:$0xff] }
 0x5cc   :  { %6432 = vmatpush1.bf16.msra.mxu0 %v6431_v47  ;;  %v1998_v47 = vld [vmem:[#allocation10 + $0xcf8] sm:$0xff]  ;;  %v2109_v44 = vld [vmem:[#allocation10 + $0x1070] sm:$0xff] }
 0x5cd   :  { %6688 = vmatpush1.bf16.msra.mxu1 %v6687_v20  ;;  %6434 = vmatprep.subr.bf16.mxu0 %v6433_v62  ;;  %v6451_v20 = vpack.c.bf16 %v1979_v6, %v1971_v37  ;;  %v6707_v62 = vpack.c.bf16 %v1981_v22, %v1973_v11  ;;  %v6709_v61 = vpack.c.bf16 %v1998_v47, %v1990_v19  ;;  %v2051_v6 = vld [vmem:[#allocation10 + $0xea0] sm:$0xff]  ;;  %v2076_v19 = vld [vmem:[#allocation10 + $0xf68] sm:$0xff]  ;;  %v2070_v47 = vld [vmem:[#allocation10 + $0xf38] sm:$0xff] }
 0x5ce   :  { %6690 = vmatprep.subr.bf16.mxu1 %v6689_v33  ;;  %v1989_v33 = vld [vmem:[#allocation10 + $0xcb0] sm:$0xff]  ;;  %v6469_v37 = vpack.c.bf16 %v2060_v41, %v2052_v32  ;;  %v2059_v11 = vld [vmem:[#allocation10 + $0xee0] sm:$0xff]  ;;  %v2132_v32 = vld [vmem:[#allocation10 + $0x1128] sm:$0xff] }
 0x5cf   :  { %v2140_v41 = vld [vmem:[#allocation10 + $0x1168] sm:$0xff] }
 0x5d0   :  { %6436 = vmatpush1.bf16.msra.mxu0 %v6435_v2  ;;  %v2014_v2 = vld [vmem:[#allocation10 + $0xd78] sm:$0xff] }
 0x5d1   :  { %6692 = vmatpush1.bf16.msra.mxu1 %v6691_v40  ;;  %6438 = vmatprep.subr.bf16.mxu0 %v6437_v35  ;;  %v6455_v40 = vpack.c.bf16 %v1995_v12, %v1987_v31  ;;  %v6711_v35 = vpack.c.bf16 %v1997_v18, %v1989_v33  ;;  %v6713_v52 = vpack.c.bf16 %v2014_v2, %v2006_v39  ;;  %v2067_v12 = vld [vmem:[#allocation10 + $0xf20] sm:$0xff]  ;;  %v2092_v39 = vld [vmem:[#allocation10 + $0xfe8] sm:$0xff]  ;;  %v2086_v2 = vld [vmem:[#allocation10 + $0xfb8] sm:$0xff] }
 0x5d2   :  { %6694 = vmatprep.subr.bf16.mxu1 %v6693_v45  ;;  %v2005_v45 = vld [vmem:[#allocation10 + $0xd30] sm:$0xff]  ;;  %v6473_v31 = vpack.c.bf16 %v2076_v19, %v2068_v14  ;;  %v2075_v33 = vld [vmem:[#allocation10 + $0xf60] sm:$0xff]  ;;  %v2148_v19 = vld [vmem:[#allocation10 + $0x11a8] sm:$0xff] }
 0x5d3   :  { %v2141_v14 = vld [vmem:[#allocation10 + $0x1170] sm:$0xff] }
 0x5d4   :  { %6440 = vmatpush1.bf16.msra.mxu0 %v6439_v59  ;;  %v2030_v59 = vld [vmem:[#allocation10 + $0xdf8] sm:$0xff] }
 0x5d5   :  { %6696 = vmatpush1.bf16.msra.mxu1 %v6695_v3  ;;  %6442 = vmatprep.subr.bf16.mxu0 %v6441_v43  ;;  %v6459_v3 = vpack.c.bf16 %v2011_v23, %v2003_v48  ;;  %v6715_v43 = vpack.c.bf16 %v2013_v34, %v2005_v45  ;;  %v6717_v29 = vpack.c.bf16 %v2030_v59, %v2022_v58  ;;  %v2083_v23 = vld [vmem:[#allocation10 + $0xfa0] sm:$0xff]  ;;  %v2108_v58 = vld [vmem:[#allocation10 + $0x1068] sm:$0xff]  ;;  %v2102_v59 = vld [vmem:[#allocation10 + $0x1038] sm:$0xff] }
 0x5d6   :  { %6698 = vmatprep.subr.bf16.mxu1 %v6697_v7  ;;  %v2021_v7 = vld [vmem:[#allocation10 + $0xdb0] sm:$0xff]  ;;  %v6477_v48 = vpack.c.bf16 %v2092_v39, %v2084_v36  ;;  %v2091_v45 = vld [vmem:[#allocation10 + $0xfe0] sm:$0xff]  ;;  %v2172_v36 = vld [vmem:[#allocation10 + $0x1268] sm:$0xff] }
 0x5d7   :  { %v2166_v39 = vld [vmem:[#allocation10 + $0x1238] sm:$0xff] }
 0x5d8   :  { %6444 = vmatpush1.bf16.msra.mxu0 %v6443_v26  ;;  %v2046_v26 = vld [vmem:[#allocation10 + $0xe78] sm:$0xff] }
 0x5d9   :  { %6700 = vmatpush1.bf16.msra.mxu1 %v6699_v15  ;;  %6446 = vmatprep.subr.bf16.mxu0 %v6445_v63  ;;  %v6463_v15 = vpack.c.bf16 %v2027_v54, %v2019_v60  ;;  %v6719_v63 = vpack.c.bf16 %v2029_v9, %v2021_v7  ;;  %v6721_v28 = vpack.c.bf16 %v2046_v26, %v2038_v21  ;;  %v2099_v54 = vld [vmem:[#allocation10 + $0x1020] sm:$0xff]  ;;  %v2101_v9 = vld [vmem:[#allocation10 + $0x1030] sm:$0xff]  ;;  %v2124_v21 = vld [vmem:[#allocation10 + $0x10e8] sm:$0xff] }
 0x5da   :  { %6702 = vmatprep.subr.bf16.mxu1 %v6701_v38  ;;  %v2037_v38 = vld [vmem:[#allocation10 + $0xe30] sm:$0xff]  ;;  %v6481_v60 = vpack.c.bf16 %v2108_v58, %v2100_v1  ;;  %v2107_v7 = vld [vmem:[#allocation10 + $0x1060] sm:$0xff]  ;;  %v2188_v1 = vld [vmem:[#allocation10 + $0x12e8] sm:$0xff] }
 0x5db   :  { %v6483_v26 = vpack.c.bf16 %v2107_v7, %v2099_v54  ;;  %v2182_v58 = vld [vmem:[#allocation10 + $0x12b8] sm:$0xff]  ;;  %v2187_v54 = vld [vmem:[#allocation10 + $0x12e0] sm:$0xff]  ;;  %v2181_v7 = vld [vmem:[#allocation10 + $0x12b0] sm:$0xff] }
 0x5dc   :  { %6448 = vmatpush1.bf16.msra.mxu0 %v6447_v17  ;;  %v2062_v17 = vld [vmem:[#allocation10 + $0xef8] sm:$0xff] }
 0x5dd   :  { %6704 = vmatpush1.bf16.msra.mxu1 %v6703_v13  ;;  %6450 = vmatprep.subr.bf16.mxu0 %v6449_v27  ;;  %v6467_v13 = vpack.c.bf16 %v2043_v55, %v2035_v53  ;;  %v6723_v27 = vpack.c.bf16 %v2045_v24, %v2037_v38  ;;  %v6725_v22 = vpack.c.bf16 %v2062_v17, %v2054_v4  ;;  %v2115_v53 = vld [vmem:[#allocation10 + $0x10a0] sm:$0xff]  ;;  %v2117_v38 = vld [vmem:[#allocation10 + $0x10b0] sm:$0xff]  ;;  %v2134_v17 = vld [vmem:[#allocation10 + $0x1138] sm:$0xff] }
 0x5de   :  { %6706 = vmatprep.subr.bf16.mxu1 %v6705_v50  ;;  %v2053_v50 = vld [vmem:[#allocation10 + $0xeb0] sm:$0xff]  ;;  %v2123_v55 = vld [vmem:[#allocation10 + $0x10e0] sm:$0xff] }
 0x5df   :  { %v2125_v24 = vld [vmem:[#allocation10 + $0x10f0] sm:$0xff] }
 0x5e0   :  { %6452 = vmatpush1.bf16.msra.mxu0 %v6451_v20  ;;  %v2078_v20 = vld [vmem:[#allocation10 + $0xf78] sm:$0xff] }
 0x5e1   :  { %6708 = vmatpush1.bf16.msra.mxu1 %v6707_v62  ;;  %6454 = vmatprep.subr.bf16.mxu0 %v6453_v30  ;;  %v6471_v62 = vpack.c.bf16 %v2059_v11, %v2051_v6  ;;  %v6727_v30 = vpack.c.bf16 %v2061_v56, %v2053_v50  ;;  %v6729_v18 = vpack.c.bf16 %v2078_v20, %v2070_v47  ;;  %v2131_v11 = vld [vmem:[#allocation10 + $0x1120] sm:$0xff]  ;;  %v2156_v47 = vld [vmem:[#allocation10 + $0x11e8] sm:$0xff]  ;;  %v2150_v20 = vld [vmem:[#allocation10 + $0x11b8] sm:$0xff] }
 0x5e2   :  { %6710 = vmatprep.subr.bf16.mxu1 %v6709_v61  ;;  %v2069_v61 = vld [vmem:[#allocation10 + $0xf30] sm:$0xff]  ;;  %v6489_v6 = vpack.c.bf16 %v2140_v41, %v2132_v32  ;;  %v2139_v50 = vld [vmem:[#allocation10 + $0x1160] sm:$0xff]  ;;  %v2212_v32 = vld [vmem:[#allocation10 + $0x13a8] sm:$0xff] }
 0x5e3   :  { %v2220_v41 = vld [vmem:[#allocation10 + $0x13e8] sm:$0xff] }
 0x5e4   :  { %6456 = vmatpush1.bf16.msra.mxu0 %v6455_v40  ;;  %v2094_v40 = vld [vmem:[#allocation10 + $0xff8] sm:$0xff] }
 0x5e5   :  { %6712 = vmatpush1.bf16.msra.mxu1 %v6711_v35  ;;  %6458 = vmatprep.subr.bf16.mxu0 %v6457_v49  ;;  %v6475_v35 = vpack.c.bf16 %v2075_v33, %v2067_v12  ;;  %v6731_v49 = vpack.c.bf16 %v2077_v16, %v2069_v61  ;;  %v6733_v34 = vpack.c.bf16 %v2094_v40, %v2086_v2  ;;  %v2147_v12 = vld [vmem:[#allocation10 + $0x11a0] sm:$0xff]  ;;  %v2149_v61 = vld [vmem:[#allocation10 + $0x11b0] sm:$0xff]  ;;  %v2164_v16 = vld [vmem:[#allocation10 + $0x1228] sm:$0xff] }
 0x5e6   :  { %6714 = vmatprep.subr.bf16.mxu1 %v6713_v52  ;;  %v2085_v52 = vld [vmem:[#allocation10 + $0xfb0] sm:$0xff]  ;;  %v2155_v33 = vld [vmem:[#allocation10 + $0x11e0] sm:$0xff]  ;;  %v2174_v2 = vld [vmem:[#allocation10 + $0x1278] sm:$0xff] }
 0x5e7   :  { %v6495_v40 = vpack.c.bf16 %v2155_v33, %v2147_v12  ;;  %v2235_v12 = vld [vmem:[#allocation10 + $0x1460] sm:$0xff]  ;;  %v2229_v33 = vld [vmem:[#allocation10 + $0x1430] sm:$0xff] }
 0x5e8   :  { %6460 = vmatpush1.bf16.msra.mxu0 %v6459_v3  ;;  %v2110_v3 = vld [vmem:[#allocation10 + $0x1078] sm:$0xff] }
 0x5e9   :  { %6716 = vmatpush1.bf16.msra.mxu1 %v6715_v43  ;;  %6462 = vmatprep.subr.bf16.mxu0 %v6461_v8  ;;  %v6479_v43 = vpack.c.bf16 %v2091_v45, %v2083_v23  ;;  %v6735_v8 = vpack.c.bf16 %v2093_v46, %v2085_v52  ;;  %v2171_v23 = vld [vmem:[#allocation10 + $0x1260] sm:$0xff]  ;;  %v2165_v45 = vld [vmem:[#allocation10 + $0x1230] sm:$0xff]  ;;  %v6753_v52 = vpack.c.bf16 %v2174_v2, %v2166_v39  ;;  %v2180_v46 = vld [vmem:[#allocation10 + $0x12a8] sm:$0xff] }
 0x5ea   :  { %6718 = vmatprep.subr.bf16.mxu1 %v6717_v29  ;;  %v6737_v29 = vpack.c.bf16 %v2110_v3, %v2102_v59  ;;  %v2190_v59 = vld [vmem:[#allocation10 + $0x12f8] sm:$0xff] }
 0x5eb   :  { %v2254_v39 = vld [vmem:[#allocation10 + $0x14f8] sm:$0xff] }
 0x5ec   :  { %6464 = vmatpush1.bf16.msra.mxu0 %v6463_v15  ;;  %v2118_v15 = vld [vmem:[#allocation10 + $0x10b8] sm:$0xff] }
 0x5ed   :  { %6720 = vmatpush1.bf16.msra.mxu1 %v6719_v63  ;;  %6466 = vmatprep.subr.bf16.mxu0 %v6465_v42  ;;  %v2126_v63 = vld [vmem:[#allocation10 + $0x10f8] sm:$0xff]  ;;  %v6739_v42 = vpack.c.bf16 %v2109_v44, %v2101_v9  ;;  %v2189_v9 = vld [vmem:[#allocation10 + $0x12f0] sm:$0xff]  ;;  %v2196_v44 = vld [vmem:[#allocation10 + $0x1328] sm:$0xff] }
 0x5ee   :  { %6722 = vmatprep.subr.bf16.mxu1 %v6721_v28  ;;  %v6485_v28 = vpack.c.bf16 %v2124_v21, %v2116_v25  ;;  %v6741_v4 = vpack.c.bf16 %v2126_v63, %v2118_v15  ;;  %v2204_v25 = vld [vmem:[#allocation10 + $0x1368] sm:$0xff]  ;;  %v2198_v21 = vld [vmem:[#allocation10 + $0x1338] sm:$0xff]  ;;  %v6759_v63 = vpack.c.bf16 %v2189_v9, %v2181_v7 }
 0x5ef   :  { %v2276_v9 = vld [vmem:[#allocation10 + $0x15a8] sm:$0xff] }
 0x5f0   :  { %6468 = vmatpush1.bf16.msra.mxu0 %v6467_v13  ;;  %v2142_v13 = vld [vmem:[#allocation10 + $0x1178] sm:$0xff] }
 0x5f1   :  { %6724 = vmatpush1.bf16.msra.mxu1 %v6723_v27  ;;  %6470 = vmatprep.subr.bf16.mxu0 %v6469_v37  ;;  %v6487_v27 = vpack.c.bf16 %v2123_v55, %v2115_v53  ;;  %v6743_v37 = vpack.c.bf16 %v2125_v24, %v2117_v38  ;;  %v6745_v56 = vpack.c.bf16 %v2142_v13, %v2134_v17  ;;  %v2195_v53 = vld [vmem:[#allocation10 + $0x1320] sm:$0xff]  ;;  %v2197_v38 = vld [vmem:[#allocation10 + $0x1330] sm:$0xff]  ;;  %v2222_v17 = vld [vmem:[#allocation10 + $0x13f8] sm:$0xff] }
 0x5f2   :  { %6726 = vmatprep.subr.bf16.mxu1 %v6725_v22  ;;  %v2133_v22 = vld [vmem:[#allocation10 + $0x1130] sm:$0xff]  ;;  %v2203_v55 = vld [vmem:[#allocation10 + $0x1360] sm:$0xff] }
 0x5f3   :  { %v2205_v24 = vld [vmem:[#allocation10 + $0x1370] sm:$0xff]  ;;  %v6507_v13 = vpack.c.bf16 %v2203_v55, %v2195_v53  ;;  %v2283_v53 = vld [vmem:[#allocation10 + $0x15e0] sm:$0xff] }
 0x5f4   :  { %6472 = vmatpush1.bf16.msra.mxu0 %v6471_v62  ;;  %v6491_v62 = vpack.c.bf16 %v2139_v50, %v2131_v11  ;;  %v2219_v11 = vld [vmem:[#allocation10 + $0x13e0] sm:$0xff]  ;;  %v2213_v50 = vld [vmem:[#allocation10 + $0x13b0] sm:$0xff] }
 0x5f5   :  { %6728 = vmatpush1.bf16.msra.mxu1 %v6727_v30  ;;  %6474 = vmatprep.subr.bf16.mxu0 %v6473_v31  ;;  %v6747_v30 = vpack.c.bf16 %v2141_v14, %v2133_v22  ;;  %v6493_v31 = vpack.c.bf16 %v2156_v47, %v2148_v19  ;;  %v2228_v14 = vld [vmem:[#allocation10 + $0x1428] sm:$0xff]  ;;  %v2230_v47 = vld [vmem:[#allocation10 + $0x1438] sm:$0xff]  ;;  %v2277_v55 = vld [vmem:[#allocation10 + $0x15b0] sm:$0xff] }
 0x5f6   :  { %6730 = vmatprep.subr.bf16.mxu1 %v6729_v18  ;;  %v2236_v19 = vld [vmem:[#allocation10 + $0x1468] sm:$0xff] }
 0x5f8   :  { %6476 = vmatpush1.bf16.msra.mxu0 %v6475_v35 }
 0x5f9   :  { %6732 = vmatpush1.bf16.msra.mxu1 %v6731_v49  ;;  %6478 = vmatprep.subr.bf16.mxu0 %v6477_v48  ;;  %v6497_v49 = vpack.c.bf16 %v2172_v36, %v2164_v16  ;;  %v2163_v48 = vld [vmem:[#allocation10 + $0x1220] sm:$0xff]  ;;  %v2252_v16 = vld [vmem:[#allocation10 + $0x14e8] sm:$0xff]  ;;  %v2246_v36 = vld [vmem:[#allocation10 + $0x14b8] sm:$0xff] }
 0x5fa   :  { %6734 = vmatprep.subr.bf16.mxu1 %v6733_v34  ;;  %v2173_v34 = vld [vmem:[#allocation10 + $0x1270] sm:$0xff]  ;;  %v6499_v3 = vpack.c.bf16 %v2171_v23, %v2163_v48  ;;  %v2251_v48 = vld [vmem:[#allocation10 + $0x14e0] sm:$0xff] }
 0x5fb   :  { %v2245_v23 = vld [vmem:[#allocation10 + $0x14b0] sm:$0xff] }
 0x5fc   :  { %6480 = vmatpush1.bf16.msra.mxu0 %v6479_v43  ;;  %v6755_v43 = vpack.c.bf16 %v2173_v34, %v2165_v45  ;;  %v6773_v45 = vpack.c.bf16 %v2254_v39, %v2246_v36  ;;  %v2260_v34 = vld [vmem:[#allocation10 + $0x1528] sm:$0xff]  ;;  %v2334_v36 = vld [vmem:[#allocation10 + $0x1778] sm:$0xff] }
 0x5fd   :  { %6736 = vmatpush1.bf16.msra.mxu1 %v6735_v8  ;;  %6482 = vmatprep.subr.bf16.mxu0 %v6481_v60  ;;  %v6501_v8 = vpack.c.bf16 %v2188_v1, %v2180_v46  ;;  %v2179_v60 = vld [vmem:[#allocation10 + $0x12a0] sm:$0xff]  ;;  %v2268_v46 = vld [vmem:[#allocation10 + $0x1568] sm:$0xff]  ;;  %v2262_v1 = vld [vmem:[#allocation10 + $0x1538] sm:$0xff] }
 0x5fe   :  { %6738 = vmatprep.subr.bf16.mxu1 %v6737_v29  ;;  %v6757_v29 = vpack.c.bf16 %v2190_v59, %v2182_v58  ;;  %v6503_v15 = vpack.c.bf16 %v2187_v54, %v2179_v60  ;;  %v2270_v58 = vld [vmem:[#allocation10 + $0x1578] sm:$0xff]  ;;  %v2267_v60 = vld [vmem:[#allocation10 + $0x1560] sm:$0xff]  ;;  %v2261_v54 = vld [vmem:[#allocation10 + $0x1530] sm:$0xff] }
 0x5ff   :  { %3353 = vmatmul.mubr.f32.vlgmr.msra.gmra.mrb[24].mxu0 %v8823_v51  ;;  %v6777_v7 = vpack.c.bf16 %v2270_v58, %v2262_v1  ;;  %v2350_v1 = vld [vmem:[#allocation10 + $0x17f8] sm:$0xff] }
 0x600   :  { %3637 = vmatmul.mubr.f32.vlgmr.msra.gmra.mrb[26].mxu1 %v8823_v51  ;;  %6484 = vmatpush1.bf16.msra.mxu0 %v6483_v26  ;;  %v2158_v51 = vld [vmem:[#allocation10 + $0x11f8] sm:$0xff] }
 0x601   :  { %3423 = vmatprep.mubr.f32.mxu0 %v8830_v5  ;;  %6740 = vmatpush1.bf16.msra.mxu1 %v6739_v42  ;;  %v6749_v18 = vpack.c.bf16 %v2158_v51, %v2150_v20  ;;  %v2206_v26 = vld [vmem:[#allocation10 + $0x1378] sm:$0xff]  ;;  %v6505_v42 = vpack.c.bf16 %v2204_v25, %v2196_v44  ;;  %v2284_v44 = vld [vmem:[#allocation10 + $0x15e8] sm:$0xff] }
 0x602   :  { %3707 = vmatprep.mubr.f32.mxu1 %v8830_v5  ;;  %6486 = vmatprep.subr.bf16.mxu0 %v6485_v28  ;;  %v2157_v5 = vld [vmem:[#allocation10 + $0x11f0] sm:$0xff]  ;;  %v6761_v28 = vpack.c.bf16 %v2206_v26, %v2198_v21  ;;  %v2238_v20 = vld [vmem:[#allocation10 + $0x1478] sm:$0xff] }
 0x603   :  { %6742 = vmatprep.subr.bf16.mxu1 %v6741_v4  ;;  %v6751_v35 = vpack.c.bf16 %v2157_v5, %v2149_v61  ;;  %v2214_v4 = vld [vmem:[#allocation10 + $0x13b8] sm:$0xff]  ;;  %v6769_v61 = vpack.c.bf16 %v2238_v20, %v2230_v47  ;;  %v2244_v5 = vld [vmem:[#allocation10 + $0x14a8] sm:$0xff] }
 0x604   :  { %6488 = vmatpush1.bf16.msra.mxu0 %v6487_v27  ;;  %v6763_v27 = vpack.c.bf16 %v2205_v24, %v2197_v38  ;;  %v6765_v22 = vpack.c.bf16 %v2222_v17, %v2214_v4  ;;  %v2278_v25 = vld [vmem:[#allocation10 + $0x15b8] sm:$0xff]  ;;  %v2292_v24 = vld [vmem:[#allocation10 + $0x1628] sm:$0xff] }
 0x605   :  { %6744 = vmatpush1.bf16.msra.mxu1 %v6743_v37  ;;  %6490 = vmatprep.subr.bf16.mxu0 %v6489_v6  ;;  %v6509_v37 = vpack.c.bf16 %v2220_v41, %v2212_v32  ;;  %v2211_v6 = vld [vmem:[#allocation10 + $0x13a0] sm:$0xff]  ;;  %v2286_v21 = vld [vmem:[#allocation10 + $0x15f8] sm:$0xff]  ;;  %v2300_v32 = vld [vmem:[#allocation10 + $0x1668] sm:$0xff] }
 0x606   :  { %6746 = vmatprep.subr.bf16.mxu1 %v6745_v56  ;;  %v2221_v56 = vld [vmem:[#allocation10 + $0x13f0] sm:$0xff]  ;;  %v6511_v51 = vpack.c.bf16 %v2219_v11, %v2211_v6  ;;  %v6781_v38 = vpack.c.bf16 %v2286_v21, %v2278_v25  ;;  %v2294_v41 = vld [vmem:[#allocation10 + $0x1638] sm:$0xff]  ;;  %v2299_v6 = vld [vmem:[#allocation10 + $0x1660] sm:$0xff] }
 0x607   :  { %v2302_v4 = vld [vmem:[#allocation10 + $0x1678] sm:$0xff]  ;;  %v2293_v11 = vld [vmem:[#allocation10 + $0x1630] sm:$0xff] }
 0x608   :  { %6492 = vmatpush1.bf16.msra.mxu0 %v6491_v62  ;;  %v6767_v62 = vpack.c.bf16 %v2221_v56, %v2213_v50  ;;  %v6785_v50 = vpack.c.bf16 %v2302_v4, %v2294_v41  ;;  %v2308_v56 = vld [vmem:[#allocation10 + $0x16a8] sm:$0xff]  ;;  %v2318_v47 = vld [vmem:[#allocation10 + $0x16f8] sm:$0xff] }
 0x609   :  { %6748 = vmatpush1.bf16.msra.mxu1 %v6747_v30  ;;  %6494 = vmatprep.subr.bf16.mxu0 %v6493_v31  ;;  %v6513_v30 = vpack.c.bf16 %v2236_v19, %v2228_v14  ;;  %v2227_v31 = vld [vmem:[#allocation10 + $0x1420] sm:$0xff]  ;;  %v2316_v14 = vld [vmem:[#allocation10 + $0x16e8] sm:$0xff]  ;;  %v2310_v19 = vld [vmem:[#allocation10 + $0x16b8] sm:$0xff] }
 0x60a   :  { %6750 = vmatprep.subr.bf16.mxu1 %v6749_v18  ;;  %v2237_v18 = vld [vmem:[#allocation10 + $0x1470] sm:$0xff]  ;;  %v6515_v2 = vpack.c.bf16 %v2235_v12, %v2227_v31  ;;  %v2315_v31 = vld [vmem:[#allocation10 + $0x16e0] sm:$0xff]  ;;  %v2366_v25 = vld [vmem:[#allocation10 + $0x1878] sm:$0xff] }
 0x60b   :  { %v2309_v12 = vld [vmem:[#allocation10 + $0x16b0] sm:$0xff]  ;;  %v2374_v41 = vld [vmem:[#allocation10 + $0x18b8] sm:$0xff] }
 0x60c   :  { %6496 = vmatpush1.bf16.msra.mxu0 %v6495_v40  ;;  %v6771_v40 = vpack.c.bf16 %v2237_v18, %v2229_v33  ;;  %v6789_v33 = vpack.c.bf16 %v2318_v47, %v2310_v19  ;;  %v2324_v18 = vld [vmem:[#allocation10 + $0x1728] sm:$0xff]  ;;  %v2382_v4 = vld [vmem:[#allocation10 + $0x18f8] sm:$0xff] }
 0x60d   :  { %6752 = vmatpush1.bf16.msra.mxu1 %v6751_v35  ;;  %6498 = vmatprep.subr.bf16.mxu0 %v6497_v49  ;;  %v6517_v35 = vpack.c.bf16 %v2252_v16, %v2244_v5  ;;  %v2243_v49 = vld [vmem:[#allocation10 + $0x14a0] sm:$0xff]  ;;  %v2332_v5 = vld [vmem:[#allocation10 + $0x1768] sm:$0xff]  ;;  %v2326_v16 = vld [vmem:[#allocation10 + $0x1738] sm:$0xff] }
 0x60e   :  { %6754 = vmatprep.subr.bf16.mxu1 %v6753_v52  ;;  %v2253_v52 = vld [vmem:[#allocation10 + $0x14f0] sm:$0xff]  ;;  %v6519_v59 = vpack.c.bf16 %v2251_v48, %v2243_v49  ;;  %v2331_v49 = vld [vmem:[#allocation10 + $0x1760] sm:$0xff]  ;;  %v2398_v19 = vld [vmem:[#allocation10 + $0x1978] sm:$0xff] }
 0x60f   :  { %v2325_v48 = vld [vmem:[#allocation10 + $0x1730] sm:$0xff] }
 0x610   :  { %6500 = vmatpush1.bf16.msra.mxu0 %v6499_v3  ;;  %v6775_v3 = vpack.c.bf16 %v2253_v52, %v2245_v23  ;;  %v6793_v23 = vpack.c.bf16 %v2334_v36, %v2326_v16  ;;  %v2340_v52 = vld [vmem:[#allocation10 + $0x17a8] sm:$0xff] }
 0x611   :  { %6756 = vmatpush1.bf16.msra.mxu1 %v6755_v43  ;;  %6502 = vmatprep.subr.bf16.mxu0 %v6501_v8  ;;  %v6521_v43 = vpack.c.bf16 %v2268_v46, %v2260_v34  ;;  %v2259_v8 = vld [vmem:[#allocation10 + $0x1520] sm:$0xff]  ;;  %v2348_v34 = vld [vmem:[#allocation10 + $0x17e8] sm:$0xff]  ;;  %v2342_v46 = vld [vmem:[#allocation10 + $0x17b8] sm:$0xff] }
 0x612   :  { %6758 = vmatprep.subr.bf16.mxu1 %v6757_v29  ;;  %v2269_v29 = vld [vmem:[#allocation10 + $0x1570] sm:$0xff]  ;;  %v6523_v26 = vpack.c.bf16 %v2267_v60, %v2259_v8  ;;  %v2347_v8 = vld [vmem:[#allocation10 + $0x17e0] sm:$0xff] }
 0x613   :  { %v2341_v60 = vld [vmem:[#allocation10 + $0x17b0] sm:$0xff] }
 0x614   :  { %6504 = vmatpush1.bf16.msra.mxu0 %v6503_v15  ;;  %v6779_v15 = vpack.c.bf16 %v2269_v29, %v2261_v54  ;;  %v6797_v54 = vpack.c.bf16 %v2350_v1, %v2342_v46  ;;  %v2356_v29 = vld [vmem:[#allocation10 + $0x1828] sm:$0xff] }
 0x615   :  { %6760 = vmatpush1.bf16.msra.mxu1 %v6759_v63  ;;  %6506 = vmatprep.subr.bf16.mxu0 %v6505_v42  ;;  %v6525_v63 = vpack.c.bf16 %v2284_v44, %v2276_v9  ;;  %v2275_v42 = vld [vmem:[#allocation10 + $0x15a0] sm:$0xff]  ;;  %v2364_v9 = vld [vmem:[#allocation10 + $0x1868] sm:$0xff]  ;;  %v2358_v44 = vld [vmem:[#allocation10 + $0x1838] sm:$0xff] }
 0x616   :  { %6762 = vmatprep.subr.bf16.mxu1 %v6761_v28  ;;  %v2285_v28 = vld [vmem:[#allocation10 + $0x15f0] sm:$0xff]  ;;  %v6527_v17 = vpack.c.bf16 %v2283_v53, %v2275_v42  ;;  %v2363_v42 = vld [vmem:[#allocation10 + $0x1860] sm:$0xff]  ;;  %v6801_v53 = vpack.c.bf16 %v2366_v25, %v2358_v44 }
 0x618   :  { %6508 = vmatpush1.bf16.msra.mxu0 %v6507_v13  ;;  %v6783_v13 = vpack.c.bf16 %v2285_v28, %v2277_v55  ;;  %v2357_v55 = vld [vmem:[#allocation10 + $0x1830] sm:$0xff]  ;;  %v2372_v28 = vld [vmem:[#allocation10 + $0x18a8] sm:$0xff] }
 0x619   :  { %6764 = vmatpush1.bf16.msra.mxu1 %v6763_v27  ;;  %6510 = vmatprep.subr.bf16.mxu0 %v6509_v37  ;;  %v6529_v27 = vpack.c.bf16 %v2300_v32, %v2292_v24  ;;  %v2291_v37 = vld [vmem:[#allocation10 + $0x1620] sm:$0xff]  ;;  %v2380_v24 = vld [vmem:[#allocation10 + $0x18e8] sm:$0xff] }
 0x61a   :  { %6766 = vmatprep.subr.bf16.mxu1 %v6765_v22  ;;  %v2301_v22 = vld [vmem:[#allocation10 + $0x1670] sm:$0xff]  ;;  %v6531_v20 = vpack.c.bf16 %v2299_v6, %v2291_v37  ;;  %v6549_v6 = vpack.c.bf16 %v2380_v24, %v2372_v28  ;;  %v2462_v28 = vld [vmem:[#allocation10 + $0x1b78] sm:$0xff] }
 0x61b   :  { %v2373_v37 = vld [vmem:[#allocation10 + $0x18b0] sm:$0xff] }
 0x61c   :  { %6512 = vmatpush1.bf16.msra.mxu0 %v6511_v51  ;;  %v6787_v51 = vpack.c.bf16 %v2301_v22, %v2293_v11  ;;  %v2381_v11 = vld [vmem:[#allocation10 + $0x18f0] sm:$0xff]  ;;  %v2396_v22 = vld [vmem:[#allocation10 + $0x1968] sm:$0xff] }
 0x61d   :  { %6768 = vmatpush1.bf16.msra.mxu1 %v6767_v62  ;;  %6514 = vmatprep.subr.bf16.mxu0 %v6513_v30  ;;  %v6533_v62 = vpack.c.bf16 %v2316_v14, %v2308_v56  ;;  %v2307_v30 = vld [vmem:[#allocation10 + $0x16a0] sm:$0xff]  ;;  %v6805_v56 = vpack.c.bf16 %v2382_v4, %v2374_v41  ;;  %v2390_v14 = vld [vmem:[#allocation10 + $0x1938] sm:$0xff] }
 0x61e   :  { %6770 = vmatprep.subr.bf16.mxu1 %v6769_v61  ;;  %v2317_v61 = vld [vmem:[#allocation10 + $0x16f0] sm:$0xff]  ;;  %v6535_v39 = vpack.c.bf16 %v2315_v31, %v2307_v30  ;;  %v2395_v30 = vld [vmem:[#allocation10 + $0x1960] sm:$0xff] }
 0x61f   :  { %v2389_v31 = vld [vmem:[#allocation10 + $0x1930] sm:$0xff]  ;;  %v2451_v4 = vld [vmem:[#allocation10 + $0x1b20] sm:$0xff] }
 0x620   :  { %6516 = vmatpush1.bf16.msra.mxu0 %v6515_v2  ;;  %v6791_v2 = vpack.c.bf16 %v2317_v61, %v2309_v12  ;;  %v6809_v12 = vpack.c.bf16 %v2398_v19, %v2390_v14  ;;  %v2404_v61 = vld [vmem:[#allocation10 + $0x19a8] sm:$0xff]  ;;  %v2470_v14 = vld [vmem:[#allocation10 + $0x1bb8] sm:$0xff] }
 0x621   :  { %6772 = vmatpush1.bf16.msra.mxu1 %v6771_v40  ;;  %6518 = vmatprep.subr.bf16.mxu0 %v6517_v35  ;;  %v6537_v40 = vpack.c.bf16 %v2332_v5, %v2324_v18  ;;  %v2323_v35 = vld [vmem:[#allocation10 + $0x1720] sm:$0xff]  ;;  %v2412_v18 = vld [vmem:[#allocation10 + $0x19e8] sm:$0xff]  ;;  %v2406_v5 = vld [vmem:[#allocation10 + $0x19b8] sm:$0xff] }
 0x622   :  { %6774 = vmatprep.subr.bf16.mxu1 %v6773_v45  ;;  %v2333_v45 = vld [vmem:[#allocation10 + $0x1770] sm:$0xff]  ;;  %v6539_v58 = vpack.c.bf16 %v2331_v49, %v2323_v35  ;;  %v2478_v19 = vld [vmem:[#allocation10 + $0x1bf8] sm:$0xff] }
 0x623   :  { %v2405_v35 = vld [vmem:[#allocation10 + $0x19b0] sm:$0xff] }
 0x624   :  { %6520 = vmatpush1.bf16.msra.mxu0 %v6519_v59  ;;  %v6795_v59 = vpack.c.bf16 %v2333_v45, %v2325_v48  ;;  %v2420_v48 = vld [vmem:[#allocation10 + $0x1a28] sm:$0xff]  ;;  %v2422_v45 = vld [vmem:[#allocation10 + $0x1a38] sm:$0xff] }
 0x625   :  { %6776 = vmatpush1.bf16.msra.mxu1 %v6775_v3  ;;  %6522 = vmatprep.subr.bf16.mxu0 %v6521_v43  ;;  %v6541_v3 = vpack.c.bf16 %v2348_v34, %v2340_v52  ;;  %v2339_v43 = vld [vmem:[#allocation10 + $0x17a0] sm:$0xff]  ;;  %v2430_v52 = vld [vmem:[#allocation10 + $0x1a78] sm:$0xff] }
 0x626   :  { %6778 = vmatprep.subr.bf16.mxu1 %v6777_v7  ;;  %v2349_v7 = vld [vmem:[#allocation10 + $0x17f0] sm:$0xff]  ;;  %v6543_v21 = vpack.c.bf16 %v2347_v8, %v2339_v43  ;;  %v6817_v43 = vpack.c.bf16 %v2430_v52, %v2422_v45  ;;  %v2508_v45 = vld [vmem:[#allocation10 + $0x1ce8] sm:$0xff]  ;;  %v2502_v52 = vld [vmem:[#allocation10 + $0x1cb8] sm:$0xff] }
 0x627   :  { %v2429_v8 = vld [vmem:[#allocation10 + $0x1a70] sm:$0xff] }
 0x628   :  { %6524 = vmatpush1.bf16.msra.mxu0 %v6523_v26  ;;  %v6799_v26 = vpack.c.bf16 %v2349_v7, %v2341_v60  ;;  %v2436_v60 = vld [vmem:[#allocation10 + $0x1aa8] sm:$0xff]  ;;  %v2438_v7 = vld [vmem:[#allocation10 + $0x1ab8] sm:$0xff] }
 0x629   :  { %6780 = vmatpush1.bf16.msra.mxu1 %v6779_v15  ;;  %6526 = vmatprep.subr.bf16.mxu0 %v6525_v63  ;;  %v6545_v15 = vpack.c.bf16 %v2364_v9, %v2356_v29  ;;  %v2355_v63 = vld [vmem:[#allocation10 + $0x1820] sm:$0xff]  ;;  %v2446_v29 = vld [vmem:[#allocation10 + $0x1af8] sm:$0xff] }
 0x62a   :  { %6782 = vmatprep.subr.bf16.mxu1 %v6781_v38  ;;  %v2365_v38 = vld [vmem:[#allocation10 + $0x1870] sm:$0xff]  ;;  %v6547_v32 = vpack.c.bf16 %v2363_v42, %v2355_v63  ;;  %v6821_v63 = vpack.c.bf16 %v2446_v29, %v2438_v7  ;;  %v2524_v7 = vld [vmem:[#allocation10 + $0x1d68] sm:$0xff]  ;;  %v2518_v29 = vld [vmem:[#allocation10 + $0x1d38] sm:$0xff] }
 0x62b   :  { %v2445_v42 = vld [vmem:[#allocation10 + $0x1af0] sm:$0xff] }
 0x62c   :  { %6528 = vmatpush1.bf16.msra.mxu0 %v6527_v17  ;;  %v6803_v17 = vpack.c.bf16 %v2365_v38, %v2357_v55  ;;  %v2460_v55 = vld [vmem:[#allocation10 + $0x1b68] sm:$0xff]  ;;  %v2454_v38 = vld [vmem:[#allocation10 + $0x1b38] sm:$0xff] }
 0x62d   :  { %6784 = vmatpush1.bf16.msra.mxu1 %v6783_v13  ;;  %6530 = vmatprep.subr.bf16.mxu0 %v6529_v27  ;;  %v2371_v13 = vld [vmem:[#allocation10 + $0x18a0] sm:$0xff] }
 0x62e   :  { %6786 = vmatprep.subr.bf16.mxu1 %v6785_v50  ;;  %v2379_v27 = vld [vmem:[#allocation10 + $0x18e0] sm:$0xff]  ;;  %v2388_v50 = vld [vmem:[#allocation10 + $0x1928] sm:$0xff] }
 0x62f   :  { %v6551_v47 = vpack.c.bf16 %v2379_v27, %v2371_v13  ;;  %v2453_v13 = vld [vmem:[#allocation10 + $0x1b30] sm:$0xff] }
 0x630   :  { %6532 = vmatpush1.bf16.msra.mxu0 %v6531_v20  ;;  %v6807_v20 = vpack.c.bf16 %v2381_v11, %v2373_v37  ;;  %v6825_v37 = vpack.c.bf16 %v2462_v28, %v2454_v38  ;;  %v2468_v11 = vld [vmem:[#allocation10 + $0x1ba8] sm:$0xff]  ;;  %v2534_v28 = vld [vmem:[#allocation10 + $0x1db8] sm:$0xff] }
 0x631   :  { %6788 = vmatpush1.bf16.msra.mxu1 %v6787_v51  ;;  %6534 = vmatprep.subr.bf16.mxu0 %v6533_v62  ;;  %v6553_v51 = vpack.c.bf16 %v2396_v22, %v2388_v50  ;;  %v2387_v62 = vld [vmem:[#allocation10 + $0x1920] sm:$0xff]  ;;  %v2476_v50 = vld [vmem:[#allocation10 + $0x1be8] sm:$0xff] }
 0x632   :  { %6790 = vmatprep.subr.bf16.mxu1 %v6789_v33  ;;  %v2397_v33 = vld [vmem:[#allocation10 + $0x1970] sm:$0xff]  ;;  %v6555_v16 = vpack.c.bf16 %v2395_v30, %v2387_v62  ;;  %v6573_v62 = vpack.c.bf16 %v2476_v50, %v2468_v11  ;;  %v2467_v30 = vld [vmem:[#allocation10 + $0x1ba0] sm:$0xff]  ;;  %v2540_v38 = vld [vmem:[#allocation10 + $0x1de8] sm:$0xff] }
 0x633   :  { %v6811_v36 = vpack.c.bf16 %v2397_v33, %v2389_v31  ;;  %v2475_v31 = vld [vmem:[#allocation10 + $0x1be0] sm:$0xff]  ;;  %v6829_v33 = vpack.c.bf16 %v2478_v19, %v2470_v14  ;;  %v2541_v11 = vld [vmem:[#allocation10 + $0x1df0] sm:$0xff]  ;;  %v2548_v50 = vld [vmem:[#allocation10 + $0x1e28] sm:$0xff] }
 0x634   :  { %6536 = vmatpush1.bf16.msra.mxu0 %v6535_v39  ;;  %v6557_v39 = vpack.c.bf16 %v2412_v18, %v2404_v61  ;;  %v2477_v61 = vld [vmem:[#allocation10 + $0x1bf0] sm:$0xff]  ;;  %v2484_v18 = vld [vmem:[#allocation10 + $0x1c28] sm:$0xff]  ;;  %v2550_v19 = vld [vmem:[#allocation10 + $0x1e38] sm:$0xff] }
 0x635   :  { %6792 = vmatpush1.bf16.msra.mxu1 %v6791_v2  ;;  %6538 = vmatprep.subr.bf16.mxu0 %v6537_v40  ;;  %v2403_v2 = vld [vmem:[#allocation10 + $0x19a0] sm:$0xff]  ;;  %v2556_v14 = vld [vmem:[#allocation10 + $0x1e68] sm:$0xff] }
 0x636   :  { %6794 = vmatprep.subr.bf16.mxu1 %v6793_v23  ;;  %v2411_v40 = vld [vmem:[#allocation10 + $0x19e0] sm:$0xff]  ;;  %v2428_v23 = vld [vmem:[#allocation10 + $0x1a68] sm:$0xff] }
 0x637   :  { %v6559_v34 = vpack.c.bf16 %v2411_v40, %v2403_v2  ;;  %v6561_v1 = vpack.c.bf16 %v2428_v23, %v2420_v48  ;;  %v2483_v40 = vld [vmem:[#allocation10 + $0x1c20] sm:$0xff]  ;;  %v2493_v48 = vld [vmem:[#allocation10 + $0x1c70] sm:$0xff]  ;;  %v2500_v23 = vld [vmem:[#allocation10 + $0x1ca8] sm:$0xff] }
 0x638   :  { %6540 = vmatpush1.bf16.msra.mxu0 %v6539_v58  ;;  %v2419_v58 = vld [vmem:[#allocation10 + $0x1a20] sm:$0xff] }
 0x639   :  { %6796 = vmatpush1.bf16.msra.mxu1 %v6795_v59  ;;  %6542 = vmatprep.subr.bf16.mxu0 %v6541_v3  ;;  %v2427_v59 = vld [vmem:[#allocation10 + $0x1a60] sm:$0xff]  ;;  %v2421_v3 = vld [vmem:[#allocation10 + $0x1a30] sm:$0xff] }
 0x63a   :  { %6798 = vmatprep.subr.bf16.mxu1 %v6797_v54  ;;  %v2444_v54 = vld [vmem:[#allocation10 + $0x1ae8] sm:$0xff]  ;;  %v6563_v9 = vpack.c.bf16 %v2427_v59, %v2419_v58  ;;  %v6819_v44 = vpack.c.bf16 %v2429_v8, %v2421_v3  ;;  %v6581_v58 = vpack.c.bf16 %v2508_v45, %v2500_v23  ;;  %v2499_v59 = vld [vmem:[#allocation10 + $0x1ca0] sm:$0xff]  ;;  %v2573_v23 = vld [vmem:[#allocation10 + $0x1ef0] sm:$0xff] }
 0x63b   :  { %v6565_v25 = vpack.c.bf16 %v2444_v54, %v2436_v60  ;;  %v2507_v3 = vld [vmem:[#allocation10 + $0x1ce0] sm:$0xff]  ;;  %v2509_v60 = vld [vmem:[#allocation10 + $0x1cf0] sm:$0xff]  ;;  %v2516_v54 = vld [vmem:[#allocation10 + $0x1d28] sm:$0xff] }
 0x63c   :  { %6544 = vmatpush1.bf16.msra.mxu0 %v6543_v21  ;;  %v2435_v21 = vld [vmem:[#allocation10 + $0x1aa0] sm:$0xff]  ;;  %v2580_v45 = vld [vmem:[#allocation10 + $0x1f28] sm:$0xff] }
 0x63d   :  { %6800 = vmatpush1.bf16.msra.mxu1 %v6799_v26  ;;  %6546 = vmatprep.subr.bf16.mxu0 %v6545_v15  ;;  %v2443_v26 = vld [vmem:[#allocation10 + $0x1ae0] sm:$0xff]  ;;  %v2437_v15 = vld [vmem:[#allocation10 + $0x1ab0] sm:$0xff] }
 0x63e   :  { %6802 = vmatprep.subr.bf16.mxu1 %v6801_v53  ;;  %v2452_v53 = vld [vmem:[#allocation10 + $0x1b28] sm:$0xff]  ;;  %v6567_v24 = vpack.c.bf16 %v2443_v26, %v2435_v21  ;;  %v6585_v21 = vpack.c.bf16 %v2524_v7, %v2516_v54  ;;  %v2515_v26 = vld [vmem:[#allocation10 + $0x1d20] sm:$0xff]  ;;  %v2589_v54 = vld [vmem:[#allocation10 + $0x1f70] sm:$0xff] }
 0x63f   :  { %3424 = vmatmul.mubr.f32.vlgmr.msra.gmra.mrb[24].mxu0 %v8862_v0  ;;  %v6569_v41 = vpack.c.bf16 %v2460_v55, %v2452_v53  ;;  %v2525_v53 = vld [vmem:[#allocation10 + $0x1d70] sm:$0xff]  ;;  %v2532_v55 = vld [vmem:[#allocation10 + $0x1da8] sm:$0xff] }
 0x640   :  { %3708 = vmatmul.mubr.f32.vlgmr.msra.gmra.mrb[26].mxu1 %v8862_v0  ;;  %6548 = vmatpush1.bf16.msra.mxu0 %v6547_v32  ;;  %v2414_v0 = vld [vmem:[#allocation10 + $0x19f8] sm:$0xff]  ;;  %v6823_v32 = vpack.c.bf16 %v2445_v42, %v2437_v15  ;;  %v2523_v15 = vld [vmem:[#allocation10 + $0x1d60] sm:$0xff]  ;;  %v2596_v7 = vld [vmem:[#allocation10 + $0x1fa8] sm:$0xff] }
 0x641   :  { %3494 = vmatprep.mubr.f32.mxu0 %v8865_v10  ;;  %6804 = vmatpush1.bf16.msra.mxu1 %v6803_v17  ;;  %v6813_v49 = vpack.c.bf16 %v2414_v0, %v2406_v5  ;;  %v2459_v17 = vld [vmem:[#allocation10 + $0x1b60] sm:$0xff]  ;;  %v2492_v5 = vld [vmem:[#allocation10 + $0x1c68] sm:$0xff]  ;;  %v2486_v0 = vld [vmem:[#allocation10 + $0x1c38] sm:$0xff] }
 0x642   :  { %3778 = vmatprep.mubr.f32.mxu1 %v8865_v10  ;;  %6550 = vmatprep.subr.bf16.mxu0 %v6549_v6  ;;  %v2413_v10 = vld [vmem:[#allocation10 + $0x19f0] sm:$0xff]  ;;  %v6577_v2 = vpack.c.bf16 %v2492_v5, %v2484_v18  ;;  %v2564_v5 = vld [vmem:[#allocation10 + $0x1ea8] sm:$0xff] }
 0x643   :  { %6806 = vmatprep.subr.bf16.mxu1 %v6805_v56  ;;  %v6815_v46 = vpack.c.bf16 %v2413_v10, %v2405_v35  ;;  %v2461_v6 = vld [vmem:[#allocation10 + $0x1b70] sm:$0xff]  ;;  %v2491_v35 = vld [vmem:[#allocation10 + $0x1c60] sm:$0xff] }
 0x644   :  { %6552 = vmatpush1.bf16.msra.mxu0 %v6551_v47  ;;  %v2557_v18 = vld [vmem:[#allocation10 + $0x1e70] sm:$0xff] }
 0x645   :  { %6808 = vmatpush1.bf16.msra.mxu1 %v6807_v20  ;;  %6554 = vmatprep.subr.bf16.mxu0 %v6553_v51  ;;  %v6571_v20 = vpack.c.bf16 %v2459_v17, %v2451_v4  ;;  %v6827_v51 = vpack.c.bf16 %v2461_v6, %v2453_v13  ;;  %v6589_v4 = vpack.c.bf16 %v2540_v38, %v2532_v55  ;;  %v2531_v17 = vld [vmem:[#allocation10 + $0x1da0] sm:$0xff]  ;;  %v2605_v38 = vld [vmem:[#allocation10 + $0x1ff0] sm:$0xff] }
 0x646   :  { %6810 = vmatprep.subr.bf16.mxu1 %v6809_v12  ;;  %v2469_v12 = vld [vmem:[#allocation10 + $0x1bb0] sm:$0xff]  ;;  %v2539_v13 = vld [vmem:[#allocation10 + $0x1de0] sm:$0xff] }
 0x648   :  { %6556 = vmatpush1.bf16.msra.mxu0 %v6555_v16  ;;  %v2494_v16 = vld [vmem:[#allocation10 + $0x1c78] sm:$0xff] }
 0x649   :  { %6812 = vmatpush1.bf16.msra.mxu1 %v6811_v36  ;;  %6558 = vmatprep.subr.bf16.mxu0 %v6557_v39  ;;  %v6575_v36 = vpack.c.bf16 %v2475_v31, %v2467_v30  ;;  %v6831_v39 = vpack.c.bf16 %v2477_v61, %v2469_v12  ;;  %v6833_v10 = vpack.c.bf16 %v2494_v16, %v2486_v0  ;;  %v2547_v31 = vld [vmem:[#allocation10 + $0x1e20] sm:$0xff]  ;;  %v2572_v0 = vld [vmem:[#allocation10 + $0x1ee8] sm:$0xff]  ;;  %v2566_v16 = vld [vmem:[#allocation10 + $0x1eb8] sm:$0xff] }
 0x64a   :  { %6814 = vmatprep.subr.bf16.mxu1 %v6813_v49  ;;  %v2485_v49 = vld [vmem:[#allocation10 + $0x1c30] sm:$0xff]  ;;  %v6593_v30 = vpack.c.bf16 %v2556_v14, %v2548_v50  ;;  %v2555_v12 = vld [vmem:[#allocation10 + $0x1e60] sm:$0xff] }
 0x64b   :  { %v3800_v50 = vld [vmem:[#allocation13 + $0x38] sm:$0xff] }
 0x64c   :  { %6560 = vmatpush1.bf16.msra.mxu0 %v6559_v34  ;;  %v2510_v34 = vld [vmem:[#allocation10 + $0x1cf8] sm:$0xff] }
 0x64d   :  { %6816 = vmatpush1.bf16.msra.mxu1 %v6815_v46  ;;  %6562 = vmatprep.subr.bf16.mxu0 %v6561_v1  ;;  %v6579_v46 = vpack.c.bf16 %v2491_v35, %v2483_v40  ;;  %v6835_v1 = vpack.c.bf16 %v2493_v48, %v2485_v49  ;;  %v6837_v8 = vpack.c.bf16 %v2510_v34, %v2502_v52  ;;  %v2563_v35 = vld [vmem:[#allocation10 + $0x1ea0] sm:$0xff]  ;;  %v2588_v52 = vld [vmem:[#allocation10 + $0x1f68] sm:$0xff]  ;;  %v2582_v34 = vld [vmem:[#allocation10 + $0x1f38] sm:$0xff] }
 0x64e   :  { %6818 = vmatprep.subr.bf16.mxu1 %v6817_v43  ;;  %v2501_v43 = vld [vmem:[#allocation10 + $0x1cb0] sm:$0xff]  ;;  %v6597_v40 = vpack.c.bf16 %v2572_v0, %v2564_v5  ;;  %v2571_v49 = vld [vmem:[#allocation10 + $0x1ee0] sm:$0xff] }
 0x64f   :  { %v3806_v5 = vld [vmem:[#allocation13 + $0x68] sm:$0xff]  ;;  %v3808_v0 = vld [vmem:[#allocation13 + $0x78] sm:$0xff] }
 0x650   :  { %6564 = vmatpush1.bf16.msra.mxu0 %v6563_v9  ;;  %v2526_v9 = vld [vmem:[#allocation10 + $0x1d78] sm:$0xff] }
 0x651   :  { %6820 = vmatpush1.bf16.msra.mxu1 %v6819_v44  ;;  %6566 = vmatprep.subr.bf16.mxu0 %v6565_v25  ;;  %v6583_v44 = vpack.c.bf16 %v2507_v3, %v2499_v59  ;;  %v6839_v25 = vpack.c.bf16 %v2509_v60, %v2501_v43  ;;  %v6841_v42 = vpack.c.bf16 %v2526_v9, %v2518_v29  ;;  %v2579_v3 = vld [vmem:[#allocation10 + $0x1f20] sm:$0xff]  ;;  %v2604_v29 = vld [vmem:[#allocation10 + $0x1fe8] sm:$0xff]  ;;  %v2598_v9 = vld [vmem:[#allocation10 + $0x1fb8] sm:$0xff] }
 0x652   :  { %v8903_v27 = vpop.f32.mrb[22].mxu0  ;;  %6822 = vmatprep.subr.bf16.mxu1 %v6821_v63  ;;  %v2517_v63 = vld [vmem:[#allocation10 + $0x1d30] sm:$0xff]  ;;  %v6601_v59 = vpack.c.bf16 %v2588_v52, %v2580_v45  ;;  %v2587_v43 = vld [vmem:[#allocation10 + $0x1f60] sm:$0xff] }
 0x653   :  { %v8905_v22 = vpop.f32.mrb[24].mxu1  ;;  %v8907_v56 = vpop.f32.mrb[23].mxu0  ;;  %v3816_v45 = vld [vmem:[#allocation13 + $0xb8] sm:$0xff] }
 0x654   :  { %v8909_v47 = vpop.f32.mrb[25].mxu1  ;;  %6568 = vmatpush1.bf16.msra.mxu0 %v6567_v24  ;;  %v2542_v24 = vld [vmem:[#allocation10 + $0x1df8] sm:$0xff] }
 0x655   :  { %6824 = vmatpush1.bf16.msra.mxu1 %v6823_v32  ;;  %6570 = vmatprep.subr.bf16.mxu0 %v6569_v41  ;;  %v6587_v32 = vpack.c.bf16 %v2523_v15, %v2515_v26  ;;  %v6843_v41 = vpack.c.bf16 %v2525_v53, %v2517_v63  ;;  %v6845_v6 = vpack.c.bf16 %v2542_v24, %v2534_v28  ;;  %v2595_v63 = vld [vmem:[#allocation10 + $0x1fa0] sm:$0xff]  ;;  %v2597_v53 = vld [vmem:[#allocation10 + $0x1fb0] sm:$0xff] }
 0x656   :  { %6826 = vmatprep.subr.bf16.mxu1 %v6825_v37  ;;  %v2533_v37 = vld [vmem:[#allocation10 + $0x1db0] sm:$0xff]  ;;  %v6605_v15 = vpack.c.bf16 %v2604_v29, %v2596_v7  ;;  %v3796_v24 = vld [vmem:[#allocation13 + $0x18] sm:$0xff] }
 0x657   :  { %v3794_v28 = vld [vmem:[#allocation13 + $0x8] sm:$0xff]  ;;  %v3824_v7 = vld [vmem:[#allocation13 + $0xf8] sm:$0xff] }
 0x658   :  { %6572 = vmatpush1.bf16.msra.mxu0 %v6571_v20  ;;  %v2558_v20 = vld [vmem:[#allocation10 + $0x1e78] sm:$0xff] }
 0x659   :  { %6828 = vmatpush1.bf16.msra.mxu1 %v6827_v51  ;;  %6574 = vmatprep.subr.bf16.mxu0 %v6573_v62  ;;  %v6591_v51 = vpack.c.bf16 %v2539_v13, %v2531_v17  ;;  %v6847_v62 = vpack.c.bf16 %v2541_v11, %v2533_v37  ;;  %v6849_v61 = vpack.c.bf16 %v2558_v20, %v2550_v19  ;;  %v3793_v37 = vld [vmem:[#allocation13] sm:$0xff]  ;;  %v3798_v11 = vld [vmem:[#allocation13 + $0x28] sm:$0xff] }
 0x65a   :  { %6830 = vmatprep.subr.bf16.mxu1 %v6829_v33  ;;  %v2549_v33 = vld [vmem:[#allocation10 + $0x1e30] sm:$0xff]  ;;  %v6863_v17 = vpack.c.bf16 %v2605_v38, %v2597_v53  ;;  %v6865_v13 = vpack.c.bf16 %v3796_v24, %v3794_v28  ;;  %v6869_v20 = vpack.c.bf16 %v3800_v50, %v3798_v11  ;;  %v3825_v53 = vld [vmem:[#allocation13 + $0x100] sm:$0xff]  ;;  %v3832_v28 = vld [vmem:[#allocation13 + $0x138] sm:$0xff] }
 0x65b   :  { %v3830_v38 = vld [vmem:[#allocation13 + $0x128] sm:$0xff]  ;;  %v3833_v50 = vld [vmem:[#allocation13 + $0x140] sm:$0xff] }
 0x65c   :  { %6576 = vmatpush1.bf16.msra.mxu0 %v6575_v36  ;;  %v2574_v36 = vld [vmem:[#allocation10 + $0x1ef8] sm:$0xff] }
 0x65d   :  { %6832 = vmatpush1.bf16.msra.mxu1 %v6831_v39  ;;  %6578 = vmatprep.subr.bf16.mxu0 %v6577_v2  ;;  %v6595_v39 = vpack.c.bf16 %v2555_v12, %v2547_v31  ;;  %v6851_v2 = vpack.c.bf16 %v2557_v18, %v2549_v33  ;;  %v6853_v48 = vpack.c.bf16 %v2574_v36, %v2566_v16  ;;  %v3804_v31 = vld [vmem:[#allocation13 + $0x58] sm:$0xff]  ;;  %v3803_v18 = vld [vmem:[#allocation13 + $0x50] sm:$0xff] }
 0x65e   :  { %6834 = vmatprep.subr.bf16.mxu1 %v6833_v10  ;;  %v2565_v10 = vld [vmem:[#allocation10 + $0x1eb0] sm:$0xff]  ;;  %v6877_v36 = vpack.c.bf16 %v3808_v0, %v3806_v5  ;;  %v3843_v5 = vld [vmem:[#allocation13 + $0x190] sm:$0xff] }
 0x65f   :  { %v3846_v0 = vld [vmem:[#allocation13 + $0x1a8] sm:$0xff] }
 0x660   :  { %6580 = vmatpush1.bf16.msra.mxu0 %v6579_v46  ;;  %v2590_v46 = vld [vmem:[#allocation10 + $0x1f78] sm:$0xff] }
 0x661   :  { %6836 = vmatpush1.bf16.msra.mxu1 %v6835_v1  ;;  %6582 = vmatprep.subr.bf16.mxu0 %v6581_v58  ;;  %v6599_v1 = vpack.c.bf16 %v2571_v49, %v2563_v35  ;;  %v6855_v58 = vpack.c.bf16 %v2573_v23, %v2565_v10  ;;  %v6857_v60 = vpack.c.bf16 %v2590_v46, %v2582_v34  ;;  %v3812_v35 = vld [vmem:[#allocation13 + $0x98] sm:$0xff]  ;;  %v3809_v10 = vld [vmem:[#allocation13 + $0x80] sm:$0xff]  ;;  %v3814_v23 = vld [vmem:[#allocation13 + $0xa8] sm:$0xff] }
 0x662   :  { %6838 = vmatprep.subr.bf16.mxu1 %v6837_v8  ;;  %v2581_v8 = vld [vmem:[#allocation10 + $0x1f30] sm:$0xff]  ;;  %v6885_v34 = vpack.c.bf16 %v3816_v45, %v3814_v23  ;;  %v3813_v46 = vld [vmem:[#allocation13 + $0xa0] sm:$0xff]  ;;  %v3851_v23 = vld [vmem:[#allocation13 + $0x1d0] sm:$0xff] }
 0x663   :  { %v6859_v26 = vpack.c.bf16 %v2589_v54, %v2581_v8  ;;  %v3817_v8 = vld [vmem:[#allocation13 + $0xc0] sm:$0xff]  ;;  %v3822_v54 = vld [vmem:[#allocation13 + $0xe8] sm:$0xff] }
 0x664   :  { %6584 = vmatpush1.bf16.msra.mxu0 %v6583_v44  ;;  %v2606_v44 = vld [vmem:[#allocation10 + $0x1ff8] sm:$0xff] }
 0x665   :  { %6840 = vmatpush1.bf16.msra.mxu1 %v6839_v25  ;;  %6586 = vmatprep.subr.bf16.mxu0 %v6585_v21  ;;  %v8911_v25 = vld [vmem:[#allocation11] sm:$0xff]  ;;  %v6603_v21 = vpack.c.bf16 %v2587_v43, %v2579_v3  ;;  %v6861_v55 = vpack.c.bf16 %v2606_v44, %v2598_v9  ;;  %v6893_v9 = vpack.c.bf16 %v3824_v7, %v3822_v54  ;;  %v3821_v44 = vld [vmem:[#allocation13 + $0xe0] sm:$0xff]  ;;  %v9486_v45 = vld [vmem:[#allocation28_spill] sm:$0xff] }
 0x666   :  { %6842 = vmatprep.subr.bf16.mxu1 %v6841_v42  ;;  %v2603_v42 = vld [vmem:[#allocation10 + $0x1fe0] sm:$0xff]  ;;  %v3858_v54 = vld [vmem:[#allocation13 + $0x208] sm:$0xff] }
 0x667   :  { %v3860_v7 = vld [vmem:[#allocation13 + $0x218] sm:$0xff] }
 0x668   :  { %6588 = vmatpush1.bf16.msra.mxu0 %v6587_v32  ;;  %v9485_v32 = vld [vmem:[#allocation31_spill] sm:$0xff] }
 0x669   :  { %6844 = vmatpush1.bf16.msra.mxu1 %v6843_v41  ;;  %6590 = vmatprep.subr.bf16.mxu0 %v6589_v4  ;;  %v2616_v41 = vrot.slane %v8911_v25, %v9485_v32  ;;  %v6607_v4 = vpack.c.bf16 %v2603_v42, %v2595_v63 }
 0x66a   :  { %6846 = vmatprep.subr.bf16.mxu1 %v6845_v6  ;;  %v3795_v6 = vld [vmem:[#allocation13 + $0x10] sm:$0xff] }
 0x66b   :  { %v7506_v14 = vadd.f32 %v8907_v56, %v2616_v41  ;;  %v6867_v19 = vpack.c.bf16 %v3795_v6, %v3793_v37  ;;  %v3801_v56 = vld [vmem:[#allocation13 + $0x40] sm:$0xff]  ;;  %v6901_v41 = vpack.c.bf16 %v3832_v28, %v3830_v38  ;;  %v3836_v37 = vld [vmem:[#allocation13 + $0x158] sm:$0xff] }
 0x66c   :  { %6592 = vmatpush1.bf16.msra.mxu0 %v6591_v51  ;;  %v3797_v51 = vld [vmem:[#allocation13 + $0x20] sm:$0xff]  ;;  %v6875_v16 = vpack.c.bf16 %v3803_v18, %v3801_v56 }
 0x66d   :  { %6848 = vmatpush1.bf16.msra.mxu1 %v6847_v62  ;;  %6594 = vmatprep.subr.bf16.mxu0 %v6593_v30  ;;  %v3799_v62 = vld [vmem:[#allocation13 + $0x30] sm:$0xff]  ;;  %v3802_v30 = vld [vmem:[#allocation13 + $0x48] sm:$0xff]  ;;  %v3786_v12 = vmax.f32 %v7506_v14, 0.0  ;;  %v3841_v18 = vld [vmem:[#allocation13 + $0x180] sm:$0xff] }
 0x66e   :  { %6850 = vmatprep.subr.bf16.mxu1 %v6849_v61  ;;  %v6871_v33 = vpack.c.bf16 %v3799_v62, %v3797_v51  ;;  %v6873_v61 = vpack.c.bf16 %v3804_v31, %v3802_v30  ;;  %v3835_v14 = vld [vmem:[#allocation13 + $0x150] sm:$0xff]  ;;  %v3837_v30 = vld [vmem:[#allocation13 + $0x160] sm:$0xff] }
 0x66f   :  { %v6907_v51 = vpack.c.bf16 %v3835_v14, %v3833_v50  ;;  %v3839_v31 = vld [vmem:[#allocation13 + $0x170] sm:$0xff]  ;;  %v3861_v28 = vld [vmem:[#allocation13 + $0x220] sm:$0xff] }
 0x670   :  { %6596 = vmatpush1.bf16.msra.mxu0 %v6595_v39  ;;  %v3805_v39 = vld [vmem:[#allocation13 + $0x60] sm:$0xff] }
 0x671   :  { %6852 = vmatpush1.bf16.msra.mxu1 %v6851_v2  ;;  %6598 = vmatprep.subr.bf16.mxu0 %v6597_v40  ;;  %v3807_v2 = vld [vmem:[#allocation13 + $0x70] sm:$0xff]  ;;  %v3810_v40 = vld [vmem:[#allocation13 + $0x88] sm:$0xff] }
 0x672   :  { %6854 = vmatprep.subr.bf16.mxu1 %v6853_v48  ;;  %v6879_v49 = vpack.c.bf16 %v3807_v2, %v3805_v39  ;;  %v3811_v48 = vld [vmem:[#allocation13 + $0x90] sm:$0xff]  ;;  %v3845_v2 = vld [vmem:[#allocation13 + $0x1a0] sm:$0xff] }
 0x673   :  { %v6883_v52 = vpack.c.bf16 %v3811_v48, %v3809_v10  ;;  %v3849_v48 = vld [vmem:[#allocation13 + $0x1c0] sm:$0xff] }
 0x674   :  { %6600 = vmatpush1.bf16.msra.mxu0 %v6599_v1  ;;  %v3815_v1 = vld [vmem:[#allocation13 + $0xb0] sm:$0xff] }
 0x675   :  { %6856 = vmatpush1.bf16.msra.mxu1 %v6855_v58  ;;  %6602 = vmatprep.subr.bf16.mxu0 %v6601_v59  ;;  %v3818_v58 = vld [vmem:[#allocation13 + $0xc8] sm:$0xff]  ;;  %v3820_v59 = vld [vmem:[#allocation13 + $0xd8] sm:$0xff]  ;;  %v6887_v3 = vpack.c.bf16 %v3815_v1, %v3813_v46  ;;  %v6923_v1 = vpack.c.bf16 %v3851_v23, %v3849_v48 }
 0x676   :  { %6858 = vmatprep.subr.bf16.mxu1 %v6857_v60  ;;  %v6889_v43 = vpack.c.bf16 %v3820_v59, %v3818_v58  ;;  %v3819_v60 = vld [vmem:[#allocation13 + $0xd0] sm:$0xff]  ;;  %v3856_v46 = vld [vmem:[#allocation13 + $0x1f8] sm:$0xff] }
 0x677   :  { %v6891_v29 = vpack.c.bf16 %v3819_v60, %v3817_v8  ;;  %v9487_v58 = vld [vmem:[#allocation30_spill] sm:$0xff]  ;;  %v3855_v8 = vld [vmem:[#allocation13 + $0x1f0] sm:$0xff] }
 0x678   :  { %6604 = vmatpush1.bf16.msra.mxu0 %v6603_v21  ;;  %v3823_v21 = vld [vmem:[#allocation13 + $0xf0] sm:$0xff]  ;;  %v2612_v59 = vrot.slane %v8911_v25, %v9487_v58 }
 0x679   :  { %6860 = vmatpush1.bf16.msra.mxu1 %v6859_v26  ;;  %6606 = vmatprep.subr.bf16.mxu0 %v6605_v15  ;;  %v3826_v26 = vld [vmem:[#allocation13 + $0x108] sm:$0xff]  ;;  %v3828_v15 = vld [vmem:[#allocation13 + $0x118] sm:$0xff]  ;;  %v6895_v63 = vpack.c.bf16 %v3823_v21, %v3821_v44  ;;  %v6929_v44 = vpack.c.bf16 %v3860_v7, %v3858_v54  ;;  %v3857_v21 = vld [vmem:[#allocation13 + $0x200] sm:$0xff] }
 0x67a   :  { %6862 = vmatprep.subr.bf16.mxu1 %v6861_v55  ;;  %v6897_v42 = vpack.c.bf16 %v3828_v15, %v3826_v26  ;;  %v3827_v55 = vld [vmem:[#allocation13 + $0x110] sm:$0xff]  ;;  %v3894_v54 = vld [vmem:[#allocation13 + $0x328] sm:$0xff]  ;;  %v3896_v7 = vld [vmem:[#allocation13 + $0x338] sm:$0xff] }
 0x67b   :  { %v6899_v24 = vpack.c.bf16 %v3827_v55, %v3825_v53  ;;  %v3859_v26 = vld [vmem:[#allocation13 + $0x210] sm:$0xff] }
 0x67c   :  { %6608 = vmatpush1.bf16.msra.mxu0 %v6607_v4  ;;  %v3829_v4 = vld [vmem:[#allocation13 + $0x120] sm:$0xff]  ;;  %v6931_v53 = vpack.c.bf16 %v3859_v26, %v3857_v21  ;;  %v3895_v21 = vld [vmem:[#allocation13 + $0x330] sm:$0xff]  ;;  %v3898_v26 = vld [vmem:[#allocation13 + $0x348] sm:$0xff] }
 0x67d   :  { %6864 = vmatpush1.bf16.msra.mxu1 %v6863_v17  ;;  %6866 = vmatprep.subr.bf16.mxu0 %v6865_v13  ;;  %v3831_v17 = vld [vmem:[#allocation13 + $0x130] sm:$0xff]  ;;  %v3834_v13 = vld [vmem:[#allocation13 + $0x148] sm:$0xff] }
 0x67e   :  { %v6903_v6 = vpack.c.bf16 %v3831_v17, %v3829_v4  ;;  %v6905_v11 = vpack.c.bf16 %v3836_v37, %v3834_v13  ;;  %v3866_v4 = vld [vmem:[#allocation13 + $0x248] sm:$0xff]  ;;  %v3868_v17 = vld [vmem:[#allocation13 + $0x258] sm:$0xff]  ;;  %v3865_v37 = vld [vmem:[#allocation13 + $0x240] sm:$0xff] }
 0x67f   :  { %3495 = vmatmul.mubr.f32.vlgmr.msra.gmra.mrb[24].mxu0 %v8870_v57  ;;  %v6937_v13 = vpack.c.bf16 %v3868_v17, %v3866_v4  ;;  %v3901_v4 = vld [vmem:[#allocation13 + $0x360] sm:$0xff]  ;;  %v3903_v17 = vld [vmem:[#allocation13 + $0x370] sm:$0xff] }
 0x680   :  { %3779 = vmatmul.mubr.f32.vlgmr.msra.gmra.mrb[26].mxu1 %v8870_v57  ;;  %6868 = vmatpush1.bf16.msra.mxu0 %v6867_v19  ;;  %v6881_v57 = vpack.c.bf16 %v3812_v35, %v3810_v40  ;;  %v3838_v19 = vld [vmem:[#allocation13 + $0x168] sm:$0xff]  ;;  %v3847_v40 = vld [vmem:[#allocation13 + $0x1b0] sm:$0xff] }
 0x681   :  { %4125 = vmatprep.mubr.f32.mxu0 %v3786_v12  ;;  %6870 = vmatprep.subr.bf16.mxu0 %v6869_v20  ;;  %v3840_v20 = vld [vmem:[#allocation13 + $0x178] sm:$0xff]  ;;  %v3842_v12 = vld [vmem:[#allocation13 + $0x188] sm:$0xff] }
 0x682   :  { %v6909_v62 = vpack.c.bf16 %v3840_v20, %v3838_v19  ;;  %v3850_v35 = vld [vmem:[#allocation13 + $0x1c8] sm:$0xff]  ;;  %v3869_v19 = vld [vmem:[#allocation13 + $0x260] sm:$0xff]  ;;  %v3871_v20 = vld [vmem:[#allocation13 + $0x270] sm:$0xff] }
 0x684   :  { %6872 = vmatpush1.bf16.msra.mxu0 %v6871_v33  ;;  %v3844_v33 = vld [vmem:[#allocation13 + $0x198] sm:$0xff] }
 0x685   :  { %6874 = vmatprep.subr.bf16.mxu0 %v6873_v61  ;;  %v6911_v61 = vpack.c.bf16 %v3839_v31, %v3837_v30  ;;  %v6913_v56 = vpack.c.bf16 %v3844_v33, %v3842_v12  ;;  %v6943_v30 = vpack.c.bf16 %v3871_v20, %v3869_v19  ;;  %v3873_v12 = vld [vmem:[#allocation13 + $0x280] sm:$0xff]  ;;  %v3875_v33 = vld [vmem:[#allocation13 + $0x290] sm:$0xff] }
 0x688   :  { %6876 = vmatpush1.bf16.msra.mxu0 %v6875_v16  ;;  %v3848_v16 = vld [vmem:[#allocation13 + $0x1b8] sm:$0xff] }
 0x689   :  { %6878 = vmatprep.subr.bf16.mxu0 %v6877_v36  ;;  %v6915_v36 = vpack.c.bf16 %v3843_v5, %v3841_v18  ;;  %v6917_v39 = vpack.c.bf16 %v3848_v16, %v3846_v0  ;;  %v6947_v18 = vpack.c.bf16 %v3875_v33, %v3873_v12  ;;  %v3877_v0 = vld [vmem:[#allocation13 + $0x2a0] sm:$0xff]  ;;  %v3879_v16 = vld [vmem:[#allocation13 + $0x2b0] sm:$0xff]  ;;  %v2619_v33 = vsub.s32 2, %v9486_v45 }
 0x68c   :  { %6880 = vmatpush1.bf16.msra.mxu0 %v6879_v49  ;;  %v3852_v49 = vld [vmem:[#allocation13 + $0x1d8] sm:$0xff] }
 0x68d   :  { %6882 = vmatprep.subr.bf16.mxu0 %v6881_v57  ;;  %v6919_v57 = vpack.c.bf16 %v3847_v40, %v3845_v2  ;;  %v6921_v10 = vpack.c.bf16 %v3852_v49, %v3850_v35  ;;  %v6951_v2 = vpack.c.bf16 %v3879_v16, %v3877_v0  ;;  %v3881_v35 = vld [vmem:[#allocation13 + $0x2c0] sm:$0xff]  ;;  %v3883_v49 = vld [vmem:[#allocation13 + $0x2d0] sm:$0xff]  ;;  %v3920_v0 = vld [vmem:[#allocation13 + $0x3f8] sm:$0xff] }
 0x68e   :  { %v6955_v48 = vpack.c.bf16 %v3883_v49, %v3881_v35  ;;  %v3922_v35 = vld [vmem:[#allocation13 + $0x408] sm:$0xff]  ;;  %v3924_v49 = vld [vmem:[#allocation13 + $0x418] sm:$0xff] }
 0x690   :  { %6884 = vmatpush1.bf16.msra.mxu0 %v6883_v52  ;;  %v2623_v52 = vsub.s32 3, %v9486_v45 }
 0x691   :  { %6886 = vmatprep.subr.bf16.mxu0 %v6885_v34  ;;  %v3854_v34 = vld [vmem:[#allocation13 + $0x1e8] sm:$0xff] }
 0x692   :  { %v2624_v60 = vrot.slane %v8911_v25, %v2623_v52 }
 0x694   :  { %6888 = vmatpush1.bf16.msra.mxu0 %v6887_v3  ;;  %v6925_v3 = vpack.c.bf16 %v3856_v46, %v3854_v34  ;;  %v7508_v15 = vadd.f32 %v8909_v47, %v2624_v60  ;;  %v3867_v47 = vld [vmem:[#allocation13 + $0x250] sm:$0xff]  ;;  %v3885_v34 = vld [vmem:[#allocation13 + $0x2e0] sm:$0xff] }
 0x695   :  { %6890 = vmatprep.subr.bf16.mxu0 %v6889_v43  ;;  %v3853_v43 = vld [vmem:[#allocation13 + $0x1e0] sm:$0xff]  ;;  %v6939_v50 = vpack.c.bf16 %v3867_v47, %v3865_v37  ;;  %v3887_v46 = vld [vmem:[#allocation13 + $0x2f0] sm:$0xff]  ;;  %v6975_v37 = vpack.c.bf16 %v3903_v17, %v3901_v4  ;;  %v3942_v4 = vld [vmem:[#allocation13 + $0x4a8] sm:$0xff] }
 0x696   :  { %v3891_v60 = vld [vmem:[#allocation13 + $0x310] sm:$0xff]  ;;  %v3944_v17 = vld [vmem:[#allocation13 + $0x4b8] sm:$0xff] }
 0x698   :  { %6892 = vmatpush1.bf16.msra.mxu0 %v6891_v29  ;;  %v6927_v29 = vpack.c.bf16 %v3855_v8, %v3853_v43  ;;  %v3889_v8 = vld [vmem:[#allocation13 + $0x300] sm:$0xff] }
 0x699   :  { %6894 = vmatprep.subr.bf16.mxu0 %v6893_v9  ;;  %v7505_v9 = vadd.f32 %v8903_v27, %v2612_v59  ;;  %v3892_v59 = vld [vmem:[#allocation13 + $0x318] sm:$0xff] }
 0x69b   :  { %v3785_v55 = vmax.f32 %v7505_v9, 0.0  ;;  %v6965_v9 = vpack.c.bf16 %v3896_v7, %v3894_v54  ;;  %v3932_v54 = vld [vmem:[#allocation13 + $0x458] sm:$0xff] }
 0x69c   :  { %6896 = vmatpush1.bf16.msra.mxu0 %v6895_v63  ;;  %v3862_v63 = vld [vmem:[#allocation13 + $0x228] sm:$0xff] }
 0x69d   :  { %6898 = vmatprep.subr.bf16.mxu0 %v6897_v42  ;;  %v3864_v42 = vld [vmem:[#allocation13 + $0x238] sm:$0xff] }
 0x69e   :  { %v6933_v38 = vpack.c.bf16 %v3864_v42, %v3862_v63 }
 0x6a0   :  { %6900 = vmatpush1.bf16.msra.mxu0 %v6899_v24  ;;  %v3863_v24 = vld [vmem:[#allocation13 + $0x230] sm:$0xff] }
 0x6a1   :  { %6902 = vmatprep.subr.bf16.mxu0 %v6901_v41  ;;  %v3788_v41 = vmax.f32 %v7508_v15, 0.0  ;;  %v6935_v27 = vpack.c.bf16 %v3863_v24, %v3861_v28  ;;  %v3900_v15 = vld [vmem:[#allocation13 + $0x358] sm:$0xff] }
 0x6a2   :  { %v6969_v42 = vpack.c.bf16 %v3900_v15, %v3898_v26  ;;  %v3904_v28 = vld [vmem:[#allocation13 + $0x378] sm:$0xff] }
 0x6a4   :  { %6904 = vmatpush1.bf16.msra.mxu0 %v6903_v6  ;;  %v3870_v6 = vld [vmem:[#allocation13 + $0x268] sm:$0xff] }
 0x6a5   :  { %6906 = vmatprep.subr.bf16.mxu0 %v6905_v11  ;;  %v3872_v11 = vld [vmem:[#allocation13 + $0x278] sm:$0xff] }
 0x6a6   :  { %v6941_v14 = vpack.c.bf16 %v3872_v11, %v3870_v6  ;;  %v3905_v6 = vld [vmem:[#allocation13 + $0x380] sm:$0xff]  ;;  %v3907_v11 = vld [vmem:[#allocation13 + $0x390] sm:$0xff] }
 0x6a7   :  { %v6979_v19 = vpack.c.bf16 %v3907_v11, %v3905_v6  ;;  %v3946_v6 = vld [vmem:[#allocation13 + $0x4c8] sm:$0xff]  ;;  %v3948_v11 = vld [vmem:[#allocation13 + $0x4d8] sm:$0xff] }
 0x6a8   :  { %6908 = vmatpush1.bf16.msra.mxu0 %v6907_v51  ;;  %v3874_v51 = vld [vmem:[#allocation13 + $0x288] sm:$0xff] }
 0x6a9   :  { %6910 = vmatprep.subr.bf16.mxu0 %v6909_v62  ;;  %v3876_v62 = vld [vmem:[#allocation13 + $0x298] sm:$0xff] }
 0x6aa   :  { %v6945_v31 = vpack.c.bf16 %v3876_v62, %v3874_v51  ;;  %v3909_v51 = vld [vmem:[#allocation13 + $0x3a0] sm:$0xff]  ;;  %v3911_v62 = vld [vmem:[#allocation13 + $0x3b0] sm:$0xff] }
 0x6ab   :  { %v6983_v12 = vpack.c.bf16 %v3911_v62, %v3909_v51  ;;  %v3950_v51 = vld [vmem:[#allocation13 + $0x4e8] sm:$0xff]  ;;  %v3952_v62 = vld [vmem:[#allocation13 + $0x4f8] sm:$0xff] }
 0x6ac   :  { %6912 = vmatpush1.bf16.msra.mxu0 %v6911_v61  ;;  %v3878_v61 = vld [vmem:[#allocation13 + $0x2a8] sm:$0xff] }
 0x6ad   :  { %6914 = vmatprep.subr.bf16.mxu0 %v6913_v56  ;;  %v3880_v56 = vld [vmem:[#allocation13 + $0x2b8] sm:$0xff] }
 0x6ae   :  { %v6949_v5 = vpack.c.bf16 %v3880_v56, %v3878_v61  ;;  %v3913_v56 = vld [vmem:[#allocation13 + $0x3c0] sm:$0xff] }
 0x6b0   :  { %6916 = vmatpush1.bf16.msra.mxu0 %v6915_v36  ;;  %v3882_v36 = vld [vmem:[#allocation13 + $0x2c8] sm:$0xff] }
 0x6b1   :  { %6918 = vmatprep.subr.bf16.mxu0 %v6917_v39  ;;  %v3884_v39 = vld [vmem:[#allocation13 + $0x2d8] sm:$0xff] }
 0x6b2   :  { %v6953_v40 = vpack.c.bf16 %v3884_v39, %v3882_v36  ;;  %v2620_v36 = vrot.slane %v8911_v25, %v2619_v33 }
 0x6b4   :  { %6920 = vmatpush1.bf16.msra.mxu0 %v6919_v57  ;;  %v3886_v57 = vld [vmem:[#allocation13 + $0x2e8] sm:$0xff] }
 0x6b5   :  { %6922 = vmatprep.subr.bf16.mxu0 %v6921_v10  ;;  %v3888_v10 = vld [vmem:[#allocation13 + $0x2f8] sm:$0xff] }
 0x6b6   :  { %v6957_v23 = vpack.c.bf16 %v3888_v10, %v3886_v57  ;;  %v7507_v10 = vadd.f32 %v8905_v22, %v2620_v36  ;;  %v3958_v36 = vld [vmem:[#allocation13 + $0x528] sm:$0xff] }
 0x6b8   :  { %6924 = vmatpush1.bf16.msra.mxu0 %v6923_v1  ;;  %v3890_v1 = vld [vmem:[#allocation13 + $0x308] sm:$0xff] }
 0x6b9   :  { %6926 = vmatprep.subr.bf16.mxu0 %v6925_v3  ;;  %v6959_v3 = vpack.c.bf16 %v3887_v46, %v3885_v34  ;;  %v6961_v43 = vpack.c.bf16 %v3892_v59, %v3890_v1  ;;  %v3923_v34 = vld [vmem:[#allocation13 + $0x410] sm:$0xff]  ;;  %v3926_v46 = vld [vmem:[#allocation13 + $0x428] sm:$0xff]  ;;  %v3928_v1 = vld [vmem:[#allocation13 + $0x438] sm:$0xff] }
 0x6ba   :  { %v6997_v25 = vpack.c.bf16 %v3928_v1, %v3926_v46  ;;  %v4363_v1 = vld [vmem:[#allocation16 + $0x80] sm:$0xff] }
 0x6bc   :  { %6928 = vmatpush1.bf16.msra.mxu0 %v6927_v29  ;;  %v6963_v29 = vpack.c.bf16 %v3891_v60, %v3889_v8  ;;  %v3927_v8 = vld [vmem:[#allocation13 + $0x430] sm:$0xff]  ;;  %v3930_v60 = vld [vmem:[#allocation13 + $0x448] sm:$0xff] }
 0x6bd   :  { %6930 = vmatprep.subr.bf16.mxu0 %v6929_v44  ;;  %v3893_v44 = vld [vmem:[#allocation13 + $0x320] sm:$0xff]  ;;  %v7001_v22 = vpack.c.bf16 %v3932_v54, %v3930_v60  ;;  %v3959_v54 = vld [vmem:[#allocation13 + $0x530] sm:$0xff] }
 0x6be   :  { %v6967_v63 = vpack.c.bf16 %v3895_v21, %v3893_v44  ;;  %v3934_v44 = vld [vmem:[#allocation13 + $0x468] sm:$0xff]  ;;  %v3936_v21 = vld [vmem:[#allocation13 + $0x478] sm:$0xff]  ;;  %v3957_v60 = vld [vmem:[#allocation13 + $0x520] sm:$0xff] }
 0x6bf   :  { %4126 = vmatmul.mubr.f32.vlgmr.msra.gmra.mrb[26].mxu0 %v3785_v55  ;;  %v3899_v55 = vld [vmem:[#allocation13 + $0x350] sm:$0xff]  ;;  %v7005_v15 = vpack.c.bf16 %v3936_v21, %v3934_v44  ;;  %v4379_v44 = vld [vmem:[#allocation16 + $0x100] sm:$0xff] }
 0x6c0   :  { %6932 = vmatpush1.bf16.msra.mxu0 %v6931_v53  ;;  %4196 = vmatprep.mubr.f32.mxu0 %v3788_v41  ;;  %v3897_v53 = vld [vmem:[#allocation13 + $0x340] sm:$0xff] }
 0x6c1   :  { %6934 = vmatprep.subr.bf16.mxu0 %v6933_v38  ;;  %v3902_v38 = vld [vmem:[#allocation13 + $0x368] sm:$0xff]  ;;  %v6971_v24 = vpack.c.bf16 %v3899_v55, %v3897_v53  ;;  %v3940_v55 = vld [vmem:[#allocation13 + $0x498] sm:$0xff] }
 0x6c2   :  { %v6973_v41 = vpack.c.bf16 %v3904_v28, %v3902_v38  ;;  %v3938_v53 = vld [vmem:[#allocation13 + $0x488] sm:$0xff] }
 0x6c3   :  { %v7009_v28 = vpack.c.bf16 %v3940_v55, %v3938_v53  ;;  %v4387_v21 = vld [vmem:[#allocation16 + $0x140] sm:$0xff]  ;;  %v3963_v55 = vld [vmem:[#allocation13 + $0x550] sm:$0xff] }
 0x6c4   :  { %6936 = vmatpush1.bf16.msra.mxu0 %v6935_v27  ;;  %v3906_v27 = vld [vmem:[#allocation13 + $0x388] sm:$0xff]  ;;  %v3961_v53 = vld [vmem:[#allocation13 + $0x540] sm:$0xff] }
 0x6c5   :  { %6938 = vmatprep.subr.bf16.mxu0 %v6937_v13  ;;  %v3908_v13 = vld [vmem:[#allocation13 + $0x398] sm:$0xff] }
 0x6c6   :  { %v6977_v47 = vpack.c.bf16 %v3908_v13, %v3906_v27  ;;  %v7013_v13 = vpack.c.bf16 %v3944_v17, %v3942_v4  ;;  %v4395_v4 = vld [vmem:[#allocation16 + $0x180] sm:$0xff] }
 0x6c7   :  { %v4403_v17 = vld [vmem:[#allocation16 + $0x1c0] sm:$0xff] }
 0x6c8   :  { %6940 = vmatpush1.bf16.msra.mxu0 %v6939_v50  ;;  %v3910_v50 = vld [vmem:[#allocation13 + $0x3a8] sm:$0xff] }
 0x6c9   :  { %6942 = vmatprep.subr.bf16.mxu0 %v6941_v14  ;;  %v3912_v14 = vld [vmem:[#allocation13 + $0x3b8] sm:$0xff] }
 0x6ca   :  { %v6981_v20 = vpack.c.bf16 %v3912_v14, %v3910_v50  ;;  %v7017_v14 = vpack.c.bf16 %v3948_v11, %v3946_v6  ;;  %v3965_v6 = vld [vmem:[#allocation13 + $0x560] sm:$0xff]  ;;  %v3967_v11 = vld [vmem:[#allocation13 + $0x570] sm:$0xff] }
 0x6cc   :  { %6944 = vmatpush1.bf16.msra.mxu0 %v6943_v30  ;;  %v3914_v30 = vld [vmem:[#allocation13 + $0x3c8] sm:$0xff] }
 0x6cd   :  { %6946 = vmatprep.subr.bf16.mxu0 %v6945_v31  ;;  %v3916_v31 = vld [vmem:[#allocation13 + $0x3d8] sm:$0xff] }
 0x6ce   :  { %v6985_v61 = vpack.c.bf16 %v3916_v31, %v3914_v30  ;;  %v7021_v31 = vpack.c.bf16 %v3952_v62, %v3950_v51  ;;  %v4411_v51 = vld [vmem:[#allocation16 + $0x200] sm:$0xff] }
 0x6cf   :  { %v4419_v62 = vld [vmem:[#allocation16 + $0x240] sm:$0xff] }
 0x6d0   :  { %6948 = vmatpush1.bf16.msra.mxu0 %v6947_v18  ;;  %v3915_v18 = vld [vmem:[#allocation13 + $0x3d0] sm:$0xff] }
 0x6d1   :  { %6950 = vmatprep.subr.bf16.mxu0 %v6949_v5  ;;  %v3918_v5 = vld [vmem:[#allocation13 + $0x3e8] sm:$0xff]  ;;  %v6987_v16 = vpack.c.bf16 %v3915_v18, %v3913_v56  ;;  %v3956_v18 = vld [vmem:[#allocation13 + $0x518] sm:$0xff] }
 0x6d2   :  { %v6989_v39 = vpack.c.bf16 %v3920_v0, %v3918_v5  ;;  %v3954_v56 = vld [vmem:[#allocation13 + $0x508] sm:$0xff]  ;;  %v3953_v5 = vld [vmem:[#allocation13 + $0x500] sm:$0xff] }
 0x6d4   :  { %6952 = vmatpush1.bf16.msra.mxu0 %v6951_v2  ;;  %v3917_v2 = vld [vmem:[#allocation13 + $0x3e0] sm:$0xff] }
 0x6d5   :  { %6954 = vmatprep.subr.bf16.mxu0 %v6953_v40  ;;  %v3919_v40 = vld [vmem:[#allocation13 + $0x3f0] sm:$0xff] }
 0x6d6   :  { %v6991_v57 = vpack.c.bf16 %v3919_v40, %v3917_v2  ;;  %v7025_v2 = vpack.c.bf16 %v3956_v18, %v3954_v56  ;;  %v4348_v40 = vld [vmem:[#allocation16 + $0x8] sm:$0xff]  ;;  %v3969_v56 = vld [vmem:[#allocation13 + $0x580] sm:$0xff] }
 0x6d7   :  { %v3971_v18 = vld [vmem:[#allocation13 + $0x590] sm:$0xff] }
 0x6d8   :  { %6956 = vmatpush1.bf16.msra.mxu0 %v6955_v48  ;;  %v6993_v48 = vpack.c.bf16 %v3924_v49, %v3922_v35  ;;  %v4356_v35 = vld [vmem:[#allocation16 + $0x48] sm:$0xff]  ;;  %v4347_v49 = vld [vmem:[#allocation16] sm:$0xff] }
 0x6d9   :  { %6958 = vmatprep.subr.bf16.mxu0 %v6957_v23  ;;  %v3921_v23 = vld [vmem:[#allocation13 + $0x400] sm:$0xff] }
 0x6da   :  { %v6995_v59 = vpack.c.bf16 %v3923_v34, %v3921_v23  ;;  %v4372_v23 = vld [vmem:[#allocation16 + $0xc8] sm:$0xff] }
 0x6dc   :  { %6960 = vmatpush1.bf16.msra.mxu0 %v6959_v3  ;;  %v3787_v3 = vmax.f32 %v7507_v10, 0.0  ;;  %v4355_v10 = vld [vmem:[#allocation16 + $0x40] sm:$0xff] }
 0x6dd   :  { %6962 = vmatprep.subr.bf16.mxu0 %v6961_v43  ;;  %v3925_v43 = vld [vmem:[#allocation13 + $0x420] sm:$0xff]  ;;  %v7123_v34 = vpack.c.bf16 %v4355_v10, %v4347_v49  ;;  %v7043_v49 = vpack.c.bf16 %v3971_v18, %v3969_v56  ;;  %v4532_v56 = vld [vmem:[#allocation16 + $0x5c8] sm:$0xff] }
 0x6de   :  { %v6999_v7 = vpack.c.bf16 %v3927_v8, %v3925_v43  ;;  %v4388_v43 = vld [vmem:[#allocation16 + $0x148] sm:$0xff]  ;;  %v3973_v10 = vld [vmem:[#allocation13 + $0x5a0] sm:$0xff] }
 0x6e0   :  { %6964 = vmatpush1.bf16.msra.mxu0 %v6963_v29  ;;  %v3929_v29 = vld [vmem:[#allocation13 + $0x440] sm:$0xff] }
 0x6e1   :  { %6966 = vmatprep.subr.bf16.mxu0 %v6965_v9  ;;  %v3931_v9 = vld [vmem:[#allocation13 + $0x450] sm:$0xff] }
 0x6e2   :  { %v7003_v26 = vpack.c.bf16 %v3931_v9, %v3929_v29  ;;  %v3964_v29 = vld [vmem:[#allocation13 + $0x558] sm:$0xff] }
 0x6e4   :  { %6968 = vmatpush1.bf16.msra.mxu0 %v6967_v63  ;;  %v3933_v63 = vld [vmem:[#allocation13 + $0x460] sm:$0xff] }
 0x6e5   :  { %6970 = vmatprep.subr.bf16.mxu0 %v6969_v42  ;;  %v3935_v42 = vld [vmem:[#allocation13 + $0x470] sm:$0xff] }
 0x6e6   :  { %v7007_v38 = vpack.c.bf16 %v3935_v42, %v3933_v63  ;;  %v7031_v63 = vpack.c.bf16 %v3959_v54, %v3957_v60  ;;  %v3977_v54 = vld [vmem:[#allocation13 + $0x5c0] sm:$0xff] }
 0x6e8   :  { %6972 = vmatpush1.bf16.msra.mxu0 %v6971_v24  ;;  %v3937_v24 = vld [vmem:[#allocation13 + $0x480] sm:$0xff] }
 0x6e9   :  { %6974 = vmatprep.subr.bf16.mxu0 %v6973_v41  ;;  %v3939_v41 = vld [vmem:[#allocation13 + $0x490] sm:$0xff] }
 0x6ea   :  { %v7011_v27 = vpack.c.bf16 %v3939_v41, %v3937_v24  ;;  %v3968_v24 = vld [vmem:[#allocation13 + $0x578] sm:$0xff] }
 0x6ec   :  { %6976 = vmatpush1.bf16.msra.mxu0 %v6975_v37  ;;  %v3941_v37 = vld [vmem:[#allocation13 + $0x4a0] sm:$0xff] }
 0x6ed   :  { %6978 = vmatprep.subr.bf16.mxu0 %v6977_v47  ;;  %v3943_v47 = vld [vmem:[#allocation13 + $0x4b0] sm:$0xff] }
 0x6ee   :  { %v7015_v50 = vpack.c.bf16 %v3943_v47, %v3941_v37  ;;  %v7035_v37 = vpack.c.bf16 %v3963_v55, %v3961_v53  ;;  %v3981_v55 = vld [vmem:[#allocation13 + $0x5e0] sm:$0xff] }
 0x6f0   :  { %6980 = vmatpush1.bf16.msra.mxu0 %v6979_v19  ;;  %v3945_v19 = vld [vmem:[#allocation13 + $0x4c0] sm:$0xff] }
 0x6f1   :  { %6982 = vmatprep.subr.bf16.mxu0 %v6981_v20  ;;  %v3947_v20 = vld [vmem:[#allocation13 + $0x4d0] sm:$0xff] }
 0x6f2   :  { %v7019_v30 = vpack.c.bf16 %v3947_v20, %v3945_v19  ;;  %v3972_v19 = vld [vmem:[#allocation13 + $0x598] sm:$0xff] }
 0x6f4   :  { %6984 = vmatpush1.bf16.msra.mxu0 %v6983_v12  ;;  %v3949_v12 = vld [vmem:[#allocation13 + $0x4e0] sm:$0xff] }
 0x6f5   :  { %6986 = vmatprep.subr.bf16.mxu0 %v6985_v61  ;;  %v3951_v61 = vld [vmem:[#allocation13 + $0x4f0] sm:$0xff] }
 0x6f6   :  { %v7023_v0 = vpack.c.bf16 %v3951_v61, %v3949_v12  ;;  %v7039_v12 = vpack.c.bf16 %v3967_v11, %v3965_v6 }
 0x6f8   :  { %6988 = vmatpush1.bf16.msra.mxu0 %v6987_v16  ;;  %v3955_v16 = vld [vmem:[#allocation13 + $0x510] sm:$0xff] }
 0x6f9   :  { %6990 = vmatprep.subr.bf16.mxu0 %v6989_v39  ;;  %v3960_v39 = vld [vmem:[#allocation13 + $0x538] sm:$0xff] }
 0x6fa   :  { %v7029_v8 = vpack.c.bf16 %v3960_v39, %v3958_v36  ;;  %v4427_v39 = vld [vmem:[#allocation16 + $0x280] sm:$0xff] }
 0x6fc   :  { %6992 = vmatpush1.bf16.msra.mxu0 %v6991_v57  ;;  %v7121_v57 = vpack.c.bf16 %v4356_v35, %v4348_v40  ;;  %v4444_v40 = vld [vmem:[#allocation16 + $0x308] sm:$0xff] }
 0x6fd   :  { %6994 = vmatprep.subr.bf16.mxu0 %v6993_v48  ;;  %v4364_v48 = vld [vmem:[#allocation16 + $0x88] sm:$0xff] }
 0x6fe   :  { %v7125_v46 = vpack.c.bf16 %v4372_v23, %v4364_v48  ;;  %7122 = vmatprep.subr.bf16.mxu1 %v7121_v57  ;;  %v4452_v35 = vld [vmem:[#allocation16 + $0x348] sm:$0xff] }
 0x6ff   :  { %4197 = vmatmul.mubr.f32.vlgmr.msra.gmra.mrb[26].mxu0 %v3787_v3  ;;  %v4380_v3 = vld [vmem:[#allocation16 + $0x108] sm:$0xff]  ;;  %7124 = vmatpush1.bf16.msra.mxu1 %v7123_v34 }
 0x700   :  { %6996 = vmatpush1.bf16.msra.mxu0 %v6995_v59  ;;  %v4371_v59 = vld [vmem:[#allocation16 + $0xc0] sm:$0xff]  ;;  %7126 = vmatprep.subr.bf16.mxu1 %v7125_v46  ;;  %v7129_v9 = vpack.c.bf16 %v4388_v43, %v4380_v3  ;;  %v3975_v48 = vld [vmem:[#allocation13 + $0x5b0] sm:$0xff]  ;;  %v3980_v46 = vld [vmem:[#allocation13 + $0x5d8] sm:$0xff] }
 0x701   :  { %6998 = vmatprep.subr.bf16.mxu0 %v6997_v25  ;;  %v7027_v25 = vpack.c.bf16 %v3955_v16, %v3953_v5  ;;  %v3974_v5 = vld [vmem:[#allocation13 + $0x5a8] sm:$0xff]  ;;  %v3976_v16 = vld [vmem:[#allocation13 + $0x5b8] sm:$0xff] }
 0x702   :  { %v7045_v57 = vpack.c.bf16 %v3976_v16, %v3974_v5  ;;  %v3978_v23 = vld [vmem:[#allocation13 + $0x5c8] sm:$0xff] }
 0x703   :  { %v4451_v3 = vld [vmem:[#allocation16 + $0x340] sm:$0xff]  ;;  %v4468_v43 = vld [vmem:[#allocation16 + $0x3c8] sm:$0xff]  ;;  %v7049_v60 = vpack.c.bf16 %v3980_v46, %v3978_v23 }
 0x704   :  { %7000 = vmatpush1.bf16.msra.mxu0 %v6999_v7  ;;  %v3962_v7 = vld [vmem:[#allocation13 + $0x548] sm:$0xff] }
 0x705   :  { %7002 = vmatprep.subr.bf16.mxu0 %v7001_v22  ;;  %v7127_v22 = vpack.c.bf16 %v4371_v59, %v4363_v1  ;;  %v7033_v42 = vpack.c.bf16 %v3964_v29, %v3962_v7  ;;  %v7145_v1 = vpack.c.bf16 %v4452_v35, %v4444_v40  ;;  %v4443_v59 = vld [vmem:[#allocation16 + $0x300] sm:$0xff]  ;;  %v3979_v7 = vld [vmem:[#allocation13 + $0x5d0] sm:$0xff] }
 0x706   :  { %v7147_v29 = vpack.c.bf16 %v4451_v3, %v4443_v59  ;;  %v4531_v16 = vld [vmem:[#allocation16 + $0x5c0] sm:$0xff]  ;;  %v4572_v59 = vld [vmem:[#allocation16 + $0x708] sm:$0xff] }
 0x707   :  { %7128 = vmatpush1.bf16.msra.mxu1 %v7127_v22  ;;  %v3982_v22 = vld [vmem:[#allocation13 + $0x5e8] sm:$0xff] }
 0x708   :  { %7004 = vmatpush1.bf16.msra.mxu0 %v7003_v26  ;;  %v4396_v26 = vld [vmem:[#allocation16 + $0x188] sm:$0xff]  ;;  %7130 = vmatprep.subr.bf16.mxu1 %v7129_v9  ;;  %v3984_v9 = vld [vmem:[#allocation13 + $0x5f8] sm:$0xff]  ;;  %v4539_v35 = vld [vmem:[#allocation16 + $0x600] sm:$0xff] }
 0x709   :  { %7006 = vmatprep.subr.bf16.mxu0 %v7005_v15  ;;  %v4404_v15 = vld [vmem:[#allocation16 + $0x1c8] sm:$0xff]  ;;  %v7053_v53 = vpack.c.bf16 %v3984_v9, %v3982_v22  ;;  %v4563_v46 = vld [vmem:[#allocation16 + $0x6c0] sm:$0xff]  ;;  %v8934_v22 = vld [vmem:[#allocation11] sm:$0xff] }
 0x70a   :  { %v7133_v41 = vpack.c.bf16 %v4404_v15, %v4396_v26  ;;  %v4467_v26 = vld [vmem:[#allocation16 + $0x3c0] sm:$0xff]  ;;  %v4476_v15 = vld [vmem:[#allocation16 + $0x408] sm:$0xff] }
 0x70b   :  { %v4580_v3 = vld [vmem:[#allocation16 + $0x748] sm:$0xff] }
 0x70c   :  { %7008 = vmatpush1.bf16.msra.mxu0 %v7007_v38  ;;  %v3966_v38 = vld [vmem:[#allocation13 + $0x568] sm:$0xff] }
 0x70d   :  { %7010 = vmatprep.subr.bf16.mxu0 %v7009_v28  ;;  %v7131_v28 = vpack.c.bf16 %v4387_v21, %v4379_v44  ;;  %v7037_v47 = vpack.c.bf16 %v3968_v24, %v3966_v38  ;;  %v4459_v21 = vld [vmem:[#allocation16 + $0x380] sm:$0xff]  ;;  %v3983_v38 = vld [vmem:[#allocation13 + $0x5f0] sm:$0xff] }
 0x70e   :  { %v7151_v24 = vpack.c.bf16 %v4467_v26, %v4459_v21 }
 0x70f   :  { %7132 = vmatpush1.bf16.msra.mxu1 %v7131_v28  ;;  %v3986_v28 = vld [vmem:[#allocation13 + $0x608] sm:$0xff] }
 0x710   :  { %7012 = vmatpush1.bf16.msra.mxu0 %v7011_v27  ;;  %v4412_v27 = vld [vmem:[#allocation16 + $0x208] sm:$0xff]  ;;  %7134 = vmatprep.subr.bf16.mxu1 %v7133_v41  ;;  %v3988_v41 = vld [vmem:[#allocation13 + $0x618] sm:$0xff] }
 0x711   :  { %7014 = vmatprep.subr.bf16.mxu0 %v7013_v13  ;;  %v4420_v13 = vld [vmem:[#allocation16 + $0x248] sm:$0xff]  ;;  %v7057_v6 = vpack.c.bf16 %v3988_v41, %v3986_v28  ;;  %v3992_v41 = vld [vmem:[#allocation13 + $0x638] sm:$0xff] }
 0x712   :  { %v7137_v20 = vpack.c.bf16 %v4420_v13, %v4412_v27  ;;  %v4483_v27 = vld [vmem:[#allocation16 + $0x440] sm:$0xff]  ;;  %v4492_v13 = vld [vmem:[#allocation16 + $0x488] sm:$0xff] }
 0x714   :  { %7016 = vmatpush1.bf16.msra.mxu0 %v7015_v50  ;;  %v3970_v50 = vld [vmem:[#allocation13 + $0x588] sm:$0xff] }
 0x715   :  { %7018 = vmatprep.subr.bf16.mxu0 %v7017_v14  ;;  %v7135_v14 = vpack.c.bf16 %v4403_v17, %v4395_v4  ;;  %v7041_v61 = vpack.c.bf16 %v3972_v19, %v3970_v50  ;;  %v4475_v17 = vld [vmem:[#allocation16 + $0x400] sm:$0xff] }
 0x716   :  { %v7155_v11 = vpack.c.bf16 %v4483_v27, %v4475_v17  ;;  %v4499_v19 = vld [vmem:[#allocation16 + $0x4c0] sm:$0xff] }
 0x717   :  { %7136 = vmatpush1.bf16.msra.mxu1 %v7135_v14  ;;  %v4491_v14 = vld [vmem:[#allocation16 + $0x480] sm:$0xff] }
 0x718   :  { %7020 = vmatpush1.bf16.msra.mxu0 %v7019_v30  ;;  %v4428_v30 = vld [vmem:[#allocation16 + $0x288] sm:$0xff]  ;;  %7138 = vmatprep.subr.bf16.mxu1 %v7137_v20 }
 0x719   :  { %7022 = vmatprep.subr.bf16.mxu0 %v7021_v31  ;;  %v4436_v31 = vld [vmem:[#allocation16 + $0x2c8] sm:$0xff] }
 0x71a   :  { %v7141_v36 = vpack.c.bf16 %v4436_v31, %v4428_v30  ;;  %v4508_v20 = vld [vmem:[#allocation16 + $0x508] sm:$0xff]  ;;  %v4507_v31 = vld [vmem:[#allocation16 + $0x500] sm:$0xff] }
 0x71c   :  { %7024 = vmatpush1.bf16.msra.mxu0 %v7023_v0  ;;  %v7139_v0 = vpack.c.bf16 %v4419_v62, %v4411_v51  ;;  %v4516_v51 = vld [vmem:[#allocation16 + $0x548] sm:$0xff]  ;;  %v7159_v62 = vpack.c.bf16 %v4499_v19, %v4491_v14  ;;  %v3996_v14 = vld [vmem:[#allocation13 + $0x658] sm:$0xff] }
 0x71d   :  { %7026 = vmatprep.subr.bf16.mxu0 %v7025_v2  ;;  %v4435_v2 = vld [vmem:[#allocation16 + $0x2c0] sm:$0xff]  ;;  %v7161_v30 = vpack.c.bf16 %v4516_v51, %v4508_v20 }
 0x71e   :  { %7140 = vmatpush1.bf16.msra.mxu1 %v7139_v0  ;;  %v7143_v34 = vpack.c.bf16 %v4435_v2, %v4427_v39  ;;  %v4523_v0 = vld [vmem:[#allocation16 + $0x580] sm:$0xff]  ;;  %v4548_v39 = vld [vmem:[#allocation16 + $0x648] sm:$0xff] }
 0x71f   :  { %7142 = vmatprep.subr.bf16.mxu1 %v7141_v36  ;;  %v4540_v36 = vld [vmem:[#allocation16 + $0x608] sm:$0xff]  ;;  %v7167_v2 = vpack.c.bf16 %v4531_v16, %v4523_v0  ;;  %v3993_v51 = vld [vmem:[#allocation13 + $0x640] sm:$0xff]  ;;  %v4004_v0 = vld [vmem:[#allocation13 + $0x698] sm:$0xff] }
 0x720   :  { %7028 = vmatpush1.bf16.msra.mxu0 %v7027_v25  ;;  %v4460_v25 = vld [vmem:[#allocation16 + $0x388] sm:$0xff]  ;;  %v7169_v40 = vpack.c.bf16 %v4548_v39, %v4540_v36  ;;  %v4001_v39 = vld [vmem:[#allocation13 + $0x680] sm:$0xff] }
 0x721   :  { %7030 = vmatprep.subr.bf16.mxu0 %v7029_v8  ;;  %v7047_v8 = vpack.c.bf16 %v3975_v48, %v3973_v10  ;;  %v7149_v44 = vpack.c.bf16 %v4468_v43, %v4460_v25  ;;  %v4564_v10 = vld [vmem:[#allocation16 + $0x6c8] sm:$0xff]  ;;  %v2631_v25 = vsub.s32 5, %v9486_v45  ;;  %v2639_v43 = vsub.s32 7, %v9486_v45 }
 0x722   :  { %7144 = vmatpush1.bf16.msra.mxu1 %v7143_v34  ;;  %v4555_v34 = vld [vmem:[#allocation16 + $0x680] sm:$0xff] }
 0x723   :  { %7146 = vmatprep.subr.bf16.mxu1 %v7145_v1  ;;  %v2627_v1 = vsub.s32 4, %v9486_v45  ;;  %v2632_v9 = vrot.slane %v8934_v22, %v2631_v25 }
 0x724   :  { %7032 = vmatpush1.bf16.msra.mxu0 %v7031_v63  ;;  %v4484_v63 = vld [vmem:[#allocation16 + $0x448] sm:$0xff] }
 0x725   :  { %7034 = vmatprep.subr.bf16.mxu0 %v7033_v42  ;;  %v7051_v42 = vpack.c.bf16 %v3979_v7, %v3977_v54  ;;  %v7153_v4 = vpack.c.bf16 %v4484_v63, %v4476_v15  ;;  %v4571_v54 = vld [vmem:[#allocation16 + $0x700] sm:$0xff] }
 0x726   :  { %7148 = vmatpush1.bf16.msra.mxu1 %v7147_v29  ;;  %v4579_v7 = vld [vmem:[#allocation16 + $0x740] sm:$0xff]  ;;  %v2628_v29 = vrot.slane %v8934_v22, %v2627_v1 }
 0x727   :  { %7150 = vmatprep.subr.bf16.mxu1 %v7149_v44  ;;  %v2640_v44 = vrot.slane %v8934_v22, %v2639_v43  ;;  %v7179_v21 = vpack.c.bf16 %v4579_v7, %v4571_v54  ;;  %v4016_v54 = vld [vmem:[#allocation13 + $0x6f8] sm:$0xff] }
 0x728   :  { %7036 = vmatpush1.bf16.msra.mxu0 %v7035_v37  ;;  %v4500_v37 = vld [vmem:[#allocation16 + $0x4c8] sm:$0xff] }
 0x729   :  { %7038 = vmatprep.subr.bf16.mxu0 %v7037_v47  ;;  %v7055_v47 = vpack.c.bf16 %v3983_v38, %v3981_v55  ;;  %v7157_v50 = vpack.c.bf16 %v4500_v37, %v4492_v13  ;;  %v3987_v55 = vld [vmem:[#allocation13 + $0x610] sm:$0xff] }
 0x72a   :  { %7152 = vmatpush1.bf16.msra.mxu1 %v7151_v24  ;;  %v3990_v24 = vld [vmem:[#allocation13 + $0x628] sm:$0xff] }
 0x72b   :  { %7154 = vmatprep.subr.bf16.mxu1 %v7153_v4  ;;  %v7061_v37 = vpack.c.bf16 %v3992_v41, %v3990_v24 }
 0x72c   :  { %7040 = vmatpush1.bf16.msra.mxu0 %v7039_v12  ;;  %v4515_v12 = vld [vmem:[#allocation16 + $0x540] sm:$0xff] }
 0x72d   :  { %7042 = vmatprep.subr.bf16.mxu0 %v7041_v61  ;;  %v4524_v61 = vld [vmem:[#allocation16 + $0x588] sm:$0xff]  ;;  %v7163_v18 = vpack.c.bf16 %v4515_v12, %v4507_v31  ;;  %v4000_v31 = vld [vmem:[#allocation13 + $0x678] sm:$0xff] }
 0x72e   :  { %7156 = vmatpush1.bf16.msra.mxu1 %v7155_v11  ;;  %v7165_v5 = vpack.c.bf16 %v4532_v56, %v4524_v61  ;;  %v3997_v56 = vld [vmem:[#allocation13 + $0x660] sm:$0xff] }
 0x72f   :  { %7158 = vmatprep.subr.bf16.mxu1 %v7157_v50  ;;  %v3994_v50 = vld [vmem:[#allocation13 + $0x648] sm:$0xff] }
 0x730   :  { %7044 = vmatpush1.bf16.msra.mxu0 %v7043_v49  ;;  %v4547_v49 = vld [vmem:[#allocation16 + $0x640] sm:$0xff]  ;;  %v7065_v20 = vpack.c.bf16 %v3996_v14, %v3994_v50  ;;  %v4032_v14 = vld [vmem:[#allocation13 + $0x778] sm:$0xff] }
 0x731   :  { %7046 = vmatprep.subr.bf16.mxu0 %v7045_v57  ;;  %v4556_v57 = vld [vmem:[#allocation16 + $0x688] sm:$0xff]  ;;  %v7171_v48 = vpack.c.bf16 %v4547_v49, %v4539_v35  ;;  %v4008_v35 = vld [vmem:[#allocation13 + $0x6b8] sm:$0xff] }
 0x732   :  { %7160 = vmatpush1.bf16.msra.mxu1 %v7159_v62  ;;  %v7173_v23 = vpack.c.bf16 %v4564_v10, %v4556_v57  ;;  %v3995_v62 = vld [vmem:[#allocation13 + $0x650] sm:$0xff]  ;;  %v4005_v10 = vld [vmem:[#allocation13 + $0x6a0] sm:$0xff]  ;;  %v4030_v50 = vld [vmem:[#allocation13 + $0x768] sm:$0xff] }
 0x733   :  { %7162 = vmatprep.subr.bf16.mxu1 %v7161_v30  ;;  %v3998_v30 = vld [vmem:[#allocation13 + $0x668] sm:$0xff]  ;;  %v7067_v12 = vpack.c.bf16 %v3995_v62, %v3993_v51  ;;  %v4029_v51 = vld [vmem:[#allocation13 + $0x760] sm:$0xff]  ;;  %v4031_v62 = vld [vmem:[#allocation13 + $0x770] sm:$0xff] }
 0x734   :  { %7048 = vmatpush1.bf16.msra.mxu0 %v7047_v8  ;;  %v7175_v8 = vpack.c.bf16 %v4563_v46, %v4555_v34  ;;  %v7069_v61 = vpack.c.bf16 %v4000_v31, %v3998_v30  ;;  %v4012_v34 = vld [vmem:[#allocation13 + $0x6d8] sm:$0xff]  ;;  %v4034_v30 = vld [vmem:[#allocation13 + $0x788] sm:$0xff] }
 0x735   :  { %7050 = vmatprep.subr.bf16.mxu0 %v7049_v60  ;;  %v7177_v60 = vpack.c.bf16 %v4580_v3, %v4572_v59  ;;  %v4009_v3 = vld [vmem:[#allocation13 + $0x6c0] sm:$0xff]  ;;  %v4036_v31 = vld [vmem:[#allocation13 + $0x798] sm:$0xff] }
 0x736   :  { %7164 = vmatpush1.bf16.msra.mxu1 %v7163_v18  ;;  %v3999_v18 = vld [vmem:[#allocation13 + $0x670] sm:$0xff] }
 0x737   :  { %7166 = vmatprep.subr.bf16.mxu1 %v7165_v5  ;;  %v4002_v5 = vld [vmem:[#allocation13 + $0x688] sm:$0xff]  ;;  %v7071_v16 = vpack.c.bf16 %v3999_v18, %v3997_v56  ;;  %v4033_v56 = vld [vmem:[#allocation13 + $0x780] sm:$0xff]  ;;  %v4035_v18 = vld [vmem:[#allocation13 + $0x790] sm:$0xff] }
 0x738   :  { %7052 = vmatpush1.bf16.msra.mxu0 %v7051_v42  ;;  %v7073_v36 = vpack.c.bf16 %v4004_v0, %v4002_v5  ;;  %v4038_v5 = vld [vmem:[#allocation13 + $0x7a8] sm:$0xff]  ;;  %v4040_v0 = vld [vmem:[#allocation13 + $0x7b8] sm:$0xff] }
 0x739   :  { %7054 = vmatprep.subr.bf16.mxu0 %v7053_v53  ;;  %v3985_v53 = vld [vmem:[#allocation13 + $0x600] sm:$0xff] }
 0x73a   :  { %7168 = vmatpush1.bf16.msra.mxu1 %v7167_v2  ;;  %v7059_v27 = vpack.c.bf16 %v3987_v55, %v3985_v53  ;;  %v4003_v2 = vld [vmem:[#allocation13 + $0x690] sm:$0xff]  ;;  %v4017_v53 = vld [vmem:[#allocation13 + $0x700] sm:$0xff] }
 0x73b   :  { %7170 = vmatprep.subr.bf16.mxu1 %v7169_v40  ;;  %v4006_v40 = vld [vmem:[#allocation13 + $0x6a8] sm:$0xff]  ;;  %v7075_v49 = vpack.c.bf16 %v4003_v2, %v4001_v39  ;;  %v4019_v55 = vld [vmem:[#allocation13 + $0x710] sm:$0xff]  ;;  %v4037_v39 = vld [vmem:[#allocation13 + $0x7a0] sm:$0xff] }
 0x73c   :  { %7056 = vmatpush1.bf16.msra.mxu0 %v7055_v47  ;;  %v3989_v47 = vld [vmem:[#allocation13 + $0x620] sm:$0xff]  ;;  %v7077_v57 = vpack.c.bf16 %v4008_v35, %v4006_v40  ;;  %v7091_v24 = vpack.c.bf16 %v4019_v55, %v4017_v53  ;;  %v4039_v2 = vld [vmem:[#allocation13 + $0x7b0] sm:$0xff]  ;;  %v4042_v40 = vld [vmem:[#allocation13 + $0x7c8] sm:$0xff] }
 0x73d   :  { %7058 = vmatprep.subr.bf16.mxu0 %v7057_v6  ;;  %v3991_v6 = vld [vmem:[#allocation13 + $0x630] sm:$0xff]  ;;  %v4044_v35 = vld [vmem:[#allocation13 + $0x7d8] sm:$0xff] }
 0x73e   :  { %7172 = vmatpush1.bf16.msra.mxu1 %v7171_v48  ;;  %v7063_v19 = vpack.c.bf16 %v3991_v6, %v3989_v47  ;;  %v4007_v48 = vld [vmem:[#allocation13 + $0x6b0] sm:$0xff]  ;;  %v4025_v6 = vld [vmem:[#allocation13 + $0x740] sm:$0xff] }
 0x73f   :  { %7174 = vmatprep.subr.bf16.mxu1 %v7173_v23  ;;  %v4010_v23 = vld [vmem:[#allocation13 + $0x6c8] sm:$0xff]  ;;  %v7079_v46 = vpack.c.bf16 %v4007_v48, %v4005_v10  ;;  %v7113_v10 = vpack.c.bf16 %v4044_v35, %v4042_v40  ;;  %v4041_v48 = vld [vmem:[#allocation13 + $0x7c0] sm:$0xff] }
 0x740   :  { %v7081_v59 = vpack.c.bf16 %v4012_v34, %v4010_v23  ;;  %v4043_v23 = vld [vmem:[#allocation13 + $0x7d0] sm:$0xff]  ;;  %v4046_v34 = vld [vmem:[#allocation13 + $0x7e8] sm:$0xff]  ;;  %v4350_v55 = vld [vmem:[#allocation16 + $0x18] sm:$0xff] }
 0x741   :  { %v4422_v40 = vld [vmem:[#allocation16 + $0x258] sm:$0xff] }
 0x742   :  { %7176 = vmatpush1.bf16.msra.mxu1 %v7175_v8  ;;  %v4011_v8 = vld [vmem:[#allocation13 + $0x6d0] sm:$0xff] }
 0x743   :  { %7178 = vmatprep.subr.bf16.mxu1 %v7177_v60  ;;  %v4014_v60 = vld [vmem:[#allocation13 + $0x6e8] sm:$0xff]  ;;  %v7083_v7 = vpack.c.bf16 %v4011_v8, %v4009_v3 }
 0x746   :  { %7180 = vmatpush1.bf16.msra.mxu1 %v7179_v21  ;;  %v4018_v21 = vld [vmem:[#allocation13 + $0x708] sm:$0xff] }
 0x752   :  { %v3496_v26 = vpop.f32.mrb[24].mxu0 }
 0x753   :  { %v7509_v15 = vadd.f32 %v3496_v26, %v2628_v29  ;;  %v8945_v63 = vpop.f32.mrb[26].mxu1  ;;  %v3498_v42 = vpop.f32.mrb[25].mxu0  ;;  %v7085_v29 = vpack.c.bf16 %v4016_v54, %v4014_v60  ;;  %v4020_v26 = vld [vmem:[#allocation13 + $0x718] sm:$0xff]  ;;  %v4045_v60 = vld [vmem:[#allocation13 + $0x7e0] sm:$0xff]  ;;  %v4047_v54 = vld [vmem:[#allocation13 + $0x7f0] sm:$0xff] }
 0x754   :  { %v7510_v38 = vadd.f32 %v3498_v42, %v2632_v9  ;;  %v3782_v28 = vpop.f32.mrb[27].mxu1  ;;  %v4013_v9 = vld [vmem:[#allocation13 + $0x6e0] sm:$0xff]  ;;  %v7089_v42 = vpack.c.bf16 %v4020_v26, %v4018_v21  ;;  %v4596_v21 = vld [vmem:[#allocation16 + $0x7c8] sm:$0xff] }
 0x755   :  { %v7512_v4 = vadd.f32 %v3782_v28, %v2640_v44  ;;  %v3789_v13 = vmax.f32 %v7509_v15, 0.0  ;;  %v4015_v44 = vld [vmem:[#allocation13 + $0x6f0] sm:$0xff]  ;;  %v4024_v28 = vld [vmem:[#allocation13 + $0x738] sm:$0xff]  ;;  %v4587_v26 = vld [vmem:[#allocation16 + $0x780] sm:$0xff] }
 0x756   :  { %v3790_v17 = vmax.f32 %v7510_v38, 0.0  ;;  %v7087_v15 = vpack.c.bf16 %v4015_v44, %v4013_v9  ;;  %v4022_v38 = vld [vmem:[#allocation13 + $0x728] sm:$0xff] }
 0x757   :  { %v3792_v11 = vmax.f32 %v7512_v4, 0.0  ;;  %v7093_v41 = vpack.c.bf16 %v4024_v28, %v4022_v38  ;;  %v4021_v4 = vld [vmem:[#allocation13 + $0x720] sm:$0xff]  ;;  %v4588_v44 = vld [vmem:[#allocation16 + $0x788] sm:$0xff] }
 0x758   :  { %4267 = vmatprep.mubr.f32.mxu0 %v3790_v17  ;;  %v4023_v17 = vld [vmem:[#allocation13 + $0x730] sm:$0xff]  ;;  %v4049_v28 = vld [vmem:[#allocation14] sm:$0x3] }
 0x759   :  { %4268 = vmatmul.mubr.f32.vlgmr.msra.gmra.mrb[26].mxu0 %v3789_v13  ;;  %v4028_v13 = vld [vmem:[#allocation13 + $0x758] sm:$0xff] }
 0x75a   :  { %7060 = vmatpush1.bf16.msra.mxu0 %v7059_v27  ;;  %4338 = vmatprep.mubr.f32.mxu0 %v3792_v11  ;;  %v4026_v27 = vld [vmem:[#allocation13 + $0x748] sm:$0xff]  ;;  %v4027_v11 = vld [vmem:[#allocation13 + $0x750] sm:$0xff] }
 0x75b   :  { %7062 = vmatprep.subr.bf16.mxu0 %v7061_v37  ;;  %v7095_v37 = vpack.c.bf16 %v4023_v17, %v4021_v4  ;;  %v7097_v47 = vpack.c.bf16 %v4028_v13, %v4026_v27  ;;  %v4349_v27 = vld [vmem:[#allocation16 + $0x10] sm:$0xff] }
 0x75c   :  { %v4357_v13 = vld [vmem:[#allocation16 + $0x50] sm:$0xff] }
 0x75e   :  { %7064 = vmatpush1.bf16.msra.mxu0 %v7063_v19  ;;  %v7099_v19 = vpack.c.bf16 %v4027_v11, %v4025_v6  ;;  %v4374_v6 = vld [vmem:[#allocation16 + $0xd8] sm:$0xff] }
 0x75f   :  { %7066 = vmatprep.subr.bf16.mxu0 %v7065_v20  ;;  %v7101_v20 = vpack.c.bf16 %v4032_v14, %v4030_v50  ;;  %v7187_v50 = vpack.c.bf16 %v4357_v13, %v4349_v27 }
 0x762   :  { %7068 = vmatpush1.bf16.msra.mxu0 %v7067_v12  ;;  %v7103_v12 = vpack.c.bf16 %v4031_v62, %v4029_v51  ;;  %v4373_v51 = vld [vmem:[#allocation16 + $0xd0] sm:$0xff]  ;;  %v4382_v62 = vld [vmem:[#allocation16 + $0x118] sm:$0xff] }
 0x763   :  { %7070 = vmatprep.subr.bf16.mxu0 %v7069_v61  ;;  %v7105_v61 = vpack.c.bf16 %v4036_v31, %v4034_v30  ;;  %v4390_v30 = vld [vmem:[#allocation16 + $0x158] sm:$0xff] }
 0x766   :  { %7072 = vmatpush1.bf16.msra.mxu0 %v7071_v16  ;;  %v7107_v16 = vpack.c.bf16 %v4035_v18, %v4033_v56  ;;  %v4389_v56 = vld [vmem:[#allocation16 + $0x150] sm:$0xff]  ;;  %v4398_v18 = vld [vmem:[#allocation16 + $0x198] sm:$0xff] }
 0x767   :  { %7074 = vmatprep.subr.bf16.mxu0 %v7073_v36  ;;  %v7109_v36 = vpack.c.bf16 %v4040_v0, %v4038_v5  ;;  %v4406_v5 = vld [vmem:[#allocation16 + $0x1d8] sm:$0xff] }
 0x76a   :  { %7076 = vmatpush1.bf16.msra.mxu0 %v7075_v49  ;;  %v7111_v49 = vpack.c.bf16 %v4039_v2, %v4037_v39  ;;  %v4405_v39 = vld [vmem:[#allocation16 + $0x1d0] sm:$0xff]  ;;  %v4414_v2 = vld [vmem:[#allocation16 + $0x218] sm:$0xff] }
 0x76b   :  { %7078 = vmatprep.subr.bf16.mxu0 %v7077_v57  ;;  %v2635_v57 = vsub.s32 6, %v9486_v45 }
 0x76d   :  { %v2636_v3 = vrot.slane %v8934_v22, %v2635_v57  ;;  %v4358_v22 = vld [vmem:[#allocation16 + $0x58] sm:$0xff] }
 0x76e   :  { %7080 = vmatpush1.bf16.msra.mxu0 %v7079_v46  ;;  %v4048_v46 = vld [vmem:[#allocation13 + $0x7f8] sm:$0xff]  ;;  %v7185_v38 = vpack.c.bf16 %v4358_v22, %v4350_v55 }
 0x76f   :  { %7082 = vmatprep.subr.bf16.mxu0 %v7081_v59  ;;  %v7115_v59 = vpack.c.bf16 %v4043_v23, %v4041_v48  ;;  %v7117_v8 = vpack.c.bf16 %v4048_v46, %v4046_v34  ;;  %v4421_v48 = vld [vmem:[#allocation16 + $0x250] sm:$0xff]  ;;  %v4430_v23 = vld [vmem:[#allocation16 + $0x298] sm:$0xff] }
 0x770   :  { %v4438_v34 = vld [vmem:[#allocation16 + $0x2d8] sm:$0xff]  ;;  %v4469_v55 = vld [vmem:[#allocation16 + $0x3d0] sm:$0xff] }
 0x771   :  { %v4478_v22 = vld [vmem:[#allocation16 + $0x418] sm:$0xff] }
 0x772   :  { %7084 = vmatpush1.bf16.msra.mxu0 %v7083_v7  ;;  %v7119_v7 = vpack.c.bf16 %v4047_v54, %v4045_v60  ;;  %v4446_v60 = vld [vmem:[#allocation16 + $0x318] sm:$0xff] }
 0x773   :  { %7086 = vmatprep.subr.bf16.mxu0 %v7085_v29  ;;  %v7511_v29 = vadd.f32 %v8945_v63, %v2636_v3  ;;  %v4058_v63 = vrot.slane %v4049_v28, %v9485_v32  ;;  %v4429_v3 = vld [vmem:[#allocation16 + $0x290] sm:$0xff]  ;;  %v4454_v54 = vld [vmem:[#allocation16 + $0x358] sm:$0xff] }
 0x775   :  { %v3791_v9 = vmax.f32 %v7511_v29, 0.0  ;;  %v7209_v29 = vpack.c.bf16 %v4454_v54, %v4446_v60  ;;  %v4581_v60 = vld [vmem:[#allocation16 + $0x750] sm:$0xff]  ;;  %v4590_v54 = vld [vmem:[#allocation16 + $0x798] sm:$0xff] }
 0x776   :  { %7088 = vmatpush1.bf16.msra.mxu0 %v7087_v15  ;;  %v7181_v15 = vpack.c.bf16 %v4596_v21, %v4588_v44  ;;  %v4453_v44 = vld [vmem:[#allocation16 + $0x350] sm:$0xff]  ;;  %v4462_v21 = vld [vmem:[#allocation16 + $0x398] sm:$0xff] }
 0x777   :  { %7090 = vmatprep.subr.bf16.mxu0 %v7089_v42  ;;  %v4595_v42 = vld [vmem:[#allocation16 + $0x7c0] sm:$0xff] }
 0x778   :  { %v7183_v53 = vpack.c.bf16 %v4595_v42, %v4587_v26  ;;  %7182 = vmatprep.subr.bf16.mxu1 %v7181_v15  ;;  %v4470_v26 = vld [vmem:[#allocation16 + $0x3d8] sm:$0xff] }
 0x779   :  { %v7213_v42 = vpack.c.bf16 %v4470_v26, %v4462_v21  ;;  %v4597_v21 = vld [vmem:[#allocation16 + $0x7d0] sm:$0xff]  ;;  %v4352_v26 = vld [vmem:[#allocation16 + $0x28] sm:$0xff] }
 0x77a   :  { %7092 = vmatpush1.bf16.msra.mxu0 %v7091_v24  ;;  %7184 = vmatpush1.bf16.msra.mxu1 %v7183_v53  ;;  %v4054_v24 = vrot.slane %v4049_v28, %v9487_v58  ;;  %v4461_v53 = vld [vmem:[#allocation16 + $0x390] sm:$0xff] }
 0x77b   :  { %7094 = vmatprep.subr.bf16.mxu0 %v7093_v41  ;;  %7186 = vmatprep.subr.bf16.mxu1 %v7185_v38  ;;  %v4486_v38 = vld [vmem:[#allocation16 + $0x458] sm:$0xff]  ;;  %v7215_v28 = vpack.c.bf16 %v4469_v55, %v4461_v53  ;;  %v4351_v53 = vld [vmem:[#allocation16 + $0x20] sm:$0xff] }
 0x77c   :  { %v4953_v55 = vld [vmem:[%s9399_s13 + $0x80] sm:$0xff] }
 0x77e   :  { %7096 = vmatpush1.bf16.msra.mxu0 %v7095_v37 }
 0x77f   :  { %7098 = vmatprep.subr.bf16.mxu0 %v7097_v47  ;;  %v4366_v47 = vld [vmem:[#allocation16 + $0x98] sm:$0xff] }
 0x782   :  { %7100 = vmatpush1.bf16.msra.mxu0 %v7099_v19  ;;  %v7189_v19 = vpack.c.bf16 %v4374_v6, %v4366_v47  ;;  %v4501_v47 = vld [vmem:[#allocation16 + $0x4d0] sm:$0xff]  ;;  %v4510_v6 = vld [vmem:[#allocation16 + $0x518] sm:$0xff] }
 0x783   :  { %7102 = vmatprep.subr.bf16.mxu0 %v7101_v20  ;;  %v4365_v20 = vld [vmem:[#allocation16 + $0x90] sm:$0xff] }
 0x784   :  { %v7191_v31 = vpack.c.bf16 %v4373_v51, %v4365_v20  ;;  %v4509_v51 = vld [vmem:[#allocation16 + $0x510] sm:$0xff] }
 0x786   :  { %7104 = vmatpush1.bf16.msra.mxu0 %v7103_v12  ;;  %v7193_v12 = vpack.c.bf16 %v4390_v30, %v4382_v62  ;;  %v4517_v62 = vld [vmem:[#allocation16 + $0x550] sm:$0xff]  ;;  %v4526_v30 = vld [vmem:[#allocation16 + $0x598] sm:$0xff] }
 0x787   :  { %7106 = vmatprep.subr.bf16.mxu0 %v7105_v61  ;;  %v4381_v61 = vld [vmem:[#allocation16 + $0x110] sm:$0xff] }
 0x788   :  { %v7195_v0 = vpack.c.bf16 %v4389_v56, %v4381_v61  ;;  %v4525_v56 = vld [vmem:[#allocation16 + $0x590] sm:$0xff] }
 0x78a   :  { %7108 = vmatpush1.bf16.msra.mxu0 %v7107_v16  ;;  %v7197_v16 = vpack.c.bf16 %v4406_v5, %v4398_v18  ;;  %v4533_v18 = vld [vmem:[#allocation16 + $0x5d0] sm:$0xff]  ;;  %v4542_v5 = vld [vmem:[#allocation16 + $0x618] sm:$0xff] }
 0x78b   :  { %7110 = vmatprep.subr.bf16.mxu0 %v7109_v36  ;;  %v4397_v36 = vld [vmem:[#allocation16 + $0x190] sm:$0xff] }
 0x78c   :  { %v7199_v35 = vpack.c.bf16 %v4405_v39, %v4397_v36  ;;  %v4541_v39 = vld [vmem:[#allocation16 + $0x610] sm:$0xff] }
 0x78e   :  { %7112 = vmatpush1.bf16.msra.mxu0 %v7111_v49  ;;  %v7201_v49 = vpack.c.bf16 %v4422_v40, %v4414_v2  ;;  %v4549_v2 = vld [vmem:[#allocation16 + $0x650] sm:$0xff]  ;;  %v4558_v40 = vld [vmem:[#allocation16 + $0x698] sm:$0xff] }
 0x78f   :  { %7114 = vmatprep.subr.bf16.mxu0 %v7113_v10  ;;  %v4413_v10 = vld [vmem:[#allocation16 + $0x210] sm:$0xff] }
 0x790   :  { %v7203_v46 = vpack.c.bf16 %v4421_v48, %v4413_v10  ;;  %v4557_v48 = vld [vmem:[#allocation16 + $0x690] sm:$0xff] }
 0x792   :  { %7116 = vmatpush1.bf16.msra.mxu0 %v7115_v59  ;;  %v7205_v59 = vpack.c.bf16 %v4438_v34, %v4430_v23  ;;  %v4565_v23 = vld [vmem:[#allocation16 + $0x6d0] sm:$0xff]  ;;  %v4574_v34 = vld [vmem:[#allocation16 + $0x718] sm:$0xff] }
 0x793   :  { %7118 = vmatprep.subr.bf16.mxu0 %v7117_v8  ;;  %v4437_v8 = vld [vmem:[#allocation16 + $0x2d0] sm:$0xff] }
 0x796   :  { %7120 = vmatpush1.bf16.msra.mxu0 %v7119_v7  ;;  %v7207_v7 = vpack.c.bf16 %v4437_v8, %v4429_v3  ;;  %v4573_v8 = vld [vmem:[#allocation16 + $0x710] sm:$0xff] }
 0x799   :  { %4339 = vmatmul.mubr.f32.vlgmr.msra.gmra.mrb[26].mxu0 %v3791_v9  ;;  %v4445_v9 = vld [vmem:[#allocation16 + $0x310] sm:$0xff] }
 0x79a   :  { %v7211_v15 = vpack.c.bf16 %v4453_v44, %v4445_v9  ;;  %v4589_v44 = vld [vmem:[#allocation16 + $0x790] sm:$0xff] }
 0x86c   :  { %v4340_v41 = vpop.f32.mrb[26].mxu0 }
 0x86d   :  { %v7513_v4 = vadd.f32 %v4340_v41, %v4054_v24  ;;  %v4342_v17 = vpop.f32.mrb[27].mxu0  ;;  %v7217_v24 = vpack.c.bf16 %v4486_v38, %v4478_v22  ;;  %v4485_v41 = vld [vmem:[#allocation16 + $0x450] sm:$0xff]  ;;  %v4954_v22 = vld [vmem:[%s9399_s13 + $0x88] sm:$0xff] }
 0x86e   :  { %v7514_v37 = vadd.f32 %v4342_v17, %v4058_v63  ;;  %v4477_v63 = vld [vmem:[#allocation16 + $0x410] sm:$0xff]  ;;  %v4502_v17 = vld [vmem:[#allocation16 + $0x4d8] sm:$0xff] }
 0x86f   :  { %v8956_v14 = vmax.f32 %v7513_v4, 0.0  ;;  %v4494_v4 = vld [vmem:[#allocation16 + $0x498] sm:$0xff]  ;;  %v7219_v27 = vpack.c.bf16 %v4485_v41, %v4477_v63 }
 0x870   :  { %v8954_v11 = vmax.f32 %v7514_v37, 0.0  ;;  %v7221_v13 = vpack.c.bf16 %v4502_v17, %v4494_v4  ;;  %v4493_v37 = vld [vmem:[#allocation16 + $0x490] sm:$0xff]  ;;  %v4938_v41 = vld [vmem:[%s9399_s13 + $0x8] sm:$0xff]  ;;  %v4368_v4 = vld [vmem:[#allocation16 + $0xa8] sm:$0xff] }
 0x871   :  { %v4937_v63 = vld [vmem:[%s9399_s13] sm:$0xff]  ;;  %v4376_v17 = vld [vmem:[#allocation16 + $0xe8] sm:$0xff] }
 0x872   :  { %4709 = vmatprep.mubr.f32.mxu1 %v8954_v11 }
 0x873   :  { %4710 = vmatmul.mubr.f32.vlgmr.msra.gmra.mrb[28].mxu1 %v8956_v14 }
 0x874   :  { %7188 = vmatpush1.bf16.msra.mxu1 %v7187_v50  ;;  %4780 = vmatprep.mubr.f32.mxu1 %v8954_v11  ;;  %v4518_v50 = vld [vmem:[#allocation16 + $0x558] sm:$0xff] }
 0x875   :  { %7190 = vmatprep.subr.bf16.mxu1 %v7189_v19  ;;  %v7223_v19 = vpack.c.bf16 %v4501_v47, %v4493_v37  ;;  %v7225_v20 = vpack.c.bf16 %v4518_v50, %v4510_v6  ;;  %v4955_v37 = vld [vmem:[%s9399_s13 + $0x90] sm:$0xff]  ;;  %v4956_v47 = vld [vmem:[%s9399_s13 + $0x98] sm:$0xff]  ;;  %v7253_v6 = vpack.c.bf16 %v4376_v17, %v4368_v4 }
 0x876   :  { %v4367_v50 = vld [vmem:[#allocation16 + $0xa0] sm:$0xff] }
 0x877   :  { %v4947_v17 = vld [vmem:[%s9399_s13 + $0x50] sm:$0xff] }
 0x878   :  { %7192 = vmatpush1.bf16.msra.mxu1 %v7191_v31  ;;  %v4534_v31 = vld [vmem:[#allocation16 + $0x5d8] sm:$0xff] }
 0x879   :  { %7194 = vmatprep.subr.bf16.mxu1 %v7193_v12  ;;  %v7227_v12 = vpack.c.bf16 %v4517_v62, %v4509_v51  ;;  %v7229_v61 = vpack.c.bf16 %v4534_v31, %v4526_v30  ;;  %v4384_v51 = vld [vmem:[#allocation16 + $0x128] sm:$0xff]  ;;  %v4383_v30 = vld [vmem:[#allocation16 + $0x120] sm:$0xff] }
 0x87a   :  { %v4392_v62 = vld [vmem:[#allocation16 + $0x168] sm:$0xff] }
 0x87b   :  { %v4939_v31 = vld [vmem:[%s9399_s13 + $0x10] sm:$0xff] }
 0x87c   :  { %7196 = vmatpush1.bf16.msra.mxu1 %v7195_v0  ;;  %v4550_v0 = vld [vmem:[#allocation16 + $0x658] sm:$0xff] }
 0x87d   :  { %7198 = vmatprep.subr.bf16.mxu1 %v7197_v16  ;;  %v7231_v16 = vpack.c.bf16 %v4533_v18, %v4525_v56  ;;  %v7233_v36 = vpack.c.bf16 %v4550_v0, %v4542_v5  ;;  %v4958_v5 = vld [vmem:[%s9399_s13 + $0xa8] sm:$0xff]  ;;  %v4941_v0 = vld [vmem:[%s9399_s13 + $0x20] sm:$0xff] }
 0x880   :  { %7200 = vmatpush1.bf16.msra.mxu1 %v7199_v35  ;;  %v4566_v35 = vld [vmem:[#allocation16 + $0x6d8] sm:$0xff] }
 0x881   :  { %7202 = vmatprep.subr.bf16.mxu1 %v7201_v49  ;;  %v7235_v49 = vpack.c.bf16 %v4549_v2, %v4541_v39  ;;  %v7237_v10 = vpack.c.bf16 %v4566_v35, %v4558_v40  ;;  %v4391_v39 = vld [vmem:[#allocation16 + $0x160] sm:$0xff]  ;;  %v4960_v35 = vld [vmem:[%s9399_s13 + $0xb8] sm:$0xff] }
 0x882   :  { %v4959_v40 = vld [vmem:[%s9399_s13 + $0xb0] sm:$0xff] }
 0x884   :  { %7204 = vmatpush1.bf16.msra.mxu1 %v7203_v46  ;;  %v4582_v46 = vld [vmem:[#allocation16 + $0x758] sm:$0xff] }
 0x885   :  { %7206 = vmatprep.subr.bf16.mxu1 %v7205_v59  ;;  %v7239_v59 = vpack.c.bf16 %v4565_v23, %v4557_v48  ;;  %v7241_v3 = vpack.c.bf16 %v4582_v46, %v4574_v34  ;;  %v7389_v23 = vpack.c.bf16 %v4960_v35, %v4959_v40  ;;  %v4943_v34 = vld [vmem:[%s9399_s13 + $0x30] sm:$0xff]  ;;  %v4944_v46 = vld [vmem:[%s9399_s13 + $0x38] sm:$0xff] }
 0x886   :  { %v4471_v40 = vld [vmem:[#allocation16 + $0x3e0] sm:$0xff]  ;;  %v4480_v35 = vld [vmem:[#allocation16 + $0x428] sm:$0xff] }
 0x888   :  { %7208 = vmatpush1.bf16.msra.mxu1 %v7207_v7  ;;  %v4598_v7 = vld [vmem:[#allocation16 + $0x7d8] sm:$0xff] }
 0x889   :  { %7210 = vmatprep.subr.bf16.mxu1 %v7209_v29  ;;  %v7243_v29 = vpack.c.bf16 %v4581_v60, %v4573_v8  ;;  %v7245_v9 = vpack.c.bf16 %v4598_v7, %v4590_v54  ;;  %v4962_v8 = vld [vmem:[%s9399_s13 + $0xc8] sm:$0xff] }
 0x88a   :  { %v4399_v54 = vld [vmem:[#allocation16 + $0x1a0] sm:$0xff] }
 0x88b   :  { %v4407_v7 = vld [vmem:[#allocation16 + $0x1e0] sm:$0xff] }
 0x88c   :  { %7212 = vmatpush1.bf16.msra.mxu1 %v7211_v15  ;;  %v4360_v15 = vld [vmem:[#allocation16 + $0x68] sm:$0xff] }
 0x88d   :  { %7214 = vmatprep.subr.bf16.mxu1 %v7213_v42  ;;  %v7247_v42 = vpack.c.bf16 %v4597_v21, %v4589_v44  ;;  %v7249_v38 = vpack.c.bf16 %v4360_v15, %v4352_v26  ;;  %v7391_v44 = vpack.c.bf16 %v4944_v46, %v4943_v34  ;;  %v4945_v26 = vld [vmem:[%s9399_s13 + $0x40] sm:$0xff]  ;;  %v4946_v15 = vld [vmem:[%s9399_s13 + $0x48] sm:$0xff]  ;;  %v4951_v34 = vld [vmem:[%s9399_s13 + $0x70] sm:$0xff] }
 0x890   :  { %7216 = vmatpush1.bf16.msra.mxu1 %v7215_v28  ;;  %v4359_v28 = vld [vmem:[#allocation16 + $0x60] sm:$0xff] }
 0x891   :  { %7218 = vmatprep.subr.bf16.mxu1 %v7217_v24  ;;  %v7377_v24 = vpack.c.bf16 %v4954_v22, %v4953_v55  ;;  %v4964_v55 = vld [vmem:[%s9399_s13 + $0xd8] sm:$0xff] }
 0x893   :  { %7378 = vmatprep.subr.bf16.mxu0 %v7377_v24  ;;  %v4432_v24 = vld [vmem:[#allocation16 + $0x2a8] sm:$0xff] }
 0x894   :  { %7220 = vmatpush1.bf16.msra.mxu1 %v7219_v27  ;;  %v7379_v27 = vpack.c.bf16 %v4938_v41, %v4937_v63  ;;  %v4440_v63 = vld [vmem:[#allocation16 + $0x2e8] sm:$0xff]  ;;  %v7395_v41 = vpack.c.bf16 %v4946_v15, %v4945_v26  ;;  %v4495_v26 = vld [vmem:[#allocation16 + $0x4a0] sm:$0xff] }
 0x895   :  { %7222 = vmatprep.subr.bf16.mxu1 %v7221_v13  ;;  %v7251_v13 = vpack.c.bf16 %v4359_v28, %v4351_v53  ;;  %v4963_v53 = vld [vmem:[%s9399_s13 + $0xd0] sm:$0xff] }
 0x896   :  { %7380 = vmatpush3.bf16.msra.mxu0 %v7379_v27  ;;  %v4423_v28 = vld [vmem:[#allocation16 + $0x260] sm:$0xff]  ;;  %v7397_v4 = vpack.c.bf16 %v4964_v55, %v4963_v53  ;;  %v4948_v27 = vld [vmem:[%s9399_s13 + $0x58] sm:$0xff] }
 0x897   :  { %v4503_v15 = vld [vmem:[#allocation16 + $0x4e0] sm:$0xff]  ;;  %v4520_v53 = vld [vmem:[#allocation16 + $0x568] sm:$0xff] }
 0x898   :  { %7224 = vmatpush1.bf16.msra.mxu1 %v7223_v19  ;;  %v4375_v19 = vld [vmem:[#allocation16 + $0xe0] sm:$0xff]  ;;  %v7287_v55 = vpack.c.bf16 %v4503_v15, %v4495_v26  ;;  %v4385_v15 = vld [vmem:[#allocation16 + $0x130] sm:$0xff] }
 0x899   :  { %7226 = vmatprep.subr.bf16.mxu1 %v7225_v20  ;;  %v7381_v20 = vpack.c.bf16 %v4956_v47, %v4955_v37  ;;  %v7255_v56 = vpack.c.bf16 %v4375_v19, %v4367_v50  ;;  %v4965_v37 = vld [vmem:[%s9399_s13 + $0xe0] sm:$0xff]  ;;  %v4966_v47 = vld [vmem:[%s9399_s13 + $0xe8] sm:$0xff] }
 0x89a   :  { %v4431_v50 = vld [vmem:[#allocation16 + $0x2a0] sm:$0xff] }
 0x89b   :  { %7382 = vmatprep.subr.bf16.mxu0 %v7381_v20  ;;  %v4439_v19 = vld [vmem:[#allocation16 + $0x2e0] sm:$0xff]  ;;  %v4448_v20 = vld [vmem:[#allocation16 + $0x328] sm:$0xff] }
 0x89c   :  { %7228 = vmatpush1.bf16.msra.mxu1 %v7227_v12  ;;  %v4940_v12 = vld [vmem:[%s9399_s13 + $0x18] sm:$0xff] }
 0x89d   :  { %7230 = vmatprep.subr.bf16.mxu1 %v7229_v61  ;;  %v4957_v61 = vld [vmem:[%s9399_s13 + $0xa0] sm:$0xff]  ;;  %v7383_v18 = vpack.c.bf16 %v4940_v12, %v4939_v31  ;;  %v7271_v31 = vpack.c.bf16 %v4439_v19, %v4431_v50  ;;  %v4543_v50 = vld [vmem:[#allocation16 + $0x620] sm:$0xff] }
 0x89e   :  { %v7385_v2 = vpack.c.bf16 %v4958_v5, %v4957_v61  ;;  %v4447_v61 = vld [vmem:[#allocation16 + $0x320] sm:$0xff]  ;;  %v4472_v5 = vld [vmem:[#allocation16 + $0x3e8] sm:$0xff] }
 0x89f   :  { %7384 = vmatpush3.bf16.msra.mxu0 %v7383_v18  ;;  %v4464_v18 = vld [vmem:[#allocation16 + $0x3a8] sm:$0xff]  ;;  %v4551_v19 = vld [vmem:[#allocation16 + $0x660] sm:$0xff] }
 0x8a0   :  { %7232 = vmatpush1.bf16.msra.mxu1 %v7231_v16  ;;  %v4942_v16 = vld [vmem:[%s9399_s13 + $0x28] sm:$0xff]  ;;  %7386 = vmatprep.subr.bf16.mxu0 %v7385_v2  ;;  %v7277_v2 = vpack.c.bf16 %v4472_v5, %v4464_v18 }
 0x8a1   :  { %7234 = vmatprep.subr.bf16.mxu1 %v7233_v36  ;;  %v7257_v36 = vpack.c.bf16 %v4392_v62, %v4384_v51  ;;  %v7387_v48 = vpack.c.bf16 %v4942_v16, %v4941_v0  ;;  %v4456_v51 = vld [vmem:[#allocation16 + $0x368] sm:$0xff]  ;;  %v7399_v62 = vpack.c.bf16 %v4948_v27, %v4947_v17  ;;  %v4463_v16 = vld [vmem:[#allocation16 + $0x3a0] sm:$0xff] }
 0x8a2   :  { %v7273_v12 = vpack.c.bf16 %v4456_v51, %v4448_v20  ;;  %v4527_v17 = vld [vmem:[#allocation16 + $0x5a0] sm:$0xff]  ;;  %v4560_v20 = vld [vmem:[#allocation16 + $0x6a8] sm:$0xff] }
 0x8a3   :  { %7388 = vmatpush3.bf16.msra.mxu0 %v7387_v48  ;;  %v4967_v48 = vld [vmem:[%s9399_s13 + $0xf0] sm:$0xff] }
 0x8a4   :  { %7236 = vmatpush1.bf16.msra.mxu1 %v7235_v49  ;;  %v4400_v49 = vld [vmem:[#allocation16 + $0x1a8] sm:$0xff]  ;;  %7390 = vmatprep.subr.bf16.mxu0 %v7389_v23  ;;  %v4535_v27 = vld [vmem:[#allocation16 + $0x5e0] sm:$0xff] }
 0x8a5   :  { %7238 = vmatprep.subr.bf16.mxu1 %v7237_v10  ;;  %v4408_v10 = vld [vmem:[#allocation16 + $0x1e8] sm:$0xff] }
 0x8a6   :  { %v7261_v60 = vpack.c.bf16 %v4408_v10, %v4400_v49  ;;  %v4488_v49 = vld [vmem:[#allocation16 + $0x468] sm:$0xff] }
 0x8a7   :  { %7392 = vmatpush3.bf16.msra.mxu0 %v7391_v44  ;;  %v4968_v23 = vld [vmem:[%s9399_s13 + $0xf8] sm:$0xff] }
 0x8a8   :  { %7240 = vmatpush1.bf16.msra.mxu1 %v7239_v59  ;;  %v7259_v59 = vpack.c.bf16 %v4391_v39, %v4383_v30  ;;  %v7401_v30 = vpack.c.bf16 %v4966_v47, %v4965_v37  ;;  %v4950_v39 = vld [vmem:[%s9399_s13 + $0x68] sm:$0xff]  ;;  %v7405_v46 = vpack.c.bf16 %v4968_v23, %v4967_v48  ;;  %v4552_v37 = vld [vmem:[#allocation16 + $0x668] sm:$0xff]  ;;  %v7295_v47 = vpack.c.bf16 %v4535_v27, %v4527_v17  ;;  %v4425_v27 = vld [vmem:[#allocation16 + $0x270] sm:$0xff] }
 0x8a9   :  { %7242 = vmatprep.subr.bf16.mxu1 %v7241_v3  ;;  %v4961_v3 = vld [vmem:[%s9399_s13 + $0xc0] sm:$0xff]  ;;  %v4568_v51 = vld [vmem:[#allocation16 + $0x6e8] sm:$0xff] }
 0x8aa   :  { %v7393_v21 = vpack.c.bf16 %v4962_v8, %v4961_v3  ;;  %v7279_v3 = vpack.c.bf16 %v4471_v40, %v4463_v16  ;;  %v4583_v16 = vld [vmem:[#allocation16 + $0x760] sm:$0xff]  ;;  %v4362_v48 = vld [vmem:[#allocation16 + $0x78] sm:$0xff] }
 0x8ac   :  { %7244 = vmatpush1.bf16.msra.mxu1 %v7243_v29  ;;  %v4416_v29 = vld [vmem:[#allocation16 + $0x228] sm:$0xff]  ;;  %7394 = vmatprep.subr.bf16.mxu0 %v7393_v21 }
 0x8ad   :  { %7246 = vmatprep.subr.bf16.mxu1 %v7245_v9  ;;  %v4424_v9 = vld [vmem:[#allocation16 + $0x268] sm:$0xff]  ;;  %7396 = vmatpush3.bf16.msra.mxu0 %v7395_v41 }
 0x8ae   :  { %v7265_v22 = vpack.c.bf16 %v4424_v9, %v4416_v29  ;;  %7398 = vmatprep.subr.bf16.mxu0 %v7397_v4  ;;  %v4496_v29 = vld [vmem:[#allocation16 + $0x4a8] sm:$0xff] }
 0x8af   :  { %v4504_v9 = vld [vmem:[#allocation16 + $0x4e8] sm:$0xff] }
 0x8b0   :  { %7248 = vmatpush1.bf16.msra.mxu1 %v7247_v42  ;;  %v7263_v42 = vpack.c.bf16 %v4407_v7, %v4399_v54  ;;  %v4479_v54 = vld [vmem:[#allocation16 + $0x420] sm:$0xff]  ;;  %v7285_v21 = vpack.c.bf16 %v4504_v9, %v4496_v29  ;;  %v4377_v29 = vld [vmem:[#allocation16 + $0xf0] sm:$0xff]  ;;  %v4386_v9 = vld [vmem:[#allocation16 + $0x138] sm:$0xff] }
 0x8b1   :  { %7250 = vmatprep.subr.bf16.mxu1 %v7249_v38  ;;  %v4415_v38 = vld [vmem:[#allocation16 + $0x220] sm:$0xff]  ;;  %7400 = vmatpush3.bf16.msra.mxu0 %v7399_v62  ;;  %v7299_v62 = vpack.c.bf16 %v4551_v19, %v4543_v50  ;;  %v4433_v50 = vld [vmem:[#allocation16 + $0x2b0] sm:$0xff] }
 0x8b2   :  { %7402 = vmatprep.subr.bf16.mxu0 %v7401_v30  ;;  %v4487_v7 = vld [vmem:[#allocation16 + $0x460] sm:$0xff]  ;;  %v7301_v30 = vpack.c.bf16 %v4568_v51, %v4560_v20  ;;  %v4441_v19 = vld [vmem:[#allocation16 + $0x2f0] sm:$0xff]  ;;  %v4450_v20 = vld [vmem:[#allocation16 + $0x338] sm:$0xff] }
 0x8b3   :  { %4781 = vmatmul.mubr.f32.vlgmr.msra.gmra.mrb[30].mxu1 %v8956_v14  ;;  %v7283_v44 = vpack.c.bf16 %v4487_v7, %v4479_v54  ;;  %v4369_v7 = vld [vmem:[#allocation16 + $0xb0] sm:$0xff]  ;;  %v4458_v51 = vld [vmem:[#allocation16 + $0x378] sm:$0xff] }
 0x8b4   :  { %7252 = vmatpush1.bf16.msra.mxu1 %v7251_v13  ;;  %4851 = vmatprep.mubr.f32.mxu1 %v8954_v11  ;;  %v7267_v13 = vpack.c.bf16 %v4423_v28, %v4415_v38  ;;  %v4511_v38 = vld [vmem:[#allocation16 + $0x520] sm:$0xff] }
 0x8b5   :  { %7254 = vmatprep.subr.bf16.mxu1 %v7253_v6  ;;  %v7269_v6 = vpack.c.bf16 %v4440_v63, %v4432_v24  ;;  %v4519_v28 = vld [vmem:[#allocation16 + $0x560] sm:$0xff]  ;;  %v4528_v24 = vld [vmem:[#allocation16 + $0x5a8] sm:$0xff] }
 0x8b6   :  { %v4536_v63 = vld [vmem:[#allocation16 + $0x5e8] sm:$0xff]  ;;  %v7291_v41 = vpack.c.bf16 %v4519_v28, %v4511_v38  ;;  %v4401_v28 = vld [vmem:[#allocation16 + $0x1b0] sm:$0xff] }
 0x8b7   :  { %v7293_v4 = vpack.c.bf16 %v4536_v63, %v4528_v24  ;;  %v4409_v24 = vld [vmem:[#allocation16 + $0x1f0] sm:$0xff]  ;;  %v4418_v63 = vld [vmem:[#allocation16 + $0x238] sm:$0xff] }
 0x8b8   :  { %7256 = vmatpush1.bf16.msra.mxu1 %v7255_v56  ;;  %v4455_v56 = vld [vmem:[#allocation16 + $0x360] sm:$0xff] }
 0x8b9   :  { %7258 = vmatprep.subr.bf16.mxu1 %v7257_v36  ;;  %v7275_v0 = vpack.c.bf16 %v4455_v56, %v4447_v61  ;;  %v4949_v36 = vld [vmem:[%s9399_s13 + $0x60] sm:$0xff]  ;;  %v4576_v61 = vld [vmem:[#allocation16 + $0x728] sm:$0xff] }
 0x8ba   :  { %v7403_v10 = vpack.c.bf16 %v4950_v39, %v4949_v36  ;;  %v4584_v56 = vld [vmem:[#allocation16 + $0x768] sm:$0xff] }
 0x8bb   :  { %v7305_v5 = vpack.c.bf16 %v4584_v56, %v4576_v61  ;;  %v4592_v36 = vld [vmem:[#allocation16 + $0x7a8] sm:$0xff]  ;;  %v4466_v61 = vld [vmem:[#allocation16 + $0x3b8] sm:$0xff] }
 0x8bc   :  { %7260 = vmatpush1.bf16.msra.mxu1 %v7259_v59  ;;  %7404 = vmatpush3.bf16.msra.mxu0 %v7403_v10  ;;  %v4952_v59 = vld [vmem:[%s9399_s13 + $0x78] sm:$0xff]  ;;  %v4354_v10 = vld [vmem:[#allocation16 + $0x38] sm:$0xff] }
 0x8bd   :  { %7262 = vmatprep.subr.bf16.mxu1 %v7261_v60  ;;  %v7407_v8 = vpack.c.bf16 %v4952_v59, %v4951_v34  ;;  %v7281_v60 = vpack.c.bf16 %v4488_v49, %v4480_v35  ;;  %7406 = vmatprep.subr.bf16.mxu0 %v7405_v46  ;;  %v4600_v39 = vld [vmem:[#allocation16 + $0x7e8] sm:$0xff]  ;;  %v4591_v35 = vld [vmem:[#allocation16 + $0x7a0] sm:$0xff]  ;;  %v7313_v34 = vpack.c.bf16 %v4362_v48, %v4354_v10  ;;  %v4353_v46 = vld [vmem:[#allocation16 + $0x30] sm:$0xff] }
 0x8be   :  { %v7309_v40 = vpack.c.bf16 %v4600_v39, %v4592_v36  ;;  %v4599_v49 = vld [vmem:[#allocation16 + $0x7e0] sm:$0xff]  ;;  %v4361_v59 = vld [vmem:[#allocation16 + $0x70] sm:$0xff]  ;;  %v4474_v56 = vld [vmem:[#allocation16 + $0x3f8] sm:$0xff] }
 0x8bf   :  { %v7311_v23 = vpack.c.bf16 %v4599_v49, %v4591_v35  ;;  %v4482_v36 = vld [vmem:[#allocation16 + $0x438] sm:$0xff]  ;;  %v4489_v49 = vld [vmem:[#allocation16 + $0x470] sm:$0xff] }
 0x8c0   :  { %7264 = vmatpush1.bf16.msra.mxu1 %v7263_v42  ;;  %7408 = vmatpush3.bf16.msra.mxu0 %v7407_v8  ;;  %v4512_v42 = vld [vmem:[#allocation16 + $0x528] sm:$0xff]  ;;  %v4378_v8 = vld [vmem:[#allocation16 + $0xf8] sm:$0xff] }
 0x8c1   :  { %7266 = vmatprep.subr.bf16.mxu1 %v7265_v22  ;;  %v7289_v22 = vpack.c.bf16 %v4520_v53, %v4512_v42  ;;  %v4393_v42 = vld [vmem:[#allocation16 + $0x170] sm:$0xff]  ;;  %v4402_v53 = vld [vmem:[#allocation16 + $0x1b8] sm:$0xff] }
 0x8c2   :  { %v4490_v39 = vld [vmem:[#allocation16 + $0x478] sm:$0xff] }
 0x8c3   :  { %v7345_v35 = vpack.c.bf16 %v4490_v39, %v4482_v36  ;;  %v5017_v10 = vld [vmem:[%s9399_s13 + $0x280] sm:$0xff]  ;;  %v5018_v48 = vld [vmem:[%s9399_s13 + $0x288] sm:$0xff] }
 0x8c4   :  { %7268 = vmatpush1.bf16.msra.mxu1 %v7267_v13  ;;  %v4544_v13 = vld [vmem:[#allocation16 + $0x628] sm:$0xff]  ;;  %v4969_v39 = vld [vmem:[%s9399_s13 + $0x100] sm:$0xff] }
 0x8c5   :  { %7270 = vmatprep.subr.bf16.mxu1 %v7269_v6  ;;  %v7297_v6 = vpack.c.bf16 %v4552_v37, %v4544_v13  ;;  %v4434_v13 = vld [vmem:[#allocation16 + $0x2b8] sm:$0xff] }
 0x8c6   :  { %v4442_v37 = vld [vmem:[#allocation16 + $0x2f8] sm:$0xff] }
 0x8c8   :  { %7272 = vmatpush1.bf16.msra.mxu1 %v7271_v31  ;;  %v4559_v31 = vld [vmem:[#allocation16 + $0x6a0] sm:$0xff] }
 0x8c9   :  { %7274 = vmatprep.subr.bf16.mxu1 %v7273_v12  ;;  %v4567_v12 = vld [vmem:[#allocation16 + $0x6e0] sm:$0xff] }
 0x8ca   :  { %v7303_v18 = vpack.c.bf16 %v4567_v12, %v4559_v31  ;;  %v4449_v31 = vld [vmem:[#allocation16 + $0x330] sm:$0xff] }
 0x8cb   :  { %v4457_v12 = vld [vmem:[#allocation16 + $0x370] sm:$0xff] }
 0x8cc   :  { %7276 = vmatpush1.bf16.msra.mxu1 %v7275_v0  ;;  %v4575_v0 = vld [vmem:[#allocation16 + $0x720] sm:$0xff] }
 0x8cd   :  { %7278 = vmatprep.subr.bf16.mxu1 %v7277_v2  ;;  %v7307_v2 = vpack.c.bf16 %v4583_v16, %v4575_v0  ;;  %v4465_v0 = vld [vmem:[#allocation16 + $0x3b0] sm:$0xff] }
 0x8ce   :  { %v4473_v16 = vld [vmem:[#allocation16 + $0x3f0] sm:$0xff] }
 0x8d0   :  { %7280 = vmatpush1.bf16.msra.mxu1 %v7279_v3  ;;  %v4370_v3 = vld [vmem:[#allocation16 + $0xb8] sm:$0xff] }
 0x8d1   :  { %7282 = vmatprep.subr.bf16.mxu1 %v7281_v60  ;;  %v7315_v60 = vpack.c.bf16 %v4361_v59, %v4353_v46  ;;  %v7317_v54 = vpack.c.bf16 %v4378_v8, %v4370_v3  ;;  %v7441_v46 = vpack.c.bf16 %v5018_v48, %v5017_v10  ;;  %v4497_v8 = vld [vmem:[#allocation16 + $0x4b0] sm:$0xff]  ;;  %v4971_v48 = vld [vmem:[%s9399_s13 + $0x110] sm:$0xff] }
 0x8d3   :  { %7442 = vmatprep.subr.bf16.mxu0 %v7441_v46  ;;  %v4990_v46 = vld [vmem:[%s9399_s13 + $0x1a8] sm:$0xff] }
 0x8d4   :  { %7284 = vmatpush1.bf16.msra.mxu1 %v7283_v44  ;;  %v4394_v44 = vld [vmem:[#allocation16 + $0x178] sm:$0xff] }
 0x8d5   :  { %7286 = vmatprep.subr.bf16.mxu1 %v7285_v21  ;;  %v7319_v21 = vpack.c.bf16 %v4377_v29, %v4369_v7  ;;  %v7321_v26 = vpack.c.bf16 %v4394_v44, %v4386_v9  ;;  %v4522_v7 = vld [vmem:[#allocation16 + $0x578] sm:$0xff]  ;;  %v4513_v44 = vld [vmem:[#allocation16 + $0x530] sm:$0xff] }
 0x8d8   :  { %7288 = vmatpush1.bf16.msra.mxu1 %v7287_v55  ;;  %v4410_v55 = vld [vmem:[#allocation16 + $0x1f8] sm:$0xff] }
 0x8d9   :  { %7290 = vmatprep.subr.bf16.mxu1 %v7289_v22  ;;  %v7323_v22 = vpack.c.bf16 %v4393_v42, %v4385_v15  ;;  %v7325_v38 = vpack.c.bf16 %v4410_v55, %v4402_v53  ;;  %v4538_v15 = vld [vmem:[#allocation16 + $0x5f8] sm:$0xff]  ;;  %v4529_v55 = vld [vmem:[#allocation16 + $0x5b0] sm:$0xff] }
 0x8dc   :  { %7292 = vmatpush1.bf16.msra.mxu1 %v7291_v41  ;;  %v4426_v41 = vld [vmem:[#allocation16 + $0x278] sm:$0xff] }
 0x8dd   :  { %7294 = vmatprep.subr.bf16.mxu1 %v7293_v4  ;;  %v7327_v4 = vpack.c.bf16 %v4409_v24, %v4401_v28  ;;  %v7329_v17 = vpack.c.bf16 %v4426_v41, %v4418_v63  ;;  %v4554_v28 = vld [vmem:[#allocation16 + $0x678] sm:$0xff]  ;;  %v4545_v41 = vld [vmem:[#allocation16 + $0x630] sm:$0xff] }
 0x8e0   :  { %7296 = vmatpush1.bf16.msra.mxu1 %v7295_v47 }
 0x8e1   :  { %7298 = vmatprep.subr.bf16.mxu1 %v7297_v6  ;;  %v7333_v6 = vpack.c.bf16 %v4442_v37, %v4434_v13  ;;  %v4561_v37 = vld [vmem:[#allocation16 + $0x6b0] sm:$0xff] }
 0x8e4   :  { %7300 = vmatpush1.bf16.msra.mxu1 %v7299_v62  ;;  %v7335_v62 = vpack.c.bf16 %v4441_v19, %v4433_v50  ;;  %v4586_v50 = vld [vmem:[#allocation16 + $0x778] sm:$0xff] }
 0x8e5   :  { %7302 = vmatprep.subr.bf16.mxu1 %v7301_v30  ;;  %v7337_v30 = vpack.c.bf16 %v4458_v51, %v4450_v20  ;;  %v4577_v51 = vld [vmem:[#allocation16 + $0x730] sm:$0xff] }
 0x8e8   :  { %7304 = vmatpush1.bf16.msra.mxu1 %v7303_v18  ;;  %v7339_v18 = vpack.c.bf16 %v4457_v12, %v4449_v31  ;;  %v4602_v31 = vld [vmem:[#allocation16 + $0x7f8] sm:$0xff] }
 0x8e9   :  { %7306 = vmatprep.subr.bf16.mxu1 %v7305_v5  ;;  %v7341_v5 = vpack.c.bf16 %v4474_v56, %v4466_v61  ;;  %v4593_v56 = vld [vmem:[#allocation16 + $0x7b0] sm:$0xff] }
 0x8ec   :  { %7308 = vmatpush1.bf16.msra.mxu1 %v7307_v2  ;;  %v7343_v2 = vpack.c.bf16 %v4473_v16, %v4465_v0  ;;  %v4986_v0 = vld [vmem:[%s9399_s13 + $0x188] sm:$0xff] }
 0x8ed   :  { %7310 = vmatprep.subr.bf16.mxu1 %v7309_v40  ;;  %v4481_v40 = vld [vmem:[#allocation16 + $0x430] sm:$0xff] }
 0x8ee   :  { %v7347_v59 = vpack.c.bf16 %v4489_v49, %v4481_v40  ;;  %v4987_v40 = vld [vmem:[%s9399_s13 + $0x190] sm:$0xff] }
 0x8f0   :  { %7312 = vmatpush1.bf16.msra.mxu1 %v7311_v23  ;;  %v4498_v23 = vld [vmem:[#allocation16 + $0x4b8] sm:$0xff] }
 0x8f1   :  { %7314 = vmatprep.subr.bf16.mxu1 %v7313_v34  ;;  %v4506_v34 = vld [vmem:[#allocation16 + $0x4f8] sm:$0xff] }
 0x8f2   :  { %v7349_v3 = vpack.c.bf16 %v4506_v34, %v4498_v23  ;;  %v4972_v23 = vld [vmem:[%s9399_s13 + $0x118] sm:$0xff]  ;;  %v4989_v34 = vld [vmem:[%s9399_s13 + $0x1a0] sm:$0xff] }
 0x8f3   :  { %4852 = vmatmul.mubr.f32.vlgmr.msra.gmra.mrb[32].mxu1 %v8956_v14 }
 0x8f4   :  { %7316 = vmatpush1.bf16.msra.mxu1 %v7315_v60  ;;  %4922 = vmatprep.mubr.f32.mxu1 %v8954_v11  ;;  %v4417_v11 = vld [vmem:[#allocation16 + $0x230] sm:$0xff] }
 0x8f5   :  { %7318 = vmatprep.subr.bf16.mxu1 %v7317_v54  ;;  %v7331_v47 = vpack.c.bf16 %v4425_v27, %v4417_v11  ;;  %v4505_v60 = vld [vmem:[#allocation16 + $0x4f0] sm:$0xff]  ;;  %v4514_v54 = vld [vmem:[#allocation16 + $0x538] sm:$0xff] }
 0x8f6   :  { %v7351_v29 = vpack.c.bf16 %v4505_v60, %v4497_v8  ;;  %v7353_v9 = vpack.c.bf16 %v4522_v7, %v4514_v54  ;;  %v4570_v11 = vld [vmem:[#allocation16 + $0x6f8] sm:$0xff]  ;;  %v4991_v54 = vld [vmem:[%s9399_s13 + $0x1b0] sm:$0xff] }
 0x8f7   :  { %v4973_v8 = vld [vmem:[%s9399_s13 + $0x120] sm:$0xff]  ;;  %v4974_v60 = vld [vmem:[%s9399_s13 + $0x128] sm:$0xff] }
 0x8f8   :  { %7320 = vmatpush1.bf16.msra.mxu1 %v7319_v21  ;;  %v4521_v21 = vld [vmem:[#allocation16 + $0x570] sm:$0xff]  ;;  %v7419_v7 = vpack.c.bf16 %v4974_v60, %v4973_v8  ;;  %v5006_v60 = vld [vmem:[%s9399_s13 + $0x228] sm:$0xff] }
 0x8f9   :  { %7322 = vmatprep.subr.bf16.mxu1 %v7321_v26  ;;  %v4530_v26 = vld [vmem:[#allocation16 + $0x5b8] sm:$0xff]  ;;  %v7355_v42 = vpack.c.bf16 %v4521_v21, %v4513_v44  ;;  %v4976_v44 = vld [vmem:[%s9399_s13 + $0x138] sm:$0xff] }
 0x8fa   :  { %v7357_v53 = vpack.c.bf16 %v4538_v15, %v4530_v26  ;;  %v4993_v21 = vld [vmem:[%s9399_s13 + $0x1c0] sm:$0xff]  ;;  %v4994_v26 = vld [vmem:[%s9399_s13 + $0x1c8] sm:$0xff] }
 0x8fb   :  { %v5005_v8 = vld [vmem:[%s9399_s13 + $0x220] sm:$0xff] }
 0x8fc   :  { %7324 = vmatpush1.bf16.msra.mxu1 %v7323_v22  ;;  %v4537_v22 = vld [vmem:[#allocation16 + $0x5f0] sm:$0xff] }
 0x8fd   :  { %7326 = vmatprep.subr.bf16.mxu1 %v7325_v38  ;;  %v4546_v38 = vld [vmem:[#allocation16 + $0x638] sm:$0xff]  ;;  %v7359_v24 = vpack.c.bf16 %v4537_v22, %v4529_v55  ;;  %v4995_v22 = vld [vmem:[%s9399_s13 + $0x1d0] sm:$0xff] }
 0x8fe   :  { %v7361_v63 = vpack.c.bf16 %v4554_v28, %v4546_v38  ;;  %v4978_v55 = vld [vmem:[%s9399_s13 + $0x148] sm:$0xff]  ;;  %v4996_v38 = vld [vmem:[%s9399_s13 + $0x1d8] sm:$0xff] }
 0x8ff   :  { %v9134_v28 = vld [vmem:[#allocation17] sm:$0xff] }
 0x900   :  { %7328 = vmatpush1.bf16.msra.mxu1 %v7327_v4  ;;  %v4553_v4 = vld [vmem:[#allocation16 + $0x670] sm:$0xff] }
 0x901   :  { %7330 = vmatprep.subr.bf16.mxu1 %v7329_v17  ;;  %v4562_v17 = vld [vmem:[#allocation16 + $0x6b8] sm:$0xff]  ;;  %v7363_v27 = vpack.c.bf16 %v4553_v4, %v4545_v41  ;;  %v4979_v41 = vld [vmem:[%s9399_s13 + $0x150] sm:$0xff]  ;;  %v4980_v4 = vld [vmem:[%s9399_s13 + $0x158] sm:$0xff] }
 0x902   :  { %v7365_v13 = vpack.c.bf16 %v4570_v11, %v4562_v17  ;;  %v4997_v17 = vld [vmem:[%s9399_s13 + $0x1e0] sm:$0xff]  ;;  %v4998_v11 = vld [vmem:[%s9399_s13 + $0x1e8] sm:$0xff] }
 0x904   :  { %7332 = vmatpush1.bf16.msra.mxu1 %v7331_v47  ;;  %v4569_v47 = vld [vmem:[#allocation16 + $0x6f0] sm:$0xff] }
 0x905   :  { %7334 = vmatprep.subr.bf16.mxu1 %v7333_v6  ;;  %v4578_v6 = vld [vmem:[#allocation16 + $0x738] sm:$0xff]  ;;  %v7367_v19 = vpack.c.bf16 %v4569_v47, %v4561_v37  ;;  %v7431_v37 = vpack.c.bf16 %v4980_v4, %v4979_v41  ;;  %v7433_v47 = vpack.c.bf16 %v4998_v11, %v4997_v17  ;;  %v5011_v41 = vld [vmem:[%s9399_s13 + $0x250] sm:$0xff]  ;;  %v5012_v4 = vld [vmem:[%s9399_s13 + $0x258] sm:$0xff] }
 0x906   :  { %v7369_v20 = vpack.c.bf16 %v4586_v50, %v4578_v6  ;;  %v4981_v6 = vld [vmem:[%s9399_s13 + $0x160] sm:$0xff]  ;;  %v4982_v50 = vld [vmem:[%s9399_s13 + $0x168] sm:$0xff] }
 0x907   :  { %v5029_v17 = vld [vmem:[%s9399_s13 + $0x2e0] sm:$0xff]  ;;  %v5030_v11 = vld [vmem:[%s9399_s13 + $0x2e8] sm:$0xff] }
 0x908   :  { %7336 = vmatpush1.bf16.msra.mxu1 %v7335_v62  ;;  %v4585_v62 = vld [vmem:[#allocation16 + $0x770] sm:$0xff] }
 0x909   :  { %7338 = vmatprep.subr.bf16.mxu1 %v7337_v30  ;;  %v4594_v30 = vld [vmem:[#allocation16 + $0x7b8] sm:$0xff]  ;;  %v7371_v12 = vpack.c.bf16 %v4585_v62, %v4577_v51 }
 0x90a   :  { %v7373_v61 = vpack.c.bf16 %v4602_v31, %v4594_v30  ;;  %v5001_v62 = vld [vmem:[%s9399_s13 + $0x200] sm:$0xff]  ;;  %v5002_v30 = vld [vmem:[%s9399_s13 + $0x208] sm:$0xff] }
 0x90c   :  { %7340 = vmatpush1.bf16.msra.mxu1 %v7339_v18  ;;  %v4601_v18 = vld [vmem:[#allocation16 + $0x7f0] sm:$0xff] }
 0x90d   :  { %7342 = vmatprep.subr.bf16.mxu1 %v7341_v5  ;;  %v4985_v5 = vld [vmem:[%s9399_s13 + $0x180] sm:$0xff]  ;;  %v7375_v16 = vpack.c.bf16 %v4601_v18, %v4593_v56  ;;  %v5020_v56 = vld [vmem:[%s9399_s13 + $0x298] sm:$0xff] }
 0x90e   :  { %v7409_v36 = vpack.c.bf16 %v4986_v0, %v4985_v5  ;;  %v4983_v5 = vld [vmem:[%s9399_s13 + $0x170] sm:$0xff]  ;;  %v4984_v0 = vld [vmem:[%s9399_s13 + $0x178] sm:$0xff] }
 0x910   :  { %7344 = vmatpush1.bf16.msra.mxu1 %v7343_v2  ;;  %v4970_v2 = vld [vmem:[%s9399_s13 + $0x108] sm:$0xff] }
 0x911   :  { %7346 = vmatprep.subr.bf16.mxu1 %v7345_v35  ;;  %v4988_v35 = vld [vmem:[%s9399_s13 + $0x198] sm:$0xff]  ;;  %v7411_v49 = vpack.c.bf16 %v4970_v2, %v4969_v39 }
 0x912   :  { %v7413_v10 = vpack.c.bf16 %v4988_v35, %v4987_v40  ;;  %v5003_v40 = vld [vmem:[%s9399_s13 + $0x210] sm:$0xff]  ;;  %v5004_v35 = vld [vmem:[%s9399_s13 + $0x218] sm:$0xff] }
 0x914   :  { %7348 = vmatpush1.bf16.msra.mxu1 %v7347_v59  ;;  %v7415_v59 = vpack.c.bf16 %v4972_v23, %v4971_v48  ;;  %v5022_v48 = vld [vmem:[%s9399_s13 + $0x2a8] sm:$0xff]  ;;  %v5049_v23 = vld [vmem:[%s9399_s13 + $0x380] sm:$0xff] }
 0x915   :  { %7350 = vmatprep.subr.bf16.mxu1 %v7349_v3  ;;  %v7417_v3 = vpack.c.bf16 %v4990_v46, %v4989_v34  ;;  %v5050_v34 = vld [vmem:[%s9399_s13 + $0x388] sm:$0xff]  ;;  %v7447_v46 = vpack.c.bf16 %v5004_v35, %v5003_v40  ;;  %v5036_v40 = vld [vmem:[%s9399_s13 + $0x318] sm:$0xff]  ;;  %v5053_v35 = vld [vmem:[%s9399_s13 + $0x3a0] sm:$0xff] }
 0x918   :  { %7352 = vmatpush1.bf16.msra.mxu1 %v7351_v29 }
 0x919   :  { %7354 = vmatprep.subr.bf16.mxu1 %v7353_v9  ;;  %v4975_v9 = vld [vmem:[%s9399_s13 + $0x130] sm:$0xff] }
 0x91a   :  { %v7423_v15 = vpack.c.bf16 %v4976_v44, %v4975_v9  ;;  %v5007_v9 = vld [vmem:[%s9399_s13 + $0x230] sm:$0xff]  ;;  %v5008_v44 = vld [vmem:[%s9399_s13 + $0x238] sm:$0xff] }
 0x91c   :  { %7356 = vmatpush1.bf16.msra.mxu1 %v7355_v42  ;;  %v7425_v42 = vpack.c.bf16 %v4994_v26, %v4993_v21  ;;  %v5025_v21 = vld [vmem:[%s9399_s13 + $0x2c0] sm:$0xff]  ;;  %v5026_v26 = vld [vmem:[%s9399_s13 + $0x2c8] sm:$0xff] }
 0x91d   :  { %7358 = vmatprep.subr.bf16.mxu1 %v7357_v53  ;;  %v4977_v53 = vld [vmem:[%s9399_s13 + $0x140] sm:$0xff] }
 0x920   :  { %7360 = vmatpush1.bf16.msra.mxu1 %v7359_v24  ;;  %v7427_v24 = vpack.c.bf16 %v4978_v55, %v4977_v53  ;;  %v5009_v53 = vld [vmem:[%s9399_s13 + $0x240] sm:$0xff]  ;;  %v5010_v55 = vld [vmem:[%s9399_s13 + $0x248] sm:$0xff] }
 0x921   :  { %7362 = vmatprep.subr.bf16.mxu1 %v7361_v63  ;;  %v7429_v63 = vpack.c.bf16 %v4996_v38, %v4995_v22  ;;  %v5027_v22 = vld [vmem:[%s9399_s13 + $0x2d0] sm:$0xff]  ;;  %v5028_v38 = vld [vmem:[%s9399_s13 + $0x2d8] sm:$0xff] }
 0x924   :  { %7364 = vmatpush1.bf16.msra.mxu1 %v7363_v27  ;;  %v4608_v27 = vrot.slane %v9134_v28, %v9487_v58  ;;  %v4999_v58 = vld [vmem:[%s9399_s13 + $0x1f0] sm:$0xff] }
 0x925   :  { %7366 = vmatprep.subr.bf16.mxu1 %v7365_v13  ;;  %v4612_v13 = vrot.slane %v9134_v28, %v9485_v32  ;;  %v5000_v32 = vld [vmem:[%s9399_s13 + $0x1f8] sm:$0xff] }
 0x926   :  { %v7437_v18 = vpack.c.bf16 %v5000_v32, %v4999_v58  ;;  %v5015_v32 = vld [vmem:[%s9399_s13 + $0x270] sm:$0xff] }
 0x928   :  { %7368 = vmatpush1.bf16.msra.mxu1 %v7367_v19 }
 0x929   :  { %7370 = vmatprep.subr.bf16.mxu1 %v7369_v20 }
 0x92c   :  { %7372 = vmatpush1.bf16.msra.mxu1 %v7371_v12  ;;  %v7435_v12 = vpack.c.bf16 %v4982_v50, %v4981_v6  ;;  %v5031_v6 = vld [vmem:[%s9399_s13 + $0x2f0] sm:$0xff]  ;;  %v5032_v50 = vld [vmem:[%s9399_s13 + $0x2f8] sm:$0xff] }
 0x92d   :  { %7374 = vmatprep.subr.bf16.mxu1 %v7373_v61  ;;  %v5019_v61 = vld [vmem:[%s9399_s13 + $0x290] sm:$0xff]  ;;  %v7469_v58 = vpack.c.bf16 %v5032_v50, %v5031_v6  ;;  %v5048_v6 = vld [vmem:[%s9399_s13 + $0x378] sm:$0xff] }
 0x92e   :  { %v7445_v2 = vpack.c.bf16 %v5020_v56, %v5019_v61  ;;  %v5033_v56 = vld [vmem:[%s9399_s13 + $0x300] sm:$0xff] }
 0x930   :  { %7376 = vmatpush1.bf16.msra.mxu1 %v7375_v16 }
 0x931   :  { %7410 = vmatprep.subr.bf16.mxu1 %v7409_v36  ;;  %v7443_v36 = vpack.c.bf16 %v5002_v30, %v5001_v62  ;;  %v4616_v62 = vrot.slane %v9134_v28, %v2619_v33  ;;  %v4620_v30 = vrot.slane %v9134_v28, %v2623_v52  ;;  %v5051_v33 = vld [vmem:[%s9399_s13 + $0x390] sm:$0xff]  ;;  %v5052_v52 = vld [vmem:[%s9399_s13 + $0x398] sm:$0xff] }
 0x933   :  { %4923 = vmatmul.mubr.f32.vlgmr.msra.gmra.mrb[34].mxu1 %v8956_v14  ;;  %v4992_v14 = vld [vmem:[%s9399_s13 + $0x1b8] sm:$0xff] }
 0x934   :  { %7412 = vmatpush3.bf16.msra.mxu1 %v7411_v49  ;;  %v7421_v29 = vpack.c.bf16 %v4992_v14, %v4991_v54  ;;  %v7439_v49 = vpack.c.bf16 %v4984_v0, %v4983_v5  ;;  %v5023_v54 = vld [vmem:[%s9399_s13 + $0x2b0] sm:$0xff]  ;;  %v5024_v14 = vld [vmem:[%s9399_s13 + $0x2b8] sm:$0xff] }
 0x935   :  { %7414 = vmatprep.subr.bf16.mxu1 %v7413_v10  ;;  %v5021_v10 = vld [vmem:[%s9399_s13 + $0x2a0] sm:$0xff] }
 0x938   :  { %7416 = vmatpush3.bf16.msra.mxu1 %v7415_v59  ;;  %v7473_v59 = vpack.c.bf16 %v5050_v34, %v5049_v23  ;;  %v5037_v23 = vld [vmem:[%s9399_s13 + $0x320] sm:$0xff]  ;;  %v5038_v34 = vld [vmem:[%s9399_s13 + $0x328] sm:$0xff] }
 0x939   :  { %7418 = vmatprep.subr.bf16.mxu1 %v7417_v3  ;;  %v7449_v3 = vpack.c.bf16 %v5022_v48, %v5021_v10 }
 0x93c   :  { %7420 = vmatpush3.bf16.msra.mxu1 %v7419_v7  ;;  %v7451_v7 = vpack.c.bf16 %v5006_v60, %v5005_v8  ;;  %v5039_v60 = vld [vmem:[%s9399_s13 + $0x330] sm:$0xff] }
 0x93d   :  { %7422 = vmatprep.subr.bf16.mxu1 %v7421_v29  ;;  %v7453_v29 = vpack.c.bf16 %v5024_v14, %v5023_v54  ;;  %v5040_v54 = vld [vmem:[%s9399_s13 + $0x338] sm:$0xff]  ;;  %v5057_v14 = vld [vmem:[%s9399_s13 + $0x3c0] sm:$0xff] }
 0x940   :  { %7424 = vmatpush3.bf16.msra.mxu1 %v7423_v15  ;;  %v7455_v15 = vpack.c.bf16 %v5008_v44, %v5007_v9  ;;  %v5041_v44 = vld [vmem:[%s9399_s13 + $0x340] sm:$0xff] }
 0x941   :  { %7426 = vmatprep.subr.bf16.mxu1 %v7425_v42  ;;  %v7457_v42 = vpack.c.bf16 %v5026_v26, %v5025_v21  ;;  %v5042_v21 = vld [vmem:[%s9399_s13 + $0x348] sm:$0xff]  ;;  %v5059_v26 = vld [vmem:[%s9399_s13 + $0x3d0] sm:$0xff] }
 0x944   :  { %7428 = vmatpush3.bf16.msra.mxu1 %v7427_v24  ;;  %v7459_v24 = vpack.c.bf16 %v5010_v55, %v5009_v53  ;;  %v5043_v55 = vld [vmem:[%s9399_s13 + $0x350] sm:$0xff] }
 0x945   :  { %7430 = vmatprep.subr.bf16.mxu1 %v7429_v63  ;;  %v7461_v63 = vpack.c.bf16 %v5028_v38, %v5027_v22  ;;  %v5044_v22 = vld [vmem:[%s9399_s13 + $0x358] sm:$0xff]  ;;  %v5061_v38 = vld [vmem:[%s9399_s13 + $0x3e0] sm:$0xff] }
 0x946   :  { %v4711_v19 = vpop.f32.mrb[28].mxu1 }
 0x947   :  { %v4712_v20 = vadd.f32 %v4711_v19, %v4608_v27  ;;  %v4713_v51 = vpop.f32.mrb[29].mxu1  ;;  %v7463_v27 = vpack.c.bf16 %v5012_v4, %v5011_v41  ;;  %v5045_v4 = vld [vmem:[%s9399_s13 + $0x360] sm:$0xff] }
 0x948   :  { %v4714_v31 = vadd.f32 %v4713_v51, %v4612_v13  ;;  %7432 = vmatpush3.bf16.msra.mxu1 %v7431_v37  ;;  %v7465_v13 = vpack.c.bf16 %v5030_v11, %v5029_v17  ;;  %v5013_v37 = vld [vmem:[%s9399_s13 + $0x260] sm:$0xff]  ;;  %v5046_v17 = vld [vmem:[%s9399_s13 + $0x368] sm:$0xff]  ;;  %v5063_v11 = vld [vmem:[%s9399_s13 + $0x3f0] sm:$0xff] }
 0x949   :  { %7434 = vmatprep.subr.bf16.mxu1 %v7433_v47  ;;  %v4929_v39 = vmax.f32 %v4712_v20, 0.0  ;;  %v5014_v47 = vld [vmem:[%s9399_s13 + $0x268] sm:$0xff]  ;;  %v5016_v20 = vld [vmem:[%s9399_s13 + $0x278] sm:$0xff] }
 0x94a   :  { %v4930_v16 = vmax.f32 %v4714_v31, 0.0  ;;  %v7467_v19 = vpack.c.bf16 %v5014_v47, %v5013_v37  ;;  %v7471_v51 = vpack.c.bf16 %v5016_v20, %v5015_v32  ;;  %v5047_v47 = vld [vmem:[%s9399_s13 + $0x370] sm:$0xff] }
 0x94b   :  { %v7503_v50 = vpack.c.bf16 %v5048_v6, %v5047_v47 }
 0x94c   :  { %5136 = vmatprep.mubr.f32.mxu0 %v4930_v16  ;;  %7436 = vmatpush3.bf16.msra.mxu1 %v7435_v12 }
 0x94d   :  { %5137 = vmatmul.mubr.f32.vlgmr.msra.gmra.mrb[28].mxu0 %v4929_v39  ;;  %7438 = vmatprep.subr.bf16.mxu1 %v7437_v18  ;;  %v5034_v18 = vld [vmem:[%s9399_s13 + $0x308] sm:$0xff]  ;;  %v7477_v39 = vpack.c.bf16 %v5052_v52, %v5051_v33 }
 0x94e   :  { %7444 = vmatpush3.bf16.msra.mxu0 %v7443_v36  ;;  %v7475_v16 = vpack.c.bf16 %v5034_v18, %v5033_v56 }
 0x94f   :  { %7446 = vmatprep.subr.bf16.mxu0 %v7445_v2  ;;  %v5035_v2 = vld [vmem:[%s9399_s13 + $0x310] sm:$0xff] }
 0x950   :  { %7440 = vmatpush3.bf16.msra.mxu1 %v7439_v49  ;;  %v5054_v49 = vld [vmem:[%s9399_s13 + $0x3a8] sm:$0xff]  ;;  %v7479_v10 = vpack.c.bf16 %v5036_v40, %v5035_v2 }
 0x951   :  { %7474 = vmatprep.subr.bf16.mxu1 %v7473_v59  ;;  %v7481_v48 = vpack.c.bf16 %v5054_v49, %v5053_v35  ;;  %v5056_v59 = vld [vmem:[%s9399_s13 + $0x3b8] sm:$0xff] }
 0x952   :  { %7448 = vmatpush3.bf16.msra.mxu0 %v7447_v46  ;;  %v5055_v46 = vld [vmem:[%s9399_s13 + $0x3b0] sm:$0xff] }
 0x953   :  { %7450 = vmatprep.subr.bf16.mxu0 %v7449_v3  ;;  %v7483_v3 = vpack.c.bf16 %v5038_v34, %v5037_v23  ;;  %v7485_v8 = vpack.c.bf16 %v5056_v59, %v5055_v46 }
 0x956   :  { %7452 = vmatpush3.bf16.msra.mxu0 %v7451_v7  ;;  %v5058_v7 = vld [vmem:[%s9399_s13 + $0x3c8] sm:$0xff] }
 0x957   :  { %7454 = vmatprep.subr.bf16.mxu0 %v7453_v29  ;;  %v7487_v29 = vpack.c.bf16 %v5040_v54, %v5039_v60  ;;  %v7489_v9 = vpack.c.bf16 %v5058_v7, %v5057_v14 }
 0x95a   :  { %7456 = vmatpush3.bf16.msra.mxu0 %v7455_v15  ;;  %v5060_v15 = vld [vmem:[%s9399_s13 + $0x3d8] sm:$0xff] }
 0x95b   :  { %7458 = vmatprep.subr.bf16.mxu0 %v7457_v42  ;;  %v7491_v42 = vpack.c.bf16 %v5042_v21, %v5041_v44  ;;  %v7493_v53 = vpack.c.bf16 %v5060_v15, %v5059_v26 }
 0x95e   :  { %7460 = vmatpush3.bf16.msra.mxu0 %v7459_v24  ;;  %v5062_v24 = vld [vmem:[%s9399_s13 + $0x3e8] sm:$0xff] }
 0x95f   :  { %7462 = vmatprep.subr.bf16.mxu0 %v7461_v63  ;;  %v7495_v63 = vpack.c.bf16 %v5044_v22, %v5043_v55  ;;  %v7497_v41 = vpack.c.bf16 %v5062_v24, %v5061_v38 }
 0x962   :  { %7464 = vmatpush3.bf16.msra.mxu0 %v7463_v27  ;;  %v5064_v27 = vld [vmem:[%s9399_s13 + $0x3f8] sm:$0xff]  ;;  %s7875_s13 = smov [#allocation20]  }
 0x963   :  { %7466 = vmatprep.subr.bf16.mxu0 %v7465_v13  ;;  %v7499_v13 = vpack.c.bf16 %v5046_v17, %v5045_v4  ;;  %v7501_v37 = vpack.c.bf16 %v5064_v27, %v5063_v11  ;;  %s5362_s19 = sshll.u32 %s7875_s13, 4  ;;  %s5363_s19 = int_to_ptr.vmem [resolvable:$true] %s5362_s19 }
 0x964   :  { %s7817_s4 = scalar_lea.vmem %s5363_s19, 32  ;;  %p7822_p5 = scmp.lt.s32.totalorder %s5363_s19, %s5363_s19 }
 0x965   :  { %p7818_p4 = scmp.ne.s32.totalorder %s5363_s19, %s7817_s4  ;;  %p7823_p6 = scmp.lt.s32.totalorder %s7817_s4, %s7817_s4 }
 0x966   :  { %7468 = vmatpush3.bf16.msra.mxu0 %v7467_v19  ;;  %v4624_v19 = vrot.slane %v9134_v28, %v2627_v1  ;;  %v4636_v1 = vrot.slane %v9134_v28, %v2639_v43 }
 0x967   :  { %7470 = vmatprep.subr.bf16.mxu0 %v7469_v58  ;;  %v4628_v58 = vrot.slane %v9134_v28, %v2631_v25  ;;  %p7824_p7 = por %p7823_p6, %p7822_p5 }
 0x969   :  { %p7825_p8 = pnand %p7824_p7, %p7818_p4 }
 0x96a   :  { %7472 = vmatpush3.bf16.msra.mxu0 %v7471_v51 }
 0x986   :  { %v4782_v31 = vpop.f32.mrb[30].mxu1 }
 0x987   :  { %v4783_v12 = vadd.f32 %v4782_v31, %v4616_v62  ;;  %v4784_v61 = vpop.f32.mrb[31].mxu1 }
 0x988   :  { %v4785_v5 = vadd.f32 %v4784_v61, %v4620_v30 }
 0x989   :  { %v4931_v36 = vmax.f32 %v4783_v12, 0.0  ;;  %v4632_v12 = vrot.slane %v9134_v28, %v2635_v57 }
 0x98a   :  { %v4932_v0 = vmax.f32 %v4785_v5, 0.0 }
 0x98c   :  { %5206 = vmatprep.mubr.f32.mxu1 %v4932_v0 }
 0x98d   :  { %5207 = vmatmul.mubr.f32.vlgmr.msra.gmra.mrb[36].mxu1 %v4931_v36  ;;  %v5408_v36 = vld [vmem:[#allocation19] ss:$0 sm:$0xff] }
 0x98e   :  { %7476 = vmatpush3.bf16.msra.mxu1 %v7475_v16 }
 0x98f   :  { %7478 = vmatprep.subr.bf16.mxu1 %v7477_v39 }
 0x992   :  { %7480 = vmatpush3.bf16.msra.mxu1 %v7479_v10 }
 0x993   :  { %7482 = vmatprep.subr.bf16.mxu1 %v7481_v48 }
 0x996   :  { %7484 = vmatpush3.bf16.msra.mxu1 %v7483_v3 }
 0x997   :  { %7486 = vmatprep.subr.bf16.mxu1 %v7485_v8 }
 0x99a   :  { %7488 = vmatpush3.bf16.msra.mxu1 %v7487_v29 }
 0x99b   :  { %7490 = vmatprep.subr.bf16.mxu1 %v7489_v9 }
 0x99e   :  { %7492 = vmatpush3.bf16.msra.mxu1 %v7491_v42 }
 0x99f   :  { %7494 = vmatprep.subr.bf16.mxu1 %v7493_v53 }
 0x9a2   :  { %7496 = vmatpush3.bf16.msra.mxu1 %v7495_v63 }
 0x9a3   :  { %7498 = vmatprep.subr.bf16.mxu1 %v7497_v41 }
 0x9a6   :  { %7500 = vmatpush3.bf16.msra.mxu1 %v7499_v13 }
 0x9a7   :  { %7502 = vmatprep.subr.bf16.mxu1 %v7501_v37 }
 0x9aa   :  { %7504 = vmatpush3.bf16.msra.mxu1 %v7503_v50 }
 0x9c6   :  { %v4853_v32 = vpop.f32.mrb[32].mxu1 }
 0x9c7   :  { %v4854_v20 = vadd.f32 %v4853_v32, %v4624_v19  ;;  %v4855_v51 = vpop.f32.mrb[33].mxu1 }
 0x9c8   :  { %v4856_v62 = vadd.f32 %v4855_v51, %v4628_v58 }
 0x9c9   :  { %v4933_v31 = vmax.f32 %v4854_v20, 0.0 }
 0x9ca   :  { %v4934_v30 = vmax.f32 %v4856_v62, 0.0 }
 0x9cc   :  { %5276 = vmatprep.mubr.f32.mxu0 %v4934_v30 }
 0x9cd   :  { %5277 = vmatmul.mubr.f32.vlgmr.msra.gmra.mrb[30].mxu0 %v4933_v31 }
 0xa06   :  { %v4924_v61 = vpop.f32.mrb[34].mxu1 }
 0xa07   :  { %v4925_v56 = vadd.f32 %v4924_v61, %v4632_v12  ;;  %v4926_v18 = vpop.f32.mrb[35].mxu1 }
 0xa08   :  { %v4927_v25 = vadd.f32 %v4926_v18, %v4636_v1 }
 0xa09   :  { %v4935_v33 = vmax.f32 %v4925_v56, 0.0 }
 0xa0a   :  { %v4936_v5 = vmax.f32 %v4927_v25, 0.0 }
 0xa0c   :  { %5346 = vmatprep.mubr.f32.mxu1 %v4936_v5 }
 0xa0d   :  { %5347 = vmatmul.mubr.f32.vlgmr.msra.gmra.mrb[38].mxu1 %v4935_v33 }
 0xa20   :  { %v5585_v52 = vpop.f32.mrb[28].mxu0 }
 0xa21   :  { %v5586_v0 = vpop.f32.mrb[29].mxu0 }
 0xa22   :  { %v5587_v16 = vadd.f32 %v5586_v0, %v5585_v52 }
 0xa24   :  { %v5139_v40 = vadd.f32 %v5587_v16, %v5408_v36 }
 0xa60   :  { %v5620_v39 = vpop.f32.mrb[36].mxu1 }
 0xa61   :  { %v5621_v2 = vpop.f32.mrb[37].mxu1 }
 0xa62   :  { %v5622_v57 = vadd.f32 %v5621_v2, %v5620_v39 }
 0xa64   :  { %v5209_v35 = vadd.f32 %v5622_v57, %v5139_v40 }
 0xaa0   :  { %v5655_v45 = vpop.f32.mrb[30].mxu0 }
 0xaa1   :  { %v5656_v49 = vpop.f32.mrb[31].mxu0 }
 0xaa2   :  { %v5657_v43 = vadd.f32 %v5656_v49, %v5655_v45 }
 0xaa4   :  { %v5279_v28 = vadd.f32 %v5657_v43, %v5209_v35 }
 0xae0   :  { %v5690_v10 = vpop.f32.mrb[38].mxu1 }
 0xae1   :  { %v5691_v48 = vpop.f32.mrb[39].mxu1 }
 0xae2   :  { %v5692_v23 = vadd.f32 %v5691_v48, %v5690_v10 }
 0xae4   :  { %v5349_v34 = vadd.f32 %v5692_v23, %v5279_v28 }
 0xae6   :  { %5353 = vst.msk [vmem:[#allocation20] sm:$0x3] %vm5352_vm7, %v5349_v34 }
 0xae7   :  { %7828 = shalt.err (!%p7825_p8)
}
 0xae8   :  { %s7829_s8 = scalar_lea.hbm %s9402_s16, 32 }
 0xae9   :  { %p7830_p9 = scmp.ne.s32.totalorder %s9402_s16, %s7829_s8  ;;  %p7833_p10 = scmp.lt.u32.totalorder %s7829_s8, %s9402_s16 }
 0xaeb   :  { %p7835_p11 = pnand %p7833_p10, %p7830_p9 }
 0xaed   :  { %7838 = shalt.err (!%p7835_p11)
}
 0xaee   :  { %5365 = dma.vmem_to_hbm [thread:$0]  %s5363_s19, 32, %s9402_s16, [#allocation4]  }
 0xaef   :  { %7851 = dma.done.wait [#allocation4], 32  }
 0xaf0   :  { %7852 = vsyncadd [#allocation4], 4294967264 }
 0xaf1   :  { %5371 = vsyncpa [#allocation3], 1 }
 0xaf2   :  { %5372 = vsyncpa [#allocation6], 1 }
 0xaf3   :  { %5373 = vsyncpa [#allocation9], 1 }
 0xaf4   :  { %5374 = vsyncpa [#allocation12], 1 }
 0xaf5   :  { %5375 = vsyncpa [#allocation15], 1 }
 0xaf6   :  { %5376 = vsyncpa [#allocation18], 1 }
 0xaf7   :  { %5377 = vsyncpa [#allocation4], 1 }

</bundles_post_ra>
